<compile_context>
chip_gen: v7x
topology: tpu7x:2x2x1
jax: 0.10.0
libtpu: 0.0.40
codegen_flags: <defaults>
</compile_context>

<pallas_src>
import numpy as np
import jax
import jax.numpy as jnp
from jax.experimental import pallas as pl
from jax.experimental.pallas import tpu as pltpu

BN_EPS = 1e-5

# model sizes (small, consistent with the module's __init__)
CIN = 3            # input image channels
CH = 16            # resnet_features
HID = 32           # hidden_features
N_ANCHORS = 8
N_CLASSES = 4
B = 2
H = W = 16


# --------------------------- fused backbone kernel ---------------------------
def _make_backbone_kernel(ch, n_half, h, w):
    rows = n_half * h * w
    hw = h * w
    taps = [(t // 3 - 1, t % 3 - 1) for t in range(9)]

    def kernel(x_ref, mask_ref, wconv_ref, shift_ref,
               w1t_ref, b1_ref, w2t_ref, b2_ref,
               lat_ref, stack_ref):

        def build_stack(xb):
            # xb: (ch, rows) bf16.  Write the 9 shifted+masked taps into the
            # (9*ch, rows) bf16 VMEM scratch; stores land at sublane offsets
            # that are multiples of 16 (bf16 tile aligned).
            zero = jnp.zeros_like(xb)
            for t, (dh, dw) in enumerate(taps):
                s = dh * w + dw
                if s == 0:
                    xs = xb
                else:
                    xs = jnp.roll(xb, shift=-s, axis=1)
                    valid = mask_ref[pl.ds(t, 1), :] != 0.0     # (1, rows) bool
                    xs = jnp.where(valid, xs, zero)
                stack_ref[pl.ds(t * ch, ch), :] = xs

        def conv_bn_relu(xb, layer, skip=None):
            # one K = 9*ch GEMM per layer (BN scale pre-folded into weights);
            # additive shift / residual / ReLU stay in f32.
            build_stack(xb)
            z = jnp.dot(wconv_ref[layer], stack_ref[...],
                        preferred_element_type=jnp.float32)
            z = z + shift_ref[layer]
            if skip is not None:
                z = z + skip
            return jnp.maximum(z, 0.0)

        # ---- backbone: stem + 2 BasicBlocks; activations stay on-chip ----
        x0 = conv_bn_relu(x_ref[...], 0)                      # stem (input is bf16)
        hb = conv_bn_relu(x0.astype(jnp.bfloat16), 1)
        x1 = conv_bn_relu(hb.astype(jnp.bfloat16), 2, skip=x0)
        hb = conv_bn_relu(x1.astype(jnp.bfloat16), 3)
        x2 = conv_bn_relu(hb.astype(jnp.bfloat16), 4, skip=x1)

        # ---- global average pool: per-image 256-lane slice + lane reduce ----
        cols = [jnp.sum(x2[:, n * hw:(n + 1) * hw], axis=1, keepdims=True)
                for n in range(n_half)]
        feat = jnp.concatenate(cols, axis=1) * (1.0 / hw)     # (ch, n_half) f32

        # ---- resnet_post_fc (channels-major):
        #      Linear -> BN1d(folded into fc1) -> Tanh -> Linear -> Tanh ----
        h1 = jnp.tanh(jnp.dot(w1t_ref[...], feat,
                              preferred_element_type=jnp.float32) + b1_ref[...])
        lat = jnp.tanh(jnp.dot(w2t_ref[...], h1,
                               preferred_element_type=jnp.float32) + b2_ref[...])
        lat_ref[0] = lat                                       # (hid, n_half)

    return kernel


# --------------------------- wrapper-side parameter prep ---------------------
def _fold_conv_layer(p, ch):
    # BN(eval) folded into the conv: scale into the weights, shift kept apart.
    scale_row = p["gamma"] * jax.lax.rsqrt(p["var"] + BN_EPS)        # (1, cout)
    shift_col = (p["beta"] - p["mean"] * scale_row).reshape(-1, 1)   # (cout, 1)
    wt = p["w"] * scale_row.reshape(1, 1, 1, -1)                     # (3,3,cin,cout)
    cin = wt.shape[2]
    if cin < ch:                                                     # pad input chans
        wt = jnp.pad(wt, ((0, 0), (0, 0), (0, ch - cin), (0, 0)))
    # (3,3,ch,cout) -> (9*ch, cout) -> (cout, 9*ch), column = tap*ch + cin
    w_packed = jnp.transpose(wt.reshape(9 * ch, -1)).astype(jnp.bfloat16)
    return w_packed, shift_col


def _boundary_masks(n_half, h, w):
    # valid-tap masks per output pixel (numpy -> baked as constants)
    rows = n_half * h * w
    p = np.arange(rows)
    i = (p // w) % h
    j = p % w
    m = np.zeros((9, rows), np.float32)
    for t in range(9):
        dh, dw = t // 3 - 1, t % 3 - 1
        ok = (i + dh >= 0) & (i + dh < h) & (j + dw >= 0) & (j + dw < w)
        m[t] = ok.astype(np.float32)
    return jnp.asarray(m)


def _full_spec(a):
    nd = a.ndim
    return pl.BlockSpec(a.shape, lambda i: (0,) * nd)


def rel_resnet_forward(params, x, anchors_images, anchors_targets):
    # TODO(synk): anchors_targets is unused by the cosine-similarity variant.
    del anchors_targets
    n_anchors = anchors_images.shape[0]
    n_batch = x.shape[0]
    n_imgs = n_anchors + n_batch
    _, cin, h, w = x.shape
    hw = h * w
    rows = n_imgs * hw

    # split the image axis across 2 grid programs (both TensorCores on v7x);
    # on 1-TC chips the two programs run back-to-back.
    n_prog = 2 if (n_imgs % 2 == 0 and ((n_imgs // 2) * hw) % 128 == 0) else 1
    n_half = n_imgs // n_prog
    rows_half = n_half * hw

    # one backbone pass for both branches: [anchors; batch], channels-major,
    # zero-padded to CH input channels, pre-cast to bf16.
    imgs = jnp.concatenate([anchors_images, x], axis=0)
    x_t = jnp.transpose(imgs, (1, 0, 2, 3)).reshape(cin, rows)
    x_t = jnp.pad(x_t, ((0, CH - cin), (0, 0))).astype(jnp.bfloat16)

    masks = _boundary_masks(n_half, h, w)                      # (9, rows_half) f32

    rp = params["resnet"]
    layers = [rp["stem"], rp["b1c1"], rp["b1c2"], rp["b2c1"], rp["b2c2"]]
    folded = [_fold_conv_layer(p, CH) for p in layers]
    wconv = jnp.stack([f[0] for f in folded])                  # (5, CH, 9*CH) bf16
    shifts = jnp.stack([f[1] for f in folded])                 # (5, CH, 1)   f32

    pf = params["post_fc"]
    scale1 = pf["gamma"] * jax.lax.rsqrt(pf["var"] + BN_EPS)   # fold BN1d into fc1
    w1t = (pf["w1"] * scale1).T                                # (CH, CH)
    b1c = ((pf["b1"] - pf["mean"]) * scale1 + pf["beta"]).reshape(-1, 1)
    w2t = pf["w2"].T                                           # (HID, CH)
    b2c = pf["b2"].reshape(-1, 1)
    hid = w2t.shape[0]

    kernel = _make_backbone_kernel(CH, n_half, h, w)
    lat_halves = pl.pallas_call(
        kernel,
        out_shape=jax.ShapeDtypeStruct((n_prog, hid, n_half), jnp.float32),
        grid=(n_prog,),
        in_specs=[
            pl.BlockSpec((CH, rows_half), lambda i: (0, i)),   # input (per half)
            _full_spec(masks),
            _full_spec(wconv), _full_spec(shifts),
            _full_spec(w1t), _full_spec(b1c),
            _full_spec(w2t), _full_spec(b2c),
        ],
        out_specs=pl.BlockSpec((1, hid, n_half), lambda i: (i, 0, 0)),
        scratch_shapes=[pltpu.VMEM((9 * CH, rows_half), jnp.bfloat16)],
        compiler_params=pltpu.CompilerParams(
            dimension_semantics=("parallel",)),
    )(x_t, masks, wconv, shifts, w1t, b1c, w2t, b2c)

    # (n_prog, hid, n_half) -> (n_imgs, hid); halves are contiguous image groups
    lat = jnp.transpose(lat_halves, (0, 2, 1)).reshape(n_imgs, hid)

    # torch.no_grad() on the anchor branch -> stop_gradient (forward identical)
    anchors_latents = jax.lax.stop_gradient(lat[:n_anchors])
    batch_latents = lat[n_anchors:]

    # relative attention (cosine similarities) + final linear: microscopic tail
    # kept in XLA so the two grid programs stay independent across TensorCores.
    def _l2n(v):
        return v * jax.lax.rsqrt(jnp.sum(v * v, axis=-1, keepdims=True) + 1e-12)

    sims = _l2n(batch_latents) @ _l2n(anchors_latents).T       # (B, A)
    logits = sims @ params["final"]["w"] + params["final"]["b"]

    return {
        "logits": logits,
        "default_latent": batch_latents,
        "batch_latent": batch_latents,
        "anchors_latent": anchors_latents,
        "inv_latents": sims,
    }


# ------------------------------ parameter init -------------------------------
def init_params(key):
    ks = jax.random.split(key, 10)

    def conv_bn(k, cin, cout):
        kk = jax.random.split(k, 5)
        return dict(
            w=jax.random.normal(kk[0], (3, 3, cin, cout), jnp.float32)
            / jnp.sqrt(9.0 * cin),
            gamma=1.0 + 0.1 * jax.random.normal(kk[1], (1, cout), jnp.float32),
            beta=0.1 * jax.random.normal(kk[2], (1, cout), jnp.float32),
            mean=0.1 * jax.random.normal(kk[3], (1, cout), jnp.float32),
            var=0.5 + jnp.abs(jax.random.normal(kk[4], (1, cout), jnp.float32)),
        )

    def dense(k, fin, fout):
        k1, k2 = jax.random.split(k)
        return (jax.random.normal(k1, (fin, fout), jnp.float32)
                / jnp.sqrt(float(fin)),
                0.01 * jax.random.normal(k2, (1, fout), jnp.float32))

    w1, b1 = dense(ks[5], CH, CH)
    w2, b2 = dense(ks[6], CH, HID)
    kk = jax.random.split(ks[7], 4)
    post_fc = dict(
        w1=w1, b1=b1,
        gamma=1.0 + 0.1 * jax.random.normal(kk[0], (1, CH), jnp.float32),
        beta=0.1 * jax.random.normal(kk[1], (1, CH), jnp.float32),
        mean=0.1 * jax.random.normal(kk[2], (1, CH), jnp.float32),
        var=0.5 + jnp.abs(jax.random.normal(kk[3], (1, CH), jnp.float32)),
        w2=w2, b2=b2,
    )
    wf, bf = dense(ks[8], N_ANCHORS, N_CLASSES)
    return dict(
        resnet=dict(stem=conv_bn(ks[0], CIN, CH),
                    b1c1=conv_bn(ks[1], CH, CH), b1c2=conv_bn(ks[2], CH, CH),
                    b2c1=conv_bn(ks[3], CH, CH), b2c2=conv_bn(ks[4], CH, CH)),
        post_fc=post_fc,
        final=dict(w=wf, b=bf),
    )


if __name__ == "__main__":
    key = jax.random.PRNGKey(0)
    k_params, k_x, k_anchor = jax.random.split(key, 3)
    params = init_params(k_params)

    x = jax.random.normal(k_x, (B, CIN, H, W), jnp.float32)          # NCHW
    anchors_images = jax.random.normal(k_anchor, (N_ANCHORS, CIN, H, W),
                                       jnp.float32)                  # NCHW
    anchors_targets = jnp.arange(N_ANCHORS, dtype=jnp.int32) % N_CLASSES

    fwd = jax.jit(rel_resnet_forward)
    out = fwd(params, x, anchors_images, anchors_targets)
    jax.block_until_ready(out)

    assert out["logits"].shape == (B, N_CLASSES)
    assert out["inv_latents"].shape == (B, N_ANCHORS)
    assert out["batch_latent"].shape == (B, HID)
    assert out["anchors_latent"].shape == (N_ANCHORS, HID)
    assert all(bool(jnp.isfinite(v).all()) for v in out.values())
    print("KERNEL_OK")
</pallas_src>

<mosaic_0001>
module attributes {stable_mosaic.version = 11 : i64} {
  func.func @kernel(%arg0: i32, %arg1: memref<16x1280xbf16, #tpu.memory_space<vmem>>, %arg2: memref<9x1280xf32, #tpu.memory_space<vmem>>, %arg3: memref<5x16x144xbf16, #tpu.memory_space<vmem>>, %arg4: memref<5x16x1xf32, #tpu.memory_space<vmem>>, %arg5: memref<16x16xf32, #tpu.memory_space<vmem>>, %arg6: memref<16x1xf32, #tpu.memory_space<vmem>>, %arg7: memref<32x16xf32, #tpu.memory_space<vmem>>, %arg8: memref<32x1xf32, #tpu.memory_space<vmem>>, %arg9: memref<1x32x5xf32, #tpu.memory_space<vmem>>, %arg10: memref<144x1280xbf16, #tpu.memory_space<vmem>>) attributes {dimension_semantics = [#tpu.dimension_semantics<parallel>], iteration_bounds = array<i64: 2>, scalar_prefetch = 0 : i64, scratch_operands = 1 : i64, tpu.core_type = #tpu.core_type<tc>, window_params = [{transform_indices = @transform_0, window_bounds = array<i64: 16, 1280>}, {pipeline_mode = #tpu.pipeline_mode<synchronous>, transform_indices = @transform_1, window_bounds = array<i64: 9, 1280>}, {pipeline_mode = #tpu.pipeline_mode<synchronous>, transform_indices = @transform_2, window_bounds = array<i64: 5, 16, 144>}, {pipeline_mode = #tpu.pipeline_mode<synchronous>, transform_indices = @transform_3, window_bounds = array<i64: 5, 16, 1>}, {pipeline_mode = #tpu.pipeline_mode<synchronous>, transform_indices = @transform_4, window_bounds = array<i64: 16, 16>}, {pipeline_mode = #tpu.pipeline_mode<synchronous>, transform_indices = @transform_5, window_bounds = array<i64: 16, 1>}, {pipeline_mode = #tpu.pipeline_mode<synchronous>, transform_indices = @transform_6, window_bounds = array<i64: 32, 16>}, {pipeline_mode = #tpu.pipeline_mode<synchronous>, transform_indices = @transform_7, window_bounds = array<i64: 32, 1>}, {transform_indices = @transform_8, window_bounds = array<i64: 1, 32, 5>}]} {
    %c0 = arith.constant 0 : index
    %c0_0 = arith.constant 0 : index
    %0 = vector.load %arg1[%c0, %c0_0] : memref<16x1280xbf16, #tpu.memory_space<vmem>>, vector<16x1280xbf16>
    %cst = arith.constant 0.000000e+00 : bf16
    %1 = vector.broadcast %cst : bf16 to vector<16x1280xbf16>
    %2 = vector.extract_strided_slice %0 {offsets = [0, 1263], sizes = [16, 17], strides = [1, 1]} : vector<16x1280xbf16> to vector<16x17xbf16>
    %3 = vector.extract_strided_slice %0 {offsets = [0, 0], sizes = [16, 1263], strides = [1, 1]} : vector<16x1280xbf16> to vector<16x1263xbf16>
    %4 = tpu.concatenate %2, %3 in 1 : vector<16x17xbf16>, vector<16x1263xbf16> -> vector<16x1280xbf16>
    %c0_1 = arith.constant 0 : index
    %c0_2 = arith.constant 0 : index
    %5 = vector.load %arg2[%c0_1, %c0_2] : memref<9x1280xf32, #tpu.memory_space<vmem>>, vector<1x1280xf32>
    %cst_3 = arith.constant 0.000000e+00 : f32
    %6 = vector.broadcast %cst_3 : f32 to vector<1x1280xf32>
    %7 = arith.cmpf one, %5, %6 : vector<1x1280xf32>
    %8 = vector.shape_cast %7 : vector<1x1280xi1> to vector<1x1280xi1>
    %9 = vector.broadcast %8 : vector<1x1280xi1> to vector<16x1280xi1>
    %10 = arith.select %9, %4, %1 : vector<16x1280xi1>, vector<16x1280xbf16>
    %c0_4 = arith.constant 0 : index
    %c0_5 = arith.constant 0 : index
    %11 = vector.load %arg10[%c0_4, %c0_5] : memref<144x1280xbf16, #tpu.memory_space<vmem>>, vector<16x1280xbf16>
    tpu.vector_store %arg10[%c0_4, %c0_5], %10 {strides = array<i32>} : memref<144x1280xbf16, #tpu.memory_space<vmem>>, vector<16x1280xbf16>,
    %12 = vector.extract_strided_slice %0 {offsets = [0, 1264], sizes = [16, 16], strides = [1, 1]} : vector<16x1280xbf16> to vector<16x16xbf16>
    %13 = vector.extract_strided_slice %0 {offsets = [0, 0], sizes = [16, 1264], strides = [1, 1]} : vector<16x1280xbf16> to vector<16x1264xbf16>
    %14 = tpu.concatenate %12, %13 in 1 : vector<16x16xbf16>, vector<16x1264xbf16> -> vector<16x1280xbf16>
    %c1 = arith.constant 1 : index
    %c0_6 = arith.constant 0 : index
    %15 = vector.load %arg2[%c1, %c0_6] : memref<9x1280xf32, #tpu.memory_space<vmem>>, vector<1x1280xf32>
    %cst_7 = arith.constant 0.000000e+00 : f32
    %16 = vector.broadcast %cst_7 : f32 to vector<1x1280xf32>
    %17 = arith.cmpf one, %15, %16 : vector<1x1280xf32>
    %18 = vector.shape_cast %17 : vector<1x1280xi1> to vector<1x1280xi1>
    %19 = vector.broadcast %18 : vector<1x1280xi1> to vector<16x1280xi1>
    %20 = arith.select %19, %14, %1 : vector<16x1280xi1>, vector<16x1280xbf16>
    %c16 = arith.constant 16 : index
    %c0_8 = arith.constant 0 : index
    %21 = vector.load %arg10[%c16, %c0_8] : memref<144x1280xbf16, #tpu.memory_space<vmem>>, vector<16x1280xbf16>
    tpu.vector_store %arg10[%c16, %c0_8], %20 {strides = array<i32>} : memref<144x1280xbf16, #tpu.memory_space<vmem>>, vector<16x1280xbf16>,
    %22 = vector.extract_strided_slice %0 {offsets = [0, 1265], sizes = [16, 15], strides = [1, 1]} : vector<16x1280xbf16> to vector<16x15xbf16>
    %23 = vector.extract_strided_slice %0 {offsets = [0, 0], sizes = [16, 1265], strides = [1, 1]} : vector<16x1280xbf16> to vector<16x1265xbf16>
    %24 = tpu.concatenate %22, %23 in 1 : vector<16x15xbf16>, vector<16x1265xbf16> -> vector<16x1280xbf16>
    %c2 = arith.constant 2 : index
    %c0_9 = arith.constant 0 : index
    %25 = vector.load %arg2[%c2, %c0_9] : memref<9x1280xf32, #tpu.memory_space<vmem>>, vector<1x1280xf32>
    %cst_10 = arith.constant 0.000000e+00 : f32
    %26 = vector.broadcast %cst_10 : f32 to vector<1x1280xf32>
    %27 = arith.cmpf one, %25, %26 : vector<1x1280xf32>
    %28 = vector.shape_cast %27 : vector<1x1280xi1> to vector<1x1280xi1>
    %29 = vector.broadcast %28 : vector<1x1280xi1> to vector<16x1280xi1>
    %30 = arith.select %29, %24, %1 : vector<16x1280xi1>, vector<16x1280xbf16>
    %c32 = arith.constant 32 : index
    %c0_11 = arith.constant 0 : index
    %31 = vector.load %arg10[%c32, %c0_11] : memref<144x1280xbf16, #tpu.memory_space<vmem>>, vector<16x1280xbf16>
    tpu.vector_store %arg10[%c32, %c0_11], %30 {strides = array<i32>} : memref<144x1280xbf16, #tpu.memory_space<vmem>>, vector<16x1280xbf16>,
    %32 = vector.extract_strided_slice %0 {offsets = [0, 1279], sizes = [16, 1], strides = [1, 1]} : vector<16x1280xbf16> to vector<16x1xbf16>
    %33 = vector.extract_strided_slice %0 {offsets = [0, 0], sizes = [16, 1279], strides = [1, 1]} : vector<16x1280xbf16> to vector<16x1279xbf16>
    %34 = tpu.concatenate %32, %33 in 1 : vector<16x1xbf16>, vector<16x1279xbf16> -> vector<16x1280xbf16>
    %c3 = arith.constant 3 : index
    %c0_12 = arith.constant 0 : index
    %35 = vector.load %arg2[%c3, %c0_12] : memref<9x1280xf32, #tpu.memory_space<vmem>>, vector<1x1280xf32>
    %cst_13 = arith.constant 0.000000e+00 : f32
    %36 = vector.broadcast %cst_13 : f32 to vector<1x1280xf32>
    %37 = arith.cmpf one, %35, %36 : vector<1x1280xf32>
    %38 = vector.shape_cast %37 : vector<1x1280xi1> to vector<1x1280xi1>
    %39 = vector.broadcast %38 : vector<1x1280xi1> to vector<16x1280xi1>
    %40 = arith.select %39, %34, %1 : vector<16x1280xi1>, vector<16x1280xbf16>
    %c48 = arith.constant 48 : index
    %c0_14 = arith.constant 0 : index
    %41 = vector.load %arg10[%c48, %c0_14] : memref<144x1280xbf16, #tpu.memory_space<vmem>>, vector<16x1280xbf16>
    tpu.vector_store %arg10[%c48, %c0_14], %40 {strides = array<i32>} : memref<144x1280xbf16, #tpu.memory_space<vmem>>, vector<16x1280xbf16>,
    %c64 = arith.constant 64 : index
    %c0_15 = arith.constant 0 : index
    %42 = vector.load %arg10[%c64, %c0_15] : memref<144x1280xbf16, #tpu.memory_space<vmem>>, vector<16x1280xbf16>
    tpu.vector_store %arg10[%c64, %c0_15], %0 {strides = array<i32>} : memref<144x1280xbf16, #tpu.memory_space<vmem>>, vector<16x1280xbf16>,
    %43 = vector.extract_strided_slice %0 {offsets = [0, 1], sizes = [16, 1279], strides = [1, 1]} : vector<16x1280xbf16> to vector<16x1279xbf16>
    %44 = vector.extract_strided_slice %0 {offsets = [0, 0], sizes = [16, 1], strides = [1, 1]} : vector<16x1280xbf16> to vector<16x1xbf16>
    %45 = tpu.concatenate %43, %44 in 1 : vector<16x1279xbf16>, vector<16x1xbf16> -> vector<16x1280xbf16>
    %c5 = arith.constant 5 : index
    %c0_16 = arith.constant 0 : index
    %46 = vector.load %arg2[%c5, %c0_16] : memref<9x1280xf32, #tpu.memory_space<vmem>>, vector<1x1280xf32>
    %cst_17 = arith.constant 0.000000e+00 : f32
    %47 = vector.broadcast %cst_17 : f32 to vector<1x1280xf32>
    %48 = arith.cmpf one, %46, %47 : vector<1x1280xf32>
    %49 = vector.shape_cast %48 : vector<1x1280xi1> to vector<1x1280xi1>
    %50 = vector.broadcast %49 : vector<1x1280xi1> to vector<16x1280xi1>
    %51 = arith.select %50, %45, %1 : vector<16x1280xi1>, vector<16x1280xbf16>
    %c80 = arith.constant 80 : index
    %c0_18 = arith.constant 0 : index
    %52 = vector.load %arg10[%c80, %c0_18] : memref<144x1280xbf16, #tpu.memory_space<vmem>>, vector<16x1280xbf16>
    tpu.vector_store %arg10[%c80, %c0_18], %51 {strides = array<i32>} : memref<144x1280xbf16, #tpu.memory_space<vmem>>, vector<16x1280xbf16>,
    %53 = vector.extract_strided_slice %0 {offsets = [0, 15], sizes = [16, 1265], strides = [1, 1]} : vector<16x1280xbf16> to vector<16x1265xbf16>
    %54 = vector.extract_strided_slice %0 {offsets = [0, 0], sizes = [16, 15], strides = [1, 1]} : vector<16x1280xbf16> to vector<16x15xbf16>
    %55 = tpu.concatenate %53, %54 in 1 : vector<16x1265xbf16>, vector<16x15xbf16> -> vector<16x1280xbf16>
    %c6 = arith.constant 6 : index
    %c0_19 = arith.constant 0 : index
    %56 = vector.load %arg2[%c6, %c0_19] : memref<9x1280xf32, #tpu.memory_space<vmem>>, vector<1x1280xf32>
    %cst_20 = arith.constant 0.000000e+00 : f32
    %57 = vector.broadcast %cst_20 : f32 to vector<1x1280xf32>
    %58 = arith.cmpf one, %56, %57 : vector<1x1280xf32>
    %59 = vector.shape_cast %58 : vector<1x1280xi1> to vector<1x1280xi1>
    %60 = vector.broadcast %59 : vector<1x1280xi1> to vector<16x1280xi1>
    %61 = arith.select %60, %55, %1 : vector<16x1280xi1>, vector<16x1280xbf16>
    %c96 = arith.constant 96 : index
    %c0_21 = arith.constant 0 : index
    %62 = vector.load %arg10[%c96, %c0_21] : memref<144x1280xbf16, #tpu.memory_space<vmem>>, vector<16x1280xbf16>
    tpu.vector_store %arg10[%c96, %c0_21], %61 {strides = array<i32>} : memref<144x1280xbf16, #tpu.memory_space<vmem>>, vector<16x1280xbf16>,
    %63 = vector.extract_strided_slice %0 {offsets = [0, 16], sizes = [16, 1264], strides = [1, 1]} : vector<16x1280xbf16> to vector<16x1264xbf16>
    %64 = vector.extract_strided_slice %0 {offsets = [0, 0], sizes = [16, 16], strides = [1, 1]} : vector<16x1280xbf16> to vector<16x16xbf16>
    %65 = tpu.concatenate %63, %64 in 1 : vector<16x1264xbf16>, vector<16x16xbf16> -> vector<16x1280xbf16>
    %c7 = arith.constant 7 : index
    %c0_22 = arith.constant 0 : index
    %66 = vector.load %arg2[%c7, %c0_22] : memref<9x1280xf32, #tpu.memory_space<vmem>>, vector<1x1280xf32>
    %cst_23 = arith.constant 0.000000e+00 : f32
    %67 = vector.broadcast %cst_23 : f32 to vector<1x1280xf32>
    %68 = arith.cmpf one, %66, %67 : vector<1x1280xf32>
    %69 = vector.shape_cast %68 : vector<1x1280xi1> to vector<1x1280xi1>
    %70 = vector.broadcast %69 : vector<1x1280xi1> to vector<16x1280xi1>
    %71 = arith.select %70, %65, %1 : vector<16x1280xi1>, vector<16x1280xbf16>
    %c112 = arith.constant 112 : index
    %c0_24 = arith.constant 0 : index
    %72 = vector.load %arg10[%c112, %c0_24] : memref<144x1280xbf16, #tpu.memory_space<vmem>>, vector<16x1280xbf16>
    tpu.vector_store %arg10[%c112, %c0_24], %71 {strides = array<i32>} : memref<144x1280xbf16, #tpu.memory_space<vmem>>, vector<16x1280xbf16>,
    %73 = vector.extract_strided_slice %0 {offsets = [0, 17], sizes = [16, 1263], strides = [1, 1]} : vector<16x1280xbf16> to vector<16x1263xbf16>
    %74 = vector.extract_strided_slice %0 {offsets = [0, 0], sizes = [16, 17], strides = [1, 1]} : vector<16x1280xbf16> to vector<16x17xbf16>
    %75 = tpu.concatenate %73, %74 in 1 : vector<16x1263xbf16>, vector<16x17xbf16> -> vector<16x1280xbf16>
    %c8 = arith.constant 8 : index
    %c0_25 = arith.constant 0 : index
    %76 = vector.load %arg2[%c8, %c0_25] : memref<9x1280xf32, #tpu.memory_space<vmem>>, vector<1x1280xf32>
    %cst_26 = arith.constant 0.000000e+00 : f32
    %77 = vector.broadcast %cst_26 : f32 to vector<1x1280xf32>
    %78 = arith.cmpf one, %76, %77 : vector<1x1280xf32>
    %79 = vector.shape_cast %78 : vector<1x1280xi1> to vector<1x1280xi1>
    %80 = vector.broadcast %79 : vector<1x1280xi1> to vector<16x1280xi1>
    %81 = arith.select %80, %75, %1 : vector<16x1280xi1>, vector<16x1280xbf16>
    %c128 = arith.constant 128 : index
    %c0_27 = arith.constant 0 : index
    %82 = vector.load %arg10[%c128, %c0_27] : memref<144x1280xbf16, #tpu.memory_space<vmem>>, vector<16x1280xbf16>
    tpu.vector_store %arg10[%c128, %c0_27], %81 {strides = array<i32>} : memref<144x1280xbf16, #tpu.memory_space<vmem>>, vector<16x1280xbf16>,
    %c0_28 = arith.constant 0 : index
    %c0_29 = arith.constant 0 : index
    %c0_30 = arith.constant 0 : index
    %83 = vector.load %arg3[%c0_28, %c0_29, %c0_30] : memref<5x16x144xbf16, #tpu.memory_space<vmem>>, vector<1x16x144xbf16>
    %84 = vector.shape_cast %83 : vector<1x16x144xbf16> to vector<16x144xbf16>
    %c0_31 = arith.constant 0 : index
    %c0_32 = arith.constant 0 : index
    %85 = vector.load %arg10[%c0_31, %c0_32] : memref<144x1280xbf16, #tpu.memory_space<vmem>>, vector<144x1280xbf16>
    %cst_33 = arith.constant dense<0.000000e+00> : vector<16x1280xf32>
    %86 = tpu.matmul %84, %85, %cst_33 {dimension_numbers = #tpu.dot_dimension_numbers<[1], [0], [0], [1], [0, 0, 1, 1], [], []>} : vector<16x144xbf16>, vector<144x1280xbf16>, vector<16x1280xf32> -> vector<16x1280xf32>
    %c0_34 = arith.constant 0 : index
    %c0_35 = arith.constant 0 : index
    %c0_36 = arith.constant 0 : index
    %87 = vector.load %arg4[%c0_34, %c0_35, %c0_36] : memref<5x16x1xf32, #tpu.memory_space<vmem>>, vector<1x16x1xf32>
    %88 = vector.shape_cast %87 : vector<1x16x1xf32> to vector<16x1xf32>
    %89 = vector.broadcast %88 : vector<16x1xf32> to vector<16x1280xf32>
    %90 = arith.addf %86, %89 : vector<16x1280xf32>
    %cst_37 = arith.constant 0.000000e+00 : f32
    %91 = vector.broadcast %cst_37 : f32 to vector<16x1280xf32>
    %92 = arith.maximumf %90, %91 : vector<16x1280xf32>
    %93 = arith.truncf %92 : vector<16x1280xf32> to vector<16x1280xbf16>
    %cst_38 = arith.constant 0.000000e+00 : bf16
    %94 = vector.broadcast %cst_38 : bf16 to vector<16x1280xbf16>
    %95 = vector.extract_strided_slice %93 {offsets = [0, 1263], sizes = [16, 17], strides = [1, 1]} : vector<16x1280xbf16> to vector<16x17xbf16>
    %96 = vector.extract_strided_slice %93 {offsets = [0, 0], sizes = [16, 1263], strides = [1, 1]} : vector<16x1280xbf16> to vector<16x1263xbf16>
    %97 = tpu.concatenate %95, %96 in 1 : vector<16x17xbf16>, vector<16x1263xbf16> -> vector<16x1280xbf16>
    %c0_39 = arith.constant 0 : index
    %c0_40 = arith.constant 0 : index
    %98 = vector.load %arg2[%c0_39, %c0_40] : memref<9x1280xf32, #tpu.memory_space<vmem>>, vector<1x1280xf32>
    %cst_41 = arith.constant 0.000000e+00 : f32
    %99 = vector.broadcast %cst_41 : f32 to vector<1x1280xf32>
    %100 = arith.cmpf one, %98, %99 : vector<1x1280xf32>
    %101 = vector.shape_cast %100 : vector<1x1280xi1> to vector<1x1280xi1>
    %102 = vector.broadcast %101 : vector<1x1280xi1> to vector<16x1280xi1>
    %103 = arith.select %102, %97, %94 : vector<16x1280xi1>, vector<16x1280xbf16>
    %c0_42 = arith.constant 0 : index
    %c0_43 = arith.constant 0 : index
    %104 = vector.load %arg10[%c0_42, %c0_43] : memref<144x1280xbf16, #tpu.memory_space<vmem>>, vector<16x1280xbf16>
    tpu.vector_store %arg10[%c0_42, %c0_43], %103 {strides = array<i32>} : memref<144x1280xbf16, #tpu.memory_space<vmem>>, vector<16x1280xbf16>,
    %105 = vector.extract_strided_slice %93 {offsets = [0, 1264], sizes = [16, 16], strides = [1, 1]} : vector<16x1280xbf16> to vector<16x16xbf16>
    %106 = vector.extract_strided_slice %93 {offsets = [0, 0], sizes = [16, 1264], strides = [1, 1]} : vector<16x1280xbf16> to vector<16x1264xbf16>
    %107 = tpu.concatenate %105, %106 in 1 : vector<16x16xbf16>, vector<16x1264xbf16> -> vector<16x1280xbf16>
    %c1_44 = arith.constant 1 : index
    %c0_45 = arith.constant 0 : index
    %108 = vector.load %arg2[%c1_44, %c0_45] : memref<9x1280xf32, #tpu.memory_space<vmem>>, vector<1x1280xf32>
    %cst_46 = arith.constant 0.000000e+00 : f32
    %109 = vector.broadcast %cst_46 : f32 to vector<1x1280xf32>
    %110 = arith.cmpf one, %108, %109 : vector<1x1280xf32>
    %111 = vector.shape_cast %110 : vector<1x1280xi1> to vector<1x1280xi1>
    %112 = vector.broadcast %111 : vector<1x1280xi1> to vector<16x1280xi1>
    %113 = arith.select %112, %107, %94 : vector<16x1280xi1>, vector<16x1280xbf16>
    %c16_47 = arith.constant 16 : index
    %c0_48 = arith.constant 0 : index
    %114 = vector.load %arg10[%c16_47, %c0_48] : memref<144x1280xbf16, #tpu.memory_space<vmem>>, vector<16x1280xbf16>
    tpu.vector_store %arg10[%c16_47, %c0_48], %113 {strides = array<i32>} : memref<144x1280xbf16, #tpu.memory_space<vmem>>, vector<16x1280xbf16>,
    %115 = vector.extract_strided_slice %93 {offsets = [0, 1265], sizes = [16, 15], strides = [1, 1]} : vector<16x1280xbf16> to vector<16x15xbf16>
    %116 = vector.extract_strided_slice %93 {offsets = [0, 0], sizes = [16, 1265], strides = [1, 1]} : vector<16x1280xbf16> to vector<16x1265xbf16>
    %117 = tpu.concatenate %115, %116 in 1 : vector<16x15xbf16>, vector<16x1265xbf16> -> vector<16x1280xbf16>
    %c2_49 = arith.constant 2 : index
    %c0_50 = arith.constant 0 : index
    %118 = vector.load %arg2[%c2_49, %c0_50] : memref<9x1280xf32, #tpu.memory_space<vmem>>, vector<1x1280xf32>
    %cst_51 = arith.constant 0.000000e+00 : f32
    %119 = vector.broadcast %cst_51 : f32 to vector<1x1280xf32>
    %120 = arith.cmpf one, %118, %119 : vector<1x1280xf32>
    %121 = vector.shape_cast %120 : vector<1x1280xi1> to vector<1x1280xi1>
    %122 = vector.broadcast %121 : vector<1x1280xi1> to vector<16x1280xi1>
    %123 = arith.select %122, %117, %94 : vector<16x1280xi1>, vector<16x1280xbf16>
    %c32_52 = arith.constant 32 : index
    %c0_53 = arith.constant 0 : index
    %124 = vector.load %arg10[%c32_52, %c0_53] : memref<144x1280xbf16, #tpu.memory_space<vmem>>, vector<16x1280xbf16>
    tpu.vector_store %arg10[%c32_52, %c0_53], %123 {strides = array<i32>} : memref<144x1280xbf16, #tpu.memory_space<vmem>>, vector<16x1280xbf16>,
    %125 = vector.extract_strided_slice %93 {offsets = [0, 1279], sizes = [16, 1], strides = [1, 1]} : vector<16x1280xbf16> to vector<16x1xbf16>
    %126 = vector.extract_strided_slice %93 {offsets = [0, 0], sizes = [16, 1279], strides = [1, 1]} : vector<16x1280xbf16> to vector<16x1279xbf16>
    %127 = tpu.concatenate %125, %126 in 1 : vector<16x1xbf16>, vector<16x1279xbf16> -> vector<16x1280xbf16>
    %c3_54 = arith.constant 3 : index
    %c0_55 = arith.constant 0 : index
    %128 = vector.load %arg2[%c3_54, %c0_55] : memref<9x1280xf32, #tpu.memory_space<vmem>>, vector<1x1280xf32>
    %cst_56 = arith.constant 0.000000e+00 : f32
    %129 = vector.broadcast %cst_56 : f32 to vector<1x1280xf32>
    %130 = arith.cmpf one, %128, %129 : vector<1x1280xf32>
    %131 = vector.shape_cast %130 : vector<1x1280xi1> to vector<1x1280xi1>
    %132 = vector.broadcast %131 : vector<1x1280xi1> to vector<16x1280xi1>
    %133 = arith.select %132, %127, %94 : vector<16x1280xi1>, vector<16x1280xbf16>
    %c48_57 = arith.constant 48 : index
    %c0_58 = arith.constant 0 : index
    %134 = vector.load %arg10[%c48_57, %c0_58] : memref<144x1280xbf16, #tpu.memory_space<vmem>>, vector<16x1280xbf16>
    tpu.vector_store %arg10[%c48_57, %c0_58], %133 {strides = array<i32>} : memref<144x1280xbf16, #tpu.memory_space<vmem>>, vector<16x1280xbf16>,
    %c64_59 = arith.constant 64 : index
    %c0_60 = arith.constant 0 : index
    %135 = vector.load %arg10[%c64_59, %c0_60] : memref<144x1280xbf16, #tpu.memory_space<vmem>>, vector<16x1280xbf16>
    tpu.vector_store %arg10[%c64_59, %c0_60], %93 {strides = array<i32>} : memref<144x1280xbf16, #tpu.memory_space<vmem>>, vector<16x1280xbf16>,
    %136 = vector.extract_strided_slice %93 {offsets = [0, 1], sizes = [16, 1279], strides = [1, 1]} : vector<16x1280xbf16> to vector<16x1279xbf16>
    %137 = vector.extract_strided_slice %93 {offsets = [0, 0], sizes = [16, 1], strides = [1, 1]} : vector<16x1280xbf16> to vector<16x1xbf16>
    %138 = tpu.concatenate %136, %137 in 1 : vector<16x1279xbf16>, vector<16x1xbf16> -> vector<16x1280xbf16>
    %c5_61 = arith.constant 5 : index
    %c0_62 = arith.constant 0 : index
    %139 = vector.load %arg2[%c5_61, %c0_62] : memref<9x1280xf32, #tpu.memory_space<vmem>>, vector<1x1280xf32>
    %cst_63 = arith.constant 0.000000e+00 : f32
    %140 = vector.broadcast %cst_63 : f32 to vector<1x1280xf32>
    %141 = arith.cmpf one, %139, %140 : vector<1x1280xf32>
    %142 = vector.shape_cast %141 : vector<1x1280xi1> to vector<1x1280xi1>
    %143 = vector.broadcast %142 : vector<1x1280xi1> to vector<16x1280xi1>
    %144 = arith.select %143, %138, %94 : vector<16x1280xi1>, vector<16x1280xbf16>
    %c80_64 = arith.constant 80 : index
    %c0_65 = arith.constant 0 : index
    %145 = vector.load %arg10[%c80_64, %c0_65] : memref<144x1280xbf16, #tpu.memory_space<vmem>>, vector<16x1280xbf16>
    tpu.vector_store %arg10[%c80_64, %c0_65], %144 {strides = array<i32>} : memref<144x1280xbf16, #tpu.memory_space<vmem>>, vector<16x1280xbf16>,
    %146 = vector.extract_strided_slice %93 {offsets = [0, 15], sizes = [16, 1265], strides = [1, 1]} : vector<16x1280xbf16> to vector<16x1265xbf16>
    %147 = vector.extract_strided_slice %93 {offsets = [0, 0], sizes = [16, 15], strides = [1, 1]} : vector<16x1280xbf16> to vector<16x15xbf16>
    %148 = tpu.concatenate %146, %147 in 1 : vector<16x1265xbf16>, vector<16x15xbf16> -> vector<16x1280xbf16>
    %c6_66 = arith.constant 6 : index
    %c0_67 = arith.constant 0 : index
    %149 = vector.load %arg2[%c6_66, %c0_67] : memref<9x1280xf32, #tpu.memory_space<vmem>>, vector<1x1280xf32>
    %cst_68 = arith.constant 0.000000e+00 : f32
    %150 = vector.broadcast %cst_68 : f32 to vector<1x1280xf32>
    %151 = arith.cmpf one, %149, %150 : vector<1x1280xf32>
    %152 = vector.shape_cast %151 : vector<1x1280xi1> to vector<1x1280xi1>
    %153 = vector.broadcast %152 : vector<1x1280xi1> to vector<16x1280xi1>
    %154 = arith.select %153, %148, %94 : vector<16x1280xi1>, vector<16x1280xbf16>
    %c96_69 = arith.constant 96 : index
    %c0_70 = arith.constant 0 : index
    %155 = vector.load %arg10[%c96_69, %c0_70] : memref<144x1280xbf16, #tpu.memory_space<vmem>>, vector<16x1280xbf16>
    tpu.vector_store %arg10[%c96_69, %c0_70], %154 {strides = array<i32>} : memref<144x1280xbf16, #tpu.memory_space<vmem>>, vector<16x1280xbf16>,
    %156 = vector.extract_strided_slice %93 {offsets = [0, 16], sizes = [16, 1264], strides = [1, 1]} : vector<16x1280xbf16> to vector<16x1264xbf16>
    %157 = vector.extract_strided_slice %93 {offsets = [0, 0], sizes = [16, 16], strides = [1, 1]} : vector<16x1280xbf16> to vector<16x16xbf16>
    %158 = tpu.concatenate %156, %157 in 1 : vector<16x1264xbf16>, vector<16x16xbf16> -> vector<16x1280xbf16>
    %c7_71 = arith.constant 7 : index
    %c0_72 = arith.constant 0 : index
    %159 = vector.load %arg2[%c7_71, %c0_72] : memref<9x1280xf32, #tpu.memory_space<vmem>>, vector<1x1280xf32>
    %cst_73 = arith.constant 0.000000e+00 : f32
    %160 = vector.broadcast %cst_73 : f32 to vector<1x1280xf32>
    %161 = arith.cmpf one, %159, %160 : vector<1x1280xf32>
    %162 = vector.shape_cast %161 : vector<1x1280xi1> to vector<1x1280xi1>
    %163 = vector.broadcast %162 : vector<1x1280xi1> to vector<16x1280xi1>
    %164 = arith.select %163, %158, %94 : vector<16x1280xi1>, vector<16x1280xbf16>
    %c112_74 = arith.constant 112 : index
    %c0_75 = arith.constant 0 : index
    %165 = vector.load %arg10[%c112_74, %c0_75] : memref<144x1280xbf16, #tpu.memory_space<vmem>>, vector<16x1280xbf16>
    tpu.vector_store %arg10[%c112_74, %c0_75], %164 {strides = array<i32>} : memref<144x1280xbf16, #tpu.memory_space<vmem>>, vector<16x1280xbf16>,
    %166 = vector.extract_strided_slice %93 {offsets = [0, 17], sizes = [16, 1263], strides = [1, 1]} : vector<16x1280xbf16> to vector<16x1263xbf16>
    %167 = vector.extract_strided_slice %93 {offsets = [0, 0], sizes = [16, 17], strides = [1, 1]} : vector<16x1280xbf16> to vector<16x17xbf16>
    %168 = tpu.concatenate %166, %167 in 1 : vector<16x1263xbf16>, vector<16x17xbf16> -> vector<16x1280xbf16>
    %c8_76 = arith.constant 8 : index
    %c0_77 = arith.constant 0 : index
    %169 = vector.load %arg2[%c8_76, %c0_77] : memref<9x1280xf32, #tpu.memory_space<vmem>>, vector<1x1280xf32>
    %cst_78 = arith.constant 0.000000e+00 : f32
    %170 = vector.broadcast %cst_78 : f32 to vector<1x1280xf32>
    %171 = arith.cmpf one, %169, %170 : vector<1x1280xf32>
    %172 = vector.shape_cast %171 : vector<1x1280xi1> to vector<1x1280xi1>
    %173 = vector.broadcast %172 : vector<1x1280xi1> to vector<16x1280xi1>
    %174 = arith.select %173, %168, %94 : vector<16x1280xi1>, vector<16x1280xbf16>
    %c128_79 = arith.constant 128 : index
    %c0_80 = arith.constant 0 : index
    %175 = vector.load %arg10[%c128_79, %c0_80] : memref<144x1280xbf16, #tpu.memory_space<vmem>>, vector<16x1280xbf16>
    tpu.vector_store %arg10[%c128_79, %c0_80], %174 {strides = array<i32>} : memref<144x1280xbf16, #tpu.memory_space<vmem>>, vector<16x1280xbf16>,
    %c1_81 = arith.constant 1 : index
    %c0_82 = arith.constant 0 : index
    %c0_83 = arith.constant 0 : index
    %176 = vector.load %arg3[%c1_81, %c0_82, %c0_83] : memref<5x16x144xbf16, #tpu.memory_space<vmem>>, vector<1x16x144xbf16>
    %177 = vector.shape_cast %176 : vector<1x16x144xbf16> to vector<16x144xbf16>
    %c0_84 = arith.constant 0 : index
    %c0_85 = arith.constant 0 : index
    %178 = vector.load %arg10[%c0_84, %c0_85] : memref<144x1280xbf16, #tpu.memory_space<vmem>>, vector<144x1280xbf16>
    %cst_86 = arith.constant dense<0.000000e+00> : vector<16x1280xf32>
    %179 = tpu.matmul %177, %178, %cst_86 {dimension_numbers = #tpu.dot_dimension_numbers<[1], [0], [0], [1], [0, 0, 1, 1], [], []>} : vector<16x144xbf16>, vector<144x1280xbf16>, vector<16x1280xf32> -> vector<16x1280xf32>
    %c1_87 = arith.constant 1 : index
    %c0_88 = arith.constant 0 : index
    %c0_89 = arith.constant 0 : index
    %180 = vector.load %arg4[%c1_87, %c0_88, %c0_89] : memref<5x16x1xf32, #tpu.memory_space<vmem>>, vector<1x16x1xf32>
    %181 = vector.shape_cast %180 : vector<1x16x1xf32> to vector<16x1xf32>
    %182 = vector.broadcast %181 : vector<16x1xf32> to vector<16x1280xf32>
    %183 = arith.addf %179, %182 : vector<16x1280xf32>
    %cst_90 = arith.constant 0.000000e+00 : f32
    %184 = vector.broadcast %cst_90 : f32 to vector<16x1280xf32>
    %185 = arith.maximumf %183, %184 : vector<16x1280xf32>
    %186 = arith.truncf %185 : vector<16x1280xf32> to vector<16x1280xbf16>
    %cst_91 = arith.constant 0.000000e+00 : bf16
    %187 = vector.broadcast %cst_91 : bf16 to vector<16x1280xbf16>
    %188 = vector.extract_strided_slice %186 {offsets = [0, 1263], sizes = [16, 17], strides = [1, 1]} : vector<16x1280xbf16> to vector<16x17xbf16>
    %189 = vector.extract_strided_slice %186 {offsets = [0, 0], sizes = [16, 1263], strides = [1, 1]} : vector<16x1280xbf16> to vector<16x1263xbf16>
    %190 = tpu.concatenate %188, %189 in 1 : vector<16x17xbf16>, vector<16x1263xbf16> -> vector<16x1280xbf16>
    %c0_92 = arith.constant 0 : index
    %c0_93 = arith.constant 0 : index
    %191 = vector.load %arg2[%c0_92, %c0_93] : memref<9x1280xf32, #tpu.memory_space<vmem>>, vector<1x1280xf32>
    %cst_94 = arith.constant 0.000000e+00 : f32
    %192 = vector.broadcast %cst_94 : f32 to vector<1x1280xf32>
    %193 = arith.cmpf one, %191, %192 : vector<1x1280xf32>
    %194 = vector.shape_cast %193 : vector<1x1280xi1> to vector<1x1280xi1>
    %195 = vector.broadcast %194 : vector<1x1280xi1> to vector<16x1280xi1>
    %196 = arith.select %195, %190, %187 : vector<16x1280xi1>, vector<16x1280xbf16>
    %c0_95 = arith.constant 0 : index
    %c0_96 = arith.constant 0 : index
    %197 = vector.load %arg10[%c0_95, %c0_96] : memref<144x1280xbf16, #tpu.memory_space<vmem>>, vector<16x1280xbf16>
    tpu.vector_store %arg10[%c0_95, %c0_96], %196 {strides = array<i32>} : memref<144x1280xbf16, #tpu.memory_space<vmem>>, vector<16x1280xbf16>,
    %198 = vector.extract_strided_slice %186 {offsets = [0, 1264], sizes = [16, 16], strides = [1, 1]} : vector<16x1280xbf16> to vector<16x16xbf16>
    %199 = vector.extract_strided_slice %186 {offsets = [0, 0], sizes = [16, 1264], strides = [1, 1]} : vector<16x1280xbf16> to vector<16x1264xbf16>
    %200 = tpu.concatenate %198, %199 in 1 : vector<16x16xbf16>, vector<16x1264xbf16> -> vector<16x1280xbf16>
    %c1_97 = arith.constant 1 : index
    %c0_98 = arith.constant 0 : index
    %201 = vector.load %arg2[%c1_97, %c0_98] : memref<9x1280xf32, #tpu.memory_space<vmem>>, vector<1x1280xf32>
    %cst_99 = arith.constant 0.000000e+00 : f32
    %202 = vector.broadcast %cst_99 : f32 to vector<1x1280xf32>
    %203 = arith.cmpf one, %201, %202 : vector<1x1280xf32>
    %204 = vector.shape_cast %203 : vector<1x1280xi1> to vector<1x1280xi1>
    %205 = vector.broadcast %204 : vector<1x1280xi1> to vector<16x1280xi1>
    %206 = arith.select %205, %200, %187 : vector<16x1280xi1>, vector<16x1280xbf16>
    %c16_100 = arith.constant 16 : index
    %c0_101 = arith.constant 0 : index
    %207 = vector.load %arg10[%c16_100, %c0_101] : memref<144x1280xbf16, #tpu.memory_space<vmem>>, vector<16x1280xbf16>
    tpu.vector_store %arg10[%c16_100, %c0_101], %206 {strides = array<i32>} : memref<144x1280xbf16, #tpu.memory_space<vmem>>, vector<16x1280xbf16>,
    %208 = vector.extract_strided_slice %186 {offsets = [0, 1265], sizes = [16, 15], strides = [1, 1]} : vector<16x1280xbf16> to vector<16x15xbf16>
    %209 = vector.extract_strided_slice %186 {offsets = [0, 0], sizes = [16, 1265], strides = [1, 1]} : vector<16x1280xbf16> to vector<16x1265xbf16>
    %210 = tpu.concatenate %208, %209 in 1 : vector<16x15xbf16>, vector<16x1265xbf16> -> vector<16x1280xbf16>
    %c2_102 = arith.constant 2 : index
    %c0_103 = arith.constant 0 : index
    %211 = vector.load %arg2[%c2_102, %c0_103] : memref<9x1280xf32, #tpu.memory_space<vmem>>, vector<1x1280xf32>
    %cst_104 = arith.constant 0.000000e+00 : f32
    %212 = vector.broadcast %cst_104 : f32 to vector<1x1280xf32>
    %213 = arith.cmpf one, %211, %212 : vector<1x1280xf32>
    %214 = vector.shape_cast %213 : vector<1x1280xi1> to vector<1x1280xi1>
    %215 = vector.broadcast %214 : vector<1x1280xi1> to vector<16x1280xi1>
    %216 = arith.select %215, %210, %187 : vector<16x1280xi1>, vector<16x1280xbf16>
    %c32_105 = arith.constant 32 : index
    %c0_106 = arith.constant 0 : index
    %217 = vector.load %arg10[%c32_105, %c0_106] : memref<144x1280xbf16, #tpu.memory_space<vmem>>, vector<16x1280xbf16>
    tpu.vector_store %arg10[%c32_105, %c0_106], %216 {strides = array<i32>} : memref<144x1280xbf16, #tpu.memory_space<vmem>>, vector<16x1280xbf16>,
    %218 = vector.extract_strided_slice %186 {offsets = [0, 1279], sizes = [16, 1], strides = [1, 1]} : vector<16x1280xbf16> to vector<16x1xbf16>
    %219 = vector.extract_strided_slice %186 {offsets = [0, 0], sizes = [16, 1279], strides = [1, 1]} : vector<16x1280xbf16> to vector<16x1279xbf16>
    %220 = tpu.concatenate %218, %219 in 1 : vector<16x1xbf16>, vector<16x1279xbf16> -> vector<16x1280xbf16>
    %c3_107 = arith.constant 3 : index
    %c0_108 = arith.constant 0 : index
    %221 = vector.load %arg2[%c3_107, %c0_108] : memref<9x1280xf32, #tpu.memory_space<vmem>>, vector<1x1280xf32>
    %cst_109 = arith.constant 0.000000e+00 : f32
    %222 = vector.broadcast %cst_109 : f32 to vector<1x1280xf32>
    %223 = arith.cmpf one, %221, %222 : vector<1x1280xf32>
    %224 = vector.shape_cast %223 : vector<1x1280xi1> to vector<1x1280xi1>
    %225 = vector.broadcast %224 : vector<1x1280xi1> to vector<16x1280xi1>
    %226 = arith.select %225, %220, %187 : vector<16x1280xi1>, vector<16x1280xbf16>
    %c48_110 = arith.constant 48 : index
    %c0_111 = arith.constant 0 : index
    %227 = vector.load %arg10[%c48_110, %c0_111] : memref<144x1280xbf16, #tpu.memory_space<vmem>>, vector<16x1280xbf16>
    tpu.vector_store %arg10[%c48_110, %c0_111], %226 {strides = array<i32>} : memref<144x1280xbf16, #tpu.memory_space<vmem>>, vector<16x1280xbf16>,
    %c64_112 = arith.constant 64 : index
    %c0_113 = arith.constant 0 : index
    %228 = vector.load %arg10[%c64_112, %c0_113] : memref<144x1280xbf16, #tpu.memory_space<vmem>>, vector<16x1280xbf16>
    tpu.vector_store %arg10[%c64_112, %c0_113], %186 {strides = array<i32>} : memref<144x1280xbf16, #tpu.memory_space<vmem>>, vector<16x1280xbf16>,
    %229 = vector.extract_strided_slice %186 {offsets = [0, 1], sizes = [16, 1279], strides = [1, 1]} : vector<16x1280xbf16> to vector<16x1279xbf16>
    %230 = vector.extract_strided_slice %186 {offsets = [0, 0], sizes = [16, 1], strides = [1, 1]} : vector<16x1280xbf16> to vector<16x1xbf16>
    %231 = tpu.concatenate %229, %230 in 1 : vector<16x1279xbf16>, vector<16x1xbf16> -> vector<16x1280xbf16>
    %c5_114 = arith.constant 5 : index
    %c0_115 = arith.constant 0 : index
    %232 = vector.load %arg2[%c5_114, %c0_115] : memref<9x1280xf32, #tpu.memory_space<vmem>>, vector<1x1280xf32>
    %cst_116 = arith.constant 0.000000e+00 : f32
    %233 = vector.broadcast %cst_116 : f32 to vector<1x1280xf32>
    %234 = arith.cmpf one, %232, %233 : vector<1x1280xf32>
    %235 = vector.shape_cast %234 : vector<1x1280xi1> to vector<1x1280xi1>
    %236 = vector.broadcast %235 : vector<1x1280xi1> to vector<16x1280xi1>
    %237 = arith.select %236, %231, %187 : vector<16x1280xi1>, vector<16x1280xbf16>
    %c80_117 = arith.constant 80 : index
    %c0_118 = arith.constant 0 : index
    %238 = vector.load %arg10[%c80_117, %c0_118] : memref<144x1280xbf16, #tpu.memory_space<vmem>>, vector<16x1280xbf16>
    tpu.vector_store %arg10[%c80_117, %c0_118], %237 {strides = array<i32>} : memref<144x1280xbf16, #tpu.memory_space<vmem>>, vector<16x1280xbf16>,
    %239 = vector.extract_strided_slice %186 {offsets = [0, 15], sizes = [16, 1265], strides = [1, 1]} : vector<16x1280xbf16> to vector<16x1265xbf16>
    %240 = vector.extract_strided_slice %186 {offsets = [0, 0], sizes = [16, 15], strides = [1, 1]} : vector<16x1280xbf16> to vector<16x15xbf16>
    %241 = tpu.concatenate %239, %240 in 1 : vector<16x1265xbf16>, vector<16x15xbf16> -> vector<16x1280xbf16>
    %c6_119 = arith.constant 6 : index
    %c0_120 = arith.constant 0 : index
    %242 = vector.load %arg2[%c6_119, %c0_120] : memref<9x1280xf32, #tpu.memory_space<vmem>>, vector<1x1280xf32>
    %cst_121 = arith.constant 0.000000e+00 : f32
    %243 = vector.broadcast %cst_121 : f32 to vector<1x1280xf32>
    %244 = arith.cmpf one, %242, %243 : vector<1x1280xf32>
    %245 = vector.shape_cast %244 : vector<1x1280xi1> to vector<1x1280xi1>
    %246 = vector.broadcast %245 : vector<1x1280xi1> to vector<16x1280xi1>
    %247 = arith.select %246, %241, %187 : vector<16x1280xi1>, vector<16x1280xbf16>
    %c96_122 = arith.constant 96 : index
    %c0_123 = arith.constant 0 : index
    %248 = vector.load %arg10[%c96_122, %c0_123] : memref<144x1280xbf16, #tpu.memory_space<vmem>>, vector<16x1280xbf16>
    tpu.vector_store %arg10[%c96_122, %c0_123], %247 {strides = array<i32>} : memref<144x1280xbf16, #tpu.memory_space<vmem>>, vector<16x1280xbf16>,
    %249 = vector.extract_strided_slice %186 {offsets = [0, 16], sizes = [16, 1264], strides = [1, 1]} : vector<16x1280xbf16> to vector<16x1264xbf16>
    %250 = vector.extract_strided_slice %186 {offsets = [0, 0], sizes = [16, 16], strides = [1, 1]} : vector<16x1280xbf16> to vector<16x16xbf16>
    %251 = tpu.concatenate %249, %250 in 1 : vector<16x1264xbf16>, vector<16x16xbf16> -> vector<16x1280xbf16>
    %c7_124 = arith.constant 7 : index
    %c0_125 = arith.constant 0 : index
    %252 = vector.load %arg2[%c7_124, %c0_125] : memref<9x1280xf32, #tpu.memory_space<vmem>>, vector<1x1280xf32>
    %cst_126 = arith.constant 0.000000e+00 : f32
    %253 = vector.broadcast %cst_126 : f32 to vector<1x1280xf32>
    %254 = arith.cmpf one, %252, %253 : vector<1x1280xf32>
    %255 = vector.shape_cast %254 : vector<1x1280xi1> to vector<1x1280xi1>
    %256 = vector.broadcast %255 : vector<1x1280xi1> to vector<16x1280xi1>
    %257 = arith.select %256, %251, %187 : vector<16x1280xi1>, vector<16x1280xbf16>
    %c112_127 = arith.constant 112 : index
    %c0_128 = arith.constant 0 : index
    %258 = vector.load %arg10[%c112_127, %c0_128] : memref<144x1280xbf16, #tpu.memory_space<vmem>>, vector<16x1280xbf16>
    tpu.vector_store %arg10[%c112_127, %c0_128], %257 {strides = array<i32>} : memref<144x1280xbf16, #tpu.memory_space<vmem>>, vector<16x1280xbf16>,
    %259 = vector.extract_strided_slice %186 {offsets = [0, 17], sizes = [16, 1263], strides = [1, 1]} : vector<16x1280xbf16> to vector<16x1263xbf16>
    %260 = vector.extract_strided_slice %186 {offsets = [0, 0], sizes = [16, 17], strides = [1, 1]} : vector<16x1280xbf16> to vector<16x17xbf16>
    %261 = tpu.concatenate %259, %260 in 1 : vector<16x1263xbf16>, vector<16x17xbf16> -> vector<16x1280xbf16>
    %c8_129 = arith.constant 8 : index
    %c0_130 = arith.constant 0 : index
    %262 = vector.load %arg2[%c8_129, %c0_130] : memref<9x1280xf32, #tpu.memory_space<vmem>>, vector<1x1280xf32>
    %cst_131 = arith.constant 0.000000e+00 : f32
    %263 = vector.broadcast %cst_131 : f32 to vector<1x1280xf32>
    %264 = arith.cmpf one, %262, %263 : vector<1x1280xf32>
    %265 = vector.shape_cast %264 : vector<1x1280xi1> to vector<1x1280xi1>
    %266 = vector.broadcast %265 : vector<1x1280xi1> to vector<16x1280xi1>
    %267 = arith.select %266, %261, %187 : vector<16x1280xi1>, vector<16x1280xbf16>
    %c128_132 = arith.constant 128 : index
    %c0_133 = arith.constant 0 : index
    %268 = vector.load %arg10[%c128_132, %c0_133] : memref<144x1280xbf16, #tpu.memory_space<vmem>>, vector<16x1280xbf16>
    tpu.vector_store %arg10[%c128_132, %c0_133], %267 {strides = array<i32>} : memref<144x1280xbf16, #tpu.memory_space<vmem>>, vector<16x1280xbf16>,
    %c2_134 = arith.constant 2 : index
    %c0_135 = arith.constant 0 : index
    %c0_136 = arith.constant 0 : index
    %269 = vector.load %arg3[%c2_134, %c0_135, %c0_136] : memref<5x16x144xbf16, #tpu.memory_space<vmem>>, vector<1x16x144xbf16>
    %270 = vector.shape_cast %269 : vector<1x16x144xbf16> to vector<16x144xbf16>
    %c0_137 = arith.constant 0 : index
    %c0_138 = arith.constant 0 : index
    %271 = vector.load %arg10[%c0_137, %c0_138] : memref<144x1280xbf16, #tpu.memory_space<vmem>>, vector<144x1280xbf16>
    %cst_139 = arith.constant dense<0.000000e+00> : vector<16x1280xf32>
    %272 = tpu.matmul %270, %271, %cst_139 {dimension_numbers = #tpu.dot_dimension_numbers<[1], [0], [0], [1], [0, 0, 1, 1], [], []>} : vector<16x144xbf16>, vector<144x1280xbf16>, vector<16x1280xf32> -> vector<16x1280xf32>
    %c2_140 = arith.constant 2 : index
    %c0_141 = arith.constant 0 : index
    %c0_142 = arith.constant 0 : index
    %273 = vector.load %arg4[%c2_140, %c0_141, %c0_142] : memref<5x16x1xf32, #tpu.memory_space<vmem>>, vector<1x16x1xf32>
    %274 = vector.shape_cast %273 : vector<1x16x1xf32> to vector<16x1xf32>
    %275 = vector.broadcast %274 : vector<16x1xf32> to vector<16x1280xf32>
    %276 = arith.addf %272, %275 : vector<16x1280xf32>
    %277 = arith.addf %276, %92 : vector<16x1280xf32>
    %cst_143 = arith.constant 0.000000e+00 : f32
    %278 = vector.broadcast %cst_143 : f32 to vector<16x1280xf32>
    %279 = arith.maximumf %277, %278 : vector<16x1280xf32>
    %280 = arith.truncf %279 : vector<16x1280xf32> to vector<16x1280xbf16>
    %cst_144 = arith.constant 0.000000e+00 : bf16
    %281 = vector.broadcast %cst_144 : bf16 to vector<16x1280xbf16>
    %282 = vector.extract_strided_slice %280 {offsets = [0, 1263], sizes = [16, 17], strides = [1, 1]} : vector<16x1280xbf16> to vector<16x17xbf16>
    %283 = vector.extract_strided_slice %280 {offsets = [0, 0], sizes = [16, 1263], strides = [1, 1]} : vector<16x1280xbf16> to vector<16x1263xbf16>
    %284 = tpu.concatenate %282, %283 in 1 : vector<16x17xbf16>, vector<16x1263xbf16> -> vector<16x1280xbf16>
    %c0_145 = arith.constant 0 : index
    %c0_146 = arith.constant 0 : index
    %285 = vector.load %arg2[%c0_145, %c0_146] : memref<9x1280xf32, #tpu.memory_space<vmem>>, vector<1x1280xf32>
    %cst_147 = arith.constant 0.000000e+00 : f32
    %286 = vector.broadcast %cst_147 : f32 to vector<1x1280xf32>
    %287 = arith.cmpf one, %285, %286 : vector<1x1280xf32>
    %288 = vector.shape_cast %287 : vector<1x1280xi1> to vector<1x1280xi1>
    %289 = vector.broadcast %288 : vector<1x1280xi1> to vector<16x1280xi1>
    %290 = arith.select %289, %284, %281 : vector<16x1280xi1>, vector<16x1280xbf16>
    %c0_148 = arith.constant 0 : index
    %c0_149 = arith.constant 0 : index
    %291 = vector.load %arg10[%c0_148, %c0_149] : memref<144x1280xbf16, #tpu.memory_space<vmem>>, vector<16x1280xbf16>
    tpu.vector_store %arg10[%c0_148, %c0_149], %290 {strides = array<i32>} : memref<144x1280xbf16, #tpu.memory_space<vmem>>, vector<16x1280xbf16>,
    %292 = vector.extract_strided_slice %280 {offsets = [0, 1264], sizes = [16, 16], strides = [1, 1]} : vector<16x1280xbf16> to vector<16x16xbf16>
    %293 = vector.extract_strided_slice %280 {offsets = [0, 0], sizes = [16, 1264], strides = [1, 1]} : vector<16x1280xbf16> to vector<16x1264xbf16>
    %294 = tpu.concatenate %292, %293 in 1 : vector<16x16xbf16>, vector<16x1264xbf16> -> vector<16x1280xbf16>
    %c1_150 = arith.constant 1 : index
    %c0_151 = arith.constant 0 : index
    %295 = vector.load %arg2[%c1_150, %c0_151] : memref<9x1280xf32, #tpu.memory_space<vmem>>, vector<1x1280xf32>
    %cst_152 = arith.constant 0.000000e+00 : f32
    %296 = vector.broadcast %cst_152 : f32 to vector<1x1280xf32>
    %297 = arith.cmpf one, %295, %296 : vector<1x1280xf32>
    %298 = vector.shape_cast %297 : vector<1x1280xi1> to vector<1x1280xi1>
    %299 = vector.broadcast %298 : vector<1x1280xi1> to vector<16x1280xi1>
    %300 = arith.select %299, %294, %281 : vector<16x1280xi1>, vector<16x1280xbf16>
    %c16_153 = arith.constant 16 : index
    %c0_154 = arith.constant 0 : index
    %301 = vector.load %arg10[%c16_153, %c0_154] : memref<144x1280xbf16, #tpu.memory_space<vmem>>, vector<16x1280xbf16>
    tpu.vector_store %arg10[%c16_153, %c0_154], %300 {strides = array<i32>} : memref<144x1280xbf16, #tpu.memory_space<vmem>>, vector<16x1280xbf16>,
    %302 = vector.extract_strided_slice %280 {offsets = [0, 1265], sizes = [16, 15], strides = [1, 1]} : vector<16x1280xbf16> to vector<16x15xbf16>
    %303 = vector.extract_strided_slice %280 {offsets = [0, 0], sizes = [16, 1265], strides = [1, 1]} : vector<16x1280xbf16> to vector<16x1265xbf16>
    %304 = tpu.concatenate %302, %303 in 1 : vector<16x15xbf16>, vector<16x1265xbf16> -> vector<16x1280xbf16>
    %c2_155 = arith.constant 2 : index
    %c0_156 = arith.constant 0 : index
    %305 = vector.load %arg2[%c2_155, %c0_156] : memref<9x1280xf32, #tpu.memory_space<vmem>>, vector<1x1280xf32>
    %cst_157 = arith.constant 0.000000e+00 : f32
    %306 = vector.broadcast %cst_157 : f32 to vector<1x1280xf32>
    %307 = arith.cmpf one, %305, %306 : vector<1x1280xf32>
    %308 = vector.shape_cast %307 : vector<1x1280xi1> to vector<1x1280xi1>
    %309 = vector.broadcast %308 : vector<1x1280xi1> to vector<16x1280xi1>
    %310 = arith.select %309, %304, %281 : vector<16x1280xi1>, vector<16x1280xbf16>
    %c32_158 = arith.constant 32 : index
    %c0_159 = arith.constant 0 : index
    %311 = vector.load %arg10[%c32_158, %c0_159] : memref<144x1280xbf16, #tpu.memory_space<vmem>>, vector<16x1280xbf16>
    tpu.vector_store %arg10[%c32_158, %c0_159], %310 {strides = array<i32>} : memref<144x1280xbf16, #tpu.memory_space<vmem>>, vector<16x1280xbf16>,
    %312 = vector.extract_strided_slice %280 {offsets = [0, 1279], sizes = [16, 1], strides = [1, 1]} : vector<16x1280xbf16> to vector<16x1xbf16>
    %313 = vector.extract_strided_slice %280 {offsets = [0, 0], sizes = [16, 1279], strides = [1, 1]} : vector<16x1280xbf16> to vector<16x1279xbf16>
    %314 = tpu.concatenate %312, %313 in 1 : vector<16x1xbf16>, vector<16x1279xbf16> -> vector<16x1280xbf16>
    %c3_160 = arith.constant 3 : index
    %c0_161 = arith.constant 0 : index
    %315 = vector.load %arg2[%c3_160, %c0_161] : memref<9x1280xf32, #tpu.memory_space<vmem>>, vector<1x1280xf32>
    %cst_162 = arith.constant 0.000000e+00 : f32
    %316 = vector.broadcast %cst_162 : f32 to vector<1x1280xf32>
    %317 = arith.cmpf one, %315, %316 : vector<1x1280xf32>
    %318 = vector.shape_cast %317 : vector<1x1280xi1> to vector<1x1280xi1>
    %319 = vector.broadcast %318 : vector<1x1280xi1> to vector<16x1280xi1>
    %320 = arith.select %319, %314, %281 : vector<16x1280xi1>, vector<16x1280xbf16>
    %c48_163 = arith.constant 48 : index
    %c0_164 = arith.constant 0 : index
    %321 = vector.load %arg10[%c48_163, %c0_164] : memref<144x1280xbf16, #tpu.memory_space<vmem>>, vector<16x1280xbf16>
    tpu.vector_store %arg10[%c48_163, %c0_164], %320 {strides = array<i32>} : memref<144x1280xbf16, #tpu.memory_space<vmem>>, vector<16x1280xbf16>,
    %c64_165 = arith.constant 64 : index
    %c0_166 = arith.constant 0 : index
    %322 = vector.load %arg10[%c64_165, %c0_166] : memref<144x1280xbf16, #tpu.memory_space<vmem>>, vector<16x1280xbf16>
    tpu.vector_store %arg10[%c64_165, %c0_166], %280 {strides = array<i32>} : memref<144x1280xbf16, #tpu.memory_space<vmem>>, vector<16x1280xbf16>,
    %323 = vector.extract_strided_slice %280 {offsets = [0, 1], sizes = [16, 1279], strides = [1, 1]} : vector<16x1280xbf16> to vector<16x1279xbf16>
    %324 = vector.extract_strided_slice %280 {offsets = [0, 0], sizes = [16, 1], strides = [1, 1]} : vector<16x1280xbf16> to vector<16x1xbf16>
    %325 = tpu.concatenate %323, %324 in 1 : vector<16x1279xbf16>, vector<16x1xbf16> -> vector<16x1280xbf16>
    %c5_167 = arith.constant 5 : index
    %c0_168 = arith.constant 0 : index
    %326 = vector.load %arg2[%c5_167, %c0_168] : memref<9x1280xf32, #tpu.memory_space<vmem>>, vector<1x1280xf32>
    %cst_169 = arith.constant 0.000000e+00 : f32
    %327 = vector.broadcast %cst_169 : f32 to vector<1x1280xf32>
    %328 = arith.cmpf one, %326, %327 : vector<1x1280xf32>
    %329 = vector.shape_cast %328 : vector<1x1280xi1> to vector<1x1280xi1>
    %330 = vector.broadcast %329 : vector<1x1280xi1> to vector<16x1280xi1>
    %331 = arith.select %330, %325, %281 : vector<16x1280xi1>, vector<16x1280xbf16>
    %c80_170 = arith.constant 80 : index
    %c0_171 = arith.constant 0 : index
    %332 = vector.load %arg10[%c80_170, %c0_171] : memref<144x1280xbf16, #tpu.memory_space<vmem>>, vector<16x1280xbf16>
    tpu.vector_store %arg10[%c80_170, %c0_171], %331 {strides = array<i32>} : memref<144x1280xbf16, #tpu.memory_space<vmem>>, vector<16x1280xbf16>,
    %333 = vector.extract_strided_slice %280 {offsets = [0, 15], sizes = [16, 1265], strides = [1, 1]} : vector<16x1280xbf16> to vector<16x1265xbf16>
    %334 = vector.extract_strided_slice %280 {offsets = [0, 0], sizes = [16, 15], strides = [1, 1]} : vector<16x1280xbf16> to vector<16x15xbf16>
    %335 = tpu.concatenate %333, %334 in 1 : vector<16x1265xbf16>, vector<16x15xbf16> -> vector<16x1280xbf16>
    %c6_172 = arith.constant 6 : index
    %c0_173 = arith.constant 0 : index
    %336 = vector.load %arg2[%c6_172, %c0_173] : memref<9x1280xf32, #tpu.memory_space<vmem>>, vector<1x1280xf32>
    %cst_174 = arith.constant 0.000000e+00 : f32
    %337 = vector.broadcast %cst_174 : f32 to vector<1x1280xf32>
    %338 = arith.cmpf one, %336, %337 : vector<1x1280xf32>
    %339 = vector.shape_cast %338 : vector<1x1280xi1> to vector<1x1280xi1>
    %340 = vector.broadcast %339 : vector<1x1280xi1> to vector<16x1280xi1>
    %341 = arith.select %340, %335, %281 : vector<16x1280xi1>, vector<16x1280xbf16>
    %c96_175 = arith.constant 96 : index
    %c0_176 = arith.constant 0 : index
    %342 = vector.load %arg10[%c96_175, %c0_176] : memref<144x1280xbf16, #tpu.memory_space<vmem>>, vector<16x1280xbf16>
    tpu.vector_store %arg10[%c96_175, %c0_176], %341 {strides = array<i32>} : memref<144x1280xbf16, #tpu.memory_space<vmem>>, vector<16x1280xbf16>,
    %343 = vector.extract_strided_slice %280 {offsets = [0, 16], sizes = [16, 1264], strides = [1, 1]} : vector<16x1280xbf16> to vector<16x1264xbf16>
    %344 = vector.extract_strided_slice %280 {offsets = [0, 0], sizes = [16, 16], strides = [1, 1]} : vector<16x1280xbf16> to vector<16x16xbf16>
    %345 = tpu.concatenate %343, %344 in 1 : vector<16x1264xbf16>, vector<16x16xbf16> -> vector<16x1280xbf16>
    %c7_177 = arith.constant 7 : index
    %c0_178 = arith.constant 0 : index
    %346 = vector.load %arg2[%c7_177, %c0_178] : memref<9x1280xf32, #tpu.memory_space<vmem>>, vector<1x1280xf32>
    %cst_179 = arith.constant 0.000000e+00 : f32
    %347 = vector.broadcast %cst_179 : f32 to vector<1x1280xf32>
    %348 = arith.cmpf one, %346, %347 : vector<1x1280xf32>
    %349 = vector.shape_cast %348 : vector<1x1280xi1> to vector<1x1280xi1>
    %350 = vector.broadcast %349 : vector<1x1280xi1> to vector<16x1280xi1>
    %351 = arith.select %350, %345, %281 : vector<16x1280xi1>, vector<16x1280xbf16>
    %c112_180 = arith.constant 112 : index
    %c0_181 = arith.constant 0 : index
    %352 = vector.load %arg10[%c112_180, %c0_181] : memref<144x1280xbf16, #tpu.memory_space<vmem>>, vector<16x1280xbf16>
    tpu.vector_store %arg10[%c112_180, %c0_181], %351 {strides = array<i32>} : memref<144x1280xbf16, #tpu.memory_space<vmem>>, vector<16x1280xbf16>,
    %353 = vector.extract_strided_slice %280 {offsets = [0, 17], sizes = [16, 1263], strides = [1, 1]} : vector<16x1280xbf16> to vector<16x1263xbf16>
    %354 = vector.extract_strided_slice %280 {offsets = [0, 0], sizes = [16, 17], strides = [1, 1]} : vector<16x1280xbf16> to vector<16x17xbf16>
    %355 = tpu.concatenate %353, %354 in 1 : vector<16x1263xbf16>, vector<16x17xbf16> -> vector<16x1280xbf16>
    %c8_182 = arith.constant 8 : index
    %c0_183 = arith.constant 0 : index
    %356 = vector.load %arg2[%c8_182, %c0_183] : memref<9x1280xf32, #tpu.memory_space<vmem>>, vector<1x1280xf32>
    %cst_184 = arith.constant 0.000000e+00 : f32
    %357 = vector.broadcast %cst_184 : f32 to vector<1x1280xf32>
    %358 = arith.cmpf one, %356, %357 : vector<1x1280xf32>
    %359 = vector.shape_cast %358 : vector<1x1280xi1> to vector<1x1280xi1>
    %360 = vector.broadcast %359 : vector<1x1280xi1> to vector<16x1280xi1>
    %361 = arith.select %360, %355, %281 : vector<16x1280xi1>, vector<16x1280xbf16>
    %c128_185 = arith.constant 128 : index
    %c0_186 = arith.constant 0 : index
    %362 = vector.load %arg10[%c128_185, %c0_186] : memref<144x1280xbf16, #tpu.memory_space<vmem>>, vector<16x1280xbf16>
    tpu.vector_store %arg10[%c128_185, %c0_186], %361 {strides = array<i32>} : memref<144x1280xbf16, #tpu.memory_space<vmem>>, vector<16x1280xbf16>,
    %c3_187 = arith.constant 3 : index
    %c0_188 = arith.constant 0 : index
    %c0_189 = arith.constant 0 : index
    %363 = vector.load %arg3[%c3_187, %c0_188, %c0_189] : memref<5x16x144xbf16, #tpu.memory_space<vmem>>, vector<1x16x144xbf16>
    %364 = vector.shape_cast %363 : vector<1x16x144xbf16> to vector<16x144xbf16>
    %c0_190 = arith.constant 0 : index
    %c0_191 = arith.constant 0 : index
    %365 = vector.load %arg10[%c0_190, %c0_191] : memref<144x1280xbf16, #tpu.memory_space<vmem>>, vector<144x1280xbf16>
    %cst_192 = arith.constant dense<0.000000e+00> : vector<16x1280xf32>
    %366 = tpu.matmul %364, %365, %cst_192 {dimension_numbers = #tpu.dot_dimension_numbers<[1], [0], [0], [1], [0, 0, 1, 1], [], []>} : vector<16x144xbf16>, vector<144x1280xbf16>, vector<16x1280xf32> -> vector<16x1280xf32>
    %c3_193 = arith.constant 3 : index
    %c0_194 = arith.constant 0 : index
    %c0_195 = arith.constant 0 : index
    %367 = vector.load %arg4[%c3_193, %c0_194, %c0_195] : memref<5x16x1xf32, #tpu.memory_space<vmem>>, vector<1x16x1xf32>
    %368 = vector.shape_cast %367 : vector<1x16x1xf32> to vector<16x1xf32>
    %369 = vector.broadcast %368 : vector<16x1xf32> to vector<16x1280xf32>
    %370 = arith.addf %366, %369 : vector<16x1280xf32>
    %cst_196 = arith.constant 0.000000e+00 : f32
    %371 = vector.broadcast %cst_196 : f32 to vector<16x1280xf32>
    %372 = arith.maximumf %370, %371 : vector<16x1280xf32>
    %373 = arith.truncf %372 : vector<16x1280xf32> to vector<16x1280xbf16>
    %cst_197 = arith.constant 0.000000e+00 : bf16
    %374 = vector.broadcast %cst_197 : bf16 to vector<16x1280xbf16>
    %375 = vector.extract_strided_slice %373 {offsets = [0, 1263], sizes = [16, 17], strides = [1, 1]} : vector<16x1280xbf16> to vector<16x17xbf16>
    %376 = vector.extract_strided_slice %373 {offsets = [0, 0], sizes = [16, 1263], strides = [1, 1]} : vector<16x1280xbf16> to vector<16x1263xbf16>
    %377 = tpu.concatenate %375, %376 in 1 : vector<16x17xbf16>, vector<16x1263xbf16> -> vector<16x1280xbf16>
    %c0_198 = arith.constant 0 : index
    %c0_199 = arith.constant 0 : index
    %378 = vector.load %arg2[%c0_198, %c0_199] : memref<9x1280xf32, #tpu.memory_space<vmem>>, vector<1x1280xf32>
    %cst_200 = arith.constant 0.000000e+00 : f32
    %379 = vector.broadcast %cst_200 : f32 to vector<1x1280xf32>
    %380 = arith.cmpf one, %378, %379 : vector<1x1280xf32>
    %381 = vector.shape_cast %380 : vector<1x1280xi1> to vector<1x1280xi1>
    %382 = vector.broadcast %381 : vector<1x1280xi1> to vector<16x1280xi1>
    %383 = arith.select %382, %377, %374 : vector<16x1280xi1>, vector<16x1280xbf16>
    %c0_201 = arith.constant 0 : index
    %c0_202 = arith.constant 0 : index
    %384 = vector.load %arg10[%c0_201, %c0_202] : memref<144x1280xbf16, #tpu.memory_space<vmem>>, vector<16x1280xbf16>
    tpu.vector_store %arg10[%c0_201, %c0_202], %383 {strides = array<i32>} : memref<144x1280xbf16, #tpu.memory_space<vmem>>, vector<16x1280xbf16>,
    %385 = vector.extract_strided_slice %373 {offsets = [0, 1264], sizes = [16, 16], strides = [1, 1]} : vector<16x1280xbf16> to vector<16x16xbf16>
    %386 = vector.extract_strided_slice %373 {offsets = [0, 0], sizes = [16, 1264], strides = [1, 1]} : vector<16x1280xbf16> to vector<16x1264xbf16>
    %387 = tpu.concatenate %385, %386 in 1 : vector<16x16xbf16>, vector<16x1264xbf16> -> vector<16x1280xbf16>
    %c1_203 = arith.constant 1 : index
    %c0_204 = arith.constant 0 : index
    %388 = vector.load %arg2[%c1_203, %c0_204] : memref<9x1280xf32, #tpu.memory_space<vmem>>, vector<1x1280xf32>
    %cst_205 = arith.constant 0.000000e+00 : f32
    %389 = vector.broadcast %cst_205 : f32 to vector<1x1280xf32>
    %390 = arith.cmpf one, %388, %389 : vector<1x1280xf32>
    %391 = vector.shape_cast %390 : vector<1x1280xi1> to vector<1x1280xi1>
    %392 = vector.broadcast %391 : vector<1x1280xi1> to vector<16x1280xi1>
    %393 = arith.select %392, %387, %374 : vector<16x1280xi1>, vector<16x1280xbf16>
    %c16_206 = arith.constant 16 : index
    %c0_207 = arith.constant 0 : index
    %394 = vector.load %arg10[%c16_206, %c0_207] : memref<144x1280xbf16, #tpu.memory_space<vmem>>, vector<16x1280xbf16>
    tpu.vector_store %arg10[%c16_206, %c0_207], %393 {strides = array<i32>} : memref<144x1280xbf16, #tpu.memory_space<vmem>>, vector<16x1280xbf16>,
    %395 = vector.extract_strided_slice %373 {offsets = [0, 1265], sizes = [16, 15], strides = [1, 1]} : vector<16x1280xbf16> to vector<16x15xbf16>
    %396 = vector.extract_strided_slice %373 {offsets = [0, 0], sizes = [16, 1265], strides = [1, 1]} : vector<16x1280xbf16> to vector<16x1265xbf16>
    %397 = tpu.concatenate %395, %396 in 1 : vector<16x15xbf16>, vector<16x1265xbf16> -> vector<16x1280xbf16>
    %c2_208 = arith.constant 2 : index
    %c0_209 = arith.constant 0 : index
    %398 = vector.load %arg2[%c2_208, %c0_209] : memref<9x1280xf32, #tpu.memory_space<vmem>>, vector<1x1280xf32>
    %cst_210 = arith.constant 0.000000e+00 : f32
    %399 = vector.broadcast %cst_210 : f32 to vector<1x1280xf32>
    %400 = arith.cmpf one, %398, %399 : vector<1x1280xf32>
    %401 = vector.shape_cast %400 : vector<1x1280xi1> to vector<1x1280xi1>
    %402 = vector.broadcast %401 : vector<1x1280xi1> to vector<16x1280xi1>
    %403 = arith.select %402, %397, %374 : vector<16x1280xi1>, vector<16x1280xbf16>
    %c32_211 = arith.constant 32 : index
    %c0_212 = arith.constant 0 : index
    %404 = vector.load %arg10[%c32_211, %c0_212] : memref<144x1280xbf16, #tpu.memory_space<vmem>>, vector<16x1280xbf16>
    tpu.vector_store %arg10[%c32_211, %c0_212], %403 {strides = array<i32>} : memref<144x1280xbf16, #tpu.memory_space<vmem>>, vector<16x1280xbf16>,
    %405 = vector.extract_strided_slice %373 {offsets = [0, 1279], sizes = [16, 1], strides = [1, 1]} : vector<16x1280xbf16> to vector<16x1xbf16>
    %406 = vector.extract_strided_slice %373 {offsets = [0, 0], sizes = [16, 1279], strides = [1, 1]} : vector<16x1280xbf16> to vector<16x1279xbf16>
    %407 = tpu.concatenate %405, %406 in 1 : vector<16x1xbf16>, vector<16x1279xbf16> -> vector<16x1280xbf16>
    %c3_213 = arith.constant 3 : index
    %c0_214 = arith.constant 0 : index
    %408 = vector.load %arg2[%c3_213, %c0_214] : memref<9x1280xf32, #tpu.memory_space<vmem>>, vector<1x1280xf32>
    %cst_215 = arith.constant 0.000000e+00 : f32
    %409 = vector.broadcast %cst_215 : f32 to vector<1x1280xf32>
    %410 = arith.cmpf one, %408, %409 : vector<1x1280xf32>
    %411 = vector.shape_cast %410 : vector<1x1280xi1> to vector<1x1280xi1>
    %412 = vector.broadcast %411 : vector<1x1280xi1> to vector<16x1280xi1>
    %413 = arith.select %412, %407, %374 : vector<16x1280xi1>, vector<16x1280xbf16>
    %c48_216 = arith.constant 48 : index
    %c0_217 = arith.constant 0 : index
    %414 = vector.load %arg10[%c48_216, %c0_217] : memref<144x1280xbf16, #tpu.memory_space<vmem>>, vector<16x1280xbf16>
    tpu.vector_store %arg10[%c48_216, %c0_217], %413 {strides = array<i32>} : memref<144x1280xbf16, #tpu.memory_space<vmem>>, vector<16x1280xbf16>,
    %c64_218 = arith.constant 64 : index
    %c0_219 = arith.constant 0 : index
    %415 = vector.load %arg10[%c64_218, %c0_219] : memref<144x1280xbf16, #tpu.memory_space<vmem>>, vector<16x1280xbf16>
    tpu.vector_store %arg10[%c64_218, %c0_219], %373 {strides = array<i32>} : memref<144x1280xbf16, #tpu.memory_space<vmem>>, vector<16x1280xbf16>,
    %416 = vector.extract_strided_slice %373 {offsets = [0, 1], sizes = [16, 1279], strides = [1, 1]} : vector<16x1280xbf16> to vector<16x1279xbf16>
    %417 = vector.extract_strided_slice %373 {offsets = [0, 0], sizes = [16, 1], strides = [1, 1]} : vector<16x1280xbf16> to vector<16x1xbf16>
    %418 = tpu.concatenate %416, %417 in 1 : vector<16x1279xbf16>, vector<16x1xbf16> -> vector<16x1280xbf16>
    %c5_220 = arith.constant 5 : index
    %c0_221 = arith.constant 0 : index
    %419 = vector.load %arg2[%c5_220, %c0_221] : memref<9x1280xf32, #tpu.memory_space<vmem>>, vector<1x1280xf32>
    %cst_222 = arith.constant 0.000000e+00 : f32
    %420 = vector.broadcast %cst_222 : f32 to vector<1x1280xf32>
    %421 = arith.cmpf one, %419, %420 : vector<1x1280xf32>
    %422 = vector.shape_cast %421 : vector<1x1280xi1> to vector<1x1280xi1>
    %423 = vector.broadcast %422 : vector<1x1280xi1> to vector<16x1280xi1>
    %424 = arith.select %423, %418, %374 : vector<16x1280xi1>, vector<16x1280xbf16>
    %c80_223 = arith.constant 80 : index
    %c0_224 = arith.constant 0 : index
    %425 = vector.load %arg10[%c80_223, %c0_224] : memref<144x1280xbf16, #tpu.memory_space<vmem>>, vector<16x1280xbf16>
    tpu.vector_store %arg10[%c80_223, %c0_224], %424 {strides = array<i32>} : memref<144x1280xbf16, #tpu.memory_space<vmem>>, vector<16x1280xbf16>,
    %426 = vector.extract_strided_slice %373 {offsets = [0, 15], sizes = [16, 1265], strides = [1, 1]} : vector<16x1280xbf16> to vector<16x1265xbf16>
    %427 = vector.extract_strided_slice %373 {offsets = [0, 0], sizes = [16, 15], strides = [1, 1]} : vector<16x1280xbf16> to vector<16x15xbf16>
    %428 = tpu.concatenate %426, %427 in 1 : vector<16x1265xbf16>, vector<16x15xbf16> -> vector<16x1280xbf16>
    %c6_225 = arith.constant 6 : index
    %c0_226 = arith.constant 0 : index
    %429 = vector.load %arg2[%c6_225, %c0_226] : memref<9x1280xf32, #tpu.memory_space<vmem>>, vector<1x1280xf32>
    %cst_227 = arith.constant 0.000000e+00 : f32
    %430 = vector.broadcast %cst_227 : f32 to vector<1x1280xf32>
    %431 = arith.cmpf one, %429, %430 : vector<1x1280xf32>
    %432 = vector.shape_cast %431 : vector<1x1280xi1> to vector<1x1280xi1>
    %433 = vector.broadcast %432 : vector<1x1280xi1> to vector<16x1280xi1>
    %434 = arith.select %433, %428, %374 : vector<16x1280xi1>, vector<16x1280xbf16>
    %c96_228 = arith.constant 96 : index
    %c0_229 = arith.constant 0 : index
    %435 = vector.load %arg10[%c96_228, %c0_229] : memref<144x1280xbf16, #tpu.memory_space<vmem>>, vector<16x1280xbf16>
    tpu.vector_store %arg10[%c96_228, %c0_229], %434 {strides = array<i32>} : memref<144x1280xbf16, #tpu.memory_space<vmem>>, vector<16x1280xbf16>,
    %436 = vector.extract_strided_slice %373 {offsets = [0, 16], sizes = [16, 1264], strides = [1, 1]} : vector<16x1280xbf16> to vector<16x1264xbf16>
    %437 = vector.extract_strided_slice %373 {offsets = [0, 0], sizes = [16, 16], strides = [1, 1]} : vector<16x1280xbf16> to vector<16x16xbf16>
    %438 = tpu.concatenate %436, %437 in 1 : vector<16x1264xbf16>, vector<16x16xbf16> -> vector<16x1280xbf16>
    %c7_230 = arith.constant 7 : index
    %c0_231 = arith.constant 0 : index
    %439 = vector.load %arg2[%c7_230, %c0_231] : memref<9x1280xf32, #tpu.memory_space<vmem>>, vector<1x1280xf32>
    %cst_232 = arith.constant 0.000000e+00 : f32
    %440 = vector.broadcast %cst_232 : f32 to vector<1x1280xf32>
    %441 = arith.cmpf one, %439, %440 : vector<1x1280xf32>
    %442 = vector.shape_cast %441 : vector<1x1280xi1> to vector<1x1280xi1>
    %443 = vector.broadcast %442 : vector<1x1280xi1> to vector<16x1280xi1>
    %444 = arith.select %443, %438, %374 : vector<16x1280xi1>, vector<16x1280xbf16>
    %c112_233 = arith.constant 112 : index
    %c0_234 = arith.constant 0 : index
    %445 = vector.load %arg10[%c112_233, %c0_234] : memref<144x1280xbf16, #tpu.memory_space<vmem>>, vector<16x1280xbf16>
    tpu.vector_store %arg10[%c112_233, %c0_234], %444 {strides = array<i32>} : memref<144x1280xbf16, #tpu.memory_space<vmem>>, vector<16x1280xbf16>,
    %446 = vector.extract_strided_slice %373 {offsets = [0, 17], sizes = [16, 1263], strides = [1, 1]} : vector<16x1280xbf16> to vector<16x1263xbf16>
    %447 = vector.extract_strided_slice %373 {offsets = [0, 0], sizes = [16, 17], strides = [1, 1]} : vector<16x1280xbf16> to vector<16x17xbf16>
    %448 = tpu.concatenate %446, %447 in 1 : vector<16x1263xbf16>, vector<16x17xbf16> -> vector<16x1280xbf16>
    %c8_235 = arith.constant 8 : index
    %c0_236 = arith.constant 0 : index
    %449 = vector.load %arg2[%c8_235, %c0_236] : memref<9x1280xf32, #tpu.memory_space<vmem>>, vector<1x1280xf32>
    %cst_237 = arith.constant 0.000000e+00 : f32
    %450 = vector.broadcast %cst_237 : f32 to vector<1x1280xf32>
    %451 = arith.cmpf one, %449, %450 : vector<1x1280xf32>
    %452 = vector.shape_cast %451 : vector<1x1280xi1> to vector<1x1280xi1>
    %453 = vector.broadcast %452 : vector<1x1280xi1> to vector<16x1280xi1>
    %454 = arith.select %453, %448, %374 : vector<16x1280xi1>, vector<16x1280xbf16>
    %c128_238 = arith.constant 128 : index
    %c0_239 = arith.constant 0 : index
    %455 = vector.load %arg10[%c128_238, %c0_239] : memref<144x1280xbf16, #tpu.memory_space<vmem>>, vector<16x1280xbf16>
    tpu.vector_store %arg10[%c128_238, %c0_239], %454 {strides = array<i32>} : memref<144x1280xbf16, #tpu.memory_space<vmem>>, vector<16x1280xbf16>,
    %c4 = arith.constant 4 : index
    %c0_240 = arith.constant 0 : index
    %c0_241 = arith.constant 0 : index
    %456 = vector.load %arg3[%c4, %c0_240, %c0_241] : memref<5x16x144xbf16, #tpu.memory_space<vmem>>, vector<1x16x144xbf16>
    %457 = vector.shape_cast %456 : vector<1x16x144xbf16> to vector<16x144xbf16>
    %c0_242 = arith.constant 0 : index
    %c0_243 = arith.constant 0 : index
    %458 = vector.load %arg10[%c0_242, %c0_243] : memref<144x1280xbf16, #tpu.memory_space<vmem>>, vector<144x1280xbf16>
    %cst_244 = arith.constant dense<0.000000e+00> : vector<16x1280xf32>
    %459 = tpu.matmul %457, %458, %cst_244 {dimension_numbers = #tpu.dot_dimension_numbers<[1], [0], [0], [1], [0, 0, 1, 1], [], []>} : vector<16x144xbf16>, vector<144x1280xbf16>, vector<16x1280xf32> -> vector<16x1280xf32>
    %c4_245 = arith.constant 4 : index
    %c0_246 = arith.constant 0 : index
    %c0_247 = arith.constant 0 : index
    %460 = vector.load %arg4[%c4_245, %c0_246, %c0_247] : memref<5x16x1xf32, #tpu.memory_space<vmem>>, vector<1x16x1xf32>
    %461 = vector.shape_cast %460 : vector<1x16x1xf32> to vector<16x1xf32>
    %462 = vector.broadcast %461 : vector<16x1xf32> to vector<16x1280xf32>
    %463 = arith.addf %459, %462 : vector<16x1280xf32>
    %464 = arith.addf %463, %279 : vector<16x1280xf32>
    %cst_248 = arith.constant 0.000000e+00 : f32
    %465 = vector.broadcast %cst_248 : f32 to vector<16x1280xf32>
    %466 = arith.maximumf %464, %465 : vector<16x1280xf32>
    %467 = vector.extract_strided_slice %466 {offsets = [0, 0], sizes = [16, 256], strides = [1, 1]} : vector<16x1280xf32> to vector<16x256xf32>
    %cst_249 = arith.constant dense<0.000000e+00> : vector<16xf32>
    %468 = vector.multi_reduction <add>, %467, %cst_249 [1] : vector<16x256xf32> to vector<16xf32>
    %469 = vector.shape_cast %468 : vector<16xf32> to vector<16x1xf32>
    %470 = vector.extract_strided_slice %466 {offsets = [0, 256], sizes = [16, 256], strides = [1, 1]} : vector<16x1280xf32> to vector<16x256xf32>
    %cst_250 = arith.constant dense<0.000000e+00> : vector<16xf32>
    %471 = vector.multi_reduction <add>, %470, %cst_250 [1] : vector<16x256xf32> to vector<16xf32>
    %472 = vector.shape_cast %471 : vector<16xf32> to vector<16x1xf32>
    %473 = vector.extract_strided_slice %466 {offsets = [0, 512], sizes = [16, 256], strides = [1, 1]} : vector<16x1280xf32> to vector<16x256xf32>
    %cst_251 = arith.constant dense<0.000000e+00> : vector<16xf32>
    %474 = vector.multi_reduction <add>, %473, %cst_251 [1] : vector<16x256xf32> to vector<16xf32>
    %475 = vector.shape_cast %474 : vector<16xf32> to vector<16x1xf32>
    %476 = vector.extract_strided_slice %466 {offsets = [0, 768], sizes = [16, 256], strides = [1, 1]} : vector<16x1280xf32> to vector<16x256xf32>
    %cst_252 = arith.constant dense<0.000000e+00> : vector<16xf32>
    %477 = vector.multi_reduction <add>, %476, %cst_252 [1] : vector<16x256xf32> to vector<16xf32>
    %478 = vector.shape_cast %477 : vector<16xf32> to vector<16x1xf32>
    %479 = vector.extract_strided_slice %466 {offsets = [0, 1024], sizes = [16, 256], strides = [1, 1]} : vector<16x1280xf32> to vector<16x256xf32>
    %cst_253 = arith.constant dense<0.000000e+00> : vector<16xf32>
    %480 = vector.multi_reduction <add>, %479, %cst_253 [1] : vector<16x256xf32> to vector<16xf32>
    %481 = vector.shape_cast %480 : vector<16xf32> to vector<16x1xf32>
    %482 = tpu.concatenate %469, %472, %475, %478, %481 in 1 : vector<16x1xf32>, vector<16x1xf32>, vector<16x1xf32>, vector<16x1xf32>, vector<16x1xf32> -> vector<16x5xf32>
    %cst_254 = arith.constant 3.906250e-03 : f32
    %483 = vector.broadcast %cst_254 : f32 to vector<16x5xf32>
    %484 = arith.mulf %482, %483 : vector<16x5xf32>
    %c0_255 = arith.constant 0 : index
    %c0_256 = arith.constant 0 : index
    %485 = vector.load %arg5[%c0_255, %c0_256] : memref<16x16xf32, #tpu.memory_space<vmem>>, vector<16x16xf32>
    %cst_257 = arith.constant dense<0.000000e+00> : vector<16x5xf32>
    %486 = tpu.matmul %485, %484, %cst_257 {dimension_numbers = #tpu.dot_dimension_numbers<[1], [0], [0], [1], [0, 0, 1, 1], [], []>} : vector<16x16xf32>, vector<16x5xf32>, vector<16x5xf32> -> vector<16x5xf32>
    %c0_258 = arith.constant 0 : index
    %c0_259 = arith.constant 0 : index
    %487 = vector.load %arg6[%c0_258, %c0_259] : memref<16x1xf32, #tpu.memory_space<vmem>>, vector<16x1xf32>
    %488 = vector.broadcast %487 : vector<16x1xf32> to vector<16x5xf32>
    %489 = arith.addf %486, %488 : vector<16x5xf32>
    %490 = math.tanh %489 : vector<16x5xf32>
    %c0_260 = arith.constant 0 : index
    %c0_261 = arith.constant 0 : index
    %491 = vector.load %arg7[%c0_260, %c0_261] : memref<32x16xf32, #tpu.memory_space<vmem>>, vector<32x16xf32>
    %cst_262 = arith.constant dense<0.000000e+00> : vector<32x5xf32>
    %492 = tpu.matmul %491, %490, %cst_262 {dimension_numbers = #tpu.dot_dimension_numbers<[1], [0], [0], [1], [0, 0, 1, 1], [], []>} : vector<32x16xf32>, vector<16x5xf32>, vector<32x5xf32> -> vector<32x5xf32>
    %c0_263 = arith.constant 0 : index
    %c0_264 = arith.constant 0 : index
    %493 = vector.load %arg8[%c0_263, %c0_264] : memref<32x1xf32, #tpu.memory_space<vmem>>, vector<32x1xf32>
    %494 = vector.broadcast %493 : vector<32x1xf32> to vector<32x5xf32>
    %495 = arith.addf %492, %494 : vector<32x5xf32>
    %496 = math.tanh %495 : vector<32x5xf32>
    %c0_265 = arith.constant 0 : index
    %c0_266 = arith.constant 0 : index
    %c0_267 = arith.constant 0 : index
    %497 = vector.load %arg9[%c0_265, %c0_266, %c0_267] : memref<1x32x5xf32, #tpu.memory_space<vmem>>, vector<1x32x5xf32>
    %498 = vector.shape_cast %497 : vector<1x32x5xf32> to vector<32x5xf32>
    %499 = vector.shape_cast %496 : vector<32x5xf32> to vector<1x32x5xf32>
    tpu.vector_store %arg9[%c0_265, %c0_266, %c0_267], %499 {strides = array<i32>} : memref<1x32x5xf32, #tpu.memory_space<vmem>>, vector<1x32x5xf32>,
    return
  }
  func.func @transform_0(%arg0: i32) -> (i32, i32) {
    %c0_i32 = arith.constant 0 : i32
    %c0_i32_0 = arith.constant 0 : i32
    return %c0_i32, %arg0 : i32, i32
  }
  func.func @transform_1(%arg0: i32) -> (i32, i32) {
    %c0_i32 = arith.constant 0 : i32
    %c0_i32_0 = arith.constant 0 : i32
    %c0_i32_1 = arith.constant 0 : i32
    return %c0_i32, %c0_i32_0 : i32, i32
  }
  func.func @transform_2(%arg0: i32) -> (i32, i32, i32) {
    %c0_i32 = arith.constant 0 : i32
    %c0_i32_0 = arith.constant 0 : i32
    %c0_i32_1 = arith.constant 0 : i32
    %c0_i32_2 = arith.constant 0 : i32
    return %c0_i32, %c0_i32_0, %c0_i32_1 : i32, i32, i32
  }
  func.func @transform_3(%arg0: i32) -> (i32, i32, i32) {
    %c0_i32 = arith.constant 0 : i32
    %c0_i32_0 = arith.constant 0 : i32
    %c0_i32_1 = arith.constant 0 : i32
    %c0_i32_2 = arith.constant 0 : i32
    return %c0_i32, %c0_i32_0, %c0_i32_1 : i32, i32, i32
  }
  func.func @transform_4(%arg0: i32) -> (i32, i32) {
    %c0_i32 = arith.constant 0 : i32
    %c0_i32_0 = arith.constant 0 : i32
    %c0_i32_1 = arith.constant 0 : i32
    return %c0_i32, %c0_i32_0 : i32, i32
  }
  func.func @transform_5(%arg0: i32) -> (i32, i32) {
    %c0_i32 = arith.constant 0 : i32
    %c0_i32_0 = arith.constant 0 : i32
    %c0_i32_1 = arith.constant 0 : i32
    return %c0_i32, %c0_i32_0 : i32, i32
  }
  func.func @transform_6(%arg0: i32) -> (i32, i32) {
    %c0_i32 = arith.constant 0 : i32
    %c0_i32_0 = arith.constant 0 : i32
    %c0_i32_1 = arith.constant 0 : i32
    return %c0_i32, %c0_i32_0 : i32, i32
  }
  func.func @transform_7(%arg0: i32) -> (i32, i32) {
    %c0_i32 = arith.constant 0 : i32
    %c0_i32_0 = arith.constant 0 : i32
    %c0_i32_1 = arith.constant 0 : i32
    return %c0_i32, %c0_i32_0 : i32, i32
  }
  func.func @transform_8(%arg0: i32) -> (i32, i32, i32) {
    %c0_i32 = arith.constant 0 : i32
    %c0_i32_0 = arith.constant 0 : i32
    %c0_i32_1 = arith.constant 0 : i32
    return %arg0, %c0_i32, %c0_i32_0 : i32, i32, i32
  }
}

</mosaic_0001>

<bundles_post_ra>
// kernel: rel_resnet_forward.1
= control target key start
LH: loop header
LB: loop body
LE: loop exit
PB: predicated region body
PF: predicated region fallthrough
CT: control target
= control target key end

     0   :  { %s10503_s27 = smov 0   ;;  %s10505_s28 = smov 0   ;;  %s19505_s0 = inlined_call_operand.vmem [shape: bf16[16,2560], index: 0, kind: input, shape index: {}]   ;;  %s19506_s1 = inlined_call_operand.vmem [shape: f32[9,1280], index: 1, kind: input, shape index: {}]   ;;  %s19507_s2 = inlined_call_operand.vmem [shape: bf16[5,16,144], index: 2, kind: input, shape index: {}]   ;;  %s19508_s3 = inlined_call_operand.vmem [shape: f32[5,16,1], index: 3, kind: input, shape index: {}]   ;;  %s19509_s4 = inlined_call_operand.vmem [shape: f32[16,16], index: 4, kind: input, shape index: {}]   ;;  %s19510_s5 = inlined_call_operand.vmem [shape: f32[16,1], index: 5, kind: input, shape index: {}]   ;;  %s19511_s6 = inlined_call_operand.vmem [shape: f32[32,16], index: 6, kind: input, shape index: {}]   ;;  %s19512_s7 = inlined_call_operand.vmem [shape: f32[32,1], index: 7, kind: input, shape index: {}]   ;;  %s19513_s8 = inlined_call_operand.vmem [shape: f32[2,32,5], index: 8, kind: output, shape index: {}]  }
   0x1   :  { %s10507_s29 = smov 0  }
   0x2 LB: > { %s9907_s30 = sadd.s32 4294967295, %s10447_s29   ;;  %s10520_s9 = sadd.s32 1, %s10447_s29   ;;  %s10447_s29 = sphi %s10507_s29, %s21526_s29   ;;  %s10443_s28 = sphi %s10505_s28, %s21525_s28   ;;  %s10439_s27 = sphi %s10503_s27, %s21524_s27  }
   0x3   : > { %s22_s10 = ssub.s32 %s10447_s29, %s10520_s9  ;;  %s25_s11 = sadd.s32 1, %s10443_s28 }
   0x4   : > { %p23_p0 = scmp.eq.s32.totalorder %s22_s10, 0  ;;  %p32_p1 = scmp.ne.s32.totalorder %s10443_s28, %s10439_s27 }
   0x5   : > { %p33_p2 = scmp.eq.s32.totalorder %s10447_s29, 0  ;;  %p9910_p4 = scmp.ge.s32.totalorder %s10447_s29, 2 }
   0x6   : > { %s10529_s12 = scalar_select %p23_p0, %s10443_s28, %s25_s11  }
   0x7   : > { %p34_p3 = por %p33_p2, %p32_p1  ;;  %252 = sbr.rel (%p9910_p4) target bundleno = 24 (0x18), region = 44 }
   0xe   : > { %255 = sbr.rel (!%p34_p3) target bundleno = 24 (0x18), region = 48  ;;  %s257_s13 = sand.u32 (%p34_p3), 1, %s10443_s28  }
   0xf   : > { %s10094_s14 = smul.u32 (%p34_p3), 40, %s10447_s29 }
  0x10   : > { %s10331_s15 = smul.u32 (%p34_p3), 80, %s257_s13 }
  0x11   : > { %s262_s18 = scalar_lea.vmem (%p34_p3), %s19505_s0, %s10094_s14 }
  0x12   : > { %v275_v0 = vld [vmem:[%s262_s18] sm:$0xff] (%p34_p3)  ;;  %v277_v1 = vld [vmem:[%s262_s18 + $0x8] sm:$0xff] (%p34_p3)  ;;  %v279_v2 = vld [vmem:[%s262_s18 + $0x10] sm:$0xff] (%p34_p3)  ;;  %s259_s19 = scalar_lea.vmem (%p34_p3), [#allocation3], %s10331_s15 }
  0x13   : > { %276 = vst [vmem:[%s259_s19] sm:$0xff] (%p34_p3), %v275_v0  ;;  %278 = vst [vmem:[%s259_s19 + $0x8] sm:$0xff] (%p34_p3), %v277_v1  ;;  %v281_v3 = vld [vmem:[%s262_s18 + $0x18] sm:$0xff] (%p34_p3)  ;;  %v283_v4 = vld [vmem:[%s262_s18 + $0x20] sm:$0xff] (%p34_p3) }
  0x14   : > { %280 = vst [vmem:[%s259_s19 + $0x10] sm:$0xff] (%p34_p3), %v279_v2  ;;  %v285_v5 = vld [vmem:[%s262_s18 + $0x50] sm:$0xff] (%p34_p3)  ;;  %282 = vst [vmem:[%s259_s19 + $0x18] sm:$0xff] (%p34_p3), %v281_v3  ;;  %v287_v6 = vld [vmem:[%s262_s18 + $0x58] sm:$0xff] (%p34_p3) }
  0x15   : > { %284 = vst [vmem:[%s259_s19 + $0x20] sm:$0xff] %v283_v4  ;;  %286 = vst [vmem:[%s259_s19 + $0x28] sm:$0xff] %v285_v5  ;;  %v289_v7 = vld [vmem:[%s262_s18 + $0x60] sm:$0xff]  ;;  %v291_v8 = vld [vmem:[%s262_s18 + $0x68] sm:$0xff] }
  0x16   : > { %288 = vst [vmem:[%s259_s19 + $0x30] sm:$0xff] %v287_v6  ;;  %290 = vst [vmem:[%s259_s19 + $0x38] sm:$0xff] %v289_v7  ;;  %v293_v9 = vld [vmem:[%s262_s18 + $0x70] sm:$0xff] }
  0x17   : > { %292 = vst [vmem:[%s259_s19 + $0x40] sm:$0xff] %v291_v8  ;;  %294 = vst [vmem:[%s259_s19 + $0x48] sm:$0xff] %v293_v9 }
  0x18 PF: > { %p9912_p5 = scmp.ge.s32.totalorder %s10447_s29, 1  ;;  %p299_p6 = scmp.lt.s32.totalorder %s10447_s29, 3 }
  0x1a   : > { %p300_p7 = pnand %p9912_p5, %p299_p6 }
  0x1c   : > { %303 = sbr.rel (%p300_p7) target bundleno = 3134 (0xc3e), region = 71 }
  0x23   : > { %s306_s20 = sand.u32 1, %s10439_s27   ;;  %v19516_v10 = vmov 0   ;;  %s10450_s23 = smov 17   ;;  %v10599_v15 = vld [vmem:[%s19507_s2 + $0x4] ss:$8 sps:$4 sm:$0xff]   ;;  %vm19530_vm0 = vcmask 130048   ;;  %v451_v22 = vlaneseq }
  0x24   : > { %s10332_s21 = smul.u32 80, %s306_s20  ;;  %10367 = vset.pattern.permute.xlu1 %v19516_v10  ;;  %10366 = vset.pattern.permute.xlu0 %v19516_v10  ;;  %s10451_s24 = smov 16   ;;  %v442_v20 = vld [vmem:[%s19506_s1] ss:$8 sm:$0xf]  ;;  %vm19690_vm11 = vcmask 138240  }
  0x25   : > { %s10452_s25 = smov 15   ;;  %s10453_s26 = smov 1   ;;  %9949 = vmatprep.mubr.msk.bf16.mxu0 %vm19530_vm0, %v10599_v15  ;;  %9950 = vmatprep.mubr.msk.bf16.mxu1 %vm19530_vm0, %v10599_v15  ;;  %v443_v21 = vld [vmem:[%s19506_s1] ss:$8 sm:$0xf0]  ;;  %v10686_v27 = vshrl.u32 %v451_v22, 7 }
  0x26   : > { %s10542_s22 = scalar_lea.vmem [#allocation3], %s10332_s21  ;;  %s10454_s27 = smov 127   ;;  %v444_v23 = vor.u32 %v443_v21, %v442_v20  ;;  %v9926_v24 = vld [vmem:[%s19506_s1 + $0x1] ss:$8 sm:$0xf] }
  0x27   : > { %v10545_v11 = vld [vmem:[%s10542_s22 + $0x24] ss:$40 sps:$4 sm:$0xff]   ;;  %v10553_v13 = vld [vmem:[%s10542_s22] ss:$40 sps:$4 sm:$0xff]   ;;  %s10455_s10 = smov 113   ;;  %s10456_s11 = smov 112  }
  0x28   : > { %v10548_v12 = vld [vmem:[%s10542_s22 + $0x4] ss:$40 sps:$4 sm:$0xff]   ;;  %363 = vrot.lane.b32.xlu0 %v10545_v11, %s10450_s23  ;;  %v10580_v14 = vld [vmem:[%s10542_s22 + $0x8] ss:$40 sps:$4 sm:$0xff]   ;;  %s10457_s15 = smov 111   ;;  %vm447_vm1 = vcmp.ne.f32.partialorder %v444_v23, 0.0 }
  0x29   : > { %402 = vrot.lane.b32.xlu1 %v10548_v12, %s10450_s23  ;;  %v10612_v16 = vld [vmem:[%s10542_s22 + $0xc] ss:$40 sps:$4 sm:$0xff]   ;;  %v10617_v17 = vld [vmem:[%s10542_s22 + $0x10] ss:$40 sps:$4 sm:$0xff]   ;;  %v10684_v26 = vld [vmem:[%s10542_s22 + $0x1c] ss:$40 sps:$4 sm:$0xff]  }
  0x2a   : > { %v10622_v18 = vld [vmem:[%s10542_s22 + $0x14] ss:$40 sps:$4 sm:$0xff]   ;;  %v10649_v19 = vld [vmem:[%s10542_s22 + $0x18] ss:$40 sps:$4 sm:$0xff]   ;;  %v10696_v30 = vsub.s32 0, %v10686_v27  ;;  %v10699_v31 = vsub.s32 1, %v10686_v27 }
  0x2b   : > { %v9927_v25 = vld [vmem:[%s19506_s1 + $0x1] ss:$8 sm:$0xf0]  ;;  %v10704_v32 = vsel %vm447_vm1, 1, %v19516_v10  ;;  %v10750_v46 = vsub.s32 4, %v10686_v27  ;;  %p340_p8 = scmp.lt.s32.totalorder %s9907_s30, 1 }
  0x2c   : > { %400 = vrot.lane.b32.xlu0 %v10553_v13, %s10450_s23  ;;  %v10691_v28 = vld [vmem:[%s10542_s22 + $0x20] ss:$40 sps:$4 sm:$0xff]   ;;  %v628_v29 = vor.u32 %v9927_v25, %v9926_v24  ;;  %19691 = vst [vmem:[#allocation4_spill] sm:$0xff] %v10699_v31  ;;  %v454_v35 = vrot.slane %v10704_v32, %v10696_v30  ;;  %v458_v36 = vrot.slane %v10704_v32, %v10699_v31  ;;  %v9935_v49 = vld [vmem:[%s19506_s1 + $0x5] ss:$8 sm:$0xf] }
  0x2d   : > { %581 = vrot.lane.b32.xlu1 %v10545_v11, %s10451_s24  ;;  %v9929_v33 = vld [vmem:[%s19506_s1 + $0x2] ss:$8 sm:$0xf]  ;;  %v9932_v39 = vld [vmem:[%s19506_s1 + $0x3] ss:$8 sm:$0xf] }
  0x2e   : > { %vm631_vm2 = vcmp.ne.f32.partialorder %v628_v29, 0.0  ;;  %v9930_v34 = vld [vmem:[%s19506_s1 + $0x2] ss:$8 sm:$0xf0]  ;;  %vm491_vm3 = vcmp.eq.s32.totalorder %v454_v35, 1  ;;  %vm492_vm4 = vcmp.eq.s32.totalorder %v458_v36, 1 }
  0x2f   : > { %v10721_v37 = vsel %vm631_vm2, 1, %v19516_v10  ;;  %v812_v38 = vor.u32 %v9930_v34, %v9929_v33  ;;  %v9933_v40 = vld [vmem:[%s19506_s1 + $0x3] ss:$8 sm:$0xf0]  ;;  %vm501_vm6 = vmpackc.low %vm492_vm4, %vm491_vm3  ;;  %s21528_s30 = smov (!%p340_p8, %s9907_s30), 1 }
  0x30   : > { %583 = vrot.lane.b32.xlu0 %v10553_v13, %s10451_s24  ;;  %v638_v41 = vrot.slane %v10721_v37, %v10696_v30  ;;  %v642_v42 = vrot.slane %v10721_v37, %v10699_v31  ;;  %v996_v43 = vor.u32 %v9933_v40, %v9932_v39  ;;  %v506_v48 = vsel %vm501_vm6, 65537, %v19516_v10  ;;  %v9936_v50 = vld [vmem:[%s19506_s1 + $0x5] ss:$8 sm:$0xf0]  ;;  %s10095_s21 = sshll.u32 %s21528_s30, 5 }
  0x31   : > { %585 = vrot.lane.b32.xlu1 %v10548_v12, %s10451_s24  ;;  %vm815_vm5 = vcmp.ne.f32.partialorder %v812_v38, 0.0  ;;  %v518_v53 = vrot.slane %v506_v48, %v10750_v46  ;;  %v514_v54 = vrot.slane %v506_v48, %v10696_v30  ;;  %v1200_v58 = vor.u32 %v9936_v50, %v9935_v49  ;;  %v9938_v60 = vld [vmem:[%s19506_s1 + $0x6] ss:$8 sm:$0xf] }
  0x32   : > { %vm10739_vm7 = vcmp.eq.s32.totalorder %v638_v41, 1  ;;  %vm10743_vm8 = vcmp.eq.s32.totalorder %v642_v42, 1  ;;  %v10753_v47 = vsel %vm815_vm5, 1, %v19516_v10  ;;  %vm999_vm9 = vcmp.ne.f32.partialorder %v996_v43, 0.0 }
  0x33   : > { %vm685_vm10 = vmpackc.low %vm10743_vm8, %vm10739_vm7  ;;  %v822_v51 = vrot.slane %v10753_v47, %v10696_v30  ;;  %v826_v52 = vrot.slane %v10753_v47, %v10699_v31  ;;  %v10777_v55 = vsel %vm999_vm9, 1, %v19516_v10  ;;  %v9939_v61 = vld [vmem:[%s19506_s1 + $0x6] ss:$8 sm:$0xf0]  ;;  %vm552_vm14 = vcmp.ne.s16.totalorder %v518_v53, 0 }
  0x34   : > { %765 = vrot.lane.b32.xlu0 %v10545_v11, %s10452_s25  ;;  %v690_v57 = vsel %vm685_vm10, 65537, %v19516_v10  ;;  %v1006_v0 = vrot.slane %v10777_v55, %v10696_v30  ;;  %v1010_v1 = vrot.slane %v10777_v55, %v10699_v31  ;;  %vm10806_vm15 = vcmp.ne.s16.totalorder %v514_v54, 0  ;;  %v9941_v35 = vld [vmem:[%s19506_s1 + $0x7] ss:$8 sm:$0xf] }
  0x35   : > { %767 = vrot.lane.b32.xlu1 %v10553_v13, %s10452_s25  ;;  %vm10792_vm12 = vcmp.eq.s32.totalorder %v822_v51, 1  ;;  %vm10796_vm13 = vcmp.eq.s32.totalorder %v826_v52, 1  ;;  %v698_v3 = vrot.slane %v690_v57, %v10696_v30  ;;  %v702_v5 = vrot.slane %v690_v57, %v10750_v46  ;;  %v9942_v36 = vld [vmem:[%s19506_s1 + $0x7] ss:$8 sm:$0xf0] }
  0x36   : > { %vm1203_vm1 = vcmp.ne.f32.partialorder %v1200_v58, 0.0  ;;  %v1384_v6 = vor.u32 %v9939_v61, %v9938_v60  ;;  %vm869_vm2 = vmpackc.low %vm10796_vm13, %vm10792_vm12  ;;  %vm10826_vm3 = vcmp.eq.s32.totalorder %v1006_v0, 1  ;;  %vm10830_vm4 = vcmp.eq.s32.totalorder %v1010_v1, 1  ;;  %v9944_v51 = vld [vmem:[%s19506_s1 + $0x50] ss:$8 sm:$0xf] }
  0x37   : > { %vm10836_vm5 = vcmp.ne.s16.totalorder %v698_v3, 0  ;;  %v10841_v24 = vsel %vm1203_vm1, 1, %v19516_v10  ;;  %vm736_vm6 = vcmp.ne.s16.totalorder %v702_v5, 0  ;;  %v874_v29 = vsel %vm869_vm2, 65537, %v19516_v10  ;;  %vm1053_vm8 = vmpackc.low %vm10830_vm4, %vm10826_vm3 }
  0x38   : > { %769 = vrot.lane.b32.xlu0 %v10548_v12, %s10452_s25  ;;  %vm1387_vm7 = vcmp.ne.f32.partialorder %v1384_v6, 0.0  ;;  %v1210_v40 = vrot.slane %v10841_v24, %v10696_v30  ;;  %v1214_v41 = vrot.slane %v10841_v24, %v10699_v31  ;;  %v886_v42 = vrot.slane %v874_v29, %v10750_v46  ;;  %v9945_v52 = vld [vmem:[%s19506_s1 + $0x50] ss:$8 sm:$0xf0] }
  0x39   : > { %949 = vrot.lane.b32.xlu1 %v10545_v11, %s10453_s26  ;;  %v882_v43 = vrot.slane %v874_v29, %v10696_v30  ;;  %v10873_v44 = vsel %vm1387_vm7, 1, %v19516_v10  ;;  %vm19689_vm9 = vcmask 121856   ;;  %v1058_v48 = vsel %vm1053_vm8, 65537, %v19516_v10 }
  0x3a   : > { %v1568_v49 = vor.u32 %v9942_v36, %v9941_v35  ;;  %vm10891_vm10 = vcmp.eq.s32.totalorder %v1210_v40, 1  ;;  %vm10895_vm12 = vcmp.eq.s32.totalorder %v1214_v41, 1  ;;  %v1394_v57 = vrot.slane %v10873_v44, %v10696_v30 }
  0x3b   : > { %v1398_v58 = vrot.slane %v10873_v44, %v10699_v31  ;;  %vm920_vm13 = vcmp.ne.s16.totalorder %v886_v42, 0  ;;  %v1066_v62 = vrot.slane %v1058_v48, %v10696_v30  ;;  %v1070_v0 = vrot.slane %v1058_v48, %v10750_v46  ;;  %vm1257_vm2 = vmpackc.low %vm10895_vm12, %vm10891_vm10 }
  0x3c   : > { %951 = vrot.lane.b32.xlu0 %v10553_v13, %s10453_s26  ;;  %v1752_v1 = vor.u32 %v9945_v52, %v9944_v51  ;;  %vm19515_vm1 = vcmask 7168   ;;  %vm10927_vm3 = vcmp.eq.s32.totalorder %v1394_v57, 1  ;;  %v1262_v21 = vsel %vm1257_vm2, 65537, %v19516_v10  ;;  %v11111_v57 = vld [vmem:[%s19507_s2] ss:$8 sps:$4 sm:$0xff]  }
  0x3d   : > { %953 = vrot.lane.b32.xlu1 %v10548_v12, %s10453_s26  ;;  %vm10931_vm4 = vcmp.eq.s32.totalorder %v1398_v58, 1  ;;  %v1274_v29 = vrot.slane %v1262_v21, %v10750_v46  ;;  %v1270_v36 = vrot.slane %v1262_v21, %v10696_v30  ;;  %vm19514_vm10 = vcmask 1039360  }
  0x3e   : > { %vm1755_vm7 = vcmp.ne.f32.partialorder %v1752_v1, 0.0  ;;  %vm1441_vm8 = vmpackc.low %vm10931_vm4, %vm10927_vm3  ;;  %vm19531_vm3 = vcmask 924672   ;;  %v11016_v53 = vsub.s32 5, %v10686_v27 }
  0x40   : > { %1153 = vrot.lane.b32.xlu0 %v10553_v13, %s10454_s27  ;;  %19728 = vst [vmem:[#allocation5_spill] sm:$0xff] %v11016_v53 }
  0x41   : > { %1155 = vrot.lane.b32.xlu1 %v10548_v12, %s10454_s27 }
  0x44   : > { %1157 = vrot.lane.b32.xlu0 %v10580_v14, %s10454_s27 }
  0x45   : > { %1337 = vrot.lane.b32.xlu1 %v10553_v13, %s10455_s10 }
  0x48   : > { %1339 = vrot.lane.b32.xlu0 %v10548_v12, %s10455_s10 }
  0x49   : > { %1341 = vrot.lane.b32.xlu1 %v10580_v14, %s10455_s10 }
  0x4c   : > { %1521 = vrot.lane.b32.xlu0 %v10553_v13, %s10456_s11 }
  0x4d   : > { %1523 = vrot.lane.b32.xlu1 %v10548_v12, %s10456_s11 }
  0x50   : > { %1525 = vrot.lane.b32.xlu0 %v10580_v14, %s10456_s11 }
  0x51   : > { %1705 = vrot.lane.b32.xlu1 %v10553_v13, %s10457_s15 }
  0x54   : > { %1707 = vrot.lane.b32.xlu0 %v10548_v12, %s10457_s15 }
  0x55   : > { %1709 = vrot.lane.b32.xlu1 %v10580_v14, %s10457_s15 }
  0x58   : > { %406 = vrot.lane.b32.xlu0 %v10612_v16, %s10450_s23 }
  0x59   : > { %408 = vrot.lane.b32.xlu1 %v10617_v17, %s10450_s23 }
  0x5c   : > { %410 = vrot.lane.b32.xlu0 %v10622_v18, %s10450_s23 }
  0x5d   : > { %589 = vrot.lane.b32.xlu1 %v10612_v16, %s10451_s24 }
  0x60   : > { %591 = vrot.lane.b32.xlu0 %v10617_v17, %s10451_s24 }
  0x61   : > { %593 = vrot.lane.b32.xlu1 %v10622_v18, %s10451_s24 }
  0x64   : > { %773 = vrot.lane.b32.xlu0 %v10612_v16, %s10452_s25 }
  0x65   : > { %775 = vrot.lane.b32.xlu1 %v10617_v17, %s10452_s25 }
  0x68   : > { %777 = vrot.lane.b32.xlu0 %v10622_v18, %s10452_s25 }
  0x69   : > { %957 = vrot.lane.b32.xlu1 %v10612_v16, %s10453_s26 }
  0x6c   : > { %959 = vrot.lane.b32.xlu0 %v10617_v17, %s10453_s26 }
  0x6d   : > { %961 = vrot.lane.b32.xlu1 %v10622_v18, %s10453_s26 }
  0x70   : > { %1161 = vrot.lane.b32.xlu0 %v10617_v17, %s10454_s27 }
  0x71   : > { %1163 = vrot.lane.b32.xlu1 %v10622_v18, %s10454_s27 }
  0x74   : > { %1165 = vrot.lane.b32.xlu0 %v10649_v19, %s10454_s27 }
  0x75   : > { %1345 = vrot.lane.b32.xlu1 %v10617_v17, %s10455_s10 }
  0x78   : > { %1347 = vrot.lane.b32.xlu0 %v10622_v18, %s10455_s10 }
  0x79   : > { %1349 = vrot.lane.b32.xlu1 %v10649_v19, %s10455_s10 }
  0x7c   : > { %1529 = vrot.lane.b32.xlu0 %v10617_v17, %s10456_s11 }
  0x7d   : > { %1531 = vrot.lane.b32.xlu1 %v10622_v18, %s10456_s11 }
  0x80   : > { %1533 = vrot.lane.b32.xlu0 %v10649_v19, %s10456_s11 }
  0x81   : > { %1713 = vrot.lane.b32.xlu1 %v10617_v17, %s10457_s15 }
  0x84   : > { %1715 = vrot.lane.b32.xlu0 %v10622_v18, %s10457_s15 }
  0x85   : > { %1717 = vrot.lane.b32.xlu1 %v10649_v19, %s10457_s15 }
  0x88   : > { %414 = vrot.lane.b32.xlu0 %v10684_v26, %s10450_s23 }
  0x89   : > { %416 = vrot.lane.b32.xlu1 %v10691_v28, %s10450_s23 }
  0x8c   : > { %597 = vrot.lane.b32.xlu0 %v10684_v26, %s10451_s24 }
  0x8d   : > { %599 = vrot.lane.b32.xlu1 %v10691_v28, %s10451_s24 }
  0x90   : > { %781 = vrot.lane.b32.xlu0 %v10684_v26, %s10452_s25 }
  0x91   : > { %783 = vrot.lane.b32.xlu1 %v10691_v28, %s10452_s25 }
  0x94   : > { %965 = vrot.lane.b32.xlu0 %v10684_v26, %s10453_s26 }
  0x95   : > { %967 = vrot.lane.b32.xlu1 %v10691_v28, %s10453_s26 }
  0x98   : > { %1169 = vrot.lane.b32.xlu0 %v10691_v28, %s10454_s27 }
  0x99   : > { %1171 = vrot.lane.b32.xlu1 %v10545_v11, %s10454_s27 }
  0x9a   : > { %v10779_v56 = vpop.permute.xlu0 %363 }
  0x9b   : > { %v10782_v59 = vpop.permute.xlu1 %402 }
  0x9c   : > { %404 = vrot.lane.b32.xlu0 %v10580_v14, %s10450_s23 }
  0x9d   : > { %1353 = vrot.lane.b32.xlu1 %v10691_v28, %s10455_s10 }
  0x9e   : > { %v401_v4 = vpop.permute.xlu0 %400 }
  0x9f   : > { %v10812_v7 = vpop.permute.xlu1 %581  ;;  %v419_v8 = vsel %vm19690_vm11, %v401_v4, %v10782_v59  ;;  %v440_v9 = vsel %vm19690_vm11, %v10779_v56, %v401_v4 }
  0xa0   : > { %1355 = vrot.lane.b32.xlu0 %v10545_v11, %s10455_s10  ;;  %10096 = vmatprep.subr.msk.bf16.mxu0 %vm552_vm14, %v419_v8  ;;  %v561_v20 = vsel %vm10806_vm15, %v440_v9, 0  ;;  %vm10907_vm14 = vcmp.ne.s16.totalorder %v882_v43, 0  ;;  %vm1571_vm15 = vcmp.ne.f32.partialorder %v1568_v49, 0.0 }
  0xa1   : > { %587 = vrot.lane.b32.xlu1 %v10580_v14, %s10451_s24  ;;  %2006 = vmatpush1.bf16.msra.mxu0 %v561_v20  ;;  %v10942_v6 = vsel %vm1571_vm15, 1, %v19516_v10  ;;  %vm1307_vm15 = vcmp.ne.s16.totalorder %v1270_v36, 0 }
  0xa2   : > { %v584_v25 = vpop.permute.xlu0 %583  ;;  %v1578_v23 = vrot.slane %v10942_v6, %v10696_v30 }
  0xa3   : > { %v10844_v33 = vpop.permute.xlu1 %585  ;;  %v623_v34 = vsel %vm19530_vm0, %v10812_v7, %v584_v25 }
  0xa4   : > { %1537 = vrot.lane.b32.xlu0 %v10691_v28, %s10456_s11  ;;  %v602_v38 = vsel %vm19530_vm0, %v584_v25, %v10844_v33  ;;  %v745_v39 = vsel %vm10836_vm5, %v623_v34, 0  ;;  %vm10937_vm5 = vcmp.ne.s16.totalorder %v1066_v62, 0  ;;  %v1582_v25 = vrot.slane %v10942_v6, %v10699_v31 }
  0xa5   : > { %1539 = vrot.lane.b32.xlu1 %v10545_v11, %s10456_s11  ;;  %10097 = vmatprep.subr.msk.bf16.mxu0 %vm736_vm6, %v602_v38  ;;  %vm1104_vm6 = vcmp.ne.s16.totalorder %v1070_v0, 0  ;;  %v10967_v34 = vsel %vm1755_vm7, 1, %v19516_v10  ;;  %v1446_v38 = vsel %vm1441_vm8, 65537, %v19516_v10  ;;  %vm10976_vm12 = vcmp.eq.s32.totalorder %v1578_v23, 1 }
  0xa6   : > { %2008 = vmatpush1.bf16.msra.mxu0 %v745_v39  ;;  %v10875_v45 = vpop.permute.xlu0 %765  ;;  %v1762_v42 = vrot.slane %v10967_v34, %v10696_v30  ;;  %v1766_v43 = vrot.slane %v10967_v34, %v10699_v31 }
  0xa7   : > { %v768_v50 = vpop.permute.xlu1 %767 }
  0xa8   : > { %771 = vrot.lane.b32.xlu0 %v10580_v14, %s10452_s25  ;;  %v807_v60 = vsel %vm19689_vm9, %v10875_v45, %v768_v50  ;;  %vm11007_vm4 = vcmp.eq.s32.totalorder %v1762_v42, 1 }
  0xa9   : > { %1721 = vrot.lane.b32.xlu1 %v10691_v28, %s10457_s15  ;;  %v929_v3 = vsel %vm10907_vm14, %v807_v60, 0  ;;  %vm1308_vm14 = vcmp.ne.s16.totalorder %v1274_v29, 0 }
  0xaa   : > { %v10912_v63 = vpop.permute.xlu0 %769 }
  0xab   : > { %v10915_v2 = vpop.permute.xlu1 %949  ;;  %v786_v28 = vsel %vm19689_vm9, %v768_v50, %v10912_v63  ;;  %v1458_v50 = vrot.slane %v1446_v38, %v10750_v46 }
  0xac   : > { %1723 = vrot.lane.b32.xlu0 %v10545_v11, %s10457_s15  ;;  %10098 = vmatprep.subr.msk.bf16.mxu0 %vm920_vm13, %v786_v28  ;;  %vm10980_vm13 = vcmp.eq.s32.totalorder %v1582_v25, 1  ;;  %v470_v28 = vrot.slane %v10704_v32, %v10750_v46 }
  0xad   : > { %955 = vrot.lane.b32.xlu1 %v10580_v14, %s10453_s26  ;;  %2010 = vmatpush1.bf16.msra.mxu0 %v929_v3  ;;  %vm1625_vm2 = vmpackc.low %vm10980_vm13, %vm10976_vm12  ;;  %vm1492_vm7 = vcmp.ne.s16.totalorder %v1458_v50, 0  ;;  %v474_v3 = vrot.slane %v10704_v32, %v11016_v53  ;;  %vm19529_vm12 = vcmask 916480  }
  0xae   : > { %v952_v8 = vpop.permute.xlu0 %951  ;;  %v1630_v60 = vsel %vm1625_vm2, 65537, %v19516_v10  ;;  %vm11052_vm13 = vcmp.eq.s32.totalorder %v470_v28, 1  ;;  %v1414_v28 = vrot.slane %v10873_v44, %v11016_v53 }
  0xaf   : > { %v10944_v9 = vpop.permute.xlu1 %953  ;;  %v991_v20 = vsel %vm19515_vm1, %v10915_v2, %v952_v8  ;;  %v1642_v4 = vrot.slane %v1630_v60, %v10750_v46  ;;  %v1638_v5 = vrot.slane %v1630_v60, %v10696_v30 }
  0xb0   : > { %1159 = vrot.lane.b32.xlu0 %v10612_v16, %s10454_s27  ;;  %v970_v14 = vsel %vm19515_vm1, %v952_v8, %v10944_v9  ;;  %v1113_v22 = vsel %vm10937_vm5, %v991_v20, 0  ;;  %vm11011_vm5 = vcmp.eq.s32.totalorder %v1766_v43, 1 }
  0xb1   : > { %1343 = vrot.lane.b32.xlu1 %v10612_v16, %s10455_s10  ;;  %10099 = vmatprep.subr.msk.bf16.mxu0 %vm1104_vm6, %v970_v14  ;;  %vm1809_vm8 = vmpackc.low %vm11011_vm5, %vm11007_vm4  ;;  %v654_v14 = vrot.slane %v10721_v37, %v10750_v46  ;;  %vm1675_vm2 = vcmp.ne.s16.totalorder %v1638_v5, 0  ;;  %vm19528_vm5 = vcmask 908288   ;;  %v1022_v5 = vrot.slane %v10777_v55, %v10750_v46 }
  0xb2   : > { %2012 = vmatpush1.bf16.msra.mxu0 %v1113_v22  ;;  %v10969_v35 = vpop.permute.xlu0 %1153  ;;  %v1814_v8 = vsel %vm1809_vm8, 65537, %v19516_v10  ;;  %v658_v22 = vrot.slane %v10721_v37, %v11016_v53 }
  0xb3   : > { %v1156_v39 = vpop.permute.xlu1 %1155  ;;  %2013 = vmatprep.subr.bf16.mxu0 %v10548_v12  ;;  %v1454_v12 = vrot.slane %v1446_v38, %v10696_v30  ;;  %v1822_v25 = vrot.slane %v1814_v8, %v10696_v30  ;;  %v1826_v36 = vrot.slane %v1814_v8, %v10750_v46  ;;  %v1026_v8 = vrot.slane %v10777_v55, %v11016_v53 }
  0xb4   : > { %1527 = vrot.lane.b32.xlu0 %v10612_v16, %s10456_s11  ;;  %v1174_v49 = vsel %vm19514_vm10, %v10969_v35, %v1156_v39 }
  0xb5   : > { %1711 = vrot.lane.b32.xlu1 %v10612_v16, %s10457_s15  ;;  %v1317_v54 = vsel %vm1307_vm15, %v1174_v49, 0  ;;  %vm11020_vm6 = vcmp.ne.s16.totalorder %v1454_v12, 0  ;;  %vm1676_vm15 = vcmp.ne.s16.totalorder %v1642_v4, 0  ;;  %vm1859_vm8 = vcmp.ne.s16.totalorder %v1822_v25, 0  ;;  %v1981_v4 = vld [vmem:[%s19508_s3] sm:$0xff] }
  0xb6   : > { %2014 = vmatpush1.bf16.msra.mxu0 %v10553_v13  ;;  %v10992_v48 = vpop.permute.xlu0 %1157 }
  0xb7   : > { %v10997_v51 = vpop.permute.xlu1 %1337  ;;  %v1175_v52 = vsel %vm19514_vm10, %v1156_v39, %v10992_v48 }
  0xb8   : > { %412 = vrot.lane.b32.xlu0 %v10649_v19, %s10450_s23  ;;  %10100 = vmatprep.subr.msk.bf16.mxu0 %vm1308_vm14, %v1175_v52  ;;  %vm11056_vm14 = vcmp.eq.s32.totalorder %v474_v3, 1  ;;  %v838_v52 = vrot.slane %v10753_v47, %v10750_v46  ;;  %v1982_v3 = vld [vmem:[%s19508_s3 + $0x8] sm:$0xff] }
  0xb9   : > { %595 = vrot.lane.b32.xlu1 %v10649_v19, %s10451_s24  ;;  %vm503_vm4 = vmpackc.low %vm11056_vm14, %vm11052_vm13  ;;  %vm1860_vm13 = vcmp.ne.s16.totalorder %v1826_v36, 0 }
  0xba   : > { %2016 = vmatpush1.bf16.msra.mxu0 %v1317_v54  ;;  %v1340_v58 = vpop.permute.xlu0 %1339  ;;  %v508_v12 = vsel %vm503_vm4, 65537, %v19516_v10 }
  0xbb   : > { %v11025_v61 = vpop.permute.xlu1 %1341  ;;  %v1358_v62 = vsel %vm19531_vm3, %v10997_v51, %v1340_v58  ;;  %v534_v54 = vrot.slane %v508_v12, %v10750_v46 }
  0xbc   : > { %779 = vrot.lane.b32.xlu0 %v10649_v19, %s10452_s25  ;;  %v1359_v0 = vsel %vm19531_vm3, %v1340_v58, %v11025_v61  ;;  %v1501_v1 = vsel %vm11020_vm6, %v1358_v62, 0  ;;  %vm11082_vm6 = vcmp.eq.s32.totalorder %v654_v14, 1  ;;  %v530_v58 = vrot.slane %v508_v12, %v10696_v30 }
  0xbd   : > { %963 = vrot.lane.b32.xlu1 %v10649_v19, %s10453_s26  ;;  %10101 = vmatprep.subr.msk.bf16.mxu0 %vm1492_vm7, %v1359_v0  ;;  %vm11086_vm7 = vcmp.eq.s32.totalorder %v658_v22, 1  ;;  %vm556_vm4 = vcmp.ne.s16.totalorder %v534_v54, 0 }
  0xbe   : > { %2018 = vmatpush1.bf16.msra.mxu0 %v1501_v1  ;;  %v11047_v11 = vpop.permute.xlu0 %1521  ;;  %vm687_vm14 = vmpackc.low %vm11086_vm7, %vm11082_vm6  ;;  %vm555_vm6 = vcmp.ne.s16.totalorder %v530_v58, 0  ;;  %v1410_v1 = vrot.slane %v10873_v44, %v10750_v46 }
  0xbf   : > { %v1524_v20 = vpop.permute.xlu1 %1523  ;;  %v692_v62 = vsel %vm687_vm14, 65537, %v19516_v10 }
  0xc0   : > { %1167 = vrot.lane.b32.xlu0 %v10684_v26, %s10454_s27  ;;  %v1542_v23 = vsel %vm19529_vm12, %v11047_v11, %v1524_v20  ;;  %v714_v21 = vrot.slane %v692_v62, %v10696_v30  ;;  %v718_v14 = vrot.slane %v692_v62, %v10750_v46 }
  0xc1   : > { %1351 = vrot.lane.b32.xlu1 %v10684_v26, %s10455_s10  ;;  %v1685_v40 = vsel %vm1675_vm2, %v1542_v23, 0 }
  0xc2   : > { %v11069_v29 = vpop.permute.xlu0 %1525  ;;  %vm739_vm14 = vcmp.ne.s16.totalorder %v714_v21, 0 }
  0xc3   : > { %v11072_v38 = vpop.permute.xlu1 %1705  ;;  %v1543_v39 = vsel %vm19529_vm12, %v1524_v20, %v11069_v29 }
  0xc4   : > { %1535 = vrot.lane.b32.xlu0 %v10684_v26, %s10456_s11  ;;  %10102 = vmatprep.subr.msk.bf16.mxu0 %vm1676_vm15, %v1543_v39  ;;  %vm11117_vm15 = vcmp.eq.s32.totalorder %v838_v52, 1 }
  0xc5   : > { %1719 = vrot.lane.b32.xlu1 %v10684_v26, %s10457_s15  ;;  %2020 = vmatpush1.bf16.msra.mxu0 %v1685_v40  ;;  %v842_v26 = vrot.slane %v10753_v47, %v11016_v53 }
  0xc6   : > { %v1708_v43 = vpop.permute.xlu0 %1707 }
  0xc7   : > { %v11093_v49 = vpop.permute.xlu1 %1709  ;;  %v1726_v50 = vsel %vm19528_vm5, %v11072_v38, %v1708_v43  ;;  %vm11121_vm2 = vcmp.eq.s32.totalorder %v842_v26, 1 }
  0xc8   : > { %v1727_v13 = vsel %vm19528_vm5, %v1708_v43, %v11093_v49  ;;  %v1869_v16 = vsel %vm1859_vm8, %v1726_v50, 0  ;;  %1985 = vperm.xlu0 %10366, %v1981_v4   ;;  %vm871_vm7 = vmpackc.low %vm11121_vm2, %vm11117_vm15  ;;  %vm11152_vm8 = vcmp.eq.s32.totalorder %v1022_v5, 1  ;;  %vm740_vm15 = vcmp.ne.s16.totalorder %v718_v14, 0 }
  0xc9   : > { %10103 = vmatprep.subr.msk.bf16.mxu0 %vm1860_vm13, %v1727_v13  ;;  %1990 = vperm.xlu1 %10367, %v1982_v3   ;;  %vm11156_vm13 = vcmp.eq.s32.totalorder %v1026_v8, 1  ;;  %v876_v40 = vsel %vm871_vm7, 65537, %v19516_v10  ;;  %v1226_v13 = vrot.slane %v10841_v24, %v10750_v46 }
  0xca   : > { %2022 = vmatpush1.bf16.msra.mxu0 %v1869_v16  ;;  %v11114_v60 = vpop.permute.xlu0 %406  ;;  %vm1055_vm2 = vmpackc.low %vm11156_vm13, %vm11152_vm8  ;;  %v902_v52 = vrot.slane %v876_v40, %v10750_v46  ;;  %v898_v26 = vrot.slane %v876_v40, %v10696_v30  ;;  %v1230_v16 = vrot.slane %v10841_v24, %v11016_v53 }
  0xcb   : > { %v409_v0 = vpop.permute.xlu1 %408  ;;  %v1060_v58 = vsel %vm1055_vm2, 65537, %v19516_v10  ;;  %vm11191_vm7 = vcmp.eq.s32.totalorder %v1226_v13, 1  ;;  %v1594_v13 = vrot.slane %v10942_v6, %v10750_v46 }
  0xcc   : > { %v422_v20 = vsel %vm19690_vm11, %v11114_v60, %v409_v0  ;;  %v1082_v4 = vrot.slane %v1060_v58, %v10696_v30  ;;  %vm11195_vm8 = vcmp.eq.s32.totalorder %v1230_v16, 1  ;;  %v1086_v21 = vrot.slane %v1060_v58, %v10750_v46 }
  0xcd   : > { %2038 = vmatmul.mubr.bf16.vlgmr.msra.gmra.mrb[0].mxu0 %v11111_v57  ;;  %v565_v25 = vsel %vm555_vm6, %v422_v20, 0  ;;  %vm11180_vm6 = vcmp.ne.s16.totalorder %v898_v26, 0  ;;  %vm1259_vm13 = vmpackc.low %vm11195_vm8, %vm11191_vm7 }
  0xce   : > { %v11139_v19 = vpop.permute.xlu0 %410  ;;  %9951 = vmatprep.mubr.msk.bf16.mxu0 %vm19530_vm0, %v10599_v15  ;;  %vm11220_vm2 = vcmp.ne.s16.totalorder %v1082_v4, 0  ;;  %v1264_v26 = vsel %vm1259_vm13, 65537, %v19516_v10  ;;  %vm11253_vm13 = vcmp.eq.s32.totalorder %v1594_v13, 1 }
  0xcf   : > { %v11148_v22 = vpop.permute.xlu1 %589  ;;  %v423_v23 = vsel %vm19690_vm11, %v409_v0, %v11139_v19  ;;  %v1290_v0 = vrot.slane %v1264_v26, %v10750_v46 }
  0xd0   : > { %10112 = vmatprep.subr.msk.bf16.mxu0 %vm556_vm4, %v423_v23  ;;  %vm924_vm4 = vcmp.ne.s16.totalorder %v902_v52, 0 }
  0xd1   : > { %2092 = vmatpush1.bf16.msra.mxu0 %v565_v25 }
  0xd2   : > { %v592_v41 = vpop.permute.xlu0 %591 }
  0xd3   : > { %v11161_v42 = vpop.permute.xlu1 %593  ;;  %v605_v43 = vsel %vm19530_vm0, %v11148_v22, %v592_v41 }
  0xd4   : > { %19747 = vst [vmem:[#allocation6_spill] sm:$0xff] %v11161_v42  ;;  %v606_v12 = vsel %vm19530_vm0, %v592_v41, %v11161_v42  ;;  %v749_v50 = vsel %vm739_vm14, %v605_v43, 0  ;;  %vm11212_vm14 = vcmp.eq.s32.totalorder %v1410_v1, 1  ;;  %v9925_v41 = vld [vmem:[%s19506_s1 + $0x40] ss:$8 sm:$0x3] }
  0xd5   : > { %10113 = vmatprep.subr.msk.bf16.mxu0 %vm740_vm15, %v606_v12  ;;  %vm11216_vm15 = vcmp.eq.s32.totalorder %v1414_v28, 1  ;;  %v9928_v12 = vld [vmem:[%s19506_s1 + $0x41] ss:$8 sm:$0x3]  ;;  %vm448_vm7 = vcmp.ne.f32.partialorder %v9925_v41, 0.0  ;;  %v1286_v28 = vrot.slane %v1264_v26, %v10696_v30 }
  0xd6   : > { %2094 = vmatpush1.bf16.msra.mxu0 %v749_v50  ;;  %v11177_v54 = vpop.permute.xlu0 %773  ;;  %vm632_vm8 = vcmp.ne.f32.partialorder %v9928_v12, 0.0  ;;  %v450_v8 = vsel %vm448_vm7, 1, %v19516_v10 }
  0xd7   : > { %v776_v62 = vpop.permute.xlu1 %775  ;;  %v634_v36 = vsel %vm632_vm8, 1, %v19516_v10  ;;  %v486_v12 = vrot.slane %v450_v8, %v10696_v30 }
  0xd8   : > { %v789_v3 = vsel %vm19689_vm9, %v11177_v54, %v776_v62 }
  0xd9   : > { %v933_v25 = vsel %vm11180_vm6, %v789_v3, 0  ;;  %vm1443_vm6 = vmpackc.low %vm11216_vm15, %vm11212_vm14  ;;  %vm1312_vm15 = vcmp.ne.s16.totalorder %v1290_v0, 0 }
  0xda   : > { %v11199_v20 = vpop.permute.xlu0 %777  ;;  %v1448_v3 = vsel %vm1443_vm6, 65537, %v19516_v10 }
  0xdb   : > { %19754 = vst [vmem:[#allocation7_spill] sm:$0xff] %v11199_v20  ;;  %v11202_v14 = vpop.permute.xlu1 %957  ;;  %v790_v23 = vsel %vm19689_vm9, %v776_v62, %v11199_v20  ;;  %v1598_v62 = vrot.slane %v10942_v6, %v11016_v53 }
  0xdc   : > { %10114 = vmatprep.subr.msk.bf16.mxu0 %vm924_vm4, %v790_v23  ;;  %vm1108_vm4 = vcmp.ne.s16.totalorder %v1086_v21, 0  ;;  %v1778_v23 = vrot.slane %v10967_v34, %v10750_v46 }
  0xdd   : > { %2096 = vmatpush1.bf16.msra.mxu0 %v933_v25  ;;  %vm11258_vm14 = vcmp.eq.s32.totalorder %v1598_v62, 1  ;;  %v1782_v25 = vrot.slane %v10967_v34, %v11016_v53  ;;  %v11391_v53 = vsub.s32 3, %v10686_v27 }
  0xde   : > { %v960_v43 = vpop.permute.xlu0 %959  ;;  %vm11293_vm6 = vcmp.eq.s32.totalorder %v1778_v23, 1 }
  0xdf   : > { %v11230_v50 = vpop.permute.xlu1 %961  ;;  %v973_v52 = vsel %vm19515_vm1, %v11202_v14, %v960_v43  ;;  %vm11297_vm7 = vcmp.eq.s32.totalorder %v1782_v25, 1 }
  0xe0   : > { %19761 = vst [vmem:[#allocation8_spill] sm:$0xff] %v11230_v50  ;;  %v974_v16 = vsel %vm19515_vm1, %v960_v43, %v11230_v50  ;;  %v1117_v58 = vsel %vm11220_vm2, %v973_v52, 0  ;;  %vm11273_vm2 = vcmp.ne.s16.totalorder %v1286_v28, 0  ;;  %v1474_v43 = vrot.slane %v1448_v3, %v10750_v46  ;;  %v9931_v52 = vld [vmem:[%s19506_s1 + $0x42] ss:$8 sm:$0x3] }
  0xe1   : > { %10115 = vmatprep.subr.msk.bf16.mxu0 %vm1108_vm4, %v974_v16  ;;  %vm1627_vm4 = vmpackc.low %vm11258_vm14, %vm11253_vm13  ;;  %v670_v16 = vrot.slane %v634_v36, %v10696_v30  ;;  %vm816_vm13 = vcmp.ne.f32.partialorder %v9931_v52, 0.0 }
  0xe2   : > { %2098 = vmatpush1.bf16.msra.mxu0 %v1117_v58  ;;  %v11248_v1 = vpop.permute.xlu0 %1161  ;;  %v674_v58 = vrot.slane %v634_v36, %v10699_v31  ;;  %vm1496_vm14 = vcmp.ne.s16.totalorder %v1474_v43, 0 }
  0xe3   : > { %v1164_v4 = vpop.permute.xlu1 %1163  ;;  %2099 = vmatprep.subr.bf16.mxu0 %v10622_v18  ;;  %v1470_v18 = vrot.slane %v1448_v3, %v10696_v30  ;;  %vm11327_vm1 = vcmp.eq.s32.totalorder %v670_v16, 1 }
  0xe4   : > { %v1178_v39 = vsel %vm19514_vm10, %v11248_v1, %v1164_v4 }
  0xe5   : > { %v1321_v28 = vsel %vm11273_vm2, %v1178_v39, 0  ;;  %vm11303_vm8 = vcmp.ne.s16.totalorder %v1470_v18, 0  ;;  %vm1811_vm2 = vmpackc.low %vm11297_vm7, %vm11293_vm6  ;;  %v9937_v39 = vld [vmem:[%s19506_s1 + $0x45] ss:$8 sm:$0x3] }
  0xe6   : > { %2100 = vmatpush1.bf16.msra.mxu0 %v10617_v17  ;;  %v11271_v40 = vpop.permute.xlu0 %1165  ;;  %v490_v17 = vrot.slane %v450_v8, %v10699_v31  ;;  %v1632_v8 = vsel %vm1627_vm4, 65537, %v19516_v10  ;;  %vm11331_vm4 = vcmp.eq.s32.totalorder %v674_v58, 1  ;;  %v1816_v16 = vsel %vm1811_vm2, 65537, %v19516_v10 }
  0xe7   : > { %19766 = vst [vmem:[#allocation9_spill] sm:$0xff] %v11271_v40  ;;  %v11282_v26 = vpop.permute.xlu1 %1345  ;;  %v1179_v13 = vsel %vm19514_vm10, %v1164_v4, %v11271_v40  ;;  %v9934_v4 = vld [vmem:[%s19506_s1 + $0x43] ss:$8 sm:$0x3]  ;;  %v1658_v52 = vrot.slane %v1632_v8, %v10750_v46  ;;  %v1842_v21 = vrot.slane %v1816_v16, %v10750_v46  ;;  %vm1204_vm2 = vcmp.ne.f32.partialorder %v9937_v39, 0.0 }
  0xe8   : > { %10116 = vmatprep.subr.msk.bf16.mxu0 %vm1312_vm15, %v1179_v13  ;;  %vm11311_vm15 = vcmp.eq.s32.totalorder %v486_v12, 1  ;;  %vm11323_vm10 = vcmp.eq.s32.totalorder %v490_v17, 1  ;;  %v818_v12 = vsel %vm816_vm13, 1, %v19516_v10  ;;  %vm1000_vm6 = vcmp.ne.f32.partialorder %v9934_v4, 0.0 }
  0xe9   : > { %v1654_v13 = vrot.slane %v1632_v8, %v10696_v30  ;;  %vm505_vm7 = vmpackc.low %vm11323_vm10, %vm11311_vm15  ;;  %v854_v62 = vrot.slane %v818_v12, %v10696_v30  ;;  %v1002_v0 = vsel %vm1000_vm6, 1, %v19516_v10  ;;  %vm1680_vm13 = vcmp.ne.s16.totalorder %v1658_v52, 0 }
  0xea   : > { %2102 = vmatpush1.bf16.msra.mxu0 %v1321_v28  ;;  %v1348_v5 = vpop.permute.xlu0 %1347  ;;  %v858_v28 = vrot.slane %v818_v12, %v10699_v31  ;;  %v1038_v18 = vrot.slane %v1002_v0, %v10696_v30  ;;  %v1042_v52 = vrot.slane %v1002_v0, %v10699_v31 }
  0xeb   : > { %v11315_v23 = vpop.permute.xlu1 %1349  ;;  %v1362_v25 = vsel %vm19531_vm3, %v11282_v26, %v1348_v5 }
  0xec   : > { %19777 = vst [vmem:[#allocation10_spill] sm:$0xff] %v11315_v23  ;;  %v1363_v41 = vsel %vm19531_vm3, %v1348_v5, %v11315_v23  ;;  %v1505_v43 = vsel %vm11303_vm8, %v1362_v25, 0  ;;  %vm689_vm8 = vmpackc.low %vm11331_vm4, %vm11327_vm1  ;;  %v1838_v5 = vrot.slane %v1816_v16, %v10696_v30  ;;  %v510_v25 = vsel %vm505_vm7, 65537, %v19516_v10 }
  0xed   : > { %10117 = vmatprep.subr.msk.bf16.mxu0 %vm1496_vm14, %v1363_v41  ;;  %vm11358_vm14 = vcmp.ne.s16.totalorder %v1654_v13, 0  ;;  %v694_v36 = vsel %vm689_vm8, 65537, %v19516_v10  ;;  %vm11376_vm1 = vcmp.eq.s32.totalorder %v854_v62, 1  ;;  %v11382_v13 = vsub.s32 2, %v10686_v27 }
  0xee   : > { %2104 = vmatpush1.bf16.msra.mxu0 %v1505_v43  ;;  %v11342_v17 = vpop.permute.xlu0 %1529  ;;  %vm11386_vm10 = vcmp.eq.s32.totalorder %v858_v28, 1  ;;  %vm11396_vm15 = vcmp.ne.s16.totalorder %v1838_v5, 0  ;;  %v550_v0 = vrot.slane %v510_v25, %v10750_v46  ;;  %vm1864_vm4 = vcmp.ne.s16.totalorder %v1842_v21, 0 }
  0xef   : > { %v1532_v58 = vpop.permute.xlu1 %1531  ;;  %v734_v4 = vrot.slane %v694_v36, %v10750_v46  ;;  %vm11403_vm6 = vcmp.eq.s32.totalorder %v1038_v18, 1  ;;  %vm873_vm7 = vmpackc.low %vm11386_vm10, %vm11376_vm1  ;;  %vm11415_vm8 = vcmp.eq.s32.totalorder %v1042_v52, 1  ;;  %v462_v21 = vrot.slane %v10704_v32, %v11382_v13 }
  0xf0   : > { %v1546_v3 = vsel %vm19529_vm12, %v11342_v17, %v1532_v58  ;;  %v466_v10 = vrot.slane %v10704_v32, %v11391_v53 }
  0xf1   : > { %v1689_v16 = vsel %vm11358_vm14, %v1546_v3, 0  ;;  %v546_v3 = vrot.slane %v510_v25, %v10696_v30  ;;  %vm11428_vm14 = vcmp.ne.s16.totalorder %v550_v0, 0  ;;  %vm11438_vm10 = vcmp.ne.s16.totalorder %v734_v4, 0 }
  0xf2   : > { %v11363_v8 = vpop.permute.xlu0 %1533 }
  0xf3   : > { %19786 = vst [vmem:[#allocation11_spill] sm:$0xff] %v11363_v8  ;;  %v11372_v41 = vpop.permute.xlu1 %1713  ;;  %v1547_v43 = vsel %vm19529_vm12, %v1532_v58, %v11363_v8  ;;  %v9940_v58 = vld [vmem:[%s19506_s1 + $0x46] ss:$8 sm:$0x3]  ;;  %vm11432_vm1 = vcmp.ne.s16.totalorder %v546_v3, 0 }
  0xf4   : > { %10118 = vmatprep.subr.msk.bf16.mxu0 %vm1680_vm13, %v1547_v43  ;;  %vm1388_vm13 = vcmp.ne.f32.partialorder %v9940_v58, 0.0  ;;  %v9943_v3 = vld [vmem:[%s19506_s1 + $0x47] ss:$8 sm:$0x3] }
  0xf5   : > { %2106 = vmatpush1.bf16.msra.mxu0 %v1689_v16  ;;  %v19798_v16 = vmov 0  }
  0xf6   : > { %v1716_v28 = vpop.permute.xlu0 %1715  ;;  %v1206_v23 = vsel %vm1204_vm2, 1, %v19798_v16  ;;  %v1390_v0 = vsel %vm1388_vm13, 1, %v19798_v16  ;;  %vm11454_vm2 = vcmp.eq.s32.totalorder %v462_v21, 1 }
  0xf7   : > { %v11407_v8 = vpop.permute.xlu1 %1717  ;;  %v1730_v5 = vsel %vm19528_vm5, %v11372_v41, %v1716_v28  ;;  %v1242_v4 = vrot.slane %v1206_v23, %v10696_v30  ;;  %v1426_v42 = vrot.slane %v1390_v0, %v10696_v30 }
  0xf8   : > { %19795 = vst [vmem:[#allocation12_spill] sm:$0xff] %v11407_v8  ;;  %v1731_v18 = vsel %vm19528_vm5, %v1716_v28, %v11407_v8  ;;  %v1873_v39 = vsel %vm11396_vm15, %v1730_v5, 0  ;;  %v730_v28 = vrot.slane %v694_v36, %v10696_v30  ;;  %v878_v5 = vsel %vm873_vm7, 65537, %v19798_v16  ;;  %vm1057_vm15 = vmpackc.low %vm11415_vm8, %vm11403_vm6 }
  0xf9   : > { %10119 = vmatprep.subr.msk.bf16.mxu0 %vm1864_vm4, %v1731_v18  ;;  %v646_v8 = vrot.slane %v10721_v37, %v11382_v13  ;;  %vm11464_vm4 = vcmp.eq.s32.totalorder %v466_v10, 1  ;;  %vm1572_vm7 = vcmp.ne.f32.partialorder %v9943_v3, 0.0  ;;  %v918_v12 = vrot.slane %v878_v5, %v10750_v46 }
  0xfa   : > { %2108 = vmatpush1.bf16.msra.mxu0 %v1873_v39  ;;  %v11436_v58 = vpop.permute.xlu0 %414  ;;  %v1246_v39 = vrot.slane %v1206_v23, %v10699_v31  ;;  %v650_v23 = vrot.slane %v10721_v37, %v11391_v53  ;;  %vm11479_vm13 = vcmp.ne.s16.totalorder %v730_v28, 0  ;;  %vm502_vm6 = vmpackc.low %vm11464_vm4, %vm11454_vm2  ;;  %v830_v36 = vrot.slane %v10753_v47, %v11382_v13 }
  0xfb   : > { %19803 = vst [vmem:[#allocation13_spill] sm:$0xff] %v11436_v58  ;;  %v417_v18 = vpop.permute.xlu1 %416  ;;  %vm11501_vm5 = vcmp.eq.s32.totalorder %v646_v8, 1  ;;  %v1574_v8 = vsel %vm1572_vm7, 1, %v19798_v16  ;;  %vm928_vm7 = vcmp.ne.s16.totalorder %v918_v12, 0  ;;  %v834_v28 = vrot.slane %v10753_v47, %v11391_v53 }
  0xfc   : > { %v426_v40 = vsel %vm19690_vm11, %v11436_v58, %v417_v18  ;;  %v427_v50 = vsel %vm19690_vm11, %v417_v18, %v10779_v56  ;;  %v1430_v58 = vrot.slane %v1390_v0, %v10699_v31  ;;  %vm11513_vm8 = vcmp.eq.s32.totalorder %v650_v23, 1  ;;  %v9946_v18 = vld [vmem:[%s19506_s1 + $0x90] ss:$8 sm:$0x3] }
  0xfd   : > { %10128 = vmatprep.subr.msk.bf16.mxu0 %vm11428_vm14, %v427_v50  ;;  %2124 = vmatmul.mubr.bf16.vlgmr.msra.gmra.mrb[4].mxu0 %v11111_v57  ;;  %v569_v21 = vsel %vm11432_vm1, %v426_v40, 0  ;;  %v914_v50 = vrot.slane %v878_v5, %v10696_v30  ;;  %v1062_v40 = vsel %vm1057_vm15, 65537, %v19798_v16  ;;  %vm11493_vm14 = vcmp.eq.s32.totalorder %v1242_v4, 1 }
  0xfe   : > { %2178 = vmatpush1.bf16.msra.mxu0 %v569_v21  ;;  %v11477_v56 = vpop.permute.xlu0 %597  ;;  %9953 = vmatprep.mubr.msk.bf16.mxu0 %vm19530_vm0, %v10599_v15  ;;  %vm11497_vm1 = vcmp.eq.s32.totalorder %v1246_v39, 1  ;;  %v1102_v4 = vrot.slane %v1062_v40, %v10750_v46  ;;  %vm11527_vm15 = vcmp.eq.s32.totalorder %v1426_v42, 1  ;;  %vm11531_vm12 = vcmp.eq.s32.totalorder %v1430_v58, 1 }
  0xff   : > { %v600_v52 = vpop.permute.xlu1 %599  ;;  %v1098_v21 = vrot.slane %v1062_v40, %v10696_v30  ;;  %v507_v58 = vsel %vm502_vm6, 65537, %v19798_v16  ;;  %v1610_v10 = vrot.slane %v1574_v8, %v10696_v30  ;;  %vm1756_vm3 = vcmp.ne.f32.partialorder %v9946_v18, 0.0  ;;  %vm1445_vm2 = vmpackc.low %vm11531_vm12, %vm11527_vm15 }
 0x100   : > { %v609_v43 = vsel %vm19530_vm0, %v11477_v56, %v600_v52  ;;  %v610_v25 = vsel %vm19530_vm0, %v600_v52, %v10812_v7  ;;  %vm11537_vm0 = vcmp.ne.s16.totalorder %v914_v50, 0  ;;  %v1614_v20 = vrot.slane %v1574_v8, %v10699_v31 }
 0x101   : > { %10129 = vmatprep.subr.msk.bf16.mxu0 %vm11438_vm10, %v610_v25  ;;  %v753_v7 = vsel %vm11479_vm13, %v609_v43, 0  ;;  %vm1261_vm10 = vmpackc.low %vm11497_vm1, %vm11493_vm14  ;;  %vm11570_vm4 = vcmp.ne.s16.totalorder %v1102_v4, 0  ;;  %vm11579_vm14 = vcmp.ne.s16.totalorder %v1098_v21, 0  ;;  %v526_v8 = vrot.slane %v507_v58, %v10750_v46 }
 0x102   : > { %2180 = vmatpush1.bf16.msra.mxu0 %v753_v7  ;;  %v11535_v3 = vpop.permute.xlu0 %781  ;;  %vm686_vm13 = vmpackc.low %vm11513_vm8, %vm11501_vm5  ;;  %v1758_v7 = vsel %vm1756_vm3, 1, %v19798_v16  ;;  %v522_v62 = vrot.slane %v507_v58, %v10696_v30  ;;  %vm19832_vm3 = vcmask 7168   ;;  %vm11608_vm5 = vcmp.eq.s32.totalorder %v1614_v20, 1 }
 0x103   : > { %v784_v42 = vpop.permute.xlu1 %783  ;;  %v691_v21 = vsel %vm686_vm13, 65537, %v19798_v16  ;;  %vm19833_vm1 = vmmov %vm19832_vm3  ;;  %vm11612_vm6 = vcmp.eq.s32.totalorder %v830_v36, 1  ;;  %vm11620_vm12 = vcmp.eq.s32.totalorder %v834_v28, 1  ;;  %vm11634_vm15 = vcmp.ne.s16.totalorder %v526_v8, 0 }
 0x104   : > { %v793_v12 = vsel %vm19689_vm9, %v11535_v3, %v784_v42  ;;  %v794_v50 = vsel %vm19689_vm9, %v784_v42, %v10875_v45  ;;  %v1266_v45 = vsel %vm1261_vm10, 65537, %v19798_v16  ;;  %v1450_v42 = vsel %vm1445_vm2, 65537, %v19798_v16  ;;  %vm870_vm13 = vmpackc.low %vm11620_vm12, %vm11612_vm6 }
 0x105   : > { %10130 = vmatprep.subr.msk.bf16.mxu0 %vm928_vm7, %v794_v50  ;;  %v937_v40 = vsel %vm11537_vm0, %v793_v12, 0  ;;  %v1306_v25 = vrot.slane %v1266_v45, %v10750_v46  ;;  %vm11600_vm0 = vcmp.eq.s32.totalorder %v1610_v10, 1  ;;  %v1798_v12 = vrot.slane %v1758_v7, %v10699_v31 }
 0x106   : > { %2182 = vmatpush1.bf16.msra.mxu0 %v937_v40  ;;  %v11577_v0 = vpop.permute.xlu0 %965  ;;  %v1302_v20 = vrot.slane %v1266_v45, %v10696_v30  ;;  %v10410_v40 = vld [vmem:[%s10542_s22 + $0x24] ss:$40 sps:$4 sm:$0xff]   ;;  %vm11638_vm7 = vcmp.ne.s16.totalorder %v522_v62, 0  ;;  %vm1629_vm10 = vmpackc.low %vm11608_vm5, %vm11600_vm0  ;;  %v710_v45 = vrot.slane %v691_v21, %v10750_v46  ;;  %v1486_v8 = vrot.slane %v1450_v42, %v10696_v30 }
 0x107   : > { %v968_v4 = vpop.permute.xlu1 %967  ;;  %vm11630_vm8 = vcmp.ne.s16.totalorder %v1306_v25, 0  ;;  %v1490_v25 = vrot.slane %v1450_v42, %v10750_v46  ;;  %v1018_v62 = vrot.slane %v10777_v55, %v11391_v53  ;;  %v10411_v42 = vld [vmem:[%s10542_s22 + $0x20] ss:$40 sps:$4 sm:$0xff]   ;;  %v1402_v10 = vrot.slane %v10873_v44, %v11382_v13 }
 0x108   : > { %v977_v58 = vsel %vm19832_vm3, %v11577_v0, %v968_v4  ;;  %v978_v5 = vsel %vm19833_vm1, %v968_v4, %v10915_v2  ;;  %v1794_v2 = vrot.slane %v1758_v7, %v10696_v30  ;;  %v706_v7 = vrot.slane %v691_v21, %v10696_v30 }
 0x109   : > { %10131 = vmatprep.subr.msk.bf16.mxu0 %vm11570_vm4, %v978_v5  ;;  %v1121_v39 = vsel %vm11579_vm14, %v977_v58, 0  ;;  %v1014_v4 = vrot.slane %v10777_v55, %v11382_v13  ;;  %vm11662_vm4 = vcmp.eq.s32.totalorder %v1798_v12, 1  ;;  %vm19851_vm14 = vcmask 1039360  }
 0x10a   : > { %2184 = vmatpush1.bf16.msra.mxu0 %v1121_v39  ;;  %v11626_v50 = vpop.permute.xlu0 %1169  ;;  %vm11658_vm2 = vcmp.eq.s32.totalorder %v1794_v2, 1  ;;  %vm19852_vm3 = vmmov %vm19851_vm14  ;;  %vm11671_vm1 = vcmp.ne.s16.totalorder %v1302_v20, 0  ;;  %v875_v20 = vsel %vm870_vm13, 65537, %v19798_v16  ;;  %vm11707_vm0 = vcmp.ne.s16.totalorder %v706_v7, 0 }
 0x10b   : > { %19840 = vst [vmem:[#allocation14_spill] sm:$0xff] %v11626_v50  ;;  %v1172_v36 = vpop.permute.xlu1 %1171  ;;  %2185 = vmatprep.subr.bf16.mxu0 %v10410_v40  ;;  %vm1813_vm5 = vmpackc.low %vm11662_vm4, %vm11658_vm2  ;;  %vm11717_vm6 = vcmp.ne.s16.totalorder %v1486_v8, 0  ;;  %vm11721_vm12 = vcmp.eq.s32.totalorder %v1014_v4, 1  ;;  %v894_v31 = vrot.slane %v875_v20, %v10750_v46  ;;  %vm19869_vm13 = vcmask 130048  }
 0x10c   : > { %v1182_v21 = vsel %vm19851_vm14, %v11626_v50, %v1172_v36  ;;  %v1195_v39 = vsel %vm19852_vm3, %v1172_v36, %v10969_v35  ;;  %v1634_v35 = vsel %vm1629_vm10, 65537, %v19798_v16  ;;  %vm11703_vm14 = vcmp.ne.s16.totalorder %v1490_v25, 0  ;;  %vm19870_vm2 = vmmov %vm19869_vm13 }
 0x10d   : > { %v1325_v23 = vsel %vm11671_vm1, %v1182_v21, 0  ;;  %v1674_v28 = vrot.slane %v1634_v35, %v10750_v46  ;;  %v1670_v43 = vrot.slane %v1634_v35, %v10696_v30  ;;  %v1818_v4 = vsel %vm1813_vm5, 65537, %v19798_v16 }
 0x10e   : > { %2186 = vmatpush1.bf16.msra.mxu0 %v10411_v42  ;;  %v405_v40 = vpop.permute.xlu0 %404  ;;  %v1858_v35 = vrot.slane %v1818_v4, %v10750_v46 }
 0x10f   : > { %v11675_v2 = vpop.permute.xlu1 %1353  ;;  %10132 = vmatprep.subr.msk.bf16.mxu0 %vm11630_vm8, %v1195_v39  ;;  %v421_v12 = vsel %vm19690_vm11, %v405_v40, %v11114_v60  ;;  %v420_v50 = vsel %vm19690_vm11, %v10782_v59, %v405_v40  ;;  %vm11699_vm8 = vcmp.ne.s16.totalorder %v710_v45, 0  ;;  %v890_v45 = vrot.slane %v875_v20, %v10696_v30 }
 0x110   : > { %10104 = vmatprep.subr.msk.bf16.mxu1 %vm11634_vm15, %v421_v12  ;;  %v563_v59 = vsel %vm11638_vm7, %v420_v50, 0  ;;  %vm11725_vm15 = vcmp.eq.s32.totalorder %v1018_v62, 1  ;;  %vm19867_vm7 = vcmask 924672   ;;  %v1218_v62 = vrot.slane %v10841_v24, %v11382_v13 }
 0x111   : > { %2049 = vmatpush1.bf16.msra.mxu1 %v563_v59  ;;  %vm19868_vm10 = vmmov %vm19867_vm7  ;;  %vm1684_vm3 = vcmp.ne.s16.totalorder %v1674_v28, 0  ;;  %vm1683_vm1 = vcmp.ne.s16.totalorder %v1670_v43, 0  ;;  %vm11764_vm5 = vcmp.ne.s16.totalorder %v890_v45, 0  ;;  %v1406_v50 = vrot.slane %v10873_v44, %v11391_v53 }
 0x112   : > { %2188 = vmatpush1.bf16.msra.mxu0 %v1325_v23  ;;  %v1356_v52 = vpop.permute.xlu0 %1355  ;;  %vm1054_vm4 = vmpackc.low %vm11725_vm15, %vm11721_vm12  ;;  %v1854_v23 = vrot.slane %v1818_v4, %v10696_v30  ;;  %v1590_v4 = vrot.slane %v10942_v6, %v11391_v53  ;;  %v1774_v40 = vrot.slane %v10967_v34, %v11391_v53  ;;  %v11863_v60 = vsub.s32 7, %v10686_v27 }
 0x113   : > { %v588_v25 = vpop.permute.xlu1 %587  ;;  %v1366_v7 = vsel %vm19867_vm7, %v11675_v2, %v1356_v52  ;;  %v1379_v8 = vsel %vm19868_vm10, %v1356_v52, %v10997_v51  ;;  %v1222_v51 = vrot.slane %v10841_v24, %v11391_v53  ;;  %v1059_v12 = vsel %vm1054_vm4, 65537, %v19798_v16 }
 0x114   : > { %v604_v58 = vsel %vm19869_vm13, %v588_v25, %v11148_v22  ;;  %10133 = vmatprep.subr.msk.bf16.mxu0 %vm11703_vm14, %v1379_v8  ;;  %v603_v5 = vsel %vm19870_vm2, %v10844_v33, %v588_v25  ;;  %v1509_v21 = vsel %vm11717_vm6, %v1366_v7, 0  ;;  %vm11760_vm14 = vcmp.ne.s16.totalorder %v894_v31, 0 }
 0x115   : > { %10105 = vmatprep.subr.msk.bf16.mxu1 %vm11699_vm8, %v604_v58  ;;  %v747_v22 = vsel %vm11707_vm0, %v603_v5, 0  ;;  %vm19875_vm8 = vcmask 916480   ;;  %vm11774_vm6 = vcmp.eq.s32.totalorder %v1218_v62, 1  ;;  %vm11778_vm12 = vcmp.eq.s32.totalorder %v1222_v51, 1 }
 0x116   : > { %2051 = vmatpush1.bf16.msra.mxu1 %v747_v22  ;;  %2190 = vmatpush1.bf16.msra.mxu0 %v1509_v21  ;;  %v11758_v33 = vpop.permute.xlu0 %1537  ;;  %vm19876_vm0 = vmmov %vm19875_vm8  ;;  %v1078_v36 = vrot.slane %v1059_v12, %v10750_v46  ;;  %v1074_v52 = vrot.slane %v1059_v12, %v10696_v30  ;;  %vm11803_vm7 = vcmp.ne.s16.totalorder %v1858_v35, 0  ;;  %vm11809_vm10 = vcmp.ne.s16.totalorder %v1854_v23, 0  ;;  %v10412_v23 = vld [vmem:[%s10542_s22 + $0xc] ss:$40 sps:$4 sm:$0xff]  }
 0x117   : > { %v1540_v42 = vpop.permute.xlu1 %1539  ;;  %vm1258_vm15 = vmpackc.low %vm11778_vm12, %vm11774_vm6  ;;  %vm11813_vm13 = vcmp.eq.s32.totalorder %v1402_v10, 1  ;;  %vm11817_vm2 = vcmp.eq.s32.totalorder %v1406_v50, 1  ;;  %v1770_v21 = vrot.slane %v10967_v34, %v11382_v13  ;;  %vm11855_vm12 = vcmp.eq.s32.totalorder %v1590_v4, 1 }
 0x118   : > { %v1550_v20 = vsel %vm19875_vm8, %v11758_v33, %v1540_v42  ;;  %v1563_v59 = vsel %vm19876_vm0, %v1540_v42, %v11047_v11  ;;  %vm1106_vm4 = vcmp.ne.s16.totalorder %v1078_v36, 0  ;;  %v1263_v5 = vsel %vm1258_vm15, 65537, %v19798_v16  ;;  %vm1442_vm0 = vmpackc.low %vm11817_vm2, %vm11813_vm13 }
 0x119   : > { %10134 = vmatprep.subr.msk.bf16.mxu0 %vm1684_vm3, %v1563_v59  ;;  %v1693_v15 = vsel %vm1683_vm1, %v1550_v20, 0  ;;  %vm11823_vm3 = vcmp.ne.s16.totalorder %v1074_v52, 0  ;;  %vm19891_vm1 = vcmask 908288   ;;  %v1282_v39 = vrot.slane %v1263_v5, %v10750_v46 }
 0x11a   : > { %2192 = vmatpush1.bf16.msra.mxu0 %v1693_v15  ;;  %v772_v11 = vpop.permute.xlu0 %771  ;;  %v1278_v18 = vrot.slane %v1263_v5, %v10696_v30  ;;  %v1447_v10 = vsel %vm1442_vm0, 65537, %v19798_v16  ;;  %vm11878_vm13 = vcmp.eq.s32.totalorder %v1774_v40, 1  ;;  %v482_v52 = vrot.slane %v10704_v32, %v11863_v60 }
 0x11b   : > { %v11789_v28 = vpop.permute.xlu1 %1721  ;;  %v788_v43 = vsel %vm19689_vm9, %v772_v11, %v11177_v54  ;;  %v787_v31 = vsel %vm19689_vm9, %v10912_v63, %v772_v11  ;;  %v1586_v54 = vrot.slane %v10942_v6, %v11382_v13  ;;  %vm1310_vm15 = vcmp.ne.s16.totalorder %v1282_v39, 0 }
 0x11c   : > { %10106 = vmatprep.subr.msk.bf16.mxu1 %vm11760_vm14, %v788_v43  ;;  %v931_v45 = vsel %vm11764_vm5, %v787_v31, 0  ;;  %vm19892_vm14 = vmmov %vm19891_vm1  ;;  %vm19893_vm5 = vcmask 7168   ;;  %v1466_v50 = vrot.slane %v1447_v10, %v10750_v46  ;;  %v10413_v43 = vld [vmem:[%s10542_s22 + $0x8] ss:$40 sps:$4 sm:$0xff]   ;;  %vm19903_vm2 = vcmask 1039360  }
 0x11d   : > { %2053 = vmatpush1.bf16.msra.mxu1 %v931_v45  ;;  %vm19894_vm8 = vmmov %vm19893_vm5  ;;  %vm11849_vm6 = vcmp.eq.s32.totalorder %v1586_v54, 1  ;;  %v1462_v25 = vrot.slane %v1447_v10, %v10696_v30  ;;  %v666_v4 = vrot.slane %v10721_v37, %v11863_v60  ;;  %vm19909_vm0 = vcmask 924672  }
 0x11e   : > { %v1724_v62 = vpop.permute.xlu0 %1723  ;;  %v850_v39 = vrot.slane %v10753_v47, %v11863_v60  ;;  %v1790_v59 = vrot.slane %v10967_v34, %v11863_v60 }
 0x11f   : > { %v956_v51 = vpop.permute.xlu1 %955  ;;  %v1734_v22 = vsel %vm19891_vm1, %v11789_v28, %v1724_v62  ;;  %v1747_v42 = vsel %vm19892_vm14, %v1724_v62, %v11072_v38  ;;  %vm1494_vm1 = vcmp.ne.s16.totalorder %v1466_v50, 0 }
 0x120   : > { %v972_v12 = vsel %vm19893_vm5, %v956_v51, %v11202_v14  ;;  %10135 = vmatprep.subr.msk.bf16.mxu0 %vm11803_vm7, %v1747_v42  ;;  %v971_v35 = vsel %vm19894_vm8, %v10944_v9, %v956_v51  ;;  %v1877_v20 = vsel %vm11809_vm10, %v1734_v22, 0  ;;  %v11860_v9 = vsub.s32 6, %v10686_v27  ;;  %vm1626_vm7 = vmpackc.low %vm11855_vm12, %vm11849_vm6 }
 0x121   : > { %10107 = vmatprep.subr.msk.bf16.mxu1 %vm1106_vm4, %v972_v12  ;;  %v1115_v14 = vsel %vm11823_vm3, %v971_v35, 0  ;;  %2194 = vmatpush1.bf16.msra.mxu0 %v1877_v20  ;;  %vm11874_vm10 = vcmp.eq.s32.totalorder %v1770_v21, 1  ;;  %vm19904_vm4 = vmmov %vm19903_vm2  ;;  %vm1309_vm3 = vcmp.ne.s16.totalorder %v1278_v18, 0  ;;  %v1631_v63 = vsel %vm1626_vm7, 65537, %v19798_v16 }
 0x122   : > { %2055 = vmatpush1.bf16.msra.mxu1 %v1115_v14  ;;  %v1160_v15 = vpop.permute.xlu0 %1159  ;;  %v478_v36 = vrot.slane %v10704_v32, %v11860_v9  ;;  %v1650_v7 = vrot.slane %v1631_v63, %v10750_v46  ;;  %vm1810_vm14 = vmpackc.low %vm11878_vm13, %vm11874_vm10  ;;  %v662_v32 = vrot.slane %v10721_v37, %v11860_v9  ;;  %vm11904_vm8 = vcmp.eq.s32.totalorder %v482_v52, 1  ;;  %v19927_v52 = vld [vmem:[#allocation13_spill] sm:$0xff] }
 0x123   : > { %2056 = vmatprep.subr.bf16.mxu1 %v10412_v23  ;;  %v1177_v31 = vsel %vm19903_vm2, %v1160_v15, %v11248_v1  ;;  %v1176_v45 = vsel %vm19904_vm4, %v10992_v48, %v1160_v15  ;;  %v1344_v54 = vpop.permute.xlu1 %1343  ;;  %vm19910_vm6 = vmmov %vm19909_vm0  ;;  %vm1493_vm12 = vcmp.ne.s16.totalorder %v1462_v25, 0  ;;  %v1646_v5 = vrot.slane %v1631_v63, %v10696_v30 }
 0x124   : > { %2210 = vmatmul.mubr.bf16.vlgmr.msra.gmra.mrb[8].mxu0 %v11111_v57  ;;  %v1319_v1 = vsel %vm1309_vm3, %v1176_v45, 0  ;;  %vm11900_vm5 = vcmp.eq.s32.totalorder %v478_v36, 1  ;;  %v1361_v62 = vsel %vm19909_vm0, %v1344_v54, %v11282_v26  ;;  %v1360_v58 = vsel %vm19910_vm6, %v11025_v61, %v1344_v54 }
 0x125   : > { %v1815_v51 = vsel %vm1810_vm14, 65537, %v19798_v16  ;;  %vm504_vm7 = vmpackc.low %vm11904_vm8, %vm11900_vm5  ;;  %vm11921_vm10 = vcmp.eq.s32.totalorder %v662_v32, 1  ;;  %v1503_v61 = vsel %vm1493_vm12, %v1360_v58, 0  ;;  %vm11925_vm13 = vcmp.eq.s32.totalorder %v666_v4, 1  ;;  %v19928_v32 = vld [vmem:[#allocation6_spill] sm:$0xff] }
 0x126   : > { %2057 = vmatpush1.bf16.msra.mxu1 %v10413_v43  ;;  %v1528_v21 = vpop.permute.xlu0 %1527  ;;  %v1834_v22 = vrot.slane %v1815_v51, %v10750_v46  ;;  %v846_v42 = vrot.slane %v10753_v47, %v11860_v9  ;;  %vm19915_vm2 = vcmask 916480   ;;  %vm1677_vm3 = vcmp.ne.s16.totalorder %v1646_v5, 0  ;;  %vm688_vm14 = vmpackc.low %vm11925_vm13, %vm11921_vm10 }
 0x127   : > { %10108 = vmatprep.subr.msk.bf16.mxu1 %vm1310_vm15, %v1177_v31  ;;  %vm1678_vm15 = vcmp.ne.s16.totalorder %v1650_v7, 0  ;;  %v1545_v40 = vsel %vm19915_vm2, %v1528_v21, %v11342_v17  ;;  %vm19916_vm4 = vmmov %vm19915_vm2  ;;  %v1830_v35 = vrot.slane %v1815_v51, %v10696_v30  ;;  %v1712_v20 = vpop.permute.xlu1 %1711  ;;  %v509_v38 = vsel %vm504_vm7, 65537, %v19798_v16 }
 0x128   : > { %v1544_v12 = vsel %vm19916_vm4, %v11069_v29, %v1528_v21  ;;  %v542_v14 = vrot.slane %v509_v38, %v10750_v46  ;;  %v1030_v47 = vrot.slane %v10777_v55, %v11860_v9  ;;  %vm11946_vm5 = vcmp.eq.s32.totalorder %v846_v42, 1 }
 0x129   : > { %v1687_v17 = vsel %vm1677_vm3, %v1544_v12, 0  ;;  %vm11950_vm8 = vcmp.eq.s32.totalorder %v850_v39, 1  ;;  %v1034_v18 = vrot.slane %v10777_v55, %v11863_v60  ;;  %vm19921_vm0 = vcmask 908288  }
 0x12a   : > { %2059 = vmatpush1.bf16.msra.mxu1 %v1319_v1  ;;  %v1729_v15 = vsel %vm19921_vm0, %v1712_v20, %v11372_v41  ;;  %vm19922_vm6 = vmmov %vm19921_vm0  ;;  %vm1861_vm12 = vcmp.ne.s16.totalorder %v1830_v35, 0  ;;  %v538_v10 = vrot.slane %v509_v38, %v10696_v30  ;;  %v413_v50 = vpop.permute.xlu0 %412  ;;  %v693_v27 = vsel %vm688_vm14, 65537, %v19798_v16  ;;  %v19941_v35 = vld [vmem:[#allocation8_spill] sm:$0xff] }
 0x12b   : > { %10109 = vmatprep.subr.msk.bf16.mxu1 %vm1494_vm1, %v1361_v62  ;;  %vm1862_vm1 = vcmp.ne.s16.totalorder %v1834_v22, 0  ;;  %v1728_v23 = vsel %vm19922_vm6, %v11093_v49, %v1712_v20  ;;  %v726_v11 = vrot.slane %v693_v27, %v10750_v46  ;;  %vm872_vm7 = vmpackc.low %vm11950_vm8, %vm11946_vm5  ;;  %vm11967_vm10 = vcmp.eq.s32.totalorder %v1030_v47, 1  ;;  %v596_v45 = vpop.permute.xlu1 %595  ;;  %v19936_v22 = vld [vmem:[#allocation7_spill] sm:$0xff]  ;;  %v19954_v49 = vld [vmem:[#allocation14_spill] sm:$0xff] }
 0x12c   : > { %v1871_v55 = vsel %vm1861_vm12, %v1728_v23, 0  ;;  %vm11971_vm13 = vcmp.eq.s32.totalorder %v1034_v18, 1  ;;  %v424_v36 = vsel %vm19690_vm11, %v11139_v19, %v413_v50  ;;  %v425_v43 = vsel %vm19690_vm11, %v413_v50, %v19927_v52  ;;  %v10415_v23 = vld [vmem:[%s10542_s22 + $0x1c] ss:$40 sps:$4 sm:$0xff]   ;;  %v10416_v41 = vld [vmem:[%s10542_s22 + $0x18] ss:$40 sps:$4 sm:$0xff]  }
 0x12d   : > { %vm557_vm2 = vcmp.ne.s16.totalorder %v538_v10, 0  ;;  %v722_v31 = vrot.slane %v693_v27, %v10696_v30  ;;  %v877_v25 = vsel %vm872_vm7, 65537, %v19798_v16  ;;  %vm742_vm4 = vcmp.ne.s16.totalorder %v726_v11, 0  ;;  %vm1056_vm3 = vmpackc.low %vm11971_vm13, %vm11967_vm10  ;;  %v19952_v11 = vld [vmem:[#allocation9_spill] sm:$0xff] }
 0x12e   : > { %2061 = vmatpush1.bf16.msra.mxu1 %v1503_v61  ;;  %v910_v54 = vrot.slane %v877_v25, %v10750_v46  ;;  %v567_v19 = vsel %vm557_vm2, %v424_v36, 0  ;;  %v1234_v63 = vrot.slane %v10841_v24, %v11860_v9  ;;  %v1238_v7 = vrot.slane %v10841_v24, %v11863_v60  ;;  %v780_v4 = vpop.permute.xlu0 %779 }
 0x12f   : > { %10110 = vmatprep.subr.msk.bf16.mxu1 %vm1678_vm15, %v1545_v40  ;;  %vm558_vm15 = vcmp.ne.s16.totalorder %v542_v14, 0  ;;  %vm741_vm5 = vcmp.ne.s16.totalorder %v722_v31, 0  ;;  %v906_v8 = vrot.slane %v877_v25, %v10696_v30  ;;  %v1061_v24 = vsel %vm1056_vm3, 65537, %v19798_v16  ;;  %v964_v42 = vpop.permute.xlu1 %963 }
 0x130   : > { %vm926_vm0 = vcmp.ne.s16.totalorder %v910_v54, 0  ;;  %v1094_v62 = vrot.slane %v1061_v24, %v10750_v46  ;;  %v1418_v58 = vrot.slane %v10873_v44, %v11860_v9  ;;  %vm12004_vm6 = vcmp.eq.s32.totalorder %v1234_v63, 1  ;;  %v19956_v54 = vld [vmem:[#allocation10_spill] sm:$0xff] }
 0x131   : > { %vm12008_vm12 = vcmp.eq.s32.totalorder %v1238_v7, 1  ;;  %v1422_v51 = vrot.slane %v10873_v44, %v11863_v60  ;;  %v791_v37 = vsel %vm19689_vm9, %v19936_v22, %v780_v4  ;;  %v792_v61 = vsel %vm19689_vm9, %v780_v4, %v11535_v3 }
 0x132   : > { %2063 = vmatpush1.bf16.msra.mxu1 %v1687_v17  ;;  %v1090_v26 = vrot.slane %v1061_v24, %v10696_v30  ;;  %vm1110_vm7 = vcmp.ne.s16.totalorder %v1094_v62, 0  ;;  %vm1260_vm10 = vmpackc.low %vm12008_vm12, %vm12004_vm6  ;;  %v1602_v44 = vrot.slane %v10942_v6, %v11860_v9  ;;  %vm12025_vm13 = vcmp.eq.s32.totalorder %v1418_v58, 1 }
 0x133   : > { %10111 = vmatprep.subr.msk.bf16.mxu1 %vm1862_vm1, %v1729_v15  ;;  %vm19929_vm1 = vcmask 130048   ;;  %vm12029_vm2 = vcmp.eq.s32.totalorder %v1422_v51, 1  ;;  %v1606_v12 = vrot.slane %v10942_v6, %v11863_v60  ;;  %v1265_v14 = vsel %vm1260_vm10, 65537, %v19798_v16  ;;  %v1168_v15 = vpop.permute.xlu0 %1167 }
 0x134   : > { %v607_v1 = vsel %vm19929_vm1, %v19928_v32, %v596_v45  ;;  %vm19930_vm14 = vmmov %vm19929_vm1  ;;  %v1298_v47 = vrot.slane %v1265_v14, %v10750_v46  ;;  %v1294_v18 = vrot.slane %v1265_v14, %v10696_v30 }
 0x135   : > { %v608_v48 = vsel %vm19930_vm14, %v596_v45, %v11477_v56  ;;  %vm19931_vm8 = vmmov %vm19929_vm1  ;;  %v751_v56 = vsel %vm741_vm5, %v607_v1, 0  ;;  %vm1109_vm1 = vcmp.ne.s16.totalorder %v1090_v26, 0  ;;  %vm12045_vm5 = vcmp.eq.s32.totalorder %v1602_v44, 1 }
 0x136   : > { %2065 = vmatpush1.bf16.msra.mxu1 %v1871_v55  ;;  %vm1444_vm14 = vmpackc.low %vm12029_vm2, %vm12025_vm13  ;;  %vm1313_vm13 = vcmp.ne.s16.totalorder %v1294_v18, 0 }
 0x137   : > { %10120 = vmatprep.subr.msk.bf16.mxu1 %vm558_vm15, %v425_v43  ;;  %vm925_vm15 = vcmp.ne.s16.totalorder %v906_v8, 0  ;;  %v1449_v10 = vsel %vm1444_vm14, 65537, %v19798_v16  ;;  %v1352_v43 = vpop.permute.xlu1 %1351  ;;  %v1536_v32 = vpop.permute.xlu0 %1535 }
 0x138   : > { %v935_v39 = vsel %vm925_vm15, %v791_v37, 0  ;;  %v1482_v50 = vrot.slane %v1449_v10, %v10750_v46  ;;  %vm12069_vm15 = vcmp.eq.s32.totalorder %v1790_v59, 1  ;;  %v1478_v52 = vrot.slane %v1449_v10, %v10696_v30 }
 0x139   : > { %2081 = vmatmul.mubr.bf16.vlgmr.msra.gmra.mrb[0].mxu1 %v11111_v57  ;;  %v10414_v57 = vld [vmem:[%s19507_s2 + $0x4] ss:$8 sps:$4 sm:$0xff]  }
 0x13a   : > { %2135 = vmatpush1.bf16.msra.mxu1 %v567_v19  ;;  %9952 = vmatprep.mubr.msk.bf16.mxu1 %vm19931_vm8, %v10414_v57  ;;  %vm12049_vm8 = vcmp.eq.s32.totalorder %v1606_v12, 1  ;;  %vm1498_vm2 = vcmp.ne.s16.totalorder %v1482_v50, 0  ;;  %vm1497_vm14 = vcmp.ne.s16.totalorder %v1478_v52, 0  ;;  %v19959_v57 = vld [vmem:[#allocation11_spill] sm:$0xff] }
 0x13b   : > { %10121 = vmatprep.subr.msk.bf16.mxu1 %vm742_vm4, %v608_v48  ;;  %vm19942_vm4 = vcmask 7168   ;;  %vm1628_vm6 = vmpackc.low %vm12049_vm8, %vm12045_vm5  ;;  %vm19960_vm8 = vcmask 916480   ;;  %v1720_v62 = vpop.permute.xlu1 %1719 }
 0x13c   : > { %v975_v20 = vsel %vm19942_vm4, %v19941_v35, %v964_v42  ;;  %vm19943_vm3 = vmmov %vm19942_vm4  ;;  %v1633_v31 = vsel %vm1628_vm6, 65537, %v19798_v16  ;;  %v1548_v4 = vsel %vm19960_vm8, %v19959_v57, %v1536_v32 }
 0x13d   : > { %v976_v38 = vsel %vm19943_vm3, %v964_v42, %v11577_v0  ;;  %v1119_v17 = vsel %vm1109_vm1, %v975_v20, 0  ;;  %v1786_v0 = vrot.slane %v10967_v34, %v11860_v9  ;;  %v1666_v45 = vrot.slane %v1633_v31, %v10750_v46 }
 0x13e   : > { %2137 = vmatpush1.bf16.msra.mxu1 %v751_v56  ;;  %vm19957_vm3 = vcmask 924672   ;;  %v1662_v7 = vrot.slane %v1633_v31, %v10696_v30  ;;  %v19962_v56 = vld [vmem:[#allocation12_spill] sm:$0xff] }
 0x13f   : > { %10122 = vmatprep.subr.msk.bf16.mxu1 %vm926_vm0, %v792_v61  ;;  %vm1314_vm0 = vcmp.ne.s16.totalorder %v1298_v47, 0  ;;  %vm12065_vm12 = vcmp.eq.s32.totalorder %v1786_v0, 1  ;;  %v1364_v19 = vsel %vm19957_vm3, %v19956_v54, %v1352_v43  ;;  %vm19958_vm1 = vmmov %vm19957_vm3  ;;  %vm1682_vm5 = vcmp.ne.s16.totalorder %v1666_v45, 0 }
 0x140   : > { %vm1812_vm4 = vmpackc.low %vm12069_vm15, %vm12065_vm12  ;;  %v1365_v63 = vsel %vm19958_vm1, %v1352_v43, %v11675_v2  ;;  %v1507_v8 = vsel %vm1497_vm14, %v1364_v19, 0  ;;  %vm1681_vm6 = vcmp.ne.s16.totalorder %v1662_v7, 0  ;;  %vm19963_vm15 = vcmask 908288  }
 0x141   : > { %v1817_v1 = vsel %vm1812_vm4, 65537, %v19798_v16  ;;  %v1691_v58 = vsel %vm1681_vm6, %v1548_v4, 0  ;;  %v1732_v5 = vsel %vm19963_vm15, %v19962_v56, %v1720_v62 }
 0x142   : > { %2139 = vmatpush1.bf16.msra.mxu1 %v935_v39  ;;  %v1850_v48 = vrot.slane %v1817_v1, %v10750_v46  ;;  %v1846_v2 = vrot.slane %v1817_v1, %v10696_v30 }
 0x143   : > { %10123 = vmatprep.subr.msk.bf16.mxu1 %vm1110_vm7, %v976_v38  ;;  %vm19953_vm7 = vcmask 1039360  }
 0x144   : > { %v1180_v55 = vsel %vm19953_vm7, %v19952_v11, %v1168_v15  ;;  %vm19955_vm10 = vmmov %vm19953_vm7  ;;  %vm1866_vm12 = vcmp.ne.s16.totalorder %v1850_v48, 0 }
 0x145   : > { %v1181_v36 = vsel %vm19955_vm10, %v1168_v15, %v19954_v49  ;;  %v1323_v25 = vsel %vm1313_vm13, %v1180_v55, 0  ;;  %vm19964_vm7 = vmmov %vm19963_vm15  ;;  %vm1865_vm10 = vcmp.ne.s16.totalorder %v1846_v2, 0  ;;  %vm19980_vm13 = vcmask 130048  }
 0x146   : > { %2141 = vmatpush1.bf16.msra.mxu1 %v1119_v17  ;;  %v1733_v21 = vsel %vm19964_vm7, %v1720_v62, %v11789_v28  ;;  %v1875_v51 = vsel %vm1865_vm10, %v1732_v5, 0 }
 0x147   : > { %2142 = vmatprep.subr.bf16.mxu1 %v10415_v23  ;;  %v12104_v22 = vpop.permute.xlu0 %1985 }
 0x148   : > { %v12106_v61 = vpop.permute.xlu1 %1990 }
 0x14a   : > { %2143 = vmatpush1.bf16.msra.mxu1 %v10416_v41 }
 0x14b   : > { %10124 = vmatprep.subr.msk.bf16.mxu1 %vm1314_vm0, %v1181_v36  ;;  %vm19961_vm0 = vmmov %vm19960_vm8 }
 0x14c   : > { %v1549_v24 = vsel %vm19961_vm0, %v1536_v32, %v11758_v33  ;;  %v10417_v33 = vld [vmem:[%s19507_s2] ss:$8 sps:$4 sm:$0xff]  }
 0x14e   : > { %2145 = vmatpush1.bf16.msra.mxu1 %v1323_v25 }
 0x14f   : > { %10125 = vmatprep.subr.msk.bf16.mxu1 %vm1498_vm2, %v1365_v63  ;;  %vm19981_vm2 = vmmov %vm19980_vm13 }
 0x152   : > { %2147 = vmatpush1.bf16.msra.mxu1 %v1507_v8 }
 0x153   : > { %10126 = vmatprep.subr.msk.bf16.mxu1 %vm1682_vm5, %v1549_v24 }
 0x156   : > { %2149 = vmatpush1.bf16.msra.mxu1 %v1691_v58 }
 0x157   : > { %10127 = vmatprep.subr.msk.bf16.mxu1 %vm1866_vm12, %v1733_v21 }
 0x15a   : > { %2151 = vmatpush1.bf16.msra.mxu1 %v1875_v51 }
 0x15d   : > { %2167 = vmatmul.mubr.bf16.vlgmr.msra.gmra.mrb[4].mxu1 %v10417_v33 }
 0x1a0   : > { %v2039_v37 = vpop.f32.mrb[0].mxu0 }
 0x1a1   : > { %v2041_v26 = vpop.f32.mrb[1].mxu0  ;;  %v12109_v42 = vadd.f32 %v2039_v37, %v12104_v22  ;;  %v12265_v37 = vld [vmem:[%s19507_s2 + $0x14] ss:$8 sps:$4 sm:$0xff]  }
 0x1a2   : > { %v2043_v44 = vpop.f32.mrb[2].mxu0  ;;  %v12142_v23 = vadd.f32 %v2041_v26, %v12104_v22  ;;  %9982 = vmatprep.mubr.msk.bf16.mxu1 %vm19980_vm13, %v12265_v37  ;;  %9983 = vmatprep.mubr.msk.bf16.mxu0 %vm19981_vm2, %v12265_v37 }
 0x1a3   : > { %19965 = vst [vmem:[#allocation13_spill] sm:$0xff] %v12109_v42  ;;  %v12112_v28 = vadd.f32 %v2043_v44, %v12106_v61  ;;  %v19551_v39 = vmax.f32 %v12109_v42, 0.0  ;;  %v2045_v40 = vpop.f32.mrb[3].mxu0 }
 0x1a4   : > { %19968 = vst [vmem:[#allocation8_spill] sm:$0xff] %v12142_v23  ;;  %v12145_v10 = vadd.f32 %v2045_v40, %v12106_v61  ;;  %v19549_v55 = vmax.f32 %v12142_v23, 0.0 }
 0x1a5   : > { %19966 = vst [vmem:[#allocation6_spill] sm:$0xff] %v12112_v28  ;;  %v19553_v3 = vmax.f32 %v12112_v28, 0.0 }
 0x1a6   : > { %19969 = vst [vmem:[#allocation9_spill] sm:$0xff] %v12145_v10  ;;  %v19550_v41 = vmax.f32 %v12145_v10, 0.0 }
 0x1a7   : > { %v12120_v12 = vpack.c.bf16 %v19553_v3, %v19551_v39 }
 0x1a8   : > { %v12168_v36 = vpack.c.bf16 %v19550_v41, %v19549_v55 }
 0x1a9   : > { %2442 = vrot.lane.b32.xlu1 %v12120_v12, %s10451_s24  ;;  %2262 = vrot.lane.b32.xlu0 %v12120_v12, %s10450_s23 }
 0x1ad   : > { %2802 = vrot.lane.b32.xlu1 %v12120_v12, %s10453_s26  ;;  %2622 = vrot.lane.b32.xlu0 %v12120_v12, %s10452_s25 }
 0x1b1   : > { %2990 = vrot.lane.b32.xlu1 %v12120_v12, %s10454_s27  ;;  %3170 = vrot.lane.b32.xlu0 %v12120_v12, %s10455_s10 }
 0x1d0   : > { %v2125_v35 = vpop.f32.mrb[4].mxu0 }
 0x1d1   : > { %v2127_v20 = vpop.f32.mrb[5].mxu0  ;;  %v12209_v54 = vadd.f32 %v2125_v35, %v12104_v22 }
 0x1d2   : > { %v2129_v38 = vpop.f32.mrb[6].mxu0  ;;  %v12225_v48 = vadd.f32 %v2127_v20, %v12104_v22 }
 0x1d3   : > { %v2131_v14 = vpop.f32.mrb[7].mxu0  ;;  %19974 = vst [vmem:[#allocation15_spill] sm:$0xff] %v12209_v54  ;;  %v12212_v19 = vadd.f32 %v2129_v38, %v12106_v61  ;;  %v19544_v57 = vmax.f32 %v12209_v54, 0.0 }
 0x1d4   : > { %19978 = vst [vmem:[#allocation19_spill] sm:$0xff] %v12225_v48  ;;  %v12230_v24 = vadd.f32 %v2131_v14, %v12106_v61  ;;  %v19541_v56 = vmax.f32 %v12225_v48, 0.0 }
 0x1d5   : > { %19975 = vst [vmem:[#allocation16_spill] sm:$0xff] %v12212_v19  ;;  %v19546_v4 = vmax.f32 %v12212_v19, 0.0 }
 0x1d6   : > { %19979 = vst [vmem:[#allocation20_spill] sm:$0xff] %v12230_v24  ;;  %v19542_v21 = vmax.f32 %v12230_v24, 0.0 }
 0x1d7   : > { %v12243_v5 = vpack.c.bf16 %v19546_v4, %v19544_v57 }
 0x1d8   : > { %v12260_v33 = vpack.c.bf16 %v19542_v21, %v19541_v56  ;;  %v9959_v56 = vld [vmem:[%s19506_s1 + $0x2] ss:$8 sm:$0xf0] }
 0x1f7   : > { %v12134_v47 = vpop.f32.mrb[8].mxu0 }
 0x1f8   : > { %v2213_v6 = vpop.f32.mrb[9].mxu0  ;;  %v12323_v38 = vadd.f32 %v12134_v47, %v12104_v22 }
 0x1f9   : > { %v12136_v17 = vpop.f32.mrb[10].mxu0  ;;  %v12175_v52 = vadd.f32 %v2213_v6, %v12104_v22 }
 0x1fa   : > { %v2217_v29 = vpop.f32.mrb[11].mxu0  ;;  %19985 = vst [vmem:[#allocation24_spill] sm:$0xff] %v12323_v38  ;;  %v12327_v14 = vadd.f32 %v12136_v17, %v12106_v61 }
 0x1fb   : > { %19972 = vst [vmem:[#allocation11_spill] sm:$0xff] %v12175_v52  ;;  %v12178_v43 = vadd.f32 %v2217_v29, %v12106_v61  ;;  %v19547_v31 = vmax.f32 %v12175_v52, 0.0 }
 0x1fc   : > { %19986 = vst [vmem:[#allocation25_spill] sm:$0xff] %v12327_v14  ;;  %v19538_v47 = vmax.f32 %v12327_v14, 0.0 }
 0x1fd   : > { %19973 = vst [vmem:[#allocation12_spill] sm:$0xff] %v12178_v43  ;;  %v19548_v45 = vmax.f32 %v12178_v43, 0.0 }
 0x1ff   : > { %v12194_v25 = vpack.c.bf16 %v19548_v45, %v19547_v31 }
 0x20c   : > { %v2082_v0 = vpop.f32.mrb[0].mxu1 }
 0x20d   : > { %v12139_v59 = vadd.f32 %v2082_v0, %v12104_v22  ;;  %v2084_v18 = vpop.f32.mrb[1].mxu1  ;;  %v19536_v0 = vmax.f32 %v12323_v38, 0.0 }
 0x20e   : > { %v2086_v15 = vpop.f32.mrb[2].mxu1  ;;  %v12218_v32 = vadd.f32 %v2084_v18, %v12104_v22 }
 0x20f   : > { %19967 = vst [vmem:[#allocation7_spill] sm:$0xff] %v12139_v59  ;;  %v12148_v50 = vadd.f32 %v2086_v15, %v12106_v61  ;;  %v2088_v27 = vpop.f32.mrb[3].mxu1  ;;  %v19554_v34 = vmax.f32 %v12139_v59, 0.0  ;;  %v2302_v15 = vld [vmem:[%s19506_s1] ss:$8 sm:$0xf] }
 0x210   : > { %v12215_v63 = vadd.f32 %v2088_v27, %v12106_v61  ;;  %19977 = vst [vmem:[#allocation18_spill] sm:$0xff] %v12218_v32  ;;  %v19543_v58 = vmax.f32 %v12218_v32, 0.0  ;;  %v2303_v27 = vld [vmem:[%s19506_s1] ss:$8 sm:$0xf0] }
 0x211   : > { %19970 = vst [vmem:[#allocation14_spill] sm:$0xff] %v12148_v50  ;;  %v19552_v11 = vmax.f32 %v12148_v50, 0.0 }
 0x212   : > { %19976 = vst [vmem:[#allocation17_spill] sm:$0xff] %v12215_v63  ;;  %v19545_v2 = vmax.f32 %v12215_v63, 0.0 }
 0x213   : > { %v12158_v49 = vpack.c.bf16 %v19552_v11, %v19554_v34  ;;  %v9970_v34 = vld [vmem:[%s19506_s1 + $0x7] ss:$8 sm:$0xf] }
 0x214   : > { %v12250_v51 = vpack.c.bf16 %v19545_v2, %v19543_v58  ;;  %v9962_v58 = vld [vmem:[%s19506_s1 + $0x3] ss:$8 sm:$0xf0] }
 0x215   : > { %19971 = vst [vmem:[#allocation10_spill] sm:$0xff] %v12158_v49  ;;  %2994 = vrot.lane.b32.xlu1 %v12158_v49, %s10454_s27  ;;  %3174 = vrot.lane.b32.xlu0 %v12158_v49, %s10455_s10 }
 0x219   : > { %2264 = vrot.lane.b32.xlu1 %v12168_v36, %s10450_s23  ;;  %2444 = vrot.lane.b32.xlu0 %v12168_v36, %s10451_s24 }
 0x21d   : > { %2624 = vrot.lane.b32.xlu1 %v12168_v36, %s10452_s25  ;;  %2804 = vrot.lane.b32.xlu0 %v12168_v36, %s10453_s26 }
 0x221   : > { %3172 = vrot.lane.b32.xlu1 %v12168_v36, %s10455_s10  ;;  %2992 = vrot.lane.b32.xlu0 %v12168_v36, %s10454_s27 }
 0x225   : > { %2251 = vrot.lane.b32.xlu1 %v12194_v25, %s10450_s23  ;;  %2440 = vrot.lane.b32.xlu0 %v12194_v25, %s10451_s24 }
 0x229   : > { %3350 = vrot.lane.b32.xlu1 %v12120_v12, %s10456_s11  ;;  %3352 = vrot.lane.b32.xlu0 %v12168_v36, %s10456_s11 }
 0x22d   : > { %2620 = vrot.lane.b32.xlu1 %v12194_v25, %s10452_s25  ;;  %2800 = vrot.lane.b32.xlu0 %v12194_v25, %s10453_s26 }
 0x230   : > { %v2168_v7 = vpop.f32.mrb[4].mxu1 }
 0x231   : > { %v2170_v1 = vpop.f32.mrb[5].mxu1  ;;  %3354 = vrot.lane.b32.xlu1 %v12158_v49, %s10456_s11  ;;  %3530 = vrot.lane.b32.xlu0 %v12120_v12, %s10457_s15  ;;  %v12291_v44 = vadd.f32 %v2168_v7, %v12104_v22  ;;  %v2304_v7 = vor.u32 %v2303_v27, %v2302_v15  ;;  %v19990_v27 = vld [vmem:[#allocation4_spill] sm:$0xff] }
 0x232   : > { %v2172_v8 = vpop.f32.mrb[6].mxu1  ;;  %v12333_v29 = vadd.f32 %v2170_v1, %v12104_v22  ;;  %v12351_v22 = vpack.c.bf16 %v19538_v47, %v19536_v0  ;;  %v9956_v0 = vld [vmem:[%s19506_s1 + $0x1] ss:$8 sm:$0xf0] }
 0x233   : > { %v2174_v62 = vpop.f32.mrb[7].mxu1  ;;  %v12288_v26 = vadd.f32 %v2172_v8, %v12106_v61  ;;  %19983 = vst [vmem:[#allocation22_spill] sm:$0xff] %v12291_v44  ;;  %v19539_v35 = vmax.f32 %v12291_v44, 0.0  ;;  %vm2306_vm4 = vcmp.ne.f32.partialorder %v2304_v7, 0.0  ;;  %v12384_v8 = vpop.permute.xlu1 %2442 }
 0x234   : > { %v12330_v6 = vadd.f32 %v2174_v62, %v12106_v61  ;;  %19988 = vst [vmem:[#allocation27_spill] sm:$0xff] %v12333_v29  ;;  %v19535_v17 = vmax.f32 %v12333_v29, 0.0  ;;  %v12382_v1 = vsel %vm2306_vm4, 1, %v19798_v16  ;;  %v12386_v62 = vpop.permute.xlu0 %2262 }
 0x235   : > { %3532 = vrot.lane.b32.xlu1 %v12168_v36, %s10457_s15  ;;  %3534 = vrot.lane.b32.xlu0 %v12158_v49, %s10457_s15  ;;  %19982 = vst [vmem:[#allocation21_spill] sm:$0xff] %v12288_v26  ;;  %v19540_v40 = vmax.f32 %v12288_v26, 0.0  ;;  %v2313_v15 = vrot.slane %v12382_v1, %v10696_v30  ;;  %v2317_v7 = vrot.slane %v12382_v1, %v19990_v27 }
 0x236   : > { %19987 = vst [vmem:[#allocation26_spill] sm:$0xff] %v12330_v6  ;;  %v19537_v18 = vmax.f32 %v12330_v6, 0.0 }
 0x237   : > { %v12307_v20 = vpack.c.bf16 %v19540_v40, %v19539_v35  ;;  %vm2350_vm3 = vcmp.eq.s32.totalorder %v2313_v15, 1  ;;  %vm2351_vm1 = vcmp.eq.s32.totalorder %v2317_v7, 1  ;;  %v9958_v40 = vld [vmem:[%s19506_s1 + $0x2] ss:$8 sm:$0xf] }
 0x238   : > { %v12357_v61 = vpack.c.bf16 %v19537_v18, %v19535_v17  ;;  %v9955_v17 = vld [vmem:[%s19506_s1 + $0x1] ss:$8 sm:$0xf]  ;;  %v12402_v18 = vpop.permute.xlu1 %2802  ;;  %v12404_v47 = vpop.permute.xlu0 %2622  ;;  %vm2360_vm14 = vmpackc.low %vm2351_vm1, %vm2350_vm3  ;;  %v2664_v21 = vor.u32 %v9959_v56, %v9958_v40  ;;  %v9961_v7 = vld [vmem:[%s19506_s1 + $0x3] ss:$8 sm:$0xf] }
 0x239   : > { %2268 = vrot.lane.b32.xlu1 %v12250_v51, %s10450_s23  ;;  %2270 = vrot.lane.b32.xlu0 %v12243_v5, %s10450_s23  ;;  %19984 = vst [vmem:[#allocation23_spill] sm:$0xff] %v12307_v20  ;;  %v2484_v35 = vor.u32 %v9956_v0, %v9955_v17  ;;  %v2365_v17 = vsel %vm2360_vm14, 65537, %v19798_v16  ;;  %v2844_v2 = vor.u32 %v9962_v58, %v9961_v7  ;;  %v9965_v58 = vld [vmem:[%s19506_s1 + $0x5] ss:$8 sm:$0xf0] }
 0x23a   : > { %19989 = vst [vmem:[#allocation28_spill] sm:$0xff] %v12357_v61  ;;  %vm2666_vm8 = vcmp.ne.f32.partialorder %v2664_v21, 0.0  ;;  %v2377_v57 = vrot.slane %v2365_v17, %v10750_v46  ;;  %v9964_v21 = vld [vmem:[%s19506_s1 + $0x5] ss:$8 sm:$0xf] }
 0x23b   : > { %vm2486_vm5 = vcmp.ne.f32.partialorder %v2484_v35, 0.0  ;;  %v12448_v45 = vsel %vm2666_vm8, 1, %v19798_v16  ;;  %vm2846_vm6 = vcmp.ne.f32.partialorder %v2844_v2, 0.0 }
 0x23c   : > { %v12420_v15 = vpop.permute.xlu1 %2990  ;;  %v12422_v0 = vpop.permute.xlu0 %3170  ;;  %v12436_v56 = vsel %vm2486_vm5, 1, %v19798_v16  ;;  %vm2411_vm0 = vcmp.ne.s16.totalorder %v2377_v57, 0  ;;  %v2673_v41 = vrot.slane %v12448_v45, %v10696_v30  ;;  %v2677_v39 = vrot.slane %v12448_v45, %v19990_v27 }
 0x23d   : > { %2272 = vrot.lane.b32.xlu1 %v12260_v33, %s10450_s23  ;;  %2448 = vrot.lane.b32.xlu0 %v12250_v51, %s10451_s24  ;;  %v2493_v4 = vrot.slane %v12436_v56, %v10696_v30  ;;  %v2497_v31 = vrot.slane %v12436_v56, %v19990_v27  ;;  %v3034_v57 = vor.u32 %v9965_v58, %v9964_v21  ;;  %v12484_v2 = vsel %vm2846_vm6, 1, %v19798_v16  ;;  %v9968_v58 = vld [vmem:[%s19506_s1 + $0x6] ss:$8 sm:$0xf0] }
 0x23e   : > { %vm12497_vm10 = vcmp.eq.s32.totalorder %v2673_v41, 1  ;;  %vm12501_vm13 = vcmp.eq.s32.totalorder %v2677_v39, 1  ;;  %v2853_v3 = vrot.slane %v12484_v2, %v10696_v30  ;;  %v2857_v39 = vrot.slane %v12484_v2, %v19990_v27  ;;  %v9971_v41 = vld [vmem:[%s19506_s1 + $0x7] ss:$8 sm:$0xf0] }
 0x23f   : > { %vm12471_vm12 = vcmp.eq.s32.totalorder %v2493_v4, 1  ;;  %vm12475_vm15 = vcmp.eq.s32.totalorder %v2497_v31, 1  ;;  %v9967_v4 = vld [vmem:[%s19506_s1 + $0x6] ss:$8 sm:$0xf]  ;;  %vm3036_vm2 = vcmp.ne.f32.partialorder %v3034_v57, 0.0  ;;  %v2373_v57 = vrot.slane %v2365_v17, %v10696_v30  ;;  %vm2720_vm4 = vmpackc.low %vm12501_vm13, %vm12497_vm10 }
 0x240   : > { %vm2540_vm7 = vmpackc.low %vm12475_vm15, %vm12471_vm12  ;;  %v3214_v6 = vor.u32 %v9968_v58, %v9967_v4  ;;  %v12534_v48 = vsel %vm3036_vm2, 1, %v19798_v16  ;;  %v3394_v24 = vor.u32 %v9971_v41, %v9970_v34  ;;  %v2725_v4 = vsel %vm2720_vm4, 65537, %v19798_v16 }
 0x241   : > { %2450 = vrot.lane.b32.xlu1 %v12243_v5, %s10451_s24  ;;  %2452 = vrot.lane.b32.xlu0 %v12260_v33, %s10451_s24  ;;  %v2545_v38 = vsel %vm2540_vm7, 65537, %v19798_v16  ;;  %vm12542_vm3 = vcmp.eq.s32.totalorder %v2853_v3, 1  ;;  %vm12546_vm1 = vcmp.eq.s32.totalorder %v2857_v39, 1  ;;  %vm12550_vm14 = vcmp.ne.s16.totalorder %v2373_v57, 0 }
 0x242   : > { %v2557_v26 = vrot.slane %v2545_v38, %v10750_v46  ;;  %v2553_v17 = vrot.slane %v2545_v38, %v10696_v30  ;;  %vm3216_vm5 = vcmp.ne.f32.partialorder %v3214_v6, 0.0  ;;  %v3043_v38 = vrot.slane %v12534_v48, %v10696_v30  ;;  %v9973_v3 = vld [vmem:[%s19506_s1 + $0x50] ss:$8 sm:$0xf] }
 0x243   : > { %v9974_v39 = vld [vmem:[%s19506_s1 + $0x50] ss:$8 sm:$0xf0]  ;;  %v2737_v32 = vrot.slane %v2725_v4, %v10750_v46  ;;  %v3047_v54 = vrot.slane %v12534_v48, %v19990_v27  ;;  %v12591_v63 = vsel %vm3216_vm5, 1, %v19798_v16  ;;  %vm3396_vm12 = vcmp.ne.f32.partialorder %v3394_v24, 0.0 }
 0x244   : > { %vm12569_vm8 = vcmp.ne.s16.totalorder %v2557_v26, 0  ;;  %vm12586_vm6 = vcmp.ne.s16.totalorder %v2553_v17, 0  ;;  %vm20010_vm15 = vcmask 130048   ;;  %v2733_v58 = vrot.slane %v2725_v4, %v10696_v30 }
 0x245   : > { %2628 = vrot.lane.b32.xlu1 %v12250_v51, %s10452_s25  ;;  %2630 = vrot.lane.b32.xlu0 %v12243_v5, %s10452_s25  ;;  %vm20011_vm7 = vmmov %vm20010_vm15  ;;  %vm12612_vm10 = vcmp.eq.s32.totalorder %v3043_v38, 1  ;;  %vm2771_vm13 = vcmp.ne.s16.totalorder %v2737_v32, 0  ;;  %vm12617_vm2 = vcmp.eq.s32.totalorder %v3047_v54, 1  ;;  %v3223_v32 = vrot.slane %v12591_v63, %v10696_v30 }
 0x246   : > { %v3227_v54 = vrot.slane %v12591_v63, %v19990_v27  ;;  %vm12637_vm4 = vcmp.ne.s16.totalorder %v2733_v58, 0  ;;  %v2869_v50 = vrot.slane %v12484_v2, %v10750_v46 }
 0x247   : > { %vm12663_vm5 = vcmp.eq.s32.totalorder %v3223_v32, 1 }
 0x249   : > { %2632 = vrot.lane.b32.xlu1 %v12260_v33, %s10452_s25  ;;  %2808 = vrot.lane.b32.xlu0 %v12250_v51, %s10453_s26 }
 0x24d   : > { %2810 = vrot.lane.b32.xlu1 %v12243_v5, %s10453_s26  ;;  %2812 = vrot.lane.b32.xlu0 %v12260_v33, %s10453_s26 }
 0x251   : > { %2998 = vrot.lane.b32.xlu1 %v12243_v5, %s10454_s27  ;;  %3000 = vrot.lane.b32.xlu0 %v12260_v33, %s10454_s27 }
 0x255   : > { %3002 = vrot.lane.b32.xlu1 %v12307_v20, %s10454_s27  ;;  %3178 = vrot.lane.b32.xlu0 %v12243_v5, %s10455_s10 }
 0x259   : > { %3180 = vrot.lane.b32.xlu1 %v12260_v33, %s10455_s10  ;;  %3182 = vrot.lane.b32.xlu0 %v12307_v20, %s10455_s10 }
 0x25d   : > { %3358 = vrot.lane.b32.xlu1 %v12243_v5, %s10456_s11  ;;  %3360 = vrot.lane.b32.xlu0 %v12260_v33, %s10456_s11 }
 0x261   : > { %3362 = vrot.lane.b32.xlu1 %v12307_v20, %s10456_s11  ;;  %3538 = vrot.lane.b32.xlu0 %v12243_v5, %s10457_s15 }
 0x265   : > { %3540 = vrot.lane.b32.xlu1 %v12260_v33, %s10457_s15  ;;  %3542 = vrot.lane.b32.xlu0 %v12307_v20, %s10457_s15 }
 0x269   : > { %2276 = vrot.lane.b32.xlu1 %v12357_v61, %s10450_s23  ;;  %2278 = vrot.lane.b32.xlu0 %v12351_v22, %s10450_s23 }
 0x26d   : > { %2456 = vrot.lane.b32.xlu1 %v12357_v61, %s10451_s24  ;;  %2458 = vrot.lane.b32.xlu0 %v12351_v22, %s10451_s24 }
 0x271   : > { %2636 = vrot.lane.b32.xlu1 %v12357_v61, %s10452_s25  ;;  %2638 = vrot.lane.b32.xlu0 %v12351_v22, %s10452_s25 }
 0x275   : > { %2816 = vrot.lane.b32.xlu1 %v12357_v61, %s10453_s26  ;;  %2818 = vrot.lane.b32.xlu0 %v12351_v22, %s10453_s26 }
 0x279   : > { %3006 = vrot.lane.b32.xlu1 %v12351_v22, %s10454_s27  ;;  %3186 = vrot.lane.b32.xlu0 %v12351_v22, %s10455_s10 }
 0x27d   : > { %2266 = vrot.lane.b32.xlu1 %v12158_v49, %s10450_s23  ;;  %3008 = vrot.lane.b32.xlu0 %v12194_v25, %s10454_s27 }
 0x281   : > { %3366 = vrot.lane.b32.xlu1 %v12351_v22, %s10456_s11  ;;  %2446 = vrot.lane.b32.xlu0 %v12158_v49, %s10451_s24 }
 0x285   : > { %3188 = vrot.lane.b32.xlu1 %v12194_v25, %s10455_s10  ;;  %3368 = vrot.lane.b32.xlu0 %v12194_v25, %s10456_s11 }
 0x287   : > { %v12438_v40 = vpop.permute.xlu1 %2994  ;;  %v12440_v35 = vpop.permute.xlu0 %3174 }
 0x288   : > { %19991 = vst [vmem:[#allocation29_spill] sm:$0xff] %v12440_v35 }
 0x289   : > { %2626 = vrot.lane.b32.xlu1 %v12158_v49, %s10452_s25  ;;  %3546 = vrot.lane.b32.xlu0 %v12351_v22, %s10457_s15 }
 0x28b   : > { %v12460_v7 = vpop.permute.xlu1 %2264  ;;  %v12462_v55 = vpop.permute.xlu0 %2444 }
 0x28c   : > { %v2280_v11 = vsel %vm19690_vm11, %v12386_v62, %v12460_v7  ;;  %v2460_v52 = vsel %vm20011_vm7, %v12384_v8, %v12462_v55 }
 0x28d   : > { %3548 = vrot.lane.b32.xlu1 %v12194_v25, %s10457_s15  ;;  %2806 = vrot.lane.b32.xlu0 %v12158_v49, %s10453_s26 }
 0x28e   : > { %10136 = vmatprep.subr.msk.bf16.mxu1 %vm2411_vm0, %v2280_v11  ;;  %vm2900_vm0 = vmpackc.low %vm12546_vm1, %vm12542_vm3 }
 0x28f   : > { %v12489_v29 = vpop.permute.xlu1 %2624  ;;  %v12491_v31 = vpop.permute.xlu0 %2804  ;;  %v2905_v24 = vsel %vm2900_vm0, 65537, %v19798_v16  ;;  %vm3090_vm1 = vmpackc.low %vm12617_vm2, %vm12612_vm10  ;;  %vm20022_vm0 = vcmask 7168  }
 0x290   : > { %v2640_v11 = vsel %vm19689_vm9, %v12404_v47, %v12489_v29 }
 0x291   : > { %2996 = vrot.lane.b32.xlu1 %v12250_v51, %s10454_s27  ;;  %3176 = vrot.lane.b32.xlu0 %v12250_v51, %s10455_s10 }
 0x293   : > { %v12528_v14 = vpop.permute.xlu1 %3172  ;;  %v12530_v44 = vpop.permute.xlu0 %2992 }
 0x295   : > { %3356 = vrot.lane.b32.xlu1 %v12250_v51, %s10456_s11  ;;  %3536 = vrot.lane.b32.xlu0 %v12250_v51, %s10457_s15 }
 0x297   : > { %v12554_v34 = vpop.permute.xlu1 %2251  ;;  %v12556_v41 = vpop.permute.xlu0 %2440 }
 0x298   : > { %v2300_v57 = vsel %vm19690_vm11, %v12554_v34, %v12386_v62  ;;  %v2480_v19 = vsel %vm20010_vm15, %v12556_v41, %v12384_v8  ;;  %v2917_v8 = vrot.slane %v2905_v24, %v10750_v46 }
 0x299   : > { %2274 = vrot.lane.b32.xlu1 %v12307_v20, %s10450_s23  ;;  %2454 = vrot.lane.b32.xlu0 %v12307_v20, %s10451_s24  ;;  %v2420_v26 = vsel %vm12550_vm14, %v2300_v57, 0  ;;  %v3574_v57 = vor.u32 %v9974_v39, %v9973_v3  ;;  %v2600_v21 = vsel %vm12586_vm6, %v2480_v19, 0  ;;  %v2913_v3 = vrot.slane %v2905_v24, %v10696_v30  ;;  %vm20023_vm6 = vmmov %vm20022_vm0  ;;  %v9979_v24 = vld [vmem:[%s19508_s3 + $0x18] sm:$0xff] }
 0x29a   : > { %3829 = vmatpush1.bf16.msra.mxu1 %v2420_v26  ;;  %vm2951_vm14 = vcmp.ne.s16.totalorder %v2917_v8, 0  ;;  %v2820_v4 = vsel %vm20023_vm6, %v12402_v18, %v12491_v31 }
 0x29b   : > { %v12600_v17 = vpop.permute.xlu1 %3350  ;;  %10137 = vmatprep.subr.msk.bf16.mxu1 %vm12569_vm8, %v2460_v52  ;;  %v12604_v43 = vpop.permute.xlu0 %3352  ;;  %v12622_v52 = vsel %vm3396_vm12, 1, %v19798_v16  ;;  %vm3576_vm3 = vcmp.ne.f32.partialorder %v3574_v57, 0.0  ;;  %vm12667_vm8 = vcmp.eq.s32.totalorder %v3227_v54, 1  ;;  %vm2950_vm12 = vcmp.ne.s16.totalorder %v2913_v3, 0 }
 0x29c   : > { %v3403_v6 = vrot.slane %v12622_v52, %v10696_v30  ;;  %v3407_v58 = vrot.slane %v12622_v52, %v19990_v27  ;;  %vm3270_vm7 = vmpackc.low %vm12667_vm8, %vm12663_vm5 }
 0x29d   : > { %2634 = vrot.lane.b32.xlu1 %v12307_v20, %s10452_s25  ;;  %2814 = vrot.lane.b32.xlu0 %v12307_v20, %s10453_s26  ;;  %v3275_v23 = vsel %vm3270_vm7, 65537, %v19798_v16 }
 0x29e   : > { %3831 = vmatpush1.bf16.msra.mxu1 %v2600_v21  ;;  %v3095_v21 = vsel %vm3090_vm1, 65537, %v19798_v16  ;;  %vm12685_vm15 = vcmp.eq.s32.totalorder %v3403_v6, 1  ;;  %vm12694_vm10 = vcmp.eq.s32.totalorder %v3407_v58, 1  ;;  %v9978_v58 = vld [vmem:[%s19508_s3 + $0x10] sm:$0xff]  ;;  %v3287_v10 = vrot.slane %v3275_v23, %v10750_v46 }
 0x29f   : > { %v12642_v39 = vpop.permute.xlu1 %2620  ;;  %10138 = vmatprep.subr.msk.bf16.mxu1 %vm2771_vm13, %v2640_v11  ;;  %v12644_v19 = vpop.permute.xlu0 %2800  ;;  %v3107_v38 = vrot.slane %v3095_v21, %v10750_v46  ;;  %vm3450_vm13 = vmpackc.low %vm12694_vm10, %vm12685_vm15  ;;  %vm20043_vm15 = vcmask 924672  }
 0x2a0   : > { %v2660_v62 = vsel %vm19689_vm9, %v12642_v39, %v12404_v47  ;;  %v12672_v47 = vsel %vm3576_vm3, 1, %v19798_v16  ;;  %v2840_v8 = vsel %vm20022_vm0, %v12644_v19, %v12402_v18  ;;  %vm20044_vm7 = vmmov %vm20043_vm15 }
 0x2a1   : > { %3004 = vrot.lane.b32.xlu1 %v12357_v61, %s10454_s27  ;;  %3184 = vrot.lane.b32.xlu0 %v12357_v61, %s10455_s10  ;;  %v2780_v57 = vsel %vm12637_vm4, %v2660_v62, 0  ;;  %v3583_v3 = vrot.slane %v12672_v47, %v10696_v30  ;;  %v3587_v6 = vrot.slane %v12672_v47, %v19990_v27  ;;  %v2960_v62 = vsel %vm2950_vm12, %v2840_v8, 0 }
 0x2a2   : > { %3833 = vmatpush1.bf16.msra.mxu1 %v2780_v57  ;;  %v3103_v57 = vrot.slane %v3095_v21, %v10696_v30  ;;  %v2329_v8 = vrot.slane %v12382_v1, %v10750_v46  ;;  %v20030_v21 = vld [vmem:[#allocation5_spill] sm:$0xff]  ;;  %vm3141_vm2 = vcmp.ne.s16.totalorder %v3107_v38, 0  ;;  %vm3321_vm12 = vcmp.ne.s16.totalorder %v3287_v10, 0 }
 0x2a3   : > { %v12681_v32 = vpop.permute.xlu1 %3354  ;;  %10139 = vmatprep.subr.msk.bf16.mxu1 %vm2951_vm14, %v2820_v4  ;;  %v12683_v54 = vpop.permute.xlu0 %3530  ;;  %vm12728_vm4 = vcmp.eq.s32.totalorder %v3583_v3, 1  ;;  %vm12732_vm3 = vcmp.eq.s32.totalorder %v3587_v6, 1  ;;  %vm20037_vm14 = vcmask 1039360   ;;  %v3283_v3 = vrot.slane %v3275_v23, %v10696_v30 }
 0x2a4   : > { %20024 = vst [vmem:[#allocation30_spill] sm:$0xff] %v12681_v32  ;;  %vm12736_vm1 = vcmp.ne.s16.totalorder %v3103_v57, 0  ;;  %v3010_v38 = vsel %vm20037_vm14, %v12420_v15, %v12530_v44  ;;  %vm20038_vm5 = vmmov %vm20037_vm14  ;;  %v3455_v6 = vsel %vm3450_vm13, 65537, %v19798_v16  ;;  %vm12757_vm0 = vcmp.eq.s32.totalorder %v2329_v8, 1 }
 0x2a5   : > { %3364 = vrot.lane.b32.xlu1 %v12357_v61, %s10456_s11  ;;  %3544 = vrot.lane.b32.xlu0 %v12357_v61, %s10457_s15  ;;  %v3011_v18 = vsel %vm20038_vm5, %v12530_v44, %v12438_v40  ;;  %vm3630_vm8 = vmpackc.low %vm12732_vm3, %vm12728_vm4  ;;  %v2509_v23 = vrot.slane %v12436_v56, %v10750_v46  ;;  %v3150_v42 = vsel %vm12736_vm1, %v3010_v38, 0  ;;  %v3463_v8 = vrot.slane %v3455_v6, %v10696_v30  ;;  %v9954_v61 = vld [vmem:[%s19506_s1 + $0x40] ss:$8 sm:$0x3] }
 0x2a6   : > { %3835 = vmatpush1.bf16.msra.mxu1 %v2960_v62  ;;  %v2333_v62 = vrot.slane %v12382_v1, %v20030_v21  ;;  %vm12779_vm10 = vcmp.ne.s16.totalorder %v3283_v3, 0  ;;  %v3635_v10 = vsel %vm3630_vm8, 65537, %v19798_v16  ;;  %v2693_v44 = vrot.slane %v12448_v45, %v20030_v21 }
 0x2a7   : > { %v12713_v26 = vpop.permute.xlu1 %3532  ;;  %3836 = vmatprep.subr.bf16.mxu1 %v12168_v36  ;;  %v12716_v4 = vpop.permute.xlu0 %3534  ;;  %v3467_v36 = vrot.slane %v3455_v6, %v10750_v46  ;;  %v3647_v3 = vrot.slane %v3635_v10, %v10750_v46  ;;  %vm12807_vm1 = vcmp.ne.s16.totalorder %v3463_v8, 0  ;;  %vm20054_vm14 = vcmask 916480  }
 0x2a8   : > { %20029 = vst [vmem:[#allocation31_spill] sm:$0xff] %v12716_v4  ;;  %vm12761_vm6 = vcmp.eq.s32.totalorder %v2333_v62, 1  ;;  %v3190_v62 = vsel %vm20043_vm15, %v12422_v0, %v12528_v14  ;;  %vm20055_vm5 = vmmov %vm20054_vm14  ;;  %v2873_v8 = vrot.slane %v12484_v2, %v20030_v21 }
 0x2a9   : > { %3808 = vperm.xlu1 %10367, %v9978_v58   ;;  %3813 = vperm.xlu0 %10366, %v9979_v24   ;;  %v2513_v24 = vrot.slane %v12436_v56, %v20030_v21  ;;  %vm2362_vm13 = vmpackc.low %vm12761_vm6, %vm12757_vm0  ;;  %vm3501_vm3 = vcmp.ne.s16.totalorder %v3467_v36, 0  ;;  %v3370_v36 = vsel %vm20054_vm14, %v12600_v17, %v12604_v43  ;;  %v3371_v28 = vsel %vm20055_vm5, %v12604_v43, %v12681_v32 }
 0x2aa   : > { %3837 = vmatpush1.bf16.msra.mxu1 %v12120_v12  ;;  %v2689_v12 = vrot.slane %v12448_v45, %v10750_v46  ;;  %vm3681_vm0 = vcmp.ne.s16.totalorder %v3647_v3, 0 }
 0x2ab   : > { %v12749_v58 = vpop.permute.xlu1 %2268  ;;  %10140 = vmatprep.subr.msk.bf16.mxu1 %vm3141_vm2, %v3011_v18  ;;  %v12751_v57 = vpop.permute.xlu0 %2270  ;;  %v3191_v18 = vsel %vm20044_vm7, %v12528_v14, %v12440_v35  ;;  %vm12792_vm2 = vcmp.eq.s32.totalorder %v2509_v23, 1  ;;  %vm12796_vm4 = vcmp.eq.s32.totalorder %v2513_v24, 1  ;;  %v3643_v24 = vrot.slane %v3635_v10, %v10696_v30 }
 0x2ac   : > { %vm2542_vm8 = vmpackc.low %vm12796_vm4, %vm12792_vm2  ;;  %vm12830_vm6 = vcmp.eq.s32.totalorder %v2689_v12, 1  ;;  %v3510_v14 = vsel %vm12807_vm1, %v3370_v36, 0  ;;  %vm20063_vm7 = vcmask 908288   ;;  %vm12856_vm2 = vcmp.eq.s32.totalorder %v2873_v8, 1 }
 0x2ad   : > { %vm12840_vm15 = vcmp.ne.s16.totalorder %v3643_v24, 0  ;;  %v2547_v3 = vsel %vm2542_vm8, 65537, %v19798_v16  ;;  %v3550_v12 = vsel %vm20063_vm7, %v12683_v54, %v12713_v26  ;;  %v2283_v59 = vsel %vm19690_vm11, %v12749_v58, %v12751_v57 }
 0x2ae   : > { %3839 = vmatpush1.bf16.msra.mxu1 %v3150_v42  ;;  %v3330_v42 = vsel %vm12779_vm10, %v3190_v62, 0  ;;  %vm20064_vm10 = vmmov %vm20063_vm7  ;;  %v3690_v8 = vsel %vm12840_vm15, %v3550_v12, 0  ;;  %v3423_v23 = vrot.slane %v12622_v52, %v20030_v21 }
 0x2af   : > { %v12788_v11 = vpop.permute.xlu1 %2272  ;;  %10141 = vmatprep.subr.msk.bf16.mxu1 %vm3321_vm12, %v3191_v18  ;;  %v12790_v38 = vpop.permute.xlu0 %2448  ;;  %v2367_v18 = vsel %vm2362_vm13, 65537, %v19798_v16  ;;  %vm12834_vm12 = vcmp.eq.s32.totalorder %v2693_v44, 1  ;;  %v3551_v44 = vsel %vm20064_vm10, %v12713_v26, %v12716_v4  ;;  %vm12852_vm13 = vcmp.eq.s32.totalorder %v2869_v50, 1 }
 0x2b0   : > { %20047 = vst [vmem:[#allocation32_spill] sm:$0xff] %v12788_v11  ;;  %vm2722_vm4 = vmpackc.low %vm12834_vm12, %vm12830_vm6  ;;  %v2573_v26 = vrot.slane %v2547_v3, %v10750_v46  ;;  %v2569_v50 = vrot.slane %v2547_v3, %v10696_v30  ;;  %v2284_v43 = vsel %vm19690_vm11, %v12751_v57, %v12788_v11  ;;  %vm20078_vm6 = vcmask 130048  }
 0x2b1   : > { %vm2902_vm14 = vmpackc.low %vm12856_vm2, %vm12852_vm13  ;;  %v2727_v6 = vsel %vm2722_vm4, 65537, %v19798_v16  ;;  %vm2307_vm13 = vcmp.ne.f32.partialorder %v9954_v61, 0.0 }
 0x2b2   : > { %3841 = vmatpush1.bf16.msra.mxu1 %v3330_v42  ;;  %v2393_v42 = vrot.slane %v2367_v18, %v10750_v46  ;;  %vm12898_vm5 = vcmp.ne.s16.totalorder %v2573_v26, 0  ;;  %vm12902_vm8 = vcmp.ne.s16.totalorder %v2569_v50, 0  ;;  %v2753_v57 = vrot.slane %v2727_v6, %v10750_v46  ;;  %vm20079_vm12 = vmmov %vm20078_vm6 }
 0x2b3   : > { %v2451_v62 = vpop.permute.xlu1 %2450  ;;  %10142 = vmatprep.subr.msk.bf16.mxu1 %vm3501_vm3, %v3371_v28  ;;  %v12827_v10 = vpop.permute.xlu0 %2452  ;;  %v2389_v28 = vrot.slane %v2367_v18, %v10696_v30  ;;  %v3239_v50 = vrot.slane %v12591_v63, %v10750_v46  ;;  %vm20082_vm7 = vmmov %vm20078_vm6 }
 0x2b4   : > { %20056 = vst [vmem:[#allocation33_spill] sm:$0xff] %v12827_v10  ;;  %vm2415_vm3 = vcmp.ne.s16.totalorder %v2393_v42, 0  ;;  %v3059_v42 = vrot.slane %v12534_v48, %v10750_v46  ;;  %v2463_v11 = vsel %vm20078_vm6, %v12790_v38, %v2451_v62  ;;  %vm2775_vm10 = vcmp.ne.s16.totalorder %v2753_v57, 0 }
 0x2b5   : > { %vm12875_vm1 = vcmp.ne.s16.totalorder %v2389_v28, 0  ;;  %v3063_v28 = vrot.slane %v12534_v48, %v20030_v21  ;;  %vm12986_vm6 = vcmp.eq.s32.totalorder %v3423_v23, 1 }
 0x2b6   : > { %3843 = vmatpush1.bf16.msra.mxu1 %v3510_v14  ;;  %v12873_v14 = vld [vmem:[%s19507_s2 + $0x10] ss:$8 sps:$4 sm:$0xff]   ;;  %v2424_v20 = vsel %vm12875_vm1, %v2283_v59, 0 }
 0x2b7   : > { %v12860_v18 = vpop.permute.xlu1 %2628  ;;  %10143 = vmatprep.subr.msk.bf16.mxu1 %vm3681_vm0, %v3551_v44  ;;  %v2631_v36 = vpop.permute.xlu0 %2630  ;;  %vm12912_vm0 = vcmp.eq.s32.totalorder %v3059_v42, 1  ;;  %v2464_v44 = vsel %vm20079_vm12, %v2451_v62, %v12827_v10  ;;  %vm12925_vm15 = vcmp.eq.s32.totalorder %v3063_v28, 1  ;;  %v3243_v42 = vrot.slane %v12591_v63, %v20030_v21 }
 0x2b8   : > { %v3419_v28 = vrot.slane %v12622_v52, %v10750_v46  ;;  %v2604_v10 = vsel %vm12902_vm8, %v2463_v11, 0  ;;  %vm3092_vm4 = vmpackc.low %vm12925_vm15, %vm12912_vm0  ;;  %v2643_v57 = vsel %vm19689_vm9, %v12860_v18, %v2631_v36  ;;  %vm20096_vm12 = vcmask 7168  }
 0x2b9   : > { %vm12961_vm1 = vcmp.eq.s32.totalorder %v3243_v42, 1  ;;  %vm20097_vm15 = vmmov %vm20096_vm12 }
 0x2ba   : > { %3845 = vmatpush1.bf16.msra.mxu1 %v3690_v8  ;;  %v2907_v8 = vsel %vm2902_vm14, 65537, %v19798_v16  ;;  %vm12973_vm8 = vcmp.eq.s32.totalorder %v3419_v28, 1 }
 0x2bb   : > { %v12894_v3 = vpop.permute.xlu1 %2632  ;;  %10152 = vmatprep.subr.msk.bf16.mxu1 %vm2415_vm3, %v2284_v43  ;;  %v12896_v12 = vpop.permute.xlu0 %2808  ;;  %v2749_v43 = vrot.slane %v2727_v6, %v10696_v30  ;;  %v2933_v62 = vrot.slane %v2907_v8, %v10750_v46  ;;  %vm12957_vm3 = vcmp.eq.s32.totalorder %v3239_v50, 1 }
 0x2bc   : > { %20071 = vst [vmem:[#allocation34_spill] sm:$0xff] %v12894_v3  ;;  %v2644_v61 = vsel %vm19689_vm9, %v2631_v36, %v12894_v3  ;;  %v3097_v36 = vsel %vm3092_vm4, 65537, %v19798_v16  ;;  %vm3272_vm0 = vmpackc.low %vm12961_vm1, %vm12957_vm3 }
 0x2bd   : > { %3861 = vmatmul.mubr.bf16.vlgmr.msra.gmra.mrb[8].mxu1 %v12873_v14  ;;  %vm12943_vm2 = vcmp.ne.s16.totalorder %v2749_v43, 0  ;;  %v3123_v24 = vrot.slane %v3097_v36, %v10750_v46 }
 0x2be   : > { %3915 = vmatpush1.bf16.msra.mxu1 %v2424_v20  ;;  %9984 = vmatprep.mubr.msk.bf16.mxu1 %vm20082_vm7, %v12265_v37  ;;  %v2929_v20 = vrot.slane %v2907_v8, %v10696_v30  ;;  %v2784_v59 = vsel %vm12943_vm2, %v2643_v57, 0 }
 0x2bf   : > { %v2811_v6 = vpop.permute.xlu1 %2810  ;;  %10153 = vmatprep.subr.msk.bf16.mxu1 %vm12898_vm5, %v2464_v44  ;;  %v12935_v4 = vpop.permute.xlu0 %2812  ;;  %vm2955_vm5 = vcmp.ne.s16.totalorder %v2933_v62, 0  ;;  %v9957_v44 = vld [vmem:[%s19506_s1 + $0x41] ss:$8 sm:$0x3]  ;;  %v3603_v62 = vrot.slane %v12672_v47, %v20030_v21  ;;  %v3277_v21 = vsel %vm3272_vm0, 65537, %v19798_v16 }
 0x2c0   : > { %20083 = vst [vmem:[#allocation35_spill] sm:$0xff] %v12935_v4  ;;  %vm12967_vm14 = vcmp.ne.s16.totalorder %v2929_v20, 0  ;;  %v3599_v20 = vrot.slane %v12672_v47, %v10750_v46  ;;  %v2823_v28 = vsel %vm20096_vm12, %v12896_v12, %v2811_v6  ;;  %v2824_v32 = vsel %vm20097_vm15, %v2811_v6, %v12935_v4 }
 0x2c1   : > { %vm2487_vm7 = vcmp.ne.f32.partialorder %v9957_v44, 0.0  ;;  %v2964_v6 = vsel %vm12967_vm14, %v2823_v28, 0  ;;  %v3119_v4 = vrot.slane %v3097_v36, %v10696_v30  ;;  %vm13020_vm2 = vcmp.eq.s32.totalorder %v3603_v62, 1 }
 0x2c2   : > { %3917 = vmatpush1.bf16.msra.mxu1 %v2604_v10  ;;  %v2309_v10 = vsel %vm2307_vm13, 1, %v19798_v16  ;;  %vm13016_vm13 = vcmp.eq.s32.totalorder %v3599_v20, 1  ;;  %v2489_v36 = vsel %vm2487_vm7, 1, %v19798_v16  ;;  %v3303_v20 = vrot.slane %v3277_v21, %v10750_v46 }
 0x2c3   : > { %v12965_v8 = vpop.permute.xlu1 %2998  ;;  %10154 = vmatprep.subr.msk.bf16.mxu1 %vm2775_vm10, %v2644_v61  ;;  %v3001_v43 = vpop.permute.xlu0 %3000  ;;  %v2345_v57 = vrot.slane %v2309_v10, %v10696_v30  ;;  %v2349_v23 = vrot.slane %v2309_v10, %v19990_v27  ;;  %vm3452_vm10 = vmpackc.low %vm12986_vm6, %vm12973_vm8  ;;  %v3299_v62 = vrot.slane %v3277_v21, %v10696_v30  ;;  %vm3145_vm14 = vcmp.ne.s16.totalorder %v3123_v24, 0  ;;  %v9963_v21 = vld [vmem:[%s19506_s1 + $0x43] ss:$8 sm:$0x3] }
 0x2c4   : > { %v3457_v28 = vsel %vm3452_vm10, 65537, %v19798_v16  ;;  %vm13043_vm8 = vcmp.ne.s16.totalorder %v3119_v4, 0  ;;  %vm20111_vm6 = vcmask 1039360   ;;  %v2529_v24 = vrot.slane %v2489_v36, %v19990_v27 }
 0x2c5   : > { %vm13024_vm4 = vcmp.eq.s32.totalorder %v2345_v57, 1  ;;  %vm13028_vm3 = vcmp.eq.s32.totalorder %v2349_v23, 1  ;;  %v3014_v23 = vsel %vm20111_vm6, %v12965_v8, %v3001_v43  ;;  %vm20112_vm12 = vmmov %vm20111_vm6  ;;  %vm13064_vm15 = vcmp.ne.s16.totalorder %v3303_v20, 0 }
 0x2c6   : > { %3919 = vmatpush1.bf16.msra.mxu1 %v2784_v59  ;;  %v9960_v59 = vld [vmem:[%s19506_s1 + $0x42] ss:$8 sm:$0x3]  ;;  %vm2364_vm0 = vmpackc.low %vm13028_vm3, %vm13024_vm4  ;;  %vm13068_vm7 = vcmp.ne.s16.totalorder %v3299_v62, 0  ;;  %vm2847_vm10 = vcmp.ne.f32.partialorder %v9963_v21, 0.0  ;;  %vm13101_vm4 = vcmp.eq.s32.totalorder %v2529_v24, 1 }
 0x2c7   : > { %v13000_v61 = vpop.permute.xlu1 %3002  ;;  %10155 = vmatprep.subr.msk.bf16.mxu1 %vm2955_vm5, %v2824_v32  ;;  %v13002_v11 = vpop.permute.xlu0 %3178  ;;  %vm2667_vm1 = vcmp.ne.f32.partialorder %v9960_v59, 0.0  ;;  %vm3632_vm5 = vmpackc.low %vm13020_vm2, %vm13016_vm13  ;;  %v2369_v62 = vsel %vm2364_vm0, 65537, %v19798_v16  ;;  %vm20120_vm13 = vcmask 924672  }
 0x2c8   : > { %20098 = vst [vmem:[#allocation36_spill] sm:$0xff] %v13000_v61  ;;  %20099 = vst [vmem:[#allocation37_spill] sm:$0xff] %v13002_v11  ;;  %v3015_v4 = vsel %vm20112_vm12, %v3001_v43, %v13000_v61  ;;  %v2669_v59 = vsel %vm2667_vm1, 1, %v19798_v16  ;;  %v9966_v43 = vld [vmem:[%s19506_s1 + $0x45] ss:$8 sm:$0x3]  ;;  %v2405_v24 = vrot.slane %v2369_v62, %v10696_v30 }
 0x2c9   : > { %v3637_v20 = vsel %vm3632_vm5, 65537, %v19798_v16  ;;  %v2705_v44 = vrot.slane %v2669_v59, %v10696_v30  ;;  %v2709_v10 = vrot.slane %v2669_v59, %v19990_v27  ;;  %vm20121_vm2 = vmmov %vm20120_vm13  ;;  %vm3037_vm3 = vcmp.ne.f32.partialorder %v9966_v43, 0.0 }
 0x2ca   : > { %3921 = vmatpush1.bf16.msra.mxu1 %v2964_v6  ;;  %v3663_v21 = vrot.slane %v3637_v20, %v10750_v46  ;;  %vm20132_vm12 = vcmask 916480  }
 0x2cb   : > { %v3181_v50 = vpop.permute.xlu1 %3180  ;;  %3922 = vmatprep.subr.bf16.mxu1 %v12260_v33  ;;  %v13034_v42 = vpop.permute.xlu0 %3182  ;;  %v2525_v33 = vrot.slane %v2489_v36, %v10696_v30  ;;  %v3483_v36 = vrot.slane %v3457_v28, %v10750_v46  ;;  %vm13125_vm0 = vcmp.eq.s32.totalorder %v2705_v44, 1  ;;  %vm13129_vm6 = vcmp.eq.s32.totalorder %v2709_v10, 1 }
 0x2cc   : > { %20108 = vst [vmem:[#allocation38_spill] sm:$0xff] %v13034_v42  ;;  %v3194_v61 = vsel %vm20120_vm13, %v13002_v11, %v3181_v50  ;;  %v3195_v32 = vsel %vm20121_vm2, %v3181_v50, %v13034_v42  ;;  %v3659_v50 = vrot.slane %v3637_v20, %v10696_v30  ;;  %vm2724_vm13 = vmpackc.low %vm13129_vm6, %vm13125_vm0  ;;  %vm20141_vm2 = vcmask 908288  }
 0x2cd   : > { %vm13091_vm1 = vcmp.eq.s32.totalorder %v2525_v33, 1  ;;  %v3334_v43 = vsel %vm13068_vm7, %v3194_v61, 0  ;;  %vm13142_vm7 = vcmp.ne.s16.totalorder %v3663_v21, 0  ;;  %v2681_v10 = vrot.slane %v12448_v45, %v11382_v13 }
 0x2ce   : > { %3923 = vmatpush1.bf16.msra.mxu1 %v12243_v5  ;;  %v3479_v5 = vrot.slane %v3457_v28, %v10696_v30 }
 0x2cf   : > { %v13062_v6 = vpop.permute.xlu1 %3358  ;;  %10156 = vmatprep.subr.msk.bf16.mxu1 %vm3145_vm14, %v3015_v4  ;;  %v3361_v3 = vpop.permute.xlu0 %3360  ;;  %v3154_v4 = vsel %vm13043_vm8, %v3014_v23, 0  ;;  %v2849_v23 = vsel %vm2847_vm10, 1, %v19798_v16  ;;  %vm3505_vm14 = vcmp.ne.s16.totalorder %v3483_v36, 0  ;;  %vm2544_vm8 = vmpackc.low %vm13101_vm4, %vm13091_vm1  ;;  %v3039_v36 = vsel %vm3037_vm3, 1, %v19798_v16 }
 0x2d0   : > { %20113 = vst [vmem:[#allocation39_spill] sm:$0xff] %v13062_v6  ;;  %vm13113_vm5 = vcmp.ne.s16.totalorder %v3479_v5, 0  ;;  %v3374_v20 = vsel %vm20132_vm12, %v13062_v6, %v3361_v3  ;;  %v2885_v61 = vrot.slane %v2849_v23, %v10696_v30  ;;  %v2549_v26 = vsel %vm2544_vm8, 65537, %v19798_v16  ;;  %vm20142_vm4 = vmmov %vm20141_vm2 }
 0x2d1   : > { %v3514_v21 = vsel %vm13113_vm5, %v3374_v20, 0  ;;  %vm13158_vm10 = vcmp.ne.s16.totalorder %v3659_v50, 0  ;;  %vm13162_vm1 = vcmp.ne.s16.totalorder %v2405_v24, 0  ;;  %v3079_v42 = vrot.slane %v3039_v36, %v19990_v27 }
 0x2d2   : > { %3925 = vmatpush1.bf16.msra.mxu1 %v3154_v4  ;;  %v2889_v4 = vrot.slane %v2849_v23, %v19990_v27  ;;  %v3075_v23 = vrot.slane %v3039_v36, %v10696_v30  ;;  %vm13175_vm3 = vcmp.eq.s32.totalorder %v2885_v61, 1  ;;  %v2589_v20 = vrot.slane %v2549_v26, %v10750_v46 }
 0x2d3   : > { %v13105_v57 = vpop.permute.xlu1 %3362  ;;  %10157 = vmatprep.subr.msk.bf16.mxu1 %vm13064_vm15, %v3195_v32  ;;  %v13109_v33 = vpop.permute.xlu0 %3538  ;;  %vm20133_vm15 = vmmov %vm20132_vm12  ;;  %v2409_v32 = vrot.slane %v2369_v62, %v10750_v46  ;;  %v2585_v61 = vrot.slane %v2549_v26, %v10696_v30 }
 0x2d4   : > { %20124 = vst [vmem:[#allocation40_spill] sm:$0xff] %v13105_v57  ;;  %20125 = vst [vmem:[#allocation41_spill] sm:$0xff] %v13109_v33  ;;  %v3375_v49 = vsel %vm20133_vm15, %v3361_v3, %v13105_v57  ;;  %v2325_v3 = vrot.slane %v12382_v1, %v11391_v53  ;;  %vm13205_vm12 = vcmp.eq.s32.totalorder %v3075_v23, 1  ;;  %v2505_v23 = vrot.slane %v12436_v56, %v11391_v53 }
 0x2d5   : > { %vm13187_vm5 = vcmp.ne.s16.totalorder %v2409_v32, 0  ;;  %v2685_v32 = vrot.slane %v12448_v45, %v11391_v53 }
 0x2d6   : > { %3927 = vmatpush1.bf16.msra.mxu1 %v3334_v43  ;;  %v2321_v43 = vrot.slane %v12382_v1, %v11382_v13  ;;  %vm13201_vm6 = vcmp.eq.s32.totalorder %v2325_v3, 1  ;;  %v2501_v3 = vrot.slane %v12436_v56, %v11382_v13 }
 0x2d7   : > { %v3541_v28 = vpop.permute.xlu1 %3540  ;;  %10158 = vmatprep.subr.msk.bf16.mxu1 %vm3505_vm14, %v3375_v49  ;;  %v13140_v44 = vpop.permute.xlu0 %3542  ;;  %v9969_v49 = vld [vmem:[%s19506_s1 + $0x46] ss:$8 sm:$0x3]  ;;  %vm13179_vm14 = vcmp.eq.s32.totalorder %v2889_v4, 1 }
 0x2d8   : > { %20134 = vst [vmem:[#allocation42_spill] sm:$0xff] %v13140_v44  ;;  %v3554_v6 = vsel %vm20141_vm2, %v13109_v33, %v3541_v28  ;;  %v3555_v59 = vsel %vm20142_vm4, %v3541_v28, %v13140_v44  ;;  %vm3217_vm8 = vcmp.ne.f32.partialorder %v9969_v49, 0.0  ;;  %v9972_v4 = vld [vmem:[%s19506_s1 + $0x47] ss:$8 sm:$0x3]  ;;  %v2729_v28 = vsel %vm2724_vm13, 65537, %v19798_v16  ;;  %vm2904_vm15 = vmpackc.low %vm13179_vm14, %vm13175_vm3 }
 0x2d9   : > { %vm13197_vm0 = vcmp.eq.s32.totalorder %v2321_v43, 1  ;;  %v3694_v26 = vsel %vm13158_vm10, %v3554_v6, 0  ;;  %v3219_v57 = vsel %vm3217_vm8, 1, %v19798_v16  ;;  %vm3397_vm10 = vcmp.ne.f32.partialorder %v9972_v4, 0.0 }
 0x2da   : > { %3929 = vmatpush1.bf16.msra.mxu1 %v3514_v21  ;;  %v2769_v44 = vrot.slane %v2729_v28, %v10750_v46  ;;  %v2765_v33 = vrot.slane %v2729_v28, %v10696_v30  ;;  %vm13234_vm13 = vcmp.ne.s16.totalorder %v2589_v20, 0  ;;  %vm13238_vm2 = vcmp.ne.s16.totalorder %v2585_v61, 0  ;;  %vm2361_vm4 = vmpackc.low %vm13201_vm6, %vm13197_vm0 }
 0x2db   : > { %v13183_v35 = vpop.permute.xlu1 %2276  ;;  %10159 = vmatprep.subr.msk.bf16.mxu1 %vm13142_vm7, %v3555_v59  ;;  %v2279_v5 = vpop.permute.xlu0 %2278  ;;  %vm13215_vm7 = vcmp.eq.s32.totalorder %v3079_v42, 1  ;;  %vm13259_vm8 = vcmp.eq.s32.totalorder %v2501_v3, 1  ;;  %v3255_v50 = vrot.slane %v3219_v57, %v10696_v30  ;;  %v3399_v36 = vsel %vm3397_vm10, 1, %v19798_v16 }
 0x2dc   : > { %v2287_v49 = vsel %vm19690_vm11, %v13183_v35, %v2279_v5  ;;  %v2288_v6 = vsel %vm19690_vm11, %v2279_v5, %v12554_v34  ;;  %v2909_v34 = vsel %vm2904_vm15, 65537, %v19798_v16  ;;  %vm20163_vm3 = vcmask 130048  }
 0x2dd   : > { %v2428_v5 = vsel %vm13162_vm1, %v2287_v49, 0  ;;  %vm20164_vm14 = vmmov %vm20163_vm3  ;;  %vm13269_vm1 = vcmp.eq.s32.totalorder %v2505_v23, 1  ;;  %v3259_v4 = vrot.slane %v3219_v57, %v19990_v27  ;;  %vm13280_vm10 = vcmp.ne.s16.totalorder %v2769_v44, 0 }
 0x2de   : > { %3931 = vmatpush1.bf16.msra.mxu1 %v3694_v26  ;;  %vm20167_vm15 = vmmov %vm20163_vm3  ;;  %v2949_v23 = vrot.slane %v2909_v34, %v10750_v46  ;;  %v2366_v11 = vsel %vm2361_vm4, 65537, %v19798_v16  ;;  %v3435_v44 = vrot.slane %v3399_v36, %v10696_v30  ;;  %v3439_v57 = vrot.slane %v3399_v36, %v19990_v27 }
 0x2df   : > { %v13228_v42 = vpop.permute.xlu1 %2456  ;;  %10168 = vmatprep.subr.msk.bf16.mxu1 %vm13187_vm5, %v2288_v6  ;;  %v2459_v59 = vpop.permute.xlu0 %2458  ;;  %vm3094_vm5 = vmpackc.low %vm13215_vm7, %vm13205_vm12  ;;  %v2945_v6 = vrot.slane %v2909_v34, %v10696_v30  ;;  %vm13313_vm6 = vcmp.eq.s32.totalorder %v3255_v50, 1  ;;  %vm13325_vm12 = vcmp.eq.s32.totalorder %v3259_v4, 1 }
 0x2e0   : > { %v2467_v20 = vsel %vm20163_vm3, %v13228_v42, %v2459_v59  ;;  %v2468_v62 = vsel %vm20164_vm14, %v2459_v59, %v12556_v41  ;;  %vm13284_vm3 = vcmp.ne.s16.totalorder %v2765_v33, 0  ;;  %v3099_v33 = vsel %vm3094_vm5, 65537, %v19798_v16  ;;  %vm2541_vm0 = vmpackc.low %vm13269_vm1, %vm13259_vm8 }
 0x2e1   : > { %3947 = vmatmul.mubr.bf16.vlgmr.msra.gmra.mrb[12].mxu1 %v12873_v14  ;;  %v2608_v59 = vsel %vm13238_vm2, %v2467_v20, 0  ;;  %vm13337_vm2 = vcmp.ne.s16.totalorder %v2945_v6, 0  ;;  %v2546_v4 = vsel %vm2541_vm0, 65537, %v19798_v16  ;;  %vm13350_vm4 = vcmp.eq.s32.totalorder %v3435_v44, 1  ;;  %vm3274_vm14 = vmpackc.low %vm13325_vm12, %vm13313_vm6 }
 0x2e2   : > { %4001 = vmatpush1.bf16.msra.mxu1 %v2428_v5  ;;  %9986 = vmatprep.mubr.msk.bf16.mxu1 %vm20167_vm15, %v12265_v37  ;;  %v9975_v37 = vld [vmem:[%s19506_s1 + $0x90] ss:$8 sm:$0x3]  ;;  %vm13354_vm5 = vcmp.eq.s32.totalorder %v3439_v57, 1  ;;  %vm13364_vm8 = vcmp.eq.s32.totalorder %v2681_v10, 1  ;;  %vm13368_vm1 = vcmp.eq.s32.totalorder %v2685_v32, 1  ;;  %v2861_v57 = vrot.slane %v12484_v2, %v11382_v13 }
 0x2e3   : > { %v13276_v28 = vpop.permute.xlu1 %2636  ;;  %10169 = vmatprep.subr.msk.bf16.mxu1 %vm13234_vm13, %v2468_v62  ;;  %v2639_v3 = vpop.permute.xlu0 %2638  ;;  %vm3577_vm7 = vcmp.ne.f32.partialorder %v9975_v37, 0.0  ;;  %vm13333_vm13 = vcmp.ne.s16.totalorder %v2949_v23, 0  ;;  %v2381_v62 = vrot.slane %v2366_v11, %v10696_v30  ;;  %vm20188_vm15 = vcmask 7168   ;;  %vm3454_vm0 = vmpackc.low %vm13354_vm5, %vm13350_vm4 }
 0x2e4   : > { %v2647_v43 = vsel %vm19689_vm9, %v13276_v28, %v2639_v3  ;;  %v2648_v26 = vsel %vm19689_vm9, %v2639_v3, %v12642_v39  ;;  %v2385_v39 = vrot.slane %v2366_v11, %v10750_v46  ;;  %v3135_v3 = vrot.slane %v3099_v33, %v10696_v30  ;;  %vm2721_vm12 = vmpackc.low %vm13368_vm1, %vm13364_vm8 }
 0x2e5   : > { %v2788_v6 = vsel %vm13284_vm3, %v2647_v43, 0  ;;  %v3579_v11 = vsel %vm3577_vm7, 1, %v19798_v16  ;;  %v3139_v10 = vrot.slane %v3099_v33, %v10750_v46  ;;  %v2565_v32 = vrot.slane %v2546_v4, %v10750_v46 }
 0x2e6   : > { %4003 = vmatpush1.bf16.msra.mxu1 %v2608_v59  ;;  %v2865_v59 = vrot.slane %v12484_v2, %v11391_v53  ;;  %vm13390_vm3 = vcmp.ne.s16.totalorder %v2385_v39, 0  ;;  %vm13401_vm6 = vcmp.ne.s16.totalorder %v2381_v62, 0  ;;  %v3615_v33 = vrot.slane %v3579_v11, %v10696_v30 }
 0x2e7   : > { %v13329_v5 = vpop.permute.xlu1 %2816  ;;  %10170 = vmatprep.subr.msk.bf16.mxu1 %vm13280_vm10, %v2648_v26  ;;  %v2819_v50 = vpop.permute.xlu0 %2818  ;;  %vm20189_vm10 = vmmov %vm20188_vm15  ;;  %v2561_v36 = vrot.slane %v2546_v4, %v10696_v30  ;;  %vm13412_vm7 = vcmp.ne.s16.totalorder %v3135_v3, 0  ;;  %vm20208_vm8 = vcmask 1039360   ;;  %v3591_v4 = vrot.slane %v12672_v47, %v11382_v13 }
 0x2e8   : > { %v2827_v41 = vsel %vm20188_vm15, %v13329_v5, %v2819_v50  ;;  %v2828_v44 = vsel %vm20189_vm10, %v2819_v50, %v12644_v19  ;;  %v3279_v19 = vsel %vm3274_vm14, 65537, %v19798_v16  ;;  %v3619_v50 = vrot.slane %v3579_v11, %v19990_v27  ;;  %vm20209_vm1 = vmmov %vm20208_vm8 }
 0x2e9   : > { %v2968_v26 = vsel %vm13337_vm2, %v2827_v41, 0  ;;  %vm13420_vm2 = vcmp.eq.s32.totalorder %v2865_v59, 1  ;;  %vm13425_vm14 = vcmp.ne.s16.totalorder %v3139_v10, 0  ;;  %vm13429_vm15 = vcmp.ne.s16.totalorder %v2565_v32, 0 }
 0x2ea   : > { %4005 = vmatpush1.bf16.msra.mxu1 %v2788_v6  ;;  %v3319_v3 = vrot.slane %v3279_v19, %v10750_v46  ;;  %v3315_v59 = vrot.slane %v3279_v19, %v10696_v30  ;;  %v2726_v10 = vsel %vm2721_vm12, 65537, %v19798_v16  ;;  %vm13460_vm5 = vcmp.eq.s32.totalorder %v3615_v33, 1 }
 0x2eb   : > { %v13382_v21 = vpop.permute.xlu1 %3006  ;;  %10171 = vmatprep.subr.msk.bf16.mxu1 %vm13333_vm13, %v2828_v44  ;;  %v13386_v37 = vpop.permute.xlu0 %3186  ;;  %vm13416_vm13 = vcmp.eq.s32.totalorder %v2861_v57, 1  ;;  %v3459_v44 = vsel %vm3454_vm0, 65537, %v19798_v16  ;;  %vm13464_vm10 = vcmp.eq.s32.totalorder %v3619_v50, 1  ;;  %v2745_v34 = vrot.slane %v2726_v10, %v10750_v46 }
 0x2ec   : > { %vm2901_vm4 = vmpackc.low %vm13420_vm2, %vm13416_vm13  ;;  %v3495_v43 = vrot.slane %v3459_v44, %v10696_v30  ;;  %vm20212_vm0 = vcmask 130048   ;;  %v2741_v20 = vrot.slane %v2726_v10, %v10696_v30  ;;  %vm3329_vm13 = vcmp.ne.s16.totalorder %v3319_v3, 0 }
 0x2ed   : > { %v2906_v50 = vsel %vm2901_vm4, 65537, %v19798_v16  ;;  %vm3634_vm12 = vmpackc.low %vm13464_vm10, %vm13460_vm5  ;;  %vm13508_vm2 = vcmp.ne.s16.totalorder %v3315_v59, 0  ;;  %vm20222_vm4 = vcmask 924672   ;;  %vm20230_vm10 = vcmask 916480  }
 0x2ee   : > { %4007 = vmatpush1.bf16.msra.mxu1 %v2968_v26  ;;  %v2925_v3 = vrot.slane %v2906_v50, %v10750_v46  ;;  %vm13547_vm5 = vcmp.ne.s16.totalorder %v2741_v20, 0  ;;  %v2921_v23 = vrot.slane %v2906_v50, %v10696_v30  ;;  %v2521_v50 = vrot.slane %v12436_v56, %v11863_v60 }
 0x2ef   : > { %v2267_v6 = vpop.permute.xlu1 %2266  ;;  %4008 = vmatprep.subr.bf16.mxu1 %v12194_v25  ;;  %v3009_v41 = vpop.permute.xlu0 %3008 }
 0x2f0   : > { %v2281_v25 = vsel %vm19690_vm11, %v12460_v7, %v2267_v6  ;;  %v2282_v57 = vsel %vm19690_vm11, %v2267_v6, %v12749_v58  ;;  %v3499_v7 = vrot.slane %v3459_v44, %v10750_v46  ;;  %v3018_v24 = vsel %vm20208_vm8, %v13382_v21, %v3009_v41  ;;  %vm20223_vm8 = vmmov %vm20222_vm4 }
 0x2f1   : > { %10144 = vmatprep.subr.msk.bf16.mxu0 %vm13390_vm3, %v2282_v57  ;;  %v2422_v49 = vsel %vm13401_vm6, %v2281_v25, 0  ;;  %v3030_v61 = vsel %vm20209_vm1, %v3009_v41, %v12420_v15  ;;  %vm13473_vm3 = vcmp.ne.s16.totalorder %v2561_v36, 0  ;;  %vm20213_vm6 = vmmov %vm20212_vm0  ;;  %v3055_v36 = vrot.slane %v12534_v48, %v11391_v53 }
 0x2f2   : > { %3872 = vmatpush1.bf16.msra.mxu0 %v2422_v49  ;;  %4009 = vmatpush1.bf16.msra.mxu1 %v12351_v22  ;;  %v3051_v22 = vrot.slane %v12534_v48, %v11382_v13  ;;  %v3639_v44 = vsel %vm3634_vm12, 65537, %v19798_v16  ;;  %v3231_v25 = vrot.slane %v12591_v63, %v11382_v13  ;;  %vm13574_vm12 = vcmp.ne.s16.totalorder %v2925_v3, 0 }
 0x2f3   : > { %v13478_v19 = vpop.permute.xlu1 %3366  ;;  %10172 = vmatprep.subr.msk.bf16.mxu1 %vm13425_vm14, %v3030_v61  ;;  %v2447_v26 = vpop.permute.xlu0 %2446  ;;  %vm13512_vm14 = vcmp.ne.s16.totalorder %v3499_v7, 0  ;;  %v3679_v32 = vrot.slane %v3639_v44, %v10750_v46 }
 0x2f4   : > { %v2461_v15 = vsel %vm20212_vm0, %v12462_v55, %v2447_v26  ;;  %v2462_v33 = vsel %vm20213_vm6, %v2447_v26, %v12790_v38  ;;  %v3158_v38 = vsel %vm13412_vm7, %v3018_v24, 0  ;;  %vm13520_vm7 = vcmp.ne.s16.totalorder %v2745_v34, 0  ;;  %vm20231_vm0 = vmmov %vm20230_vm10 }
 0x2f5   : > { %10145 = vmatprep.subr.msk.bf16.mxu0 %vm13429_vm15, %v2462_v33  ;;  %v2602_v55 = vsel %vm13473_vm3, %v2461_v15, 0  ;;  %vm13516_vm15 = vcmp.ne.s16.totalorder %v3495_v43, 0  ;;  %vm13537_vm1 = vcmp.eq.s32.totalorder %v3051_v22, 1  ;;  %vm13541_vm3 = vcmp.eq.s32.totalorder %v3055_v36, 1 }
 0x2f6   : > { %3874 = vmatpush1.bf16.msra.mxu0 %v2602_v55  ;;  %4011 = vmatpush1.bf16.msra.mxu1 %v3158_v38  ;;  %v3675_v43 = vrot.slane %v3639_v44, %v10696_v30  ;;  %vm3091_vm6 = vmpackc.low %vm13541_vm3, %vm13537_vm1  ;;  %v3411_v22 = vrot.slane %v12622_v52, %v11382_v13  ;;  %v2517_v33 = vrot.slane %v12436_v56, %v11860_v9  ;;  %v20263_v55 = vld [vmem:[#allocation37_spill] sm:$0xff] }
 0x2f7   : > { %v3189_v11 = vpop.permute.xlu1 %3188  ;;  %v3369_v39 = vpop.permute.xlu0 %3368  ;;  %v3096_v62 = vsel %vm3091_vm6, 65537, %v19798_v16  ;;  %v2697_v56 = vrot.slane %v12448_v45, %v11860_v9 }
 0x2f8   : > { %v3198_v57 = vsel %vm20222_vm4, %v13386_v37, %v3189_v11  ;;  %v3210_v59 = vsel %vm20223_vm8, %v3189_v11, %v12422_v0  ;;  %v3235_v0 = vrot.slane %v12591_v63, %v11391_v53  ;;  %v3378_v24 = vsel %vm20230_vm10, %v13478_v19, %v3369_v39 }
 0x2f9   : > { %10173 = vmatprep.subr.msk.bf16.mxu1 %vm3329_vm13, %v3210_v59  ;;  %v3338_v7 = vsel %vm13508_vm2, %v3198_v57, 0  ;;  %v3390_v61 = vsel %vm20231_vm0, %v3369_v39, %v12600_v17  ;;  %vm13578_vm13 = vcmp.eq.s32.totalorder %v3231_v25, 1  ;;  %vm13594_vm4 = vcmp.ne.s16.totalorder %v2921_v23, 0 }
 0x2fa   : > { %4013 = vmatpush1.bf16.msra.mxu1 %v3338_v7  ;;  %vm13588_vm2 = vcmp.eq.s32.totalorder %v3235_v0, 1  ;;  %v3115_v11 = vrot.slane %v3096_v62, %v10750_v46  ;;  %vm20244_vm8 = vcmask 908288   ;;  %v3111_v10 = vrot.slane %v3096_v62, %v10696_v30 }
 0x2fb   : > { %v2627_v26 = vpop.permute.xlu1 %2626  ;;  %10174 = vmatprep.subr.msk.bf16.mxu1 %vm13512_vm14, %v3390_v61  ;;  %v13562_v34 = vpop.permute.xlu0 %3546  ;;  %vm3689_vm14 = vcmp.ne.s16.totalorder %v3679_v32, 0  ;;  %vm20247_vm3 = vmmov %vm20244_vm8  ;;  %v2337_v23 = vrot.slane %v12382_v1, %v11860_v9  ;;  %v20255_v32 = vld [vmem:[#allocation10_spill] sm:$0xff] }
 0x2fc   : > { %v2641_v17 = vsel %vm19689_vm9, %v12489_v29, %v2627_v26  ;;  %v2642_v15 = vsel %vm19689_vm9, %v2627_v26, %v12860_v18  ;;  %v3518_v29 = vsel %vm13516_vm15, %v3378_v24, 0  ;;  %v3415_v18 = vrot.slane %v12622_v52, %v11391_v53  ;;  %vm3271_vm10 = vmpackc.low %vm13588_vm2, %vm13578_vm13 }
 0x2fd   : > { %10146 = vmatprep.subr.msk.bf16.mxu0 %vm13520_vm7, %v2642_v15  ;;  %v2782_v36 = vsel %vm13547_vm5, %v2641_v17, 0  ;;  %vm13598_vm7 = vcmp.ne.s16.totalorder %v3675_v43, 0  ;;  %vm13609_vm15 = vcmp.eq.s32.totalorder %v3411_v22, 1  ;;  %vm20245_vm5 = vcmask 7168  }
 0x2fe   : > { %3876 = vmatpush1.bf16.msra.mxu0 %v2782_v36  ;;  %4015 = vmatpush1.bf16.msra.mxu1 %v3518_v29  ;;  %vm20246_vm1 = vmmov %vm20245_vm5  ;;  %vm13633_vm0 = vcmp.eq.s32.totalorder %v3415_v18, 1  ;;  %v3276_v7 = vsel %vm3271_vm10, 65537, %v19798_v16  ;;  %vm3143_vm6 = vcmp.ne.s16.totalorder %v3115_v11, 0  ;;  %vm13650_vm13 = vcmp.eq.s32.totalorder %v3591_v4, 1  ;;  %v20261_v36 = vld [vmem:[#allocation29_spill] sm:$0xff] }
 0x2ff   : > { %v3549_v6 = vpop.permute.xlu1 %3548  ;;  %v2807_v41 = vpop.permute.xlu0 %2806  ;;  %v3295_v58 = vrot.slane %v3276_v7, %v10750_v46  ;;  %v2341_v24 = vrot.slane %v12382_v1, %v11863_v60  ;;  %v3291_v26 = vrot.slane %v3276_v7, %v10696_v30  ;;  %v2701_v4 = vrot.slane %v12448_v45, %v11863_v60  ;;  %v20299_v45 = vld [vmem:[#allocation35_spill] sm:$0xff] }
 0x300   : > { %v3558_v3 = vsel %vm20244_vm8, %v13562_v34, %v3549_v6  ;;  %v2821_v44 = vsel %vm20245_vm5, %v12491_v31, %v2807_v41  ;;  %v2822_v25 = vsel %vm20246_vm1, %v2807_v41, %v12896_v12  ;;  %v3570_v57 = vsel %vm20247_vm3, %v3549_v6, %v12683_v54 }
 0x301   : > { %10147 = vmatprep.subr.msk.bf16.mxu0 %vm13574_vm12, %v2822_v25  ;;  %10175 = vmatprep.subr.msk.bf16.mxu1 %vm3689_vm14, %v3570_v57  ;;  %v2962_v59 = vsel %vm13594_vm4, %v2821_v44, 0  ;;  %v3698_v31 = vsel %vm13598_vm7, %v3558_v3, 0  ;;  %v3595_v54 = vrot.slane %v12672_v47, %v11391_v53  ;;  %vm3451_vm12 = vmpackc.low %vm13633_vm0, %vm13609_vm15  ;;  %vm20254_vm14 = vcmask 1039360   ;;  %v20269_v3 = vld [vmem:[#allocation30_spill] sm:$0xff]  ;;  %v20271_v25 = vld [vmem:[#allocation39_spill] sm:$0xff] }
 0x302   : > { %3878 = vmatpush1.bf16.msra.mxu0 %v2962_v59  ;;  %4017 = vmatpush1.bf16.msra.mxu1 %v3698_v31  ;;  %vm20256_vm4 = vmmov %vm20254_vm14  ;;  %vm3142_vm7 = vcmp.ne.s16.totalorder %v3111_v10, 0  ;;  %v3456_v17 = vsel %vm3451_vm12, 65537, %v19798_v16  ;;  %vm3323_vm15 = vcmp.ne.s16.totalorder %v3295_v58, 0  ;;  %vm13672_vm5 = vcmp.eq.s32.totalorder %v2337_v23, 1  ;;  %v20277_v23 = vld [vmem:[#allocation31_spill] sm:$0xff] }
 0x303   : > { %v2997_v49 = vpop.permute.xlu1 %2996  ;;  %3879 = vmatprep.subr.bf16.mxu0 %v12250_v51  ;;  %vm13654_vm2 = vcmp.eq.s32.totalorder %v3595_v54, 1  ;;  %v3177_v22 = vpop.permute.xlu0 %3176  ;;  %v3475_v15 = vrot.slane %v3456_v17, %v10750_v46  ;;  %vm13676_vm1 = vcmp.eq.s32.totalorder %v2341_v24, 1  ;;  %vm20262_vm3 = vcmask 924672   ;;  %v20279_v51 = vld [vmem:[#allocation41_spill] sm:$0xff] }
 0x304   : > { %v3012_v61 = vsel %vm20254_vm14, %v12438_v40, %v2997_v49  ;;  %v3013_v43 = vsel %vm20256_vm4, %v2997_v49, %v12965_v8  ;;  %vm3631_vm8 = vmpackc.low %vm13654_vm2, %vm13650_vm13  ;;  %v3192_v29 = vsel %vm20262_vm3, %v20261_v36, %v3177_v22  ;;  %vm3322_vm0 = vcmp.ne.s16.totalorder %v3291_v26, 0 }
 0x305   : > { %4033 = vmatmul.mubr.bf16.vlgmr.msra.gmra.mrb[16].mxu1 %v12873_v14  ;;  %v3152_v40 = vsel %vm3142_vm7, %v3012_v61, 0  ;;  %vm20264_vm10 = vmmov %vm20262_vm3  ;;  %v3471_v38 = vrot.slane %v3456_v17, %v10696_v30  ;;  %v3636_v62 = vsel %vm3631_vm8, 65537, %v19798_v16  ;;  %v3332_v41 = vsel %vm3322_vm0, %v3192_v29, 0 }
 0x306   : > { %3880 = vmatpush1.bf16.msra.mxu0 %v20255_v32  ;;  %v3193_v18 = vsel %vm20264_vm10, %v3177_v22, %v20263_v55  ;;  %v3655_v6 = vrot.slane %v3636_v62, %v10750_v46  ;;  %vm2363_vm12 = vmpackc.low %vm13676_vm1, %vm13672_vm5  ;;  %vm13697_vm13 = vcmp.eq.s32.totalorder %v2517_v33, 1  ;;  %vm13701_vm2 = vcmp.eq.s32.totalorder %v2521_v50, 1  ;;  %v20311_v22 = vld [vmem:[#allocation36_spill] sm:$0xff] }
 0x307   : > { %10148 = vmatprep.subr.msk.bf16.mxu0 %vm3143_vm6, %v3013_v43  ;;  %v3357_v20 = vpop.permute.xlu1 %3356  ;;  %vm3503_vm6 = vcmp.ne.s16.totalorder %v3475_v15, 0  ;;  %vm20270_vm14 = vcmask 916480   ;;  %vm3502_vm7 = vcmp.ne.s16.totalorder %v3471_v38, 0  ;;  %v3651_v59 = vrot.slane %v3636_v62, %v10696_v30  ;;  %v3537_v31 = vpop.permute.xlu0 %3536  ;;  %vm2543_vm8 = vmpackc.low %vm13701_vm2, %vm13697_vm13  ;;  %v20285_v15 = vld [vmem:[#allocation32_spill] sm:$0xff] }
 0x308   : > { %v3372_v44 = vsel %vm20270_vm14, %v20269_v3, %v3357_v20  ;;  %vm20272_vm4 = vmmov %vm20270_vm14  ;;  %v2368_v12 = vsel %vm2363_vm12, 65537, %v19798_v16  ;;  %vm13718_vm5 = vcmp.eq.s32.totalorder %v2697_v56, 1  ;;  %vm13722_vm1 = vcmp.eq.s32.totalorder %v2701_v4, 1  ;;  %v20294_v3 = vld [vmem:[#allocation34_spill] sm:$0xff] }
 0x309   : > { %v3373_v57 = vsel %vm20272_vm4, %v3357_v20, %v20271_v25  ;;  %v2401_v54 = vrot.slane %v2368_v12, %v10750_v46  ;;  %v3512_v10 = vsel %vm3502_vm7, %v3372_v44, 0  ;;  %v2877_v7 = vrot.slane %v12484_v2, %v11860_v9  ;;  %vm2723_vm12 = vmpackc.low %vm13722_vm1, %vm13718_vm5 }
 0x30a   : > { %3882 = vmatpush1.bf16.msra.mxu0 %v3152_v40  ;;  %v2881_v58 = vrot.slane %v12484_v2, %v11863_v60  ;;  %vm20278_vm3 = vcmask 908288   ;;  %vm3682_vm0 = vcmp.ne.s16.totalorder %v3651_v59, 0  ;;  %v2397_v61 = vrot.slane %v2368_v12, %v10696_v30 }
 0x30b   : > { %10149 = vmatprep.subr.msk.bf16.mxu0 %vm3323_vm15, %v3193_v18  ;;  %vm3683_vm15 = vcmp.ne.s16.totalorder %v3655_v6, 0  ;;  %v3552_v0 = vsel %vm20278_vm3, %v20277_v23, %v3537_v31  ;;  %vm20280_vm10 = vmmov %vm20278_vm3  ;;  %v2275_v32 = vpop.permute.xlu1 %2274  ;;  %v2548_v43 = vsel %vm2543_vm8, 65537, %v19798_v16  ;;  %vm13741_vm13 = vcmp.eq.s32.totalorder %v2877_v7, 1  ;;  %v2455_v33 = vpop.permute.xlu0 %2454  ;;  %v20286_v18 = vld [vmem:[#allocation33_spill] sm:$0xff] }
 0x30c   : > { %v3553_v24 = vsel %vm20280_vm10, %v3537_v31, %v20279_v51  ;;  %v2581_v26 = vrot.slane %v2548_v43, %v10750_v46  ;;  %v3692_v2 = vsel %vm3682_vm0, %v3552_v0, 0  ;;  %vm13745_vm2 = vcmp.eq.s32.totalorder %v2881_v58, 1 }
 0x30d   : > { %v2285_v1 = vsel %vm19690_vm11, %v20285_v15, %v2275_v32  ;;  %v2286_v40 = vsel %vm19690_vm11, %v2275_v32, %v13183_v35  ;;  %vm2416_vm14 = vcmp.ne.s16.totalorder %v2397_v61, 0  ;;  %v2577_v8 = vrot.slane %v2548_v43, %v10696_v30  ;;  %vm2903_vm7 = vmpackc.low %vm13745_vm2, %vm13741_vm13  ;;  %v20306_v32 = vld [vmem:[#allocation28_spill] sm:$0xff]  ;;  %v20313_v15 = vld [vmem:[#allocation23_spill] sm:$0xff] }
 0x30e   : > { %3884 = vmatpush1.bf16.msra.mxu0 %v3332_v41  ;;  %v2728_v50 = vsel %vm2723_vm12, 65537, %v19798_v16  ;;  %vm2597_vm4 = vcmp.ne.s16.totalorder %v2581_v26, 0  ;;  %v2426_v29 = vsel %vm2416_vm14, %v2285_v1, 0  ;;  %v3067_v35 = vrot.slane %v12534_v48, %v11860_v9 }
 0x30f   : > { %10150 = vmatprep.subr.msk.bf16.mxu0 %vm3503_vm6, %v3373_v57  ;;  %vm2417_vm6 = vcmp.ne.s16.totalorder %v2401_v54, 0  ;;  %v2761_v36 = vrot.slane %v2728_v50, %v10750_v46  ;;  %v3071_v55 = vrot.slane %v12534_v48, %v11863_v60  ;;  %vm2596_vm5 = vcmp.ne.s16.totalorder %v2577_v8, 0  ;;  %v2635_v6 = vpop.permute.xlu1 %2634  ;;  %v2815_v59 = vpop.permute.xlu0 %2814 }
 0x310   : > { %v2757_v62 = vrot.slane %v2728_v50, %v10696_v30  ;;  %v2908_v48 = vsel %vm2903_vm7, 65537, %v19798_v16  ;;  %v3247_v41 = vrot.slane %v12591_v63, %v11860_v9  ;;  %vm13778_vm10 = vcmp.eq.s32.totalorder %v3067_v35, 1 }
 0x311   : > { %vm2777_vm3 = vcmp.ne.s16.totalorder %v2761_v36, 0  ;;  %v2941_v56 = vrot.slane %v2908_v48, %v10750_v46  ;;  %vm13782_vm0 = vcmp.eq.s32.totalorder %v3071_v55, 1  ;;  %v3251_v4 = vrot.slane %v12591_v63, %v11863_v60 }
 0x312   : > { %3886 = vmatpush1.bf16.msra.mxu0 %v3512_v10  ;;  %v2645_v44 = vsel %vm19689_vm9, %v20294_v3, %v2635_v6  ;;  %v2646_v25 = vsel %vm19689_vm9, %v2635_v6, %v13276_v28  ;;  %v2937_v57 = vrot.slane %v2908_v48, %v10696_v30  ;;  %vm3093_vm13 = vmpackc.low %vm13782_vm0, %vm13778_vm10  ;;  %v3427_v63 = vrot.slane %v12622_v52, %v11860_v9 }
 0x313   : > { %10151 = vmatprep.subr.msk.bf16.mxu0 %vm3683_vm15, %v3553_v24  ;;  %vm20287_vm15 = vcmask 130048   ;;  %vm2957_vm12 = vcmp.ne.s16.totalorder %v2941_v56, 0  ;;  %vm13799_vm2 = vcmp.eq.s32.totalorder %v3247_v41, 1  ;;  %vm13803_vm14 = vcmp.eq.s32.totalorder %v3251_v4, 1  ;;  %v3005_v61 = vpop.permute.xlu1 %3004  ;;  %v3185_v8 = vpop.permute.xlu0 %3184 }
 0x314   : > { %v2465_v38 = vsel %vm20287_vm15, %v20286_v18, %v2455_v33  ;;  %vm20288_vm8 = vmmov %vm20287_vm15  ;;  %v3431_v54 = vrot.slane %v12622_v52, %v11863_v60  ;;  %vm2956_vm15 = vcmp.ne.s16.totalorder %v2937_v57, 0  ;;  %v3098_v7 = vsel %vm3093_vm13, 65537, %v19798_v16 }
 0x315   : > { %v2466_v20 = vsel %vm20288_vm8, %v2455_v33, %v13228_v42  ;;  %vm20289_vm1 = vmmov %vm20288_vm8  ;;  %v2606_v42 = vsel %vm2596_vm5, %v2465_v38, 0  ;;  %v3131_v58 = vrot.slane %v3098_v7, %v10750_v46  ;;  %vm13819_vm5 = vcmp.eq.s32.totalorder %v3427_v63, 1 }
 0x316   : > { %3888 = vmatpush1.bf16.msra.mxu0 %v3692_v2  ;;  %vm3273_vm8 = vmpackc.low %vm13803_vm14, %vm13799_vm2  ;;  %v3611_v51 = vrot.slane %v12672_v47, %v11863_v60  ;;  %v3127_v24 = vrot.slane %v3098_v7, %v10696_v30 }
 0x317   : > { %10160 = vmatprep.subr.msk.bf16.mxu0 %vm2417_vm6, %v2286_v40  ;;  %vm2776_vm6 = vcmp.ne.s16.totalorder %v2757_v62, 0  ;;  %v3278_v43 = vsel %vm3273_vm8, 65537, %v19798_v16  ;;  %v3365_v18 = vpop.permute.xlu1 %3364  ;;  %v3545_v56 = vpop.permute.xlu0 %3544 }
 0x318   : > { %v2786_v31 = vsel %vm2776_vm6, %v2645_v44, 0  ;;  %v3311_v26 = vrot.slane %v3278_v43, %v10750_v46  ;;  %vm13843_vm6 = vcmp.eq.s32.totalorder %v3611_v51, 1  ;;  %vm3146_vm2 = vcmp.ne.s16.totalorder %v3127_v24, 0 }
 0x319   : > { %3904 = vmatmul.mubr.bf16.vlgmr.msra.gmra.mrb[12].mxu0 %v12873_v14  ;;  %v10418_v14 = vld [vmem:[%s19507_s2 + $0x14] ss:$8 sps:$4 sm:$0xff]   ;;  %v3307_v40 = vrot.slane %v3278_v43, %v10696_v30 }
 0x31a   : > { %3958 = vmatpush1.bf16.msra.mxu0 %v2426_v29  ;;  %9985 = vmatprep.mubr.msk.bf16.mxu0 %vm20289_vm1, %v10418_v14  ;;  %vm13823_vm1 = vcmp.eq.s32.totalorder %v3431_v54, 1  ;;  %vm3327_vm14 = vcmp.ne.s16.totalorder %v3311_v26, 0  ;;  %v20315_v29 = vld [vmem:[#allocation38_spill] sm:$0xff]  ;;  %v20318_v14 = vld [vmem:[#allocation40_spill] sm:$0xff] }
 0x31b   : > { %10161 = vmatprep.subr.msk.bf16.mxu0 %vm2597_vm4, %v2466_v20  ;;  %vm20300_vm4 = vcmask 7168   ;;  %vm3453_vm10 = vmpackc.low %vm13823_vm1, %vm13819_vm5  ;;  %vm3326_vm8 = vcmp.ne.s16.totalorder %v3307_v40, 0  ;;  %vm20319_vm1 = vcmask 916480  }
 0x31c   : > { %v2825_v10 = vsel %vm20300_vm4, %v20299_v45, %v2815_v59  ;;  %vm20301_vm7 = vmmov %vm20300_vm4  ;;  %v3458_v33 = vsel %vm3453_vm10, 65537, %v19798_v16  ;;  %v3376_v6 = vsel %vm20319_vm1, %v20318_v14, %v3365_v18 }
 0x31d   : > { %v2826_v49 = vsel %vm20301_vm7, %v2815_v59, %v13329_v5  ;;  %v2966_v23 = vsel %vm2956_vm15, %v2825_v10, 0  ;;  %v3607_v5 = vrot.slane %v12672_v47, %v11860_v9  ;;  %v3491_v50 = vrot.slane %v3458_v33, %v10750_v46 }
 0x31e   : > { %3960 = vmatpush1.bf16.msra.mxu0 %v2606_v42  ;;  %vm20316_vm7 = vcmask 924672   ;;  %v3487_v55 = vrot.slane %v3458_v33, %v10696_v30  ;;  %v20321_v42 = vld [vmem:[#allocation42_spill] sm:$0xff] }
 0x31f   : > { %10162 = vmatprep.subr.msk.bf16.mxu0 %vm2777_vm3, %v2646_v25  ;;  %vm3147_vm3 = vcmp.ne.s16.totalorder %v3131_v58, 0  ;;  %vm13839_vm0 = vcmp.eq.s32.totalorder %v3607_v5, 1  ;;  %v3196_v35 = vsel %vm20316_vm7, %v20315_v29, %v3185_v8  ;;  %vm20317_vm15 = vmmov %vm20316_vm7  ;;  %vm3507_vm5 = vcmp.ne.s16.totalorder %v3491_v50, 0 }
 0x320   : > { %vm3633_vm4 = vmpackc.low %vm13843_vm6, %vm13839_vm0  ;;  %v3336_v62 = vsel %vm3326_vm8, %v3196_v35, 0  ;;  %vm3506_vm10 = vcmp.ne.s16.totalorder %v3487_v55, 0  ;;  %vm20322_vm6 = vcmask 908288  }
 0x321   : > { %v3638_v38 = vsel %vm3633_vm4, 65537, %v19798_v16  ;;  %v3516_v41 = vsel %vm3506_vm10, %v3376_v6, 0  ;;  %v3556_v11 = vsel %vm20322_vm6, %v20321_v42, %v3545_v56 }
 0x322   : > { %3962 = vmatpush1.bf16.msra.mxu0 %v2786_v31  ;;  %v3671_v20 = vrot.slane %v3638_v38, %v10750_v46 }
 0x323   : > { %10163 = vmatprep.subr.msk.bf16.mxu0 %vm2957_vm12, %v2826_v49  ;;  %vm20312_vm12 = vcmask 1039360  }
 0x324   : > { %v3016_v17 = vsel %vm20312_vm12, %v20311_v22, %v3005_v61  ;;  %vm20314_vm13 = vmmov %vm20312_vm12  ;;  %vm3687_vm0 = vcmp.ne.s16.totalorder %v3671_v20, 0 }
 0x325   : > { %v3017_v1 = vsel %vm20314_vm13, %v3005_v61, %v13382_v21  ;;  %v3156_v36 = vsel %vm3146_vm2, %v3016_v17, 0  ;;  %v3197_v21 = vsel %vm20317_vm15, %v3185_v8, %v13386_v37  ;;  %v3667_v37 = vrot.slane %v3638_v38, %v10696_v30  ;;  %vm20323_vm12 = vmmov %vm20322_vm6 }
 0x326   : > { %3964 = vmatpush1.bf16.msra.mxu0 %v2966_v23  ;;  %v3557_v39 = vsel %vm20323_vm12, %v3545_v56, %v13562_v34  ;;  %vm20327_vm2 = vcmask 130048  }
 0x327   : > { %3965 = vmatprep.subr.bf16.mxu0 %v20306_v32  ;;  %vm3686_vm13 = vcmp.ne.s16.totalorder %v3667_v37, 0 }
 0x328   : > { %v3696_v4 = vsel %vm3686_vm13, %v3556_v11, 0  ;;  %v13878_v3 = vpop.permute.xlu1 %3808  ;;  %v13881_v59 = vpop.permute.xlu0 %3813 }
 0x32a   : > { %3966 = vmatpush1.bf16.msra.mxu0 %v20313_v15 }
 0x32b   : > { %10164 = vmatprep.subr.msk.bf16.mxu0 %vm3147_vm3, %v3017_v1  ;;  %vm20320_vm3 = vmmov %vm20319_vm1 }
 0x32c   : > { %v3377_v48 = vsel %vm20320_vm3, %v3365_v18, %v13478_v19  ;;  %v10419_v19 = vld [vmem:[%s19507_s2 + $0x10] ss:$8 sps:$4 sm:$0xff]  }
 0x32e   : > { %3968 = vmatpush1.bf16.msra.mxu0 %v3156_v36 }
 0x32f   : > { %10165 = vmatprep.subr.msk.bf16.mxu0 %vm3327_vm14, %v3197_v21  ;;  %vm20328_vm14 = vmmov %vm20327_vm2 }
 0x332   : > { %3970 = vmatpush1.bf16.msra.mxu0 %v3336_v62 }
 0x333   : > { %10166 = vmatprep.subr.msk.bf16.mxu0 %vm3507_vm5, %v3377_v48 }
 0x336   : > { %3972 = vmatpush1.bf16.msra.mxu0 %v3516_v41 }
 0x337   : > { %10167 = vmatprep.subr.msk.bf16.mxu0 %vm3687_vm0, %v3557_v39 }
 0x33a   : > { %3974 = vmatpush1.bf16.msra.mxu0 %v3696_v4 }
 0x33d   : > { %3990 = vmatmul.mubr.bf16.vlgmr.msra.gmra.mrb[16].mxu0 %v10419_v19 }
 0x390   : > { %v3862_v44 = vpop.f32.mrb[8].mxu1 }
 0x391   : > { %v3863_v25 = vadd.f32 %v3862_v44, %v13878_v3  ;;  %v3864_v57 = vpop.f32.mrb[9].mxu1 }
 0x392   : > { %v3865_v63 = vadd.f32 %v3864_v57, %v13878_v3  ;;  %v3866_v34 = vpop.f32.mrb[10].mxu1 }
 0x393   : > { %v3867_v31 = vadd.f32 %v3866_v34, %v13881_v59  ;;  %v3868_v12 = vpop.f32.mrb[11].mxu1  ;;  %v4043_v54 = vmax.f32 %v3863_v25, 0.0 }
 0x394   : > { %v3869_v28 = vadd.f32 %v3868_v12, %v13881_v59  ;;  %v4044_v10 = vmax.f32 %v3865_v63, 0.0 }
 0x395   : > { %v4053_v45 = vmax.f32 %v3867_v31, 0.0 }
 0x396   : > { %v4054_v49 = vmax.f32 %v3869_v28, 0.0 }
 0x397   : > { %v13886_v7 = vpack.c.bf16 %v4053_v45, %v4043_v54 }
 0x398   : > { %v13888_v58 = vpack.c.bf16 %v4054_v49, %v4044_v10 }
 0x3b4   : > { %v3948_v52 = vpop.f32.mrb[12].mxu1 }
 0x3b5   : > { %v3949_v23 = vadd.f32 %v3948_v52, %v13878_v3  ;;  %v3950_v0 = vpop.f32.mrb[13].mxu1 }
 0x3b6   : > { %v3951_v5 = vadd.f32 %v3950_v0, %v13878_v3  ;;  %v3952_v51 = vpop.f32.mrb[14].mxu1 }
 0x3b7   : > { %v3953_v24 = vadd.f32 %v3952_v51, %v13881_v59  ;;  %v3954_v61 = vpop.f32.mrb[15].mxu1  ;;  %v4047_v43 = vmax.f32 %v3949_v23, 0.0  ;;  %v4126_v51 = vld [vmem:[%s19506_s1] ss:$8 sm:$0xf0] }
 0x3b8   : > { %v3955_v32 = vadd.f32 %v3954_v61, %v13881_v59  ;;  %v4048_v2 = vmax.f32 %v3951_v5, 0.0 }
 0x3b9   : > { %v4057_v26 = vmax.f32 %v3953_v24, 0.0 }
 0x3ba   : > { %v4058_v47 = vmax.f32 %v3955_v32, 0.0 }
 0x3bb   : > { %v13894_v22 = vpack.c.bf16 %v4057_v26, %v4047_v43 }
 0x3bc   : > { %v13896_v17 = vpack.c.bf16 %v4058_v47, %v4048_v2  ;;  %v9988_v47 = vld [vmem:[%s19506_s1 + $0x1] ss:$8 sm:$0xf] }
 0x3d8   : > { %v4034_v15 = vpop.f32.mrb[16].mxu1 }
 0x3d9   : > { %v4035_v1 = vadd.f32 %v4034_v15, %v13878_v3  ;;  %v4036_v40 = vpop.f32.mrb[17].mxu1  ;;  %v9989_v15 = vld [vmem:[%s19506_s1 + $0x1] ss:$8 sm:$0xf0] }
 0x3da   : > { %v4037_v8 = vadd.f32 %v4036_v40, %v13878_v3  ;;  %v4038_v33 = vpop.f32.mrb[18].mxu1  ;;  %v9991_v40 = vld [vmem:[%s19506_s1 + $0x2] ss:$8 sm:$0xf] }
 0x3db   : > { %v4039_v50 = vadd.f32 %v4038_v33, %v13881_v59  ;;  %v4040_v36 = vpop.f32.mrb[19].mxu1  ;;  %v4051_v35 = vmax.f32 %v4035_v1, 0.0  ;;  %v4307_v1 = vor.u32 %v9989_v15, %v9988_v47 }
 0x3dc   : > { %v4041_v29 = vadd.f32 %v4040_v36, %v13881_v59  ;;  %v4052_v55 = vmax.f32 %v4037_v8, 0.0  ;;  %v9992_v8 = vld [vmem:[%s19506_s1 + $0x2] ss:$8 sm:$0xf0] }
 0x3dd   : > { %v4061_v21 = vmax.f32 %v4039_v50, 0.0  ;;  %v4487_v36 = vor.u32 %v9992_v8, %v9991_v40  ;;  %vm4309_vm5 = vcmp.ne.f32.partialorder %v4307_v1, 0.0 }
 0x3de   : > { %v4062_v18 = vmax.f32 %v4041_v29, 0.0 }
 0x3df   : > { %v13902_v38 = vpack.c.bf16 %v4061_v21, %v4051_v35  ;;  %vm4489_vm1 = vcmp.ne.f32.partialorder %v4487_v36, 0.0 }
 0x3e0   : > { %v13904_v20 = vpack.c.bf16 %v4062_v18, %v4052_v55  ;;  %v9994_v55 = vld [vmem:[%s19506_s1 + $0x3] ss:$8 sm:$0xf] }
 0x3e1   : > { %v9995_v18 = vld [vmem:[%s19506_s1 + $0x3] ss:$8 sm:$0xf0] }
 0x3ec   : > { %v3905_v62 = vpop.f32.mrb[12].mxu0 }
 0x3ed   : > { %v3906_v14 = vadd.f32 %v3905_v62, %v13878_v3  ;;  %v3907_v6 = vpop.f32.mrb[13].mxu0  ;;  %v14104_v62 = vsel %vm4309_vm5, 1, %v19798_v16 }
 0x3ee   : > { %v3908_v48 = vadd.f32 %v3907_v6, %v13878_v3  ;;  %v3909_v37 = vpop.f32.mrb[14].mxu0 }
 0x3ef   : > { %v3910_v56 = vadd.f32 %v3909_v37, %v13881_v59  ;;  %v3911_v41 = vpop.f32.mrb[15].mxu0  ;;  %v4045_v11 = vmax.f32 %v3906_v14, 0.0  ;;  %v4667_v37 = vor.u32 %v9995_v18, %v9994_v55 }
 0x3f0   : > { %v3912_v42 = vadd.f32 %v3911_v41, %v13881_v59  ;;  %v4046_v4 = vmax.f32 %v3908_v48, 0.0  ;;  %v4320_v41 = vrot.slane %v14104_v62, %v19990_v27 }
 0x3f1   : > { %v4055_v39 = vmax.f32 %v3910_v56, 0.0  ;;  %v4316_v56 = vrot.slane %v14104_v62, %v10696_v30  ;;  %vm4669_vm10 = vcmp.ne.f32.partialorder %v4667_v37, 0.0 }
 0x3f2   : > { %v4056_v19 = vmax.f32 %v3912_v42, 0.0  ;;  %v14116_v42 = vsel %vm4489_vm1, 1, %v19798_v16  ;;  %vm14143_vm6 = vcmp.eq.s32.totalorder %v4320_v41, 1  ;;  %v10012_v41 = vld [vmem:[%s19508_s3 + $0x28] sm:$0xff] }
 0x3f3   : > { %v13910_v44 = vpack.c.bf16 %v4055_v39, %v4045_v11  ;;  %v9997_v11 = vld [vmem:[%s19506_s1 + $0x5] ss:$8 sm:$0xf]  ;;  %vm14139_vm0 = vcmp.eq.s32.totalorder %v4316_v56, 1 }
 0x3f4   : > { %v13912_v25 = vpack.c.bf16 %v4056_v19, %v4046_v4  ;;  %v9998_v39 = vld [vmem:[%s19506_s1 + $0x5] ss:$8 sm:$0xf0]  ;;  %vm4363_vm12 = vmpackc.low %vm14143_vm6, %vm14139_vm0  ;;  %vm20348_vm6 = vcmask 130048  }
 0x3f5   : > { %20324 = vst [vmem:[#allocation10_spill] sm:$0xff] %v13910_v44  ;;  %4997 = vrot.lane.b32.xlu0 %v13910_v44, %s10455_s10  ;;  %4817 = vrot.lane.b32.xlu1 %v13910_v44, %s10454_s27  ;;  %v4368_v15 = vsel %vm4363_vm12, 65537, %v19798_v16  ;;  %vm20349_vm12 = vmmov %vm20348_vm6 }
 0x3f6   : > { %v4380_v36 = vrot.slane %v4368_v15, %v10750_v46 }
 0x3f8   : > { %vm14237_vm1 = vcmp.ne.s16.totalorder %v4380_v36, 0 }
 0x3f9   : > { %4265 = vrot.lane.b32.xlu1 %v13886_v7, %s10451_s24  ;;  %4085 = vrot.lane.b32.xlu0 %v13886_v7, %s10450_s23 }
 0x3fd   : > { %4625 = vrot.lane.b32.xlu1 %v13886_v7, %s10453_s26  ;;  %4445 = vrot.lane.b32.xlu0 %v13886_v7, %s10452_s25 }
 0x401   : > { %4813 = vrot.lane.b32.xlu1 %v13886_v7, %s10454_s27  ;;  %4993 = vrot.lane.b32.xlu0 %v13886_v7, %s10455_s10 }
 0x405   : > { %4087 = vrot.lane.b32.xlu1 %v13888_v58, %s10450_s23  ;;  %4267 = vrot.lane.b32.xlu0 %v13888_v58, %s10451_s24 }
 0x409   : > { %4447 = vrot.lane.b32.xlu1 %v13888_v58, %s10452_s25  ;;  %4627 = vrot.lane.b32.xlu0 %v13888_v58, %s10453_s26 }
 0x40d   : > { %4995 = vrot.lane.b32.xlu1 %v13888_v58, %s10455_s10  ;;  %4815 = vrot.lane.b32.xlu0 %v13888_v58, %s10454_s27 }
 0x410   : > { %v3991_v57 = vpop.f32.mrb[16].mxu0 }
 0x411   : > { %v3992_v63 = vadd.f32 %v3991_v57, %v13878_v3  ;;  %v3993_v34 = vpop.f32.mrb[17].mxu0  ;;  %4074 = vrot.lane.b32.xlu1 %v13904_v20, %s10450_s23  ;;  %4263 = vrot.lane.b32.xlu0 %v13904_v20, %s10451_s24  ;;  %v4496_v57 = vrot.slane %v14116_v42, %v10696_v30 }
 0x412   : > { %v3994_v31 = vadd.f32 %v3993_v34, %v13878_v3  ;;  %v3995_v12 = vpop.f32.mrb[18].mxu0  ;;  %v13977_v3 = vld [vmem:[%s19507_s2 + $0x24] ss:$8 sps:$4 sm:$0xff]  }
 0x413   : > { %v3996_v28 = vadd.f32 %v3995_v12, %v13881_v59  ;;  %v3997_v54 = vpop.f32.mrb[19].mxu0  ;;  %v4049_v10 = vmax.f32 %v3992_v63, 0.0  ;;  %10015 = vmatprep.mubr.msk.bf16.mxu0 %vm20327_vm2, %v13977_v3  ;;  %10016 = vmatprep.mubr.msk.bf16.mxu1 %vm20328_vm14, %v13977_v3  ;;  %v4500_v63 = vrot.slane %v14116_v42, %v19990_v27  ;;  %vm14165_vm13 = vcmp.eq.s32.totalorder %v4496_v57, 1 }
 0x414   : > { %v3998_v45 = vadd.f32 %v3997_v54, %v13881_v59  ;;  %v4050_v52 = vmax.f32 %v3994_v31, 0.0  ;;  %v4125_v59 = vld [vmem:[%s19506_s1] ss:$8 sm:$0xf]  ;;  %v14152_v54 = vsel %vm4669_vm10, 1, %v19798_v16 }
 0x415   : > { %v4059_v49 = vmax.f32 %v3996_v28, 0.0  ;;  %5173 = vrot.lane.b32.xlu1 %v13886_v7, %s10456_s11  ;;  %5175 = vrot.lane.b32.xlu0 %v13888_v58, %s10456_s11  ;;  %v4127_v24 = vor.u32 %v4126_v51, %v4125_v59  ;;  %v4857_v28 = vor.u32 %v9998_v39, %v9997_v11  ;;  %vm14169_vm2 = vcmp.eq.s32.totalorder %v4500_v63, 1  ;;  %v10001_v59 = vld [vmem:[%s19506_s1 + $0x6] ss:$8 sm:$0xf0] }
 0x416   : > { %v4060_v23 = vmax.f32 %v3998_v45, 0.0  ;;  %v10000_v45 = vld [vmem:[%s19506_s1 + $0x6] ss:$8 sm:$0xf]  ;;  %v4676_v51 = vrot.slane %v14152_v54, %v10696_v30 }
 0x417   : > { %v13954_v0 = vpack.c.bf16 %v4059_v49, %v4049_v10  ;;  %vm4129_vm4 = vcmp.ne.f32.partialorder %v4127_v24, 0.0  ;;  %vm4859_vm14 = vcmp.ne.f32.partialorder %v4857_v28, 0.0  ;;  %v4680_v24 = vrot.slane %v14152_v54, %v19990_v27  ;;  %v10006_v63 = vld [vmem:[%s19506_s1 + $0x50] ss:$8 sm:$0xf] }
 0x418   : > { %v13956_v5 = vpack.c.bf16 %v4060_v23, %v4050_v52  ;;  %v14050_v61 = vsel %vm4129_vm4, 1, %v19798_v16  ;;  %vm4543_vm4 = vmpackc.low %vm14169_vm2, %vm14165_vm13  ;;  %v5037_v1 = vor.u32 %v10001_v59, %v10000_v45  ;;  %v14202_v55 = vsel %vm4859_vm14, 1, %v19798_v16 }
 0x419   : > { %20325 = vst [vmem:[#allocation29_spill] sm:$0xff] %v13954_v0  ;;  %4443 = vrot.lane.b32.xlu1 %v13904_v20, %s10452_s25  ;;  %4623 = vrot.lane.b32.xlu0 %v13904_v20, %s10453_s26  ;;  %v4136_v32 = vrot.slane %v14050_v61, %v10696_v30  ;;  %v4140_v43 = vrot.slane %v14050_v61, %v19990_v27 }
 0x41a   : > { %20326 = vst [vmem:[#allocation37_spill] sm:$0xff] %v13956_v5  ;;  %vm5039_vm5 = vcmp.ne.f32.partialorder %v5037_v1, 0.0  ;;  %v4866_v57 = vrot.slane %v14202_v55, %v10696_v30  ;;  %v4870_v45 = vrot.slane %v14202_v55, %v19990_v27 }
 0x41b   : > { %vm4173_vm7 = vcmp.eq.s32.totalorder %v4136_v32, 1  ;;  %vm4174_vm15 = vcmp.eq.s32.totalorder %v4140_v43, 1  ;;  %v10003_v32 = vld [vmem:[%s19506_s1 + $0x7] ss:$8 sm:$0xf]  ;;  %v14259_v23 = vsel %vm5039_vm5, 1, %v19798_v16 }
 0x41c   : > { %vm4183_vm8 = vmpackc.low %vm4174_vm15, %vm4173_vm7  ;;  %v10004_v43 = vld [vmem:[%s19506_s1 + $0x7] ss:$8 sm:$0xf0]  ;;  %vm14210_vm7 = vcmp.eq.s32.totalorder %v4676_v51, 1  ;;  %vm14214_vm15 = vcmp.eq.s32.totalorder %v4680_v24, 1  ;;  %vm14280_vm13 = vcmp.eq.s32.totalorder %v4866_v57, 1  ;;  %v5050_v37 = vrot.slane %v14259_v23, %v19990_v27 }
 0x41d   : > { %5177 = vrot.lane.b32.xlu1 %v13910_v44, %s10456_s11  ;;  %5353 = vrot.lane.b32.xlu0 %v13886_v7, %s10457_s15  ;;  %v4188_v21 = vsel %vm4183_vm8, 65537, %v19798_v16  ;;  %v5217_v18 = vor.u32 %v10004_v43, %v10003_v32  ;;  %vm14285_vm14 = vcmp.eq.s32.totalorder %v4870_v45, 1 }
 0x41e   : > { %v4200_v48 = vrot.slane %v4188_v21, %v10750_v46  ;;  %v4196_v47 = vrot.slane %v4188_v21, %v10696_v30  ;;  %v4376_v21 = vrot.slane %v4368_v15, %v10696_v30 }
 0x41f   : > { %vm5219_vm0 = vcmp.ne.f32.partialorder %v5217_v18, 0.0 }
 0x420   : > { %vm4234_vm3 = vcmp.ne.s16.totalorder %v4200_v48, 0  ;;  %v4548_v48 = vsel %vm4543_vm4, 65537, %v19798_v16  ;;  %vm14218_vm8 = vcmp.ne.s16.totalorder %v4196_v47, 0  ;;  %vm14254_vm10 = vcmp.ne.s16.totalorder %v4376_v21, 0 }
 0x421   : > { %5355 = vrot.lane.b32.xlu1 %v13888_v58, %s10457_s15  ;;  %5357 = vrot.lane.b32.xlu0 %v13910_v44, %s10457_s15  ;;  %v4560_v28 = vrot.slane %v4548_v48, %v10750_v46  ;;  %v4556_v24 = vrot.slane %v4548_v48, %v10696_v30  ;;  %v14290_v18 = vsel %vm5219_vm0, 1, %v19798_v16  ;;  %v5046_v48 = vrot.slane %v14259_v23, %v10696_v30 }
 0x423   : > { %vm4594_vm2 = vcmp.ne.s16.totalorder %v4560_v28, 0  ;;  %vm14305_vm4 = vcmp.ne.s16.totalorder %v4556_v24, 0  ;;  %v5230_v28 = vrot.slane %v14290_v18, %v19990_v27  ;;  %vm14331_vm5 = vcmp.eq.s32.totalorder %v5046_v48, 1 }
 0x425   : > { %4091 = vrot.lane.b32.xlu1 %v13912_v25, %s10450_s23  ;;  %4093 = vrot.lane.b32.xlu0 %v13894_v22, %s10450_s23 }
 0x429   : > { %4095 = vrot.lane.b32.xlu1 %v13896_v17, %s10450_s23  ;;  %4271 = vrot.lane.b32.xlu0 %v13912_v25, %s10451_s24 }
 0x42d   : > { %4273 = vrot.lane.b32.xlu1 %v13894_v22, %s10451_s24  ;;  %4275 = vrot.lane.b32.xlu0 %v13896_v17, %s10451_s24 }
 0x431   : > { %4451 = vrot.lane.b32.xlu1 %v13912_v25, %s10452_s25  ;;  %4453 = vrot.lane.b32.xlu0 %v13894_v22, %s10452_s25 }
 0x435   : > { %4455 = vrot.lane.b32.xlu1 %v13896_v17, %s10452_s25  ;;  %4631 = vrot.lane.b32.xlu0 %v13912_v25, %s10453_s26 }
 0x439   : > { %4633 = vrot.lane.b32.xlu1 %v13894_v22, %s10453_s26  ;;  %4635 = vrot.lane.b32.xlu0 %v13896_v17, %s10453_s26 }
 0x43d   : > { %4821 = vrot.lane.b32.xlu1 %v13894_v22, %s10454_s27  ;;  %4823 = vrot.lane.b32.xlu0 %v13896_v17, %s10454_s27 }
 0x441   : > { %4825 = vrot.lane.b32.xlu1 %v13954_v0, %s10454_s27  ;;  %5001 = vrot.lane.b32.xlu0 %v13894_v22, %s10455_s10 }
 0x445   : > { %5003 = vrot.lane.b32.xlu1 %v13896_v17, %s10455_s10  ;;  %5005 = vrot.lane.b32.xlu0 %v13954_v0, %s10455_s10 }
 0x449   : > { %5181 = vrot.lane.b32.xlu1 %v13894_v22, %s10456_s11  ;;  %5183 = vrot.lane.b32.xlu0 %v13896_v17, %s10456_s11 }
 0x44d   : > { %5185 = vrot.lane.b32.xlu1 %v13954_v0, %s10456_s11  ;;  %5361 = vrot.lane.b32.xlu0 %v13894_v22, %s10457_s15 }
 0x451   : > { %5363 = vrot.lane.b32.xlu1 %v13896_v17, %s10457_s15  ;;  %5365 = vrot.lane.b32.xlu0 %v13954_v0, %s10457_s15 }
 0x455   : > { %4099 = vrot.lane.b32.xlu1 %v13956_v5, %s10450_s23  ;;  %4101 = vrot.lane.b32.xlu0 %v13902_v38, %s10450_s23 }
 0x459   : > { %4279 = vrot.lane.b32.xlu1 %v13956_v5, %s10451_s24  ;;  %4281 = vrot.lane.b32.xlu0 %v13902_v38, %s10451_s24 }
 0x45d   : > { %4459 = vrot.lane.b32.xlu1 %v13956_v5, %s10452_s25  ;;  %4461 = vrot.lane.b32.xlu0 %v13902_v38, %s10452_s25 }
 0x461   : > { %4639 = vrot.lane.b32.xlu1 %v13956_v5, %s10453_s26  ;;  %4641 = vrot.lane.b32.xlu0 %v13902_v38, %s10453_s26 }
 0x465   : > { %4829 = vrot.lane.b32.xlu1 %v13902_v38, %s10454_s27  ;;  %5009 = vrot.lane.b32.xlu0 %v13902_v38, %s10455_s10 }
 0x467   : > { %v14060_v26 = vpop.permute.xlu0 %4997  ;;  %v14062_v2 = vpop.permute.xlu1 %4817 }
 0x468   : > { %20329 = vst [vmem:[#allocation30_spill] sm:$0xff] %v14060_v26 }
 0x469   : > { %4089 = vrot.lane.b32.xlu1 %v13910_v44, %s10450_s23  ;;  %4831 = vrot.lane.b32.xlu0 %v13904_v20, %s10454_s27 }
 0x46b   : > { %v14080_v33 = vpop.permute.xlu1 %4265  ;;  %v14082_v50 = vpop.permute.xlu0 %4085 }
 0x46d   : > { %5189 = vrot.lane.b32.xlu1 %v13902_v38, %s10456_s11  ;;  %4269 = vrot.lane.b32.xlu0 %v13910_v44, %s10451_s24 }
 0x46f   : > { %v14088_v29 = vpop.permute.xlu1 %4625  ;;  %v14090_v35 = vpop.permute.xlu0 %4445 }
 0x471   : > { %5011 = vrot.lane.b32.xlu1 %v13904_v20, %s10455_s10  ;;  %5191 = vrot.lane.b32.xlu0 %v13904_v20, %s10456_s11 }
 0x473   : > { %v14106_v14 = vpop.permute.xlu1 %4813  ;;  %v14108_v6 = vpop.permute.xlu0 %4993 }
 0x475   : > { %4449 = vrot.lane.b32.xlu1 %v13910_v44, %s10452_s25  ;;  %5369 = vrot.lane.b32.xlu0 %v13902_v38, %s10457_s15 }
 0x477   : > { %v14128_v4 = vpop.permute.xlu1 %4087  ;;  %v14130_v19 = vpop.permute.xlu0 %4267 }
 0x478   : > { %v4103_v34 = vsel %vm19690_vm11, %v14082_v50, %v14128_v4  ;;  %v4283_v51 = vsel %vm20349_vm12, %v14080_v33, %v14130_v19 }
 0x479   : > { %5371 = vrot.lane.b32.xlu1 %v13904_v20, %s10457_s15  ;;  %4629 = vrot.lane.b32.xlu0 %v13910_v44, %s10453_s26 }
 0x47a   : > { %10176 = vmatprep.subr.msk.bf16.mxu0 %vm4234_vm3, %v4103_v34  ;;  %v10007_v34 = vld [vmem:[%s19506_s1 + $0x50] ss:$8 sm:$0xf0]  ;;  %vm4723_vm3 = vmpackc.low %vm14214_vm15, %vm14210_vm7 }
 0x47b   : > { %v14157_v10 = vpop.permute.xlu1 %4447  ;;  %v14159_v49 = vpop.permute.xlu0 %4627  ;;  %v5397_v32 = vor.u32 %v10007_v34, %v10006_v63  ;;  %v4728_v15 = vsel %vm4723_vm3, 65537, %v19798_v16  ;;  %vm4913_vm15 = vmpackc.low %vm14285_vm14, %vm14280_vm13  ;;  %vm20360_vm3 = vcmask 7168   ;;  %vm14362_vm13 = vcmp.eq.s32.totalorder %v5230_v28, 1 }
 0x47c   : > { %v4463_v56 = vsel %vm19689_vm9, %v14090_v35, %v14157_v10  ;;  %v4736_v57 = vrot.slane %v4728_v15, %v10696_v30  ;;  %v4918_v24 = vsel %vm4913_vm15, 65537, %v19798_v16  ;;  %v4152_v28 = vrot.slane %v14050_v61, %v10750_v46 }
 0x47d   : > { %4819 = vrot.lane.b32.xlu1 %v13912_v25, %s10454_s27  ;;  %4999 = vrot.lane.b32.xlu0 %v13912_v25, %s10455_s10  ;;  %vm5399_vm7 = vcmp.ne.f32.partialorder %v5397_v32, 0.0 }
 0x47e   : > { %vm4773_vm0 = vcmp.ne.s16.totalorder %v4736_v57, 0 }
 0x47f   : > { %v14196_v40 = vpop.permute.xlu1 %4995  ;;  %v14198_v8 = vpop.permute.xlu0 %4815 }
 0x481   : > { %5179 = vrot.lane.b32.xlu1 %v13912_v25, %s10456_s11  ;;  %5359 = vrot.lane.b32.xlu0 %v13912_v25, %s10457_s15 }
 0x483   : > { %v14222_v11 = vpop.permute.xlu1 %4074  ;;  %v14224_v39 = vpop.permute.xlu0 %4263 }
 0x484   : > { %v4123_v31 = vsel %vm19690_vm11, %v14222_v11, %v14082_v50  ;;  %v4303_v59 = vsel %vm20348_vm6, %v14224_v39, %v14080_v33  ;;  %v4740_v33 = vrot.slane %v4728_v15, %v10750_v46 }
 0x485   : > { %4097 = vrot.lane.b32.xlu1 %v13954_v0, %s10450_s23  ;;  %4277 = vrot.lane.b32.xlu0 %v13954_v0, %s10451_s24  ;;  %v4243_v50 = vsel %vm14218_vm8, %v4123_v31, 0  ;;  %v4423_v21 = vsel %vm14254_vm10, %v4303_v59, 0  ;;  %v5226_v31 = vrot.slane %v14290_v18, %v10696_v30  ;;  %vm20361_vm10 = vmmov %vm20360_vm3 }
 0x486   : > { %5652 = vmatpush1.bf16.msra.mxu0 %v4243_v50  ;;  %vm4774_vm8 = vcmp.ne.s16.totalorder %v4740_v33, 0  ;;  %v4930_v33 = vrot.slane %v4918_v24, %v10750_v46 }
 0x487   : > { %v14268_v43 = vpop.permute.xlu1 %5173  ;;  %10177 = vmatprep.subr.msk.bf16.mxu0 %vm14237_vm1, %v4283_v51  ;;  %v14272_v47 = vpop.permute.xlu0 %5175  ;;  %vm14335_vm1 = vcmp.eq.s32.totalorder %v5050_v37, 1  ;;  %v4643_v51 = vsel %vm20361_vm10, %v14088_v29, %v14159_v49  ;;  %vm14353_vm6 = vcmp.eq.s32.totalorder %v5226_v31, 1  ;;  %v4926_v37 = vrot.slane %v4918_v24, %v10696_v30 }
 0x488   : > { %vm5093_vm12 = vmpackc.low %vm14335_vm1, %vm14331_vm5  ;;  %vm4964_vm14 = vcmp.ne.s16.totalorder %v4930_v33, 0 }
 0x489   : > { %4457 = vrot.lane.b32.xlu1 %v13954_v0, %s10452_s25  ;;  %4637 = vrot.lane.b32.xlu0 %v13954_v0, %s10453_s26  ;;  %vm14404_vm15 = vcmp.ne.s16.totalorder %v4926_v37, 0 }
 0x48a   : > { %5654 = vmatpush1.bf16.msra.mxu0 %v4423_v21 }
 0x48b   : > { %v14310_v63 = vpop.permute.xlu1 %4443  ;;  %10178 = vmatprep.subr.msk.bf16.mxu0 %vm4594_vm2, %v4463_v56  ;;  %v14312_v34 = vpop.permute.xlu0 %4623  ;;  %v10011_v56 = vld [vmem:[%s19508_s3 + $0x20] sm:$0xff]  ;;  %vm5273_vm2 = vmpackc.low %vm14362_vm13, %vm14353_vm6  ;;  %vm20381_vm6 = vcmask 924672  }
 0x48c   : > { %v4483_v12 = vsel %vm19689_vm9, %v14310_v63, %v14090_v35  ;;  %v14340_v35 = vsel %vm5399_vm7, 1, %v19798_v16  ;;  %v4663_v59 = vsel %vm20360_vm3, %v14312_v34, %v14088_v29  ;;  %v5278_v29 = vsel %vm5273_vm2, 65537, %v19798_v16 }
 0x48d   : > { %4827 = vrot.lane.b32.xlu1 %v13956_v5, %s10454_s27  ;;  %5007 = vrot.lane.b32.xlu0 %v13956_v5, %s10455_s10  ;;  %v4603_v45 = vsel %vm14305_vm4, %v4483_v12, 0  ;;  %v5406_v36 = vrot.slane %v14340_v35, %v10696_v30  ;;  %v5410_v21 = vrot.slane %v14340_v35, %v19990_v27  ;;  %v4783_v48 = vsel %vm4773_vm0, %v4663_v59, 0 }
 0x48e   : > { %5656 = vmatpush1.bf16.msra.mxu0 %v4603_v45  ;;  %v5098_v12 = vsel %vm5093_vm12, 65537, %v19798_v16  ;;  %v20368_v45 = vld [vmem:[#allocation5_spill] sm:$0xff]  ;;  %vm14425_vm3 = vcmp.eq.s32.totalorder %v4152_v28, 1  ;;  %v5013_v28 = vsel %vm20381_vm6, %v14108_v6, %v14196_v40  ;;  %vm20382_vm12 = vmmov %vm20381_vm6 }
 0x48f   : > { %v14349_v32 = vpop.permute.xlu1 %5177  ;;  %10179 = vmatprep.subr.msk.bf16.mxu0 %vm4774_vm8, %v4643_v51  ;;  %v14351_v15 = vpop.permute.xlu0 %5353  ;;  %v4156_v50 = vrot.slane %v14050_v61, %v20368_v45  ;;  %v5110_v52 = vrot.slane %v5098_v12, %v10750_v46  ;;  %vm14396_vm4 = vcmp.eq.s32.totalorder %v5406_v36, 1  ;;  %vm14400_vm7 = vcmp.eq.s32.totalorder %v5410_v21, 1 }
 0x490   : > { %20362 = vst [vmem:[#allocation39_spill] sm:$0xff] %v14349_v32  ;;  %vm20375_vm8 = vcmask 1039360   ;;  %v5106_v33 = vrot.slane %v5098_v12, %v10696_v30  ;;  %vm5453_vm1 = vmpackc.low %vm14400_vm7, %vm14396_vm4  ;;  %v4336_v37 = vrot.slane %v14104_v62, %v20368_v45  ;;  %v5286_v12 = vrot.slane %v5278_v29, %v10696_v30 }
 0x491   : > { %5187 = vrot.lane.b32.xlu1 %v13956_v5, %s10456_s11  ;;  %5367 = vrot.lane.b32.xlu0 %v13956_v5, %s10457_s15  ;;  %v4833_v24 = vsel %vm20375_vm8, %v14106_v14, %v14198_v8  ;;  %vm20376_vm5 = vmmov %vm20375_vm8  ;;  %vm14429_vm10 = vcmp.eq.s32.totalorder %v4156_v50, 1  ;;  %vm5144_vm0 = vcmp.ne.s16.totalorder %v5110_v52, 0  ;;  %v5014_v50 = vsel %vm20382_vm12, %v14196_v40, %v14060_v26  ;;  %v9987_v5 = vld [vmem:[%s19506_s1 + $0x40] ss:$8 sm:$0x3] }
 0x492   : > { %5658 = vmatpush1.bf16.msra.mxu0 %v4783_v48  ;;  %v4834_v1 = vsel %vm20376_vm5, %v14198_v8, %v14062_v2  ;;  %v4332_v48 = vrot.slane %v14104_v62, %v10750_v46  ;;  %vm14447_vm13 = vcmp.ne.s16.totalorder %v5106_v33, 0  ;;  %v5458_v52 = vsel %vm5453_vm1, 65537, %v19798_v16  ;;  %vm4185_vm2 = vmpackc.low %vm14429_vm10, %vm14425_vm3 }
 0x493   : > { %v14381_v57 = vpop.permute.xlu1 %5355  ;;  %5659 = vmatprep.subr.bf16.mxu0 %v13888_v58  ;;  %v14384_v31 = vpop.permute.xlu0 %5357  ;;  %vm14464_vm4 = vcmp.eq.s32.totalorder %v4336_v37, 1  ;;  %v4512_v33 = vrot.slane %v14116_v42, %v10750_v46  ;;  %v4190_v37 = vsel %vm4185_vm2, 65537, %v19798_v16  ;;  %vm20392_vm8 = vcmask 916480  }
 0x494   : > { %20367 = vst [vmem:[#allocation31_spill] sm:$0xff] %v14384_v31  ;;  %vm20393_vm5 = vmmov %vm20392_vm8  ;;  %vm20401_vm12 = vcmask 908288   ;;  %v5246_v8 = vrot.slane %v14290_v18, %v20368_v45 }
 0x495   : > { %5631 = vperm.xlu1 %10367, %v10011_v56   ;;  %5636 = vperm.xlu0 %10366, %v10012_v41   ;;  %v5290_v56 = vrot.slane %v5278_v29, %v10750_v46  ;;  %v4973_v41 = vsel %vm14404_vm15, %v4833_v24, 0  ;;  %v4516_v29 = vrot.slane %v14116_v42, %v20368_v45  ;;  %vm14475_vm15 = vcmp.ne.s16.totalorder %v5286_v12, 0 }
 0x496   : > { %5660 = vmatpush1.bf16.msra.mxu0 %v13886_v7  ;;  %v5153_v7 = vsel %vm14447_vm13, %v5013_v28, 0  ;;  %v4692_v12 = vrot.slane %v14152_v54, %v10750_v46  ;;  %v4696_v28 = vrot.slane %v14152_v54, %v20368_v45  ;;  %vm14498_vm10 = vcmp.eq.s32.totalorder %v4512_v33, 1  ;;  %vm20402_vm13 = vmmov %vm20401_vm12 }
 0x497   : > { %v14417_v36 = vpop.permute.xlu1 %4091  ;;  %10180 = vmatprep.subr.msk.bf16.mxu0 %vm4964_vm14, %v4834_v1  ;;  %v14419_v21 = vpop.permute.xlu0 %4093  ;;  %vm14460_vm14 = vcmp.eq.s32.totalorder %v4332_v48, 1  ;;  %vm5324_vm7 = vcmp.ne.s16.totalorder %v5290_v56, 0  ;;  %v5470_v1 = vrot.slane %v5458_v52, %v10750_v46  ;;  %v5466_v48 = vrot.slane %v5458_v52, %v10696_v30 }
 0x498   : > { %v5193_v56 = vsel %vm20392_vm8, %v14268_v43, %v14272_v47  ;;  %vm4365_vm1 = vmpackc.low %vm14464_vm4, %vm14460_vm14  ;;  %v4216_v52 = vrot.slane %v4190_v37, %v10750_v46  ;;  %v5373_v33 = vsel %vm20401_vm12, %v14351_v15, %v14381_v57  ;;  %vm14520_vm2 = vcmp.eq.s32.totalorder %v4692_v12, 1 }
 0x499   : > { %vm5504_vm3 = vcmp.ne.s16.totalorder %v5470_v1, 0  ;;  %v5333_v40 = vsel %vm14475_vm15, %v5193_v56, 0  ;;  %vm14508_vm6 = vcmp.ne.s16.totalorder %v5466_v48, 0  ;;  %v4370_v1 = vsel %vm4365_vm1, 65537, %v19798_v16 }
 0x49a   : > { %5662 = vmatpush1.bf16.msra.mxu0 %v4973_v41  ;;  %v5194_v41 = vsel %vm20393_vm5, %v14272_v47, %v14349_v32  ;;  %vm14524_vm14 = vcmp.eq.s32.totalorder %v4696_v28, 1  ;;  %v4392_v12 = vrot.slane %v4370_v1, %v10696_v30  ;;  %v5513_v28 = vsel %vm14508_vm6, %v5373_v33, 0 }
 0x49b   : > { %v14456_v59 = vpop.permute.xlu1 %4095  ;;  %10181 = vmatprep.subr.msk.bf16.mxu0 %vm5144_vm0, %v5014_v50  ;;  %v14458_v51 = vpop.permute.xlu0 %4271  ;;  %vm14502_vm0 = vcmp.eq.s32.totalorder %v4516_v29, 1  ;;  %v5374_v29 = vsel %vm20402_vm13, %v14381_v57, %v14384_v31  ;;  %v4396_v57 = vrot.slane %v4370_v1, %v10750_v46  ;;  %vm4725_vm8 = vmpackc.low %vm14524_vm14, %vm14520_vm2  ;;  %v4106_v47 = vsel %vm19690_vm11, %v14417_v36, %v14419_v21 }
 0x49c   : > { %20385 = vst [vmem:[#allocation41_spill] sm:$0xff] %v14456_v59  ;;  %vm4545_vm4 = vmpackc.low %vm14502_vm0, %vm14498_vm10  ;;  %v4107_v24 = vsel %vm19690_vm11, %v14419_v21, %v14456_v59  ;;  %vm14570_vm1 = vcmp.ne.s16.totalorder %v4392_v12, 0  ;;  %v5062_v12 = vrot.slane %v14259_v23, %v10750_v46  ;;  %vm20416_vm10 = vcmask 130048  }
 0x49d   : > { %vm14566_vm5 = vcmp.ne.s16.totalorder %v4396_v57, 0  ;;  %vm20417_vm0 = vmmov %vm20416_vm10  ;;  %vm4130_vm2 = vcmp.ne.f32.partialorder %v9987_v5, 0.0 }
 0x49e   : > { %5664 = vmatpush1.bf16.msra.mxu0 %v5153_v7  ;;  %v4550_v7 = vsel %vm4545_vm4, 65537, %v19798_v16  ;;  %vm20420_vm12 = vmmov %vm20417_vm0 }
 0x49f   : > { %v4274_v50 = vpop.permute.xlu1 %4273  ;;  %10182 = vmatprep.subr.msk.bf16.mxu0 %vm5324_vm7, %v5194_v41  ;;  %v14495_v58 = vpop.permute.xlu0 %4275  ;;  %v4212_v41 = vrot.slane %v4190_v37, %v10696_v30  ;;  %vm4238_vm7 = vcmp.ne.s16.totalorder %v4216_v52, 0  ;;  %v4882_v52 = vrot.slane %v14202_v55, %v10750_v46  ;;  %v4576_v21 = vrot.slane %v4550_v7, %v10750_v46 }
 0x4a0   : > { %20394 = vst [vmem:[#allocation32_spill] sm:$0xff] %v14495_v58  ;;  %v4286_v59 = vsel %vm20416_vm10, %v14458_v51, %v4274_v50  ;;  %vm14654_vm10 = vcmp.eq.s32.totalorder %v5246_v8, 1 }
 0x4a1   : > { %vm14543_vm15 = vcmp.ne.s16.totalorder %v4212_v41, 0  ;;  %v4886_v41 = vrot.slane %v14202_v55, %v20368_v45  ;;  %vm4598_vm13 = vcmp.ne.s16.totalorder %v4576_v21, 0 }
 0x4a2   : > { %5666 = vmatpush1.bf16.msra.mxu0 %v5333_v40  ;;  %v14541_v40 = vld [vmem:[%s19507_s2 + $0x20] ss:$8 sps:$4 sm:$0xff]   ;;  %v4247_v0 = vsel %vm14543_vm15, %v4106_v47, 0 }
 0x4a3   : > { %v14528_v37 = vpop.permute.xlu1 %4451  ;;  %10183 = vmatprep.subr.msk.bf16.mxu0 %vm5504_vm3, %v5374_v29  ;;  %v4454_v56 = vpop.permute.xlu0 %4453  ;;  %vm14580_vm3 = vcmp.eq.s32.totalorder %v4882_v52, 1  ;;  %v4287_v29 = vsel %vm20417_vm0, %v4274_v50, %v14495_v58  ;;  %vm14593_vm6 = vcmp.eq.s32.totalorder %v4886_v41, 1  ;;  %v5066_v52 = vrot.slane %v14259_v23, %v20368_v45 }
 0x4a4   : > { %v5242_v41 = vrot.slane %v14290_v18, %v10750_v46  ;;  %v4427_v58 = vsel %vm14570_vm1, %v4286_v59, 0  ;;  %vm4915_vm4 = vmpackc.low %vm14593_vm6, %vm14580_vm3  ;;  %v4466_v21 = vsel %vm19689_vm9, %v14528_v37, %v4454_v56  ;;  %vm20434_vm0 = vcmask 7168  }
 0x4a5   : > { %vm14629_vm15 = vcmp.eq.s32.totalorder %v5066_v52, 1  ;;  %vm20435_vm6 = vmmov %vm20434_vm0 }
 0x4a6   : > { %5668 = vmatpush1.bf16.msra.mxu0 %v5513_v28  ;;  %v4730_v28 = vsel %vm4725_vm8, 65537, %v19798_v16  ;;  %vm14641_vm1 = vcmp.eq.s32.totalorder %v5242_v41, 1 }
 0x4a7   : > { %v14562_v1 = vpop.permute.xlu1 %4455  ;;  %10192 = vmatprep.subr.msk.bf16.mxu0 %vm4238_vm7, %v4107_v24  ;;  %v14564_v33 = vpop.permute.xlu0 %4631  ;;  %v4572_v24 = vrot.slane %v4550_v7, %v10696_v30  ;;  %v4756_v50 = vrot.slane %v4730_v28, %v10750_v46  ;;  %vm14625_vm7 = vcmp.eq.s32.totalorder %v5062_v12, 1 }
 0x4a8   : > { %20409 = vst [vmem:[#allocation33_spill] sm:$0xff] %v14562_v1  ;;  %v4467_v5 = vsel %vm19689_vm9, %v4454_v56, %v14562_v1  ;;  %v4920_v56 = vsel %vm4915_vm4, 65537, %v19798_v16  ;;  %vm5095_vm3 = vmpackc.low %vm14629_vm15, %vm14625_vm7 }
 0x4a9   : > { %5684 = vmatmul.mubr.bf16.vlgmr.msra.gmra.mrb[20].mxu0 %v14541_v40  ;;  %vm14611_vm14 = vcmp.ne.s16.totalorder %v4572_v24, 0  ;;  %v4946_v48 = vrot.slane %v4920_v56, %v10750_v46 }
 0x4aa   : > { %5738 = vmatpush1.bf16.msra.mxu0 %v4247_v0  ;;  %10017 = vmatprep.mubr.msk.bf16.mxu0 %vm20420_vm12, %v13977_v3  ;;  %v4752_v0 = vrot.slane %v4730_v28, %v10696_v30  ;;  %v4607_v47 = vsel %vm14611_vm14, %v4466_v21, 0 }
 0x4ab   : > { %v4634_v7 = vpop.permute.xlu1 %4633  ;;  %10193 = vmatprep.subr.msk.bf16.mxu0 %vm14566_vm5, %v4287_v29  ;;  %v14603_v31 = vpop.permute.xlu0 %4635  ;;  %vm4778_vm5 = vcmp.ne.s16.totalorder %v4756_v50, 0  ;;  %v9990_v29 = vld [vmem:[%s19506_s1 + $0x41] ss:$8 sm:$0x3]  ;;  %v5426_v50 = vrot.slane %v14340_v35, %v20368_v45  ;;  %v5100_v45 = vsel %vm5095_vm3, 65537, %v19798_v16 }
 0x4ac   : > { %20421 = vst [vmem:[#allocation34_spill] sm:$0xff] %v14603_v31  ;;  %vm14635_vm8 = vcmp.ne.s16.totalorder %v4752_v0, 0  ;;  %v5422_v0 = vrot.slane %v14340_v35, %v10750_v46  ;;  %v4646_v41 = vsel %vm20434_vm0, %v14564_v33, %v4634_v7  ;;  %v4647_v32 = vsel %vm20435_vm6, %v4634_v7, %v14603_v31 }
 0x4ad   : > { %vm4310_vm12 = vcmp.ne.f32.partialorder %v9990_v29, 0.0  ;;  %v4787_v7 = vsel %vm14635_vm8, %v4646_v41, 0  ;;  %v4942_v31 = vrot.slane %v4920_v56, %v10696_v30  ;;  %vm14688_vm14 = vcmp.eq.s32.totalorder %v5426_v50, 1 }
 0x4ae   : > { %5740 = vmatpush1.bf16.msra.mxu0 %v4427_v58  ;;  %v4132_v58 = vsel %vm4130_vm2, 1, %v19798_v16  ;;  %vm14684_vm2 = vcmp.eq.s32.totalorder %v5422_v0, 1  ;;  %v4312_v56 = vsel %vm4310_vm12, 1, %v19798_v16  ;;  %v5126_v0 = vrot.slane %v5100_v45, %v10750_v46 }
 0x4af   : > { %v14633_v28 = vpop.permute.xlu1 %4821  ;;  %10194 = vmatprep.subr.msk.bf16.mxu0 %vm4598_vm13, %v4467_v5  ;;  %v4824_v24 = vpop.permute.xlu0 %4823  ;;  %v4168_v21 = vrot.slane %v4132_v58, %v10696_v30  ;;  %v4172_v8 = vrot.slane %v4132_v58, %v19990_v27  ;;  %vm5275_vm13 = vmpackc.low %vm14654_vm10, %vm14641_vm1  ;;  %v5122_v50 = vrot.slane %v5100_v45, %v10696_v30  ;;  %vm4968_vm8 = vcmp.ne.s16.totalorder %v4946_v48, 0  ;;  %v9996_v45 = vld [vmem:[%s19506_s1 + $0x43] ss:$8 sm:$0x3] }
 0x4b0   : > { %v5280_v41 = vsel %vm5275_vm13, 65537, %v19798_v16  ;;  %vm14711_vm1 = vcmp.ne.s16.totalorder %v4942_v31, 0  ;;  %vm20449_vm10 = vcmask 1039360   ;;  %v4352_v48 = vrot.slane %v4312_v56, %v19990_v27 }
 0x4b1   : > { %vm14692_vm4 = vcmp.eq.s32.totalorder %v4168_v21, 1  ;;  %vm14696_vm7 = vcmp.eq.s32.totalorder %v4172_v8, 1  ;;  %v4837_v8 = vsel %vm20449_vm10, %v14633_v28, %v4824_v24  ;;  %vm20450_vm0 = vmmov %vm20449_vm10  ;;  %vm14732_vm6 = vcmp.ne.s16.totalorder %v5126_v0, 0 }
 0x4b2   : > { %5742 = vmatpush1.bf16.msra.mxu0 %v4607_v47  ;;  %v9993_v47 = vld [vmem:[%s19506_s1 + $0x42] ss:$8 sm:$0x3]  ;;  %vm4187_vm3 = vmpackc.low %vm14696_vm7, %vm14692_vm4  ;;  %vm14736_vm12 = vcmp.ne.s16.totalorder %v5122_v50, 0  ;;  %vm4670_vm13 = vcmp.ne.f32.partialorder %v9996_v45, 0.0  ;;  %vm14769_vm4 = vcmp.eq.s32.totalorder %v4352_v48, 1 }
 0x4b3   : > { %v14668_v5 = vpop.permute.xlu1 %4825  ;;  %10195 = vmatprep.subr.msk.bf16.mxu0 %vm4778_vm5, %v4647_v32  ;;  %v14670_v59 = vpop.permute.xlu0 %5001  ;;  %vm4490_vm15 = vcmp.ne.f32.partialorder %v9993_v47, 0.0  ;;  %vm5455_vm5 = vmpackc.low %vm14688_vm14, %vm14684_vm2  ;;  %v4192_v50 = vsel %vm4187_vm3, 65537, %v19798_v16  ;;  %vm20458_vm2 = vcmask 924672  }
 0x4b4   : > { %20436 = vst [vmem:[#allocation35_spill] sm:$0xff] %v14668_v5  ;;  %20437 = vst [vmem:[#allocation28_spill] sm:$0xff] %v14670_v59  ;;  %v4838_v31 = vsel %vm20450_vm0, %v4824_v24, %v14668_v5  ;;  %v4492_v47 = vsel %vm4490_vm15, 1, %v19798_v16  ;;  %v9999_v24 = vld [vmem:[%s19506_s1 + $0x45] ss:$8 sm:$0x3]  ;;  %v4228_v48 = vrot.slane %v4192_v50, %v10696_v30 }
 0x4b5   : > { %v5460_v0 = vsel %vm5455_vm5, 65537, %v19798_v16  ;;  %v4528_v29 = vrot.slane %v4492_v47, %v10696_v30  ;;  %v4532_v58 = vrot.slane %v4492_v47, %v19990_v27  ;;  %vm20459_vm14 = vmmov %vm20458_vm2  ;;  %vm4860_vm7 = vcmp.ne.f32.partialorder %v9999_v24, 0.0 }
 0x4b6   : > { %5744 = vmatpush1.bf16.msra.mxu0 %v4787_v7  ;;  %v5486_v45 = vrot.slane %v5460_v0, %v10750_v46  ;;  %vm20470_vm0 = vcmask 916480  }
 0x4b7   : > { %v5004_v12 = vpop.permute.xlu1 %5003  ;;  %5745 = vmatprep.subr.bf16.mxu0 %v13896_v17  ;;  %v14702_v52 = vpop.permute.xlu0 %5005  ;;  %v4348_v17 = vrot.slane %v4312_v56, %v10696_v30  ;;  %v5306_v56 = vrot.slane %v5280_v41, %v10750_v46  ;;  %vm14793_vm3 = vcmp.eq.s32.totalorder %v4528_v29, 1  ;;  %vm14797_vm10 = vcmp.eq.s32.totalorder %v4532_v58, 1 }
 0x4b8   : > { %20446 = vst [vmem:[#allocation36_spill] sm:$0xff] %v14702_v52  ;;  %v5017_v5 = vsel %vm20458_vm2, %v14670_v59, %v5004_v12  ;;  %v5018_v32 = vsel %vm20459_vm14, %v5004_v12, %v14702_v52  ;;  %v5482_v12 = vrot.slane %v5460_v0, %v10696_v30  ;;  %vm4547_vm2 = vmpackc.low %vm14797_vm10, %vm14793_vm3  ;;  %vm20479_vm14 = vcmask 908288  }
 0x4b9   : > { %vm14759_vm15 = vcmp.eq.s32.totalorder %v4348_v17, 1  ;;  %v5157_v24 = vsel %vm14736_vm12, %v5017_v5, 0  ;;  %vm14810_vm12 = vcmp.ne.s16.totalorder %v5486_v45, 0  ;;  %v4504_v58 = vrot.slane %v14116_v42, %v11382_v13 }
 0x4ba   : > { %5746 = vmatpush1.bf16.msra.mxu0 %v13894_v22  ;;  %v5302_v22 = vrot.slane %v5280_v41, %v10696_v30 }
 0x4bb   : > { %v14730_v7 = vpop.permute.xlu1 %5181  ;;  %10196 = vmatprep.subr.msk.bf16.mxu0 %vm4968_vm8, %v4838_v31  ;;  %v5184_v1 = vpop.permute.xlu0 %5183  ;;  %v4977_v31 = vsel %vm14711_vm1, %v4837_v8, 0  ;;  %v4672_v8 = vsel %vm4670_vm13, 1, %v19798_v16  ;;  %vm5328_vm8 = vcmp.ne.s16.totalorder %v5306_v56, 0  ;;  %vm4367_vm1 = vmpackc.low %vm14769_vm4, %vm14759_vm15  ;;  %v4862_v56 = vsel %vm4860_vm7, 1, %v19798_v16 }
 0x4bc   : > { %20451 = vst [vmem:[#allocation23_spill] sm:$0xff] %v14730_v7  ;;  %vm14781_vm5 = vcmp.ne.s16.totalorder %v5302_v22, 0  ;;  %v5197_v0 = vsel %vm20470_vm0, %v14730_v7, %v5184_v1  ;;  %v4708_v5 = vrot.slane %v4672_v8, %v10696_v30  ;;  %v4372_v57 = vsel %vm4367_vm1, 65537, %v19798_v16  ;;  %vm20480_vm4 = vmmov %vm20479_vm14 }
 0x4bd   : > { %v5337_v45 = vsel %vm14781_vm5, %v5197_v0, 0  ;;  %vm14826_vm13 = vcmp.ne.s16.totalorder %v5482_v12, 0  ;;  %vm14830_vm15 = vcmp.ne.s16.totalorder %v4228_v48, 0  ;;  %v4902_v52 = vrot.slane %v4862_v56, %v19990_v27 }
 0x4be   : > { %5748 = vmatpush1.bf16.msra.mxu0 %v4977_v31  ;;  %v4712_v31 = vrot.slane %v4672_v8, %v19990_v27  ;;  %v4898_v8 = vrot.slane %v4862_v56, %v10696_v30  ;;  %vm14843_vm7 = vcmp.eq.s32.totalorder %v4708_v5, 1  ;;  %v4412_v0 = vrot.slane %v4372_v57, %v10750_v46 }
 0x4bf   : > { %v14773_v21 = vpop.permute.xlu1 %5185  ;;  %10197 = vmatprep.subr.msk.bf16.mxu0 %vm14732_vm6, %v5018_v32  ;;  %v14777_v17 = vpop.permute.xlu0 %5361  ;;  %vm20471_vm6 = vmmov %vm20470_vm0  ;;  %v4232_v32 = vrot.slane %v4192_v50, %v10750_v46  ;;  %v4408_v5 = vrot.slane %v4372_v57, %v10696_v30 }
 0x4c0   : > { %20462 = vst [vmem:[#allocation38_spill] sm:$0xff] %v14773_v21  ;;  %20463 = vst [vmem:[#allocation40_spill] sm:$0xff] %v14777_v17  ;;  %v5198_v44 = vsel %vm20471_vm6, %v5184_v1, %v14773_v21  ;;  %v4148_v1 = vrot.slane %v14050_v61, %v11391_v53  ;;  %vm14873_vm0 = vcmp.eq.s32.totalorder %v4898_v8, 1  ;;  %v4328_v8 = vrot.slane %v14104_v62, %v11391_v53 }
 0x4c1   : > { %vm14855_vm5 = vcmp.ne.s16.totalorder %v4232_v32, 0  ;;  %v4508_v32 = vrot.slane %v14116_v42, %v11391_v53 }
 0x4c2   : > { %5750 = vmatpush1.bf16.msra.mxu0 %v5157_v24  ;;  %v4144_v24 = vrot.slane %v14050_v61, %v11382_v13  ;;  %vm14869_vm10 = vcmp.eq.s32.totalorder %v4148_v1, 1  ;;  %v4324_v1 = vrot.slane %v14104_v62, %v11382_v13 }
 0x4c3   : > { %v5364_v41 = vpop.permute.xlu1 %5363  ;;  %10198 = vmatprep.subr.msk.bf16.mxu0 %vm5328_vm8, %v5198_v44  ;;  %v14808_v29 = vpop.permute.xlu0 %5365  ;;  %v10002_v44 = vld [vmem:[%s19506_s1 + $0x46] ss:$8 sm:$0x3]  ;;  %vm14847_vm8 = vcmp.eq.s32.totalorder %v4712_v31, 1 }
 0x4c4   : > { %20472 = vst [vmem:[#allocation42_spill] sm:$0xff] %v14808_v29  ;;  %v5377_v7 = vsel %vm20479_vm14, %v14777_v17, %v5364_v41  ;;  %v5378_v47 = vsel %vm20480_vm4, %v5364_v41, %v14808_v29  ;;  %vm5040_vm1 = vcmp.ne.f32.partialorder %v10002_v44, 0.0  ;;  %v10005_v31 = vld [vmem:[%s19506_s1 + $0x47] ss:$8 sm:$0x3]  ;;  %v4552_v41 = vsel %vm4547_vm2, 65537, %v19798_v16  ;;  %vm4727_vm6 = vmpackc.low %vm14847_vm8, %vm14843_vm7 }
 0x4c5   : > { %vm14865_vm3 = vcmp.eq.s32.totalorder %v4144_v24, 1  ;;  %v5517_v57 = vsel %vm14826_vm13, %v5377_v7, 0  ;;  %v5042_v21 = vsel %vm5040_vm1, 1, %v19798_v16  ;;  %vm5220_vm13 = vcmp.ne.f32.partialorder %v10005_v31, 0.0 }
 0x4c6   : > { %5752 = vmatpush1.bf16.msra.mxu0 %v5337_v45  ;;  %v4592_v29 = vrot.slane %v4552_v41, %v10750_v46  ;;  %v4588_v17 = vrot.slane %v4552_v41, %v10696_v30  ;;  %vm14902_vm2 = vcmp.ne.s16.totalorder %v4412_v0, 0  ;;  %vm14906_vm14 = vcmp.ne.s16.totalorder %v4408_v5, 0  ;;  %vm4184_vm4 = vmpackc.low %vm14869_vm10, %vm14865_vm3 }
 0x4c7   : > { %v14851_v26 = vpop.permute.xlu1 %4099  ;;  %10199 = vmatprep.subr.msk.bf16.mxu0 %vm14810_vm12, %v5378_v47  ;;  %v4102_v22 = vpop.permute.xlu0 %4101  ;;  %vm14883_vm12 = vcmp.eq.s32.totalorder %v4902_v52, 1  ;;  %vm14927_vm1 = vcmp.eq.s32.totalorder %v4324_v1, 1  ;;  %v5078_v12 = vrot.slane %v5042_v21, %v10696_v30  ;;  %v5222_v56 = vsel %vm5220_vm13, 1, %v19798_v16 }
 0x4c8   : > { %v4110_v44 = vsel %vm19690_vm11, %v14851_v26, %v4102_v22  ;;  %v4111_v7 = vsel %vm19690_vm11, %v4102_v22, %v14222_v11  ;;  %v4732_v11 = vsel %vm4727_vm6, 65537, %v19798_v16  ;;  %vm20501_vm7 = vcmask 130048  }
 0x4c9   : > { %v4251_v22 = vsel %vm14830_vm15, %v4110_v44, 0  ;;  %vm20502_vm8 = vmmov %vm20501_vm7  ;;  %vm14937_vm15 = vcmp.eq.s32.totalorder %v4328_v8, 1  ;;  %v5082_v31 = vrot.slane %v5042_v21, %v19990_v27  ;;  %vm14948_vm13 = vcmp.ne.s16.totalorder %v4592_v29, 0 }
 0x4ca   : > { %5754 = vmatpush1.bf16.msra.mxu0 %v5517_v57  ;;  %vm20505_vm6 = vmmov %vm20501_vm7  ;;  %v4772_v8 = vrot.slane %v4732_v11, %v10750_v46  ;;  %v4189_v59 = vsel %vm4184_vm4, 65537, %v19798_v16  ;;  %v5258_v29 = vrot.slane %v5222_v56, %v10696_v30  ;;  %v5262_v21 = vrot.slane %v5222_v56, %v19990_v27 }
 0x4cb   : > { %v14896_v52 = vpop.permute.xlu1 %4279  ;;  %10208 = vmatprep.subr.msk.bf16.mxu0 %vm14855_vm5, %v4111_v7  ;;  %v4282_v47 = vpop.permute.xlu0 %4281  ;;  %vm4917_vm5 = vmpackc.low %vm14883_vm12, %vm14873_vm0  ;;  %v4768_v7 = vrot.slane %v4732_v11, %v10696_v30  ;;  %vm14981_vm10 = vcmp.eq.s32.totalorder %v5078_v12, 1  ;;  %vm14993_vm0 = vcmp.eq.s32.totalorder %v5082_v31, 1 }
 0x4cc   : > { %v4290_v0 = vsel %vm20501_vm7, %v14896_v52, %v4282_v47  ;;  %v4291_v50 = vsel %vm20502_vm8, %v4282_v47, %v14224_v39  ;;  %vm14952_vm7 = vcmp.ne.s16.totalorder %v4588_v17, 0  ;;  %v4922_v17 = vsel %vm4917_vm5, 65537, %v19798_v16  ;;  %vm4364_vm3 = vmpackc.low %vm14937_vm15, %vm14927_vm1 }
 0x4cd   : > { %5770 = vmatmul.mubr.bf16.vlgmr.msra.gmra.mrb[24].mxu0 %v14541_v40  ;;  %v4431_v47 = vsel %vm14906_vm14, %v4290_v0, 0  ;;  %vm15005_vm14 = vcmp.ne.s16.totalorder %v4768_v7, 0  ;;  %v4369_v31 = vsel %vm4364_vm3, 65537, %v19798_v16  ;;  %vm15018_vm4 = vcmp.eq.s32.totalorder %v5258_v29, 1  ;;  %vm5097_vm8 = vmpackc.low %vm14993_vm0, %vm14981_vm10 }
 0x4ce   : > { %5824 = vmatpush1.bf16.msra.mxu0 %v4251_v22  ;;  %10019 = vmatprep.mubr.msk.bf16.mxu0 %vm20505_vm6, %v13977_v3  ;;  %v10008_v3 = vld [vmem:[%s19506_s1 + $0x90] ss:$8 sm:$0x3]  ;;  %vm15022_vm5 = vcmp.eq.s32.totalorder %v5262_v21, 1  ;;  %vm15032_vm1 = vcmp.eq.s32.totalorder %v4504_v58, 1  ;;  %vm15036_vm15 = vcmp.eq.s32.totalorder %v4508_v32, 1  ;;  %v4684_v21 = vrot.slane %v14152_v54, %v11382_v13 }
 0x4cf   : > { %v14944_v41 = vpop.permute.xlu1 %4459  ;;  %10209 = vmatprep.subr.msk.bf16.mxu0 %vm14902_vm2, %v4291_v50  ;;  %v4462_v1 = vpop.permute.xlu0 %4461  ;;  %vm5400_vm12 = vcmp.ne.f32.partialorder %v10008_v3, 0.0  ;;  %vm15001_vm2 = vcmp.ne.s16.totalorder %v4772_v8, 0  ;;  %v4204_v50 = vrot.slane %v4189_v59, %v10696_v30  ;;  %vm20526_vm6 = vcmask 7168   ;;  %vm5277_vm3 = vmpackc.low %vm15022_vm5, %vm15018_vm4 }
 0x4d0   : > { %v4470_v24 = vsel %vm19689_vm9, %v14944_v41, %v4462_v1  ;;  %v4471_v57 = vsel %vm19689_vm9, %v4462_v1, %v14310_v63  ;;  %v4208_v63 = vrot.slane %v4189_v59, %v10750_v46  ;;  %v4958_v1 = vrot.slane %v4922_v17, %v10696_v30  ;;  %vm4544_vm0 = vmpackc.low %vm15036_vm15, %vm15032_vm1 }
 0x4d1   : > { %v4611_v7 = vsel %vm14952_vm7, %v4470_v24, 0  ;;  %v5402_v59 = vsel %vm5400_vm12, 1, %v19798_v16  ;;  %v4962_v58 = vrot.slane %v4922_v17, %v10750_v46  ;;  %v4388_v32 = vrot.slane %v4369_v31, %v10750_v46 }
 0x4d2   : > { %5826 = vmatpush1.bf16.msra.mxu0 %v4431_v47  ;;  %v4688_v47 = vrot.slane %v14152_v54, %v11391_v53  ;;  %vm15058_vm7 = vcmp.ne.s16.totalorder %v4208_v63, 0  ;;  %vm15069_vm10 = vcmp.ne.s16.totalorder %v4204_v50, 0  ;;  %v5438_v17 = vrot.slane %v5402_v59, %v10696_v30 }
 0x4d3   : > { %v14997_v22 = vpop.permute.xlu1 %4639  ;;  %10210 = vmatprep.subr.msk.bf16.mxu0 %vm14948_vm13, %v4471_v57  ;;  %v4642_v12 = vpop.permute.xlu0 %4641  ;;  %vm20527_vm13 = vmmov %vm20526_vm6  ;;  %v4384_v56 = vrot.slane %v4369_v31, %v10696_v30  ;;  %vm15080_vm12 = vcmp.ne.s16.totalorder %v4958_v1, 0  ;;  %vm20546_vm1 = vcmask 1039360   ;;  %v5414_v31 = vrot.slane %v14340_v35, %v11382_v13 }
 0x4d4   : > { %v4650_v39 = vsel %vm20526_vm6, %v14997_v22, %v4642_v12  ;;  %v4651_v29 = vsel %vm20527_vm13, %v4642_v12, %v14312_v34  ;;  %v5102_v34 = vsel %vm5097_vm8, 65537, %v19798_v16  ;;  %v5442_v12 = vrot.slane %v5402_v59, %v19990_v27  ;;  %vm20547_vm15 = vmmov %vm20546_vm1 }
 0x4d5   : > { %v4791_v57 = vsel %vm15005_vm14, %v4650_v39, 0  ;;  %vm15088_vm14 = vcmp.eq.s32.totalorder %v4688_v47, 1  ;;  %vm15093_vm8 = vcmp.ne.s16.totalorder %v4962_v58, 0  ;;  %vm15097_vm6 = vcmp.ne.s16.totalorder %v4388_v32, 0 }
 0x4d6   : > { %5828 = vmatpush1.bf16.msra.mxu0 %v4611_v7  ;;  %v5142_v1 = vrot.slane %v5102_v34, %v10750_v46  ;;  %v5138_v47 = vrot.slane %v5102_v34, %v10696_v30  ;;  %v4549_v58 = vsel %vm4544_vm0, 65537, %v19798_v16  ;;  %vm15128_vm5 = vcmp.eq.s32.totalorder %v5438_v17, 1 }
 0x4d7   : > { %v15050_v45 = vpop.permute.xlu1 %4829  ;;  %10211 = vmatprep.subr.msk.bf16.mxu0 %vm15001_vm2, %v4651_v29  ;;  %v15054_v3 = vpop.permute.xlu0 %5009  ;;  %vm15084_vm2 = vcmp.eq.s32.totalorder %v4684_v21, 1  ;;  %v5282_v29 = vsel %vm5277_vm3, 65537, %v19798_v16  ;;  %vm15132_vm13 = vcmp.eq.s32.totalorder %v5442_v12, 1  ;;  %v4568_v11 = vrot.slane %v4549_v58, %v10750_v46 }
 0x4d8   : > { %vm4724_vm4 = vmpackc.low %vm15088_vm14, %vm15084_vm2  ;;  %v5318_v24 = vrot.slane %v5282_v29, %v10696_v30  ;;  %vm20550_vm3 = vcmask 130048   ;;  %v4564_v0 = vrot.slane %v4549_v58, %v10696_v30  ;;  %vm5152_vm2 = vcmp.ne.s16.totalorder %v5142_v1, 0 }
 0x4d9   : > { %v4729_v12 = vsel %vm4724_vm4, 65537, %v19798_v16  ;;  %vm5457_vm0 = vmpackc.low %vm15132_vm13, %vm15128_vm5  ;;  %vm15176_vm14 = vcmp.ne.s16.totalorder %v5138_v47, 0  ;;  %vm20560_vm4 = vcmask 924672   ;;  %vm20568_vm13 = vcmask 916480  }
 0x4da   : > { %5830 = vmatpush1.bf16.msra.mxu0 %v4791_v57  ;;  %v4748_v1 = vrot.slane %v4729_v12, %v10750_v46  ;;  %vm15215_vm5 = vcmp.ne.s16.totalorder %v4564_v0, 0  ;;  %v4744_v8 = vrot.slane %v4729_v12, %v10696_v30  ;;  %v4344_v12 = vrot.slane %v14104_v62, %v11863_v60 }
 0x4db   : > { %v4090_v7 = vpop.permute.xlu1 %4089  ;;  %5831 = vmatprep.subr.bf16.mxu0 %v13904_v20  ;;  %v4832_v39 = vpop.permute.xlu0 %4831 }
 0x4dc   : > { %v4104_v20 = vsel %vm19690_vm11, %v14128_v4, %v4090_v7  ;;  %v4105_v21 = vsel %vm19690_vm11, %v4090_v7, %v14417_v36  ;;  %v5322_v4 = vrot.slane %v5282_v29, %v10750_v46  ;;  %v4841_v48 = vsel %vm20546_vm1, %v15050_v45, %v4832_v39  ;;  %vm20561_vm1 = vmmov %vm20560_vm4 }
 0x4dd   : > { %10184 = vmatprep.subr.msk.bf16.mxu1 %vm15058_vm7, %v4105_v21  ;;  %v4245_v44 = vsel %vm15069_vm10, %v4104_v20, 0  ;;  %v4853_v5 = vsel %vm20547_vm15, %v4832_v39, %v14106_v14  ;;  %vm15141_vm7 = vcmp.ne.s16.totalorder %v4384_v56, 0  ;;  %vm20551_vm10 = vmmov %vm20550_vm3  ;;  %v4878_v56 = vrot.slane %v14202_v55, %v11391_v53 }
 0x4de   : > { %5695 = vmatpush1.bf16.msra.mxu1 %v4245_v44  ;;  %5832 = vmatpush1.bf16.msra.mxu0 %v13902_v38  ;;  %v4874_v38 = vrot.slane %v14202_v55, %v11382_v13  ;;  %v5462_v29 = vsel %vm5457_vm0, 65537, %v19798_v16  ;;  %v5054_v20 = vrot.slane %v14259_v23, %v11382_v13  ;;  %vm15242_vm0 = vcmp.ne.s16.totalorder %v4748_v1, 0 }
 0x4df   : > { %v15146_v34 = vpop.permute.xlu1 %5189  ;;  %10212 = vmatprep.subr.msk.bf16.mxu0 %vm15093_vm8, %v4853_v5  ;;  %v4270_v57 = vpop.permute.xlu0 %4269  ;;  %vm15180_vm8 = vcmp.ne.s16.totalorder %v5322_v4, 0  ;;  %v5502_v32 = vrot.slane %v5462_v29, %v10750_v46 }
 0x4e0   : > { %v4284_v14 = vsel %vm20550_vm3, %v14130_v19, %v4270_v57  ;;  %v4285_v17 = vsel %vm20551_vm10, %v4270_v57, %v14458_v51  ;;  %v4981_v51 = vsel %vm15080_vm12, %v4841_v48, 0  ;;  %vm15188_vm12 = vcmp.ne.s16.totalorder %v4568_v11, 0  ;;  %vm20569_vm3 = vmmov %vm20568_vm13 }
 0x4e1   : > { %10185 = vmatprep.subr.msk.bf16.mxu1 %vm15097_vm6, %v4285_v17  ;;  %v4425_v19 = vsel %vm15141_vm7, %v4284_v14, 0  ;;  %vm15184_vm6 = vcmp.ne.s16.totalorder %v5318_v24, 0  ;;  %vm15205_vm15 = vcmp.eq.s32.totalorder %v4874_v38, 1  ;;  %vm15209_vm7 = vcmp.eq.s32.totalorder %v4878_v56, 1 }
 0x4e2   : > { %5697 = vmatpush1.bf16.msra.mxu1 %v4425_v19  ;;  %5834 = vmatpush1.bf16.msra.mxu0 %v4981_v51  ;;  %v5498_v24 = vrot.slane %v5462_v29, %v10696_v30  ;;  %vm4914_vm10 = vmpackc.low %vm15209_vm7, %vm15205_vm15  ;;  %v5234_v38 = vrot.slane %v14290_v18, %v11382_v13  ;;  %v4340_v17 = vrot.slane %v14104_v62, %v11860_v9  ;;  %v20601_v19 = vld [vmem:[#allocation28_spill] sm:$0xff] }
 0x4e3   : > { %v5012_v59 = vpop.permute.xlu1 %5011  ;;  %v5192_v63 = vpop.permute.xlu0 %5191  ;;  %v4919_v50 = vsel %vm4914_vm10, 65537, %v19798_v16  ;;  %v4520_v62 = vrot.slane %v14116_v42, %v11860_v9 }
 0x4e4   : > { %v5021_v21 = vsel %vm20560_vm4, %v15054_v3, %v5012_v59  ;;  %v5033_v47 = vsel %vm20561_vm1, %v5012_v59, %v14108_v6  ;;  %v5058_v6 = vrot.slane %v14259_v23, %v11391_v53  ;;  %v5201_v48 = vsel %vm20568_vm13, %v15146_v34, %v5192_v63 }
 0x4e5   : > { %10213 = vmatprep.subr.msk.bf16.mxu0 %vm5152_vm2, %v5033_v47  ;;  %v5161_v4 = vsel %vm15176_vm14, %v5021_v21, 0  ;;  %v5213_v5 = vsel %vm20569_vm3, %v5192_v63, %v14268_v43  ;;  %vm15246_vm2 = vcmp.eq.s32.totalorder %v5054_v20, 1  ;;  %vm15262_vm4 = vcmp.ne.s16.totalorder %v4744_v8, 0 }
 0x4e6   : > { %5836 = vmatpush1.bf16.msra.mxu0 %v5161_v4  ;;  %vm15256_vm14 = vcmp.eq.s32.totalorder %v5058_v6, 1  ;;  %v4938_v59 = vrot.slane %v4919_v50, %v10750_v46  ;;  %vm20582_vm1 = vcmask 908288   ;;  %v4934_v58 = vrot.slane %v4919_v50, %v10696_v30 }
 0x4e7   : > { %v4450_v57 = vpop.permute.xlu1 %4449  ;;  %10214 = vmatprep.subr.msk.bf16.mxu0 %vm15180_vm8, %v5213_v5  ;;  %v15230_v11 = vpop.permute.xlu0 %5369  ;;  %vm5512_vm8 = vcmp.ne.s16.totalorder %v5502_v32, 0  ;;  %vm20585_vm7 = vmmov %vm20582_vm1  ;;  %v4160_v8 = vrot.slane %v14050_v61, %v11860_v9  ;;  %v20593_v32 = vld [vmem:[#allocation10_spill] sm:$0xff] }
 0x4e8   : > { %v4464_v43 = vsel %vm19689_vm9, %v14157_v10, %v4450_v57  ;;  %v4465_v14 = vsel %vm19689_vm9, %v4450_v57, %v14528_v37  ;;  %v5341_v10 = vsel %vm15184_vm6, %v5201_v48, 0  ;;  %v5238_v37 = vrot.slane %v14290_v18, %v11391_v53  ;;  %vm5094_vm13 = vmpackc.low %vm15256_vm14, %vm15246_vm2 }
 0x4e9   : > { %10186 = vmatprep.subr.msk.bf16.mxu1 %vm15188_vm12, %v4465_v14  ;;  %v4605_v56 = vsel %vm15215_vm5, %v4464_v43, 0  ;;  %vm15266_vm12 = vcmp.ne.s16.totalorder %v5498_v24, 0  ;;  %vm15277_vm6 = vcmp.eq.s32.totalorder %v5234_v38, 1  ;;  %vm20583_vm5 = vcmask 7168  }
 0x4ea   : > { %5699 = vmatpush1.bf16.msra.mxu1 %v4605_v56  ;;  %5838 = vmatpush1.bf16.msra.mxu0 %v5341_v10  ;;  %vm20584_vm15 = vmmov %vm20583_vm5  ;;  %vm15301_vm3 = vcmp.eq.s32.totalorder %v5238_v37, 1  ;;  %v5099_v4 = vsel %vm5094_vm13, 65537, %v19798_v16  ;;  %vm4966_vm10 = vcmp.ne.s16.totalorder %v4938_v59, 0  ;;  %vm15318_vm2 = vcmp.eq.s32.totalorder %v5414_v31, 1  ;;  %v20599_v56 = vld [vmem:[#allocation30_spill] sm:$0xff] }
 0x4eb   : > { %v5372_v7 = vpop.permute.xlu1 %5371  ;;  %v4630_v39 = vpop.permute.xlu0 %4629  ;;  %v5118_v36 = vrot.slane %v5099_v4, %v10750_v46  ;;  %v4164_v48 = vrot.slane %v14050_v61, %v11863_v60  ;;  %v5114_v57 = vrot.slane %v5099_v4, %v10696_v30  ;;  %v4524_v31 = vrot.slane %v14116_v42, %v11863_v60  ;;  %v20637_v42 = vld [vmem:[#allocation34_spill] sm:$0xff] }
 0x4ec   : > { %v5381_v1 = vsel %vm20582_vm1, %v15230_v11, %v5372_v7  ;;  %v4644_v29 = vsel %vm20583_vm5, %v14159_v49, %v4630_v39  ;;  %v4645_v20 = vsel %vm20584_vm15, %v4630_v39, %v14564_v33  ;;  %v5393_v21 = vsel %vm20585_vm7, %v5372_v7, %v14351_v15 }
 0x4ed   : > { %10187 = vmatprep.subr.msk.bf16.mxu1 %vm15242_vm0, %v4645_v20  ;;  %10215 = vmatprep.subr.msk.bf16.mxu0 %vm5512_vm8, %v5393_v21  ;;  %v4785_v47 = vsel %vm15262_vm4, %v4644_v29, 0  ;;  %v5521_v49 = vsel %vm15266_vm12, %v5381_v1, 0  ;;  %v5418_v15 = vrot.slane %v14340_v35, %v11391_v53  ;;  %vm5274_vm0 = vmpackc.low %vm15301_vm3, %vm15277_vm6  ;;  %vm20592_vm8 = vcmask 1039360   ;;  %v20607_v1 = vld [vmem:[#allocation39_spill] sm:$0xff] }
 0x4ee   : > { %5701 = vmatpush1.bf16.msra.mxu1 %v4785_v47  ;;  %5840 = vmatpush1.bf16.msra.mxu0 %v5521_v49  ;;  %vm20594_vm4 = vmmov %vm20592_vm8  ;;  %vm4965_vm12 = vcmp.ne.s16.totalorder %v4934_v58, 0  ;;  %v5279_v43 = vsel %vm5274_vm0, 65537, %v19798_v16  ;;  %vm5146_vm6 = vcmp.ne.s16.totalorder %v5118_v36, 0  ;;  %vm15340_vm5 = vcmp.eq.s32.totalorder %v4160_v8, 1  ;;  %v20609_v20 = vld [vmem:[#allocation23_spill] sm:$0xff] }
 0x4ef   : > { %v4820_v44 = vpop.permute.xlu1 %4819  ;;  %5702 = vmatprep.subr.bf16.mxu1 %v13912_v25  ;;  %vm15322_vm14 = vcmp.eq.s32.totalorder %v5418_v15, 1  ;;  %v5000_v38 = vpop.permute.xlu0 %4999  ;;  %v5298_v14 = vrot.slane %v5279_v43, %v10750_v46  ;;  %vm15344_vm15 = vcmp.eq.s32.totalorder %v4164_v48, 1  ;;  %vm20600_vm7 = vcmask 924672   ;;  %v20615_v8 = vld [vmem:[#allocation31_spill] sm:$0xff]  ;;  %v20617_v25 = vld [vmem:[#allocation40_spill] sm:$0xff] }
 0x4f0   : > { %v4835_v5 = vsel %vm20592_vm8, %v14062_v2, %v4820_v44  ;;  %v4836_v24 = vsel %vm20594_vm4, %v4820_v44, %v14633_v28  ;;  %vm5454_vm1 = vmpackc.low %vm15322_vm14, %vm15318_vm2  ;;  %v5015_v10 = vsel %vm20600_vm7, %v20599_v56, %v5000_v38  ;;  %vm5145_vm3 = vcmp.ne.s16.totalorder %v5114_v57, 0 }
 0x4f1   : > { %5856 = vmatmul.mubr.bf16.vlgmr.msra.gmra.mrb[28].mxu0 %v14541_v40  ;;  %v4975_v2 = vsel %vm4965_vm12, %v4835_v5, 0  ;;  %vm20602_vm13 = vmmov %vm20600_vm7  ;;  %v5294_v51 = vrot.slane %v5279_v43, %v10696_v30  ;;  %v5459_v50 = vsel %vm5454_vm1, 65537, %v19798_v16  ;;  %v5155_v39 = vsel %vm5145_vm3, %v5015_v10, 0 }
 0x4f2   : > { %5703 = vmatpush1.bf16.msra.mxu1 %v20593_v32  ;;  %v5016_v37 = vsel %vm20602_vm13, %v5000_v38, %v20601_v19  ;;  %v5478_v7 = vrot.slane %v5459_v50, %v10750_v46  ;;  %vm4186_vm0 = vmpackc.low %vm15344_vm15, %vm15340_vm5  ;;  %vm15365_vm2 = vcmp.eq.s32.totalorder %v4340_v17, 1  ;;  %vm15369_vm14 = vcmp.eq.s32.totalorder %v4344_v12, 1  ;;  %v20649_v38 = vld [vmem:[#allocation35_spill] sm:$0xff] }
 0x4f3   : > { %10188 = vmatprep.subr.msk.bf16.mxu1 %vm4966_vm10, %v4836_v24  ;;  %v5180_v0 = vpop.permute.xlu1 %5179  ;;  %vm5326_vm10 = vcmp.ne.s16.totalorder %v5298_v14, 0  ;;  %vm20608_vm8 = vcmask 916480   ;;  %vm5325_vm12 = vcmp.ne.s16.totalorder %v5294_v51, 0  ;;  %v5474_v47 = vrot.slane %v5459_v50, %v10696_v30  ;;  %v5360_v49 = vpop.permute.xlu0 %5359  ;;  %vm4366_vm1 = vmpackc.low %vm15369_vm14, %vm15365_vm2  ;;  %v20623_v14 = vld [vmem:[#allocation41_spill] sm:$0xff] }
 0x4f4   : > { %v5195_v29 = vsel %vm20608_vm8, %v20607_v1, %v5180_v0  ;;  %vm20610_vm4 = vmmov %vm20608_vm8  ;;  %v4191_v33 = vsel %vm4186_vm0, 65537, %v19798_v16  ;;  %vm15386_vm5 = vcmp.eq.s32.totalorder %v4520_v62, 1  ;;  %vm15390_vm15 = vcmp.eq.s32.totalorder %v4524_v31, 1  ;;  %v20632_v1 = vld [vmem:[#allocation33_spill] sm:$0xff] }
 0x4f5   : > { %v5196_v21 = vsel %vm20610_vm4, %v5180_v0, %v20609_v20  ;;  %v4224_v15 = vrot.slane %v4191_v33, %v10750_v46  ;;  %v5335_v58 = vsel %vm5325_vm12, %v5195_v29, 0  ;;  %v4700_v4 = vrot.slane %v14152_v54, %v11860_v9  ;;  %vm4546_vm0 = vmpackc.low %vm15390_vm15, %vm15386_vm5 }
 0x4f6   : > { %5705 = vmatpush1.bf16.msra.mxu1 %v4975_v2  ;;  %v4704_v36 = vrot.slane %v14152_v54, %v11863_v60  ;;  %vm20616_vm7 = vcmask 908288   ;;  %vm5505_vm3 = vcmp.ne.s16.totalorder %v5474_v47, 0  ;;  %v4220_v5 = vrot.slane %v4191_v33, %v10696_v30 }
 0x4f7   : > { %10189 = vmatprep.subr.msk.bf16.mxu1 %vm5146_vm6, %v5016_v37  ;;  %vm5506_vm6 = vcmp.ne.s16.totalorder %v5478_v7, 0  ;;  %v5375_v6 = vsel %vm20616_vm7, %v20615_v8, %v5360_v49  ;;  %vm20618_vm13 = vmmov %vm20616_vm7  ;;  %v4098_v32 = vpop.permute.xlu1 %4097  ;;  %v4371_v24 = vsel %vm4366_vm1, 65537, %v19798_v16  ;;  %vm15409_vm2 = vcmp.eq.s32.totalorder %v4700_v4, 1  ;;  %v4278_v17 = vpop.permute.xlu0 %4277  ;;  %v20624_v37 = vld [vmem:[#allocation32_spill] sm:$0xff] }
 0x4f8   : > { %v5376_v48 = vsel %vm20618_vm13, %v5360_v49, %v20617_v25  ;;  %v4404_v57 = vrot.slane %v4371_v24, %v10750_v46  ;;  %v5515_v54 = vsel %vm5505_vm3, %v5375_v6, 0  ;;  %vm15413_vm14 = vcmp.eq.s32.totalorder %v4704_v36, 1 }
 0x4f9   : > { %v4108_v61 = vsel %vm19690_vm11, %v20623_v14, %v4098_v32  ;;  %v4109_v2 = vsel %vm19690_vm11, %v4098_v32, %v14851_v26  ;;  %vm4239_vm8 = vcmp.ne.s16.totalorder %v4220_v5, 0  ;;  %v4400_v28 = vrot.slane %v4371_v24, %v10696_v30  ;;  %vm4726_vm12 = vmpackc.low %vm15413_vm14, %vm15409_vm2  ;;  %v20644_v32 = vld [vmem:[#allocation37_spill] sm:$0xff] }
 0x4fa   : > { %5707 = vmatpush1.bf16.msra.mxu1 %v5155_v39  ;;  %v4551_v12 = vsel %vm4546_vm0, 65537, %v19798_v16  ;;  %vm4420_vm4 = vcmp.ne.s16.totalorder %v4404_v57, 0  ;;  %v4249_v10 = vsel %vm4239_vm8, %v4108_v61, 0  ;;  %v4890_v26 = vrot.slane %v14202_v55, %v11860_v9  ;;  %v20651_v14 = vld [vmem:[#allocation29_spill] sm:$0xff] }
 0x4fb   : > { %10190 = vmatprep.subr.msk.bf16.mxu1 %vm5326_vm10, %v5196_v21  ;;  %vm4240_vm10 = vcmp.ne.s16.totalorder %v4224_v15, 0  ;;  %v4584_v56 = vrot.slane %v4551_v12, %v10750_v46  ;;  %v4894_v19 = vrot.slane %v14202_v55, %v11863_v60  ;;  %vm4419_vm5 = vcmp.ne.s16.totalorder %v4400_v28, 0  ;;  %v4458_v7 = vpop.permute.xlu1 %4457  ;;  %v4638_v47 = vpop.permute.xlu0 %4637 }
 0x4fc   : > { %v4580_v50 = vrot.slane %v4551_v12, %v10696_v30  ;;  %v4731_v55 = vsel %vm4726_vm12, 65537, %v19798_v16  ;;  %v5070_v39 = vrot.slane %v14259_v23, %v11860_v9  ;;  %vm15446_vm13 = vcmp.eq.s32.totalorder %v4890_v26, 1 }
 0x4fd   : > { %vm4600_vm7 = vcmp.ne.s16.totalorder %v4584_v56, 0  ;;  %v4764_v62 = vrot.slane %v4731_v55, %v10750_v46  ;;  %vm15450_vm3 = vcmp.eq.s32.totalorder %v4894_v19, 1  ;;  %v5074_v31 = vrot.slane %v14259_v23, %v11863_v60 }
 0x4fe   : > { %5709 = vmatpush1.bf16.msra.mxu1 %v5335_v58  ;;  %v4468_v29 = vsel %vm19689_vm9, %v20632_v1, %v4458_v7  ;;  %v4469_v20 = vsel %vm19689_vm9, %v4458_v7, %v14944_v41  ;;  %v4760_v21 = vrot.slane %v4731_v55, %v10696_v30  ;;  %vm4916_vm2 = vmpackc.low %vm15450_vm3, %vm15446_vm13  ;;  %v5250_v23 = vrot.slane %v14290_v18, %v11860_v9 }
 0x4ff   : > { %10191 = vmatprep.subr.msk.bf16.mxu1 %vm5506_vm6, %v5376_v48  ;;  %vm20625_vm6 = vcmask 130048   ;;  %vm4780_vm0 = vcmp.ne.s16.totalorder %v4764_v62, 0  ;;  %vm15467_vm14 = vcmp.eq.s32.totalorder %v5070_v39, 1  ;;  %vm15471_vm8 = vcmp.eq.s32.totalorder %v5074_v31, 1  ;;  %v4828_v5 = vpop.permute.xlu1 %4827  ;;  %v5008_v28 = vpop.permute.xlu0 %5007 }
 0x500   : > { %v4288_v51 = vsel %vm20625_vm6, %v20624_v37, %v4278_v17  ;;  %vm20626_vm1 = vmmov %vm20625_vm6  ;;  %v5254_v15 = vrot.slane %v14290_v18, %v11863_v60  ;;  %vm4779_vm6 = vcmp.ne.s16.totalorder %v4760_v21, 0  ;;  %v4921_v4 = vsel %vm4916_vm2, 65537, %v19798_v16 }
 0x501   : > { %v4289_v0 = vsel %vm20626_vm1, %v4278_v17, %v14896_v52  ;;  %vm20627_vm15 = vmmov %vm20626_vm1  ;;  %v4429_v52 = vsel %vm4419_vm5, %v4288_v51, 0  ;;  %v4954_v36 = vrot.slane %v4921_v4, %v10750_v46  ;;  %vm15487_vm5 = vcmp.eq.s32.totalorder %v5250_v23, 1 }
 0x502   : > { %5711 = vmatpush1.bf16.msra.mxu1 %v5515_v54  ;;  %vm5096_vm1 = vmpackc.low %vm15471_vm8, %vm15467_vm14  ;;  %v5434_v25 = vrot.slane %v14340_v35, %v11863_v60  ;;  %v4950_v48 = vrot.slane %v4921_v4, %v10696_v30 }
 0x503   : > { %10200 = vmatprep.subr.msk.bf16.mxu1 %vm4240_vm10, %v4109_v2  ;;  %vm4599_vm10 = vcmp.ne.s16.totalorder %v4580_v50, 0  ;;  %v5101_v24 = vsel %vm5096_vm1, 65537, %v19798_v16  ;;  %v5188_v37 = vpop.permute.xlu1 %5187  ;;  %v5368_v62 = vpop.permute.xlu0 %5367 }
 0x504   : > { %v4609_v49 = vsel %vm4599_vm10, %v4468_v29, 0  ;;  %v5134_v57 = vrot.slane %v5101_v24, %v10750_v46  ;;  %vm15511_vm10 = vcmp.eq.s32.totalorder %v5434_v25, 1  ;;  %vm4969_vm14 = vcmp.ne.s16.totalorder %v4950_v48, 0  ;;  %v20662_v25 = vld [vmem:[#allocation7_spill] sm:$0xff] }
 0x505   : > { %5727 = vmatmul.mubr.bf16.vlgmr.msra.gmra.mrb[20].mxu1 %v14541_v40  ;;  %v10420_v40 = vld [vmem:[%s19507_s2 + $0x24] ss:$8 sps:$4 sm:$0xff]   ;;  %v5130_v2 = vrot.slane %v5101_v24, %v10696_v30  ;;  %v20663_v48 = vmax.f32 %v20662_v25, 0.0 }
 0x506   : > { %5781 = vmatpush1.bf16.msra.mxu1 %v4249_v10  ;;  %10018 = vmatprep.mubr.msk.bf16.mxu1 %vm20627_vm15, %v10420_v40  ;;  %vm15491_vm15 = vcmp.eq.s32.totalorder %v5254_v15, 1  ;;  %vm5150_vm8 = vcmp.ne.s16.totalorder %v5134_v57, 0  ;;  %v20653_v10 = vld [vmem:[#allocation36_spill] sm:$0xff]  ;;  %v20656_v40 = vld [vmem:[#allocation38_spill] sm:$0xff] }
 0x507   : > { %10201 = vmatprep.subr.msk.bf16.mxu1 %vm4420_vm4, %v4289_v0  ;;  %vm20638_vm4 = vcmask 7168   ;;  %vm5276_vm13 = vmpackc.low %vm15491_vm15, %vm15487_vm5  ;;  %vm5149_vm1 = vcmp.ne.s16.totalorder %v5130_v2, 0  ;;  %vm20657_vm15 = vcmask 916480   ;;  %v20665_v57 = vld [vmem:[#allocation6_spill] sm:$0xff] }
 0x508   : > { %v4648_v58 = vsel %vm20638_vm4, %v20637_v42, %v4638_v47  ;;  %vm20639_vm12 = vmmov %vm20638_vm4  ;;  %v5281_v17 = vsel %vm5276_vm13, 65537, %v19798_v16  ;;  %v5199_v7 = vsel %vm20657_vm15, %v20656_v40, %v5188_v37  ;;  %v20666_v54 = vmax.f32 %v20665_v57, 0.0  ;;  %v20678_v40 = vld [vmem:[#allocation8_spill] sm:$0xff] }
 0x509   : > { %v4649_v44 = vsel %vm20639_vm12, %v4638_v47, %v14997_v22  ;;  %v4789_v8 = vsel %vm4779_vm6, %v4648_v58, 0  ;;  %v5430_v22 = vrot.slane %v14340_v35, %v11860_v9  ;;  %v5314_v12 = vrot.slane %v5281_v17, %v10750_v46  ;;  %v20687_v57 = vld [vmem:[#allocation16_spill] sm:$0xff] }
 0x50a   : > { %5783 = vmatpush1.bf16.msra.mxu1 %v4429_v52  ;;  %vm20654_vm12 = vcmask 924672   ;;  %v5310_v19 = vrot.slane %v5281_v17, %v10696_v30  ;;  %v20659_v52 = vld [vmem:[#allocation42_spill] sm:$0xff] }
 0x50b   : > { %10202 = vmatprep.subr.msk.bf16.mxu1 %vm4600_vm7, %v4469_v20  ;;  %vm4970_vm7 = vcmp.ne.s16.totalorder %v4954_v36, 0  ;;  %vm15507_vm3 = vcmp.eq.s32.totalorder %v5430_v22, 1  ;;  %v5019_v26 = vsel %vm20654_vm12, %v20653_v10, %v5008_v28  ;;  %vm20655_vm6 = vmmov %vm20654_vm12  ;;  %vm5330_vm5 = vcmp.ne.s16.totalorder %v5314_v12, 0 }
 0x50c   : > { %vm5456_vm4 = vmpackc.low %vm15511_vm10, %vm15507_vm3  ;;  %v5159_v50 = vsel %vm5149_vm1, %v5019_v26, 0  ;;  %vm5329_vm13 = vcmp.ne.s16.totalorder %v5310_v19, 0  ;;  %vm20660_vm10 = vcmask 908288  }
 0x50d   : > { %v5461_v51 = vsel %vm5456_vm4, 65537, %v19798_v16  ;;  %v5339_v39 = vsel %vm5329_vm13, %v5199_v7, 0  ;;  %v5379_v59 = vsel %vm20660_vm10, %v20659_v52, %v5368_v62  ;;  %v20679_v7 = vmax.f32 %v20678_v40, 0.0  ;;  %v20699_v40 = vld [vmem:[#allocation20_spill] sm:$0xff] }
 0x50e   : > { %5785 = vmatpush1.bf16.msra.mxu1 %v4609_v49  ;;  %v5494_v0 = vrot.slane %v5461_v51, %v10750_v46 }
 0x50f   : > { %10203 = vmatprep.subr.msk.bf16.mxu1 %vm4780_vm0, %v4649_v44  ;;  %vm20650_vm0 = vcmask 1039360  }
 0x510   : > { %v4839_v43 = vsel %vm20650_vm0, %v20649_v38, %v4828_v5  ;;  %vm20652_vm2 = vmmov %vm20650_vm0  ;;  %vm5510_vm3 = vcmp.ne.s16.totalorder %v5494_v0, 0  ;;  %v20668_v38 = vld [vmem:[#allocation14_spill] sm:$0xff] }
 0x511   : > { %v4840_v61 = vsel %vm20652_vm2, %v4828_v5, %v15050_v45  ;;  %v4979_v56 = vsel %vm4969_vm14, %v4839_v43, 0  ;;  %v5020_v45 = vsel %vm20655_vm6, %v5008_v28, %v15054_v3  ;;  %v5490_v3 = vrot.slane %v5461_v51, %v10696_v30  ;;  %vm20661_vm0 = vmmov %vm20660_vm10  ;;  %v20675_v51 = vld [vmem:[#allocation9_spill] sm:$0xff] }
 0x512   : > { %5787 = vmatpush1.bf16.msra.mxu1 %v4789_v8  ;;  %v5380_v63 = vsel %vm20661_vm0, %v5368_v62, %v15230_v11  ;;  %v20669_v43 = vmax.f32 %v20668_v38, 0.0  ;;  %v20676_v0 = vmax.f32 %v20675_v51, 0.0  ;;  %vm20705_vm14 = vcmask 130048  }
 0x513   : > { %5788 = vmatprep.subr.bf16.mxu1 %v20644_v32  ;;  %vm5509_vm2 = vcmp.ne.s16.totalorder %v5490_v3, 0 }
 0x514   : > { %v5519_v31 = vsel %vm5509_vm2, %v5379_v59, 0  ;;  %v15556_v58 = vpop.permute.xlu1 %5631  ;;  %v15558_v44 = vpop.permute.xlu0 %5636 }
 0x516   : > { %5789 = vmatpush1.bf16.msra.mxu1 %v20651_v14 }
 0x517   : > { %10204 = vmatprep.subr.msk.bf16.mxu1 %vm4970_vm7, %v4840_v61  ;;  %vm20658_vm7 = vmmov %vm20657_vm15  ;;  %v20671_v61 = vld [vmem:[#allocation13_spill] sm:$0xff] }
 0x518   : > { %v5200_v55 = vsel %vm20658_vm7, %v5188_v37, %v15146_v34  ;;  %v10421_v34 = vld [vmem:[%s19507_s2 + $0x20] ss:$8 sps:$4 sm:$0xff]   ;;  %v20672_v2 = vmax.f32 %v20671_v61, 0.0 }
 0x51a   : > { %5791 = vmatpush1.bf16.msra.mxu1 %v4979_v56 }
 0x51b   : > { %10205 = vmatprep.subr.msk.bf16.mxu1 %vm5150_vm8, %v5020_v45  ;;  %vm20706_vm8 = vmmov %vm20705_vm14 }
 0x51e   : > { %5793 = vmatpush1.bf16.msra.mxu1 %v5159_v50 }
 0x51f   : > { %10206 = vmatprep.subr.msk.bf16.mxu1 %vm5330_vm5, %v5200_v55 }
 0x522   : > { %5795 = vmatpush1.bf16.msra.mxu1 %v5339_v39 }
 0x523   : > { %10207 = vmatprep.subr.msk.bf16.mxu1 %vm5510_vm3, %v5380_v63  ;;  %v20681_v63 = vld [vmem:[#allocation12_spill] sm:$0xff] }
 0x526   : > { %5797 = vmatpush1.bf16.msra.mxu1 %v5519_v31  ;;  %v20682_v31 = vmax.f32 %v20681_v63, 0.0  ;;  %v20702_v63 = vld [vmem:[#allocation19_spill] sm:$0xff] }
 0x529   : > { %5813 = vmatmul.mubr.bf16.vlgmr.msra.gmra.mrb[24].mxu1 %v10421_v34 }
 0x57c   : > { %v5685_v1 = vpop.f32.mrb[20].mxu0 }
 0x57d   : > { %v5687_v29 = vpop.f32.mrb[21].mxu0  ;;  %v5686_v22 = vadd.f32 %v5685_v1, %v15556_v58  ;;  %v20684_v1 = vld [vmem:[#allocation11_spill] sm:$0xff] }
 0x57e   : > { %v5689_v20 = vpop.f32.mrb[22].mxu0  ;;  %v5688_v37 = vadd.f32 %v5687_v29, %v15556_v58  ;;  %v20685_v29 = vmax.f32 %v20684_v1, 0.0 }
 0x57f   : > { %v5691_v21 = vpop.f32.mrb[23].mxu0  ;;  %v5690_v36 = vadd.f32 %v5689_v20, %v15558_v44  ;;  %v15578_v28 = vadd.f32 %v5686_v22, %v20672_v2 }
 0x580   : > { %v5692_v19 = vadd.f32 %v5691_v21, %v15558_v44  ;;  %v15612_v55 = vadd.f32 %v5688_v37, %v20679_v7  ;;  %v20696_v37 = vld [vmem:[#allocation18_spill] sm:$0xff]  ;;  %v20700_v7 = vmax.f32 %v20699_v40, 0.0 }
 0x581   : > { %v15570_v35 = vadd.f32 %v5690_v36, %v20666_v54  ;;  %20673 = vst [vmem:[#allocation39_spill] sm:$0xff] %v15578_v28  ;;  %v19630_v26 = vmax.f32 %v15578_v28, 0.0  ;;  %v20688_v54 = vmax.f32 %v20687_v57, 0.0  ;;  %v20697_v51 = vmax.f32 %v20696_v37, 0.0 }
 0x582   : > { %v15608_v50 = vadd.f32 %v5692_v19, %v20676_v0  ;;  %20680 = vst [vmem:[#allocation40_spill] sm:$0xff] %v15612_v55  ;;  %v19629_v62 = vmax.f32 %v15612_v55, 0.0 }
 0x583   : > { %20667 = vst [vmem:[#allocation30_spill] sm:$0xff] %v15570_v35  ;;  %v19628_v56 = vmax.f32 %v15570_v35, 0.0 }
 0x584   : > { %20677 = vst [vmem:[#allocation31_spill] sm:$0xff] %v15608_v50  ;;  %v19627_v3 = vmax.f32 %v15608_v50, 0.0 }
 0x585   : > { %v15598_v45 = vpack.c.bf16 %v19628_v56, %v19630_v26 }
 0x586   : > { %v15628_v39 = vpack.c.bf16 %v19627_v3, %v19629_v62  ;;  %v10037_v62 = vld [vmem:[%s19506_s1 + $0x7] ss:$8 sm:$0xf0] }
 0x5a0   : > { %v15546_v47 = vpop.f32.mrb[24].mxu0 }
 0x5a1   : > { %v15548_v23 = vpop.f32.mrb[25].mxu0 }
 0x5a2   : > { %v5775_v49 = vpop.f32.mrb[26].mxu0  ;;  %v5774_v19 = vadd.f32 %v15548_v23, %v15556_v58 }
 0x5a3   : > { %v15550_v33 = vpop.f32.mrb[27].mxu0  ;;  %v5776_v22 = vadd.f32 %v5775_v49, %v15558_v44 }
 0x5a4   : > { %v5778_v49 = vadd.f32 %v15550_v33, %v15558_v44 }
 0x5a5   : > { %v15681_v38 = vadd.f32 %v5776_v22, %v20688_v54  ;;  %v15746_v54 = vld [vmem:[%s19507_s2 + $0x34] ss:$8 sps:$4 sm:$0xff]  }
 0x5a6   : > { %10048 = vmatprep.mubr.msk.bf16.mxu1 %vm20705_vm14, %v15746_v54  ;;  %10049 = vmatprep.mubr.msk.bf16.mxu0 %vm20706_vm8, %v15746_v54 }
 0x5a7   : > { %20689 = vst [vmem:[#allocation33_spill] sm:$0xff] %v15681_v38  ;;  %v19620_v33 = vmax.f32 %v15681_v38, 0.0 }
 0x5c4   : > { %v15552_v11 = vpop.f32.mrb[28].mxu0 }
 0x5c5   : > { %v5859_v41 = vpop.f32.mrb[29].mxu0 }
 0x5c6   : > { %v15554_v15 = vpop.f32.mrb[30].mxu0  ;;  %v5860_v59 = vadd.f32 %v5859_v41, %v15556_v58 }
 0x5c7   : > { %v5863_v42 = vpop.f32.mrb[31].mxu0 }
 0x5c8   : > { %v5864_v52 = vadd.f32 %v5863_v42, %v15558_v44  ;;  %v15642_v20 = vadd.f32 %v5860_v59, %v20685_v29 }
 0x5ca   : > { %v15638_v34 = vadd.f32 %v5864_v52, %v20682_v31  ;;  %20686 = vst [vmem:[#allocation32_spill] sm:$0xff] %v15642_v20  ;;  %v19615_v41 = vmax.f32 %v15642_v20, 0.0  ;;  %v15706_v52 = vadd.f32 %v5778_v49, %v20700_v7  ;;  %v20703_v31 = vmax.f32 %v20702_v63, 0.0 }
 0x5cb   : > { %v5862_v7 = vadd.f32 %v15554_v15, %v15558_v44 }
 0x5cc   : > { %20683 = vst [vmem:[#allocation41_spill] sm:$0xff] %v15638_v34  ;;  %v19611_v21 = vmax.f32 %v15638_v34, 0.0  ;;  %20701 = vst [vmem:[#allocation29_spill] sm:$0xff] %v15706_v52  ;;  %v15712_v1 = vadd.f32 %v5774_v19, %v20703_v31  ;;  %v20710_v19 = vld [vmem:[#allocation22_spill] sm:$0xff]  ;;  %v5858_v31 = vadd.f32 %v15552_v11, %v15556_v58 }
 0x5cd   : > { %v20711_v37 = vmax.f32 %v20710_v19, 0.0  ;;  %v20717_v19 = vld [vmem:[#allocation26_spill] sm:$0xff] }
 0x5ce   : > { %20704 = vst [vmem:[#allocation36_spill] sm:$0xff] %v15712_v1  ;;  %v20718_v15 = vmax.f32 %v20717_v19, 0.0  ;;  %v5969_v19 = vld [vmem:[%s19506_s1] ss:$8 sm:$0xf0] }
 0x5d8   : > { %v5728_v4 = vpop.f32.mrb[20].mxu1 }
 0x5d9   : > { %v5729_v18 = vadd.f32 %v5728_v4, %v15556_v58  ;;  %v5730_v8 = vpop.f32.mrb[21].mxu1  ;;  %v15658_v4 = vpack.c.bf16 %v19611_v21, %v19615_v41  ;;  %v20723_v21 = vld [vmem:[#allocation27_spill] sm:$0xff] }
 0x5da   : > { %v5732_v6 = vpop.f32.mrb[22].mxu1  ;;  %v10025_v41 = vld [vmem:[%s19506_s1 + $0x2] ss:$8 sm:$0xf0] }
 0x5db   : > { %v15565_v5 = vadd.f32 %v5729_v18, %v20663_v48  ;;  %v5733_v32 = vadd.f32 %v5732_v6, %v15558_v44  ;;  %v5734_v24 = vpop.f32.mrb[23].mxu1  ;;  %v5772_v48 = vadd.f32 %v15546_v47, %v15556_v58  ;;  %v20693_v47 = vld [vmem:[#allocation15_spill] sm:$0xff] }
 0x5dc   : > { %v5735_v25 = vadd.f32 %v5734_v24, %v15558_v44  ;;  %v20694_v2 = vmax.f32 %v20693_v47, 0.0 }
 0x5dd   : > { %20664 = vst [vmem:[#allocation10_spill] sm:$0xff] %v15565_v5  ;;  %v15574_v14 = vadd.f32 %v5733_v32, %v20669_v43  ;;  %v19626_v17 = vmax.f32 %v15565_v5, 0.0  ;;  %v5731_v32 = vadd.f32 %v5730_v8, %v15556_v58  ;;  %v20690_v43 = vld [vmem:[#allocation17_spill] sm:$0xff] }
 0x5de   : > { %v20691_v24 = vmax.f32 %v20690_v43, 0.0  ;;  %v15691_v8 = vadd.f32 %v5772_v48, %v20694_v2 }
 0x5df   : > { %20670 = vst [vmem:[#allocation28_spill] sm:$0xff] %v15574_v14  ;;  %v19624_v12 = vmax.f32 %v15574_v14, 0.0  ;;  %v15697_v0 = vadd.f32 %v5731_v32, %v20697_v51  ;;  %v19621_v32 = vmax.f32 %v15712_v1, 0.0 }
 0x5e0   : > { %v15687_v61 = vadd.f32 %v5735_v25, %v20691_v24  ;;  %20695 = vst [vmem:[#allocation37_spill] sm:$0xff] %v15691_v8  ;;  %v19622_v23 = vmax.f32 %v15691_v8, 0.0  ;;  %v19619_v25 = vmax.f32 %v15706_v52, 0.0  ;;  %v20707_v24 = vld [vmem:[#allocation21_spill] sm:$0xff] }
 0x5e1   : > { %v15587_v10 = vpack.c.bf16 %v19624_v12, %v19626_v17  ;;  %20698 = vst [vmem:[#allocation35_spill] sm:$0xff] %v15697_v0  ;;  %v19625_v29 = vmax.f32 %v15697_v0, 0.0  ;;  %v20708_v47 = vmax.f32 %v20707_v24, 0.0 }
 0x5e2   : > { %20692 = vst [vmem:[#allocation34_spill] sm:$0xff] %v15687_v61  ;;  %v19623_v59 = vmax.f32 %v15687_v61, 0.0  ;;  %v15723_v22 = vpack.c.bf16 %v19620_v33, %v19622_v23  ;;  %v15741_v57 = vpack.c.bf16 %v19619_v25, %v19621_v32  ;;  %v10028_v25 = vld [vmem:[%s19506_s1 + $0x3] ss:$8 sm:$0xf0] }
 0x5e3   : > { %20674 = vst [vmem:[#allocation23_spill] sm:$0xff] %v15587_v10  ;;  %6840 = vrot.lane.b32.xlu0 %v15587_v10, %s10455_s10  ;;  %6660 = vrot.lane.b32.xlu1 %v15587_v10, %s10454_s27 }
 0x5e4   : > { %v15730_v48 = vpack.c.bf16 %v19623_v59, %v19625_v29 }
 0x5e7   : > { %6108 = vrot.lane.b32.xlu1 %v15598_v45, %s10451_s24  ;;  %5928 = vrot.lane.b32.xlu0 %v15598_v45, %s10450_s23 }
 0x5eb   : > { %6468 = vrot.lane.b32.xlu1 %v15598_v45, %s10453_s26  ;;  %6288 = vrot.lane.b32.xlu0 %v15598_v45, %s10452_s25 }
 0x5ef   : > { %6656 = vrot.lane.b32.xlu1 %v15598_v45, %s10454_s27  ;;  %6836 = vrot.lane.b32.xlu0 %v15598_v45, %s10455_s10 }
 0x5f3   : > { %5930 = vrot.lane.b32.xlu1 %v15628_v39, %s10450_s23  ;;  %6110 = vrot.lane.b32.xlu0 %v15628_v39, %s10451_s24 }
 0x5f7   : > { %6290 = vrot.lane.b32.xlu1 %v15628_v39, %s10452_s25  ;;  %6470 = vrot.lane.b32.xlu0 %v15628_v39, %s10453_s26 }
 0x5fb   : > { %6838 = vrot.lane.b32.xlu1 %v15628_v39, %s10455_s10  ;;  %6658 = vrot.lane.b32.xlu0 %v15628_v39, %s10454_s27 }
 0x5fc   : > { %v5814_v42 = vpop.f32.mrb[24].mxu1 }
 0x5fd   : > { %v15660_v36 = vpop.f32.mrb[25].mxu1  ;;  %v5815_v43 = vadd.f32 %v5814_v42, %v15556_v58 }
 0x5fe   : > { %v5818_v18 = vpop.f32.mrb[26].mxu1 }
 0x5ff   : > { %v5820_v6 = vpop.f32.mrb[27].mxu1  ;;  %5917 = vrot.lane.b32.xlu1 %v15658_v4, %s10450_s23  ;;  %6106 = vrot.lane.b32.xlu0 %v15658_v4, %s10451_s24  ;;  %v5819_v49 = vadd.f32 %v5818_v18, %v15558_v44  ;;  %v15776_v51 = vadd.f32 %v5815_v43, %v20711_v37  ;;  %v20714_v43 = vld [vmem:[#allocation25_spill] sm:$0xff] }
 0x600   : > { %v5821_v63 = vadd.f32 %v5820_v6, %v15558_v44  ;;  %v20715_v24 = vmax.f32 %v20714_v43, 0.0  ;;  %v20720_v44 = vld [vmem:[#allocation24_spill] sm:$0xff] }
 0x601   : > { %v15772_v2 = vadd.f32 %v5819_v49, %v20708_v47  ;;  %20712 = vst [vmem:[#allocation42_spill] sm:$0xff] %v15776_v51  ;;  %v19618_v18 = vmax.f32 %v15776_v51, 0.0  ;;  %v5817_v49 = vadd.f32 %v15660_v36, %v15556_v58  ;;  %v20721_v6 = vmax.f32 %v20720_v44, 0.0 }
 0x602   : > { %v15815_v47 = vadd.f32 %v5862_v7, %v20715_v24  ;;  %v15819_v37 = vadd.f32 %v5821_v63, %v20718_v15  ;;  %v20724_v58 = vmax.f32 %v20723_v21, 0.0 }
 0x603   : > { %7016 = vrot.lane.b32.xlu1 %v15598_v45, %s10456_s11  ;;  %7018 = vrot.lane.b32.xlu0 %v15628_v39, %s10456_s11  ;;  %20709 = vst [vmem:[#allocation38_spill] sm:$0xff] %v15772_v2  ;;  %v19614_v42 = vmax.f32 %v15772_v2, 0.0  ;;  %v15823_v11 = vadd.f32 %v5858_v31, %v20721_v6 }
 0x604   : > { %20716 = vst [vmem:[#allocation6_spill] sm:$0xff] %v15815_v47  ;;  %20719 = vst [vmem:[#allocation14_spill] sm:$0xff] %v15819_v37  ;;  %v15827_v36 = vadd.f32 %v5817_v49, %v20724_v58  ;;  %v19613_v7 = vmax.f32 %v15815_v47, 0.0  ;;  %v19612_v43 = vmax.f32 %v15819_v37, 0.0 }
 0x605   : > { %v15792_v40 = vpack.c.bf16 %v19614_v42, %v19618_v18  ;;  %20722 = vst [vmem:[#allocation13_spill] sm:$0xff] %v15823_v11  ;;  %v19617_v63 = vmax.f32 %v15823_v11, 0.0  ;;  %v5968_v49 = vld [vmem:[%s19506_s1] ss:$8 sm:$0xf] }
 0x606   : > { %20725 = vst [vmem:[#allocation9_spill] sm:$0xff] %v15827_v36  ;;  %v19616_v24 = vmax.f32 %v15827_v36, 0.0  ;;  %v5970_v15 = vor.u32 %v5969_v19, %v5968_v49  ;;  %v10024_v42 = vld [vmem:[%s19506_s1 + $0x2] ss:$8 sm:$0xf] }
 0x607   : > { %6286 = vrot.lane.b32.xlu1 %v15658_v4, %s10452_s25  ;;  %6466 = vrot.lane.b32.xlu0 %v15658_v4, %s10453_s26  ;;  %20713 = vst [vmem:[#allocation7_spill] sm:$0xff] %v15792_v40  ;;  %v15845_v21 = vpack.c.bf16 %v19613_v7, %v19617_v63  ;;  %v10027_v18 = vld [vmem:[%s19506_s1 + $0x3] ss:$8 sm:$0xf] }
 0x608   : > { %v15851_v31 = vpack.c.bf16 %v19612_v43, %v19616_v24  ;;  %vm5972_vm4 = vcmp.ne.f32.partialorder %v5970_v15, 0.0  ;;  %v10021_v15 = vld [vmem:[%s19506_s1 + $0x1] ss:$8 sm:$0xf]  ;;  %v6510_v32 = vor.u32 %v10028_v25, %v10027_v18 }
 0x609   : > { %v15876_v44 = vsel %vm5972_vm4, 1, %v19798_v16  ;;  %v10022_v43 = vld [vmem:[%s19506_s1 + $0x1] ss:$8 sm:$0xf0] }
 0x60a   : > { %20726 = vst [vmem:[#allocation8_spill] sm:$0xff] %v15851_v31  ;;  %v5979_v6 = vrot.slane %v15876_v44, %v10696_v30  ;;  %v5983_v58 = vrot.slane %v15876_v44, %v19990_v27  ;;  %v6150_v7 = vor.u32 %v10022_v43, %v10021_v15  ;;  %v6330_v43 = vor.u32 %v10025_v41, %v10024_v42  ;;  %v10031_v25 = vld [vmem:[%s19506_s1 + $0x5] ss:$8 sm:$0xf0] }
 0x60b   : > { %7020 = vrot.lane.b32.xlu1 %v15587_v10, %s10456_s11  ;;  %7196 = vrot.lane.b32.xlu0 %v15598_v45, %s10457_s15  ;;  %vm6512_vm13 = vcmp.ne.f32.partialorder %v6510_v32, 0.0 }
 0x60c   : > { %vm6016_vm12 = vcmp.eq.s32.totalorder %v5979_v6, 1  ;;  %vm6017_vm6 = vcmp.eq.s32.totalorder %v5983_v58, 1  ;;  %vm6152_vm5 = vcmp.ne.f32.partialorder %v6150_v7, 0.0  ;;  %vm6332_vm15 = vcmp.ne.f32.partialorder %v6330_v43, 0.0 }
 0x60d   : > { %vm6026_vm1 = vmpackc.low %vm6017_vm6, %vm6016_vm12  ;;  %v15930_v41 = vsel %vm6152_vm5, 1, %v19798_v16  ;;  %v15942_v12 = vsel %vm6332_vm15, 1, %v19798_v16  ;;  %v10030_v43 = vld [vmem:[%s19506_s1 + $0x5] ss:$8 sm:$0xf]  ;;  %v15978_v32 = vsel %vm6512_vm13, 1, %v19798_v16 }
 0x60e   : > { %v6031_v15 = vsel %vm6026_vm1, 65537, %v19798_v16  ;;  %v6159_v23 = vrot.slane %v15930_v41, %v10696_v30  ;;  %v6163_v59 = vrot.slane %v15930_v41, %v19990_v27  ;;  %v6339_v17 = vrot.slane %v15942_v12, %v10696_v30 }
 0x60f   : > { %7198 = vrot.lane.b32.xlu1 %v15628_v39, %s10457_s15  ;;  %7200 = vrot.lane.b32.xlu0 %v15587_v10, %s10457_s15  ;;  %v6043_v33 = vrot.slane %v6031_v15, %v10750_v46  ;;  %v6343_v3 = vrot.slane %v15942_v12, %v19990_v27  ;;  %v6523_v26 = vrot.slane %v15978_v32, %v19990_v27 }
 0x610   : > { %vm15965_vm3 = vcmp.eq.s32.totalorder %v6159_v23, 1  ;;  %vm15969_vm10 = vcmp.eq.s32.totalorder %v6163_v59, 1  ;;  %v10033_v23 = vld [vmem:[%s19506_s1 + $0x6] ss:$8 sm:$0xf]  ;;  %vm15991_vm2 = vcmp.eq.s32.totalorder %v6339_v17, 1  ;;  %v6519_v17 = vrot.slane %v15978_v32, %v10696_v30 }
 0x611   : > { %vm6077_vm7 = vcmp.ne.s16.totalorder %v6043_v33, 0  ;;  %v6700_v33 = vor.u32 %v10031_v25, %v10030_v43  ;;  %vm6206_vm0 = vmpackc.low %vm15969_vm10, %vm15965_vm3  ;;  %vm15995_vm14 = vcmp.eq.s32.totalorder %v6343_v3, 1  ;;  %v10034_v25 = vld [vmem:[%s19506_s1 + $0x6] ss:$8 sm:$0xf0]  ;;  %vm16040_vm6 = vcmp.eq.s32.totalorder %v6523_v26, 1 }
 0x612   : > { %v10036_v3 = vld [vmem:[%s19506_s1 + $0x7] ss:$8 sm:$0xf]  ;;  %v6211_v37 = vsel %vm6206_vm0, 65537, %v19798_v16  ;;  %vm6386_vm4 = vmpackc.low %vm15995_vm14, %vm15991_vm2  ;;  %v6880_v47 = vor.u32 %v10034_v25, %v10033_v23  ;;  %vm16036_vm12 = vcmp.eq.s32.totalorder %v6519_v17, 1  ;;  %vm20746_vm10 = vcmask 130048  }
 0x613   : > { %5934 = vrot.lane.b32.xlu1 %v15730_v48, %s10450_s23  ;;  %5936 = vrot.lane.b32.xlu0 %v15723_v22, %s10450_s23  ;;  %vm6702_vm8 = vcmp.ne.f32.partialorder %v6700_v33, 0.0  ;;  %v6039_v33 = vrot.slane %v6031_v15, %v10696_v30  ;;  %v6223_v36 = vrot.slane %v6211_v37, %v10750_v46  ;;  %v7060_v51 = vor.u32 %v10037_v62, %v10036_v3  ;;  %v10039_v17 = vld [vmem:[%s19506_s1 + $0x50] ss:$8 sm:$0xf]  ;;  %vm20747_vm0 = vmmov %vm20746_vm10 }
 0x614   : > { %v16028_v11 = vsel %vm6702_vm8, 1, %v19798_v16  ;;  %v6219_v15 = vrot.slane %v6211_v37, %v10696_v30  ;;  %v6391_v23 = vsel %vm6386_vm4, 65537, %v19798_v16  ;;  %vm6882_vm5 = vcmp.ne.f32.partialorder %v6880_v47, 0.0  ;;  %v10040_v26 = vld [vmem:[%s19506_s1 + $0x50] ss:$8 sm:$0xf0] }
 0x615   : > { %vm16044_vm1 = vcmp.ne.s16.totalorder %v6039_v33, 0  ;;  %v6709_v37 = vrot.slane %v16028_v11, %v10696_v30  ;;  %vm16063_vm15 = vcmp.ne.s16.totalorder %v6223_v36, 0  ;;  %v6403_v52 = vrot.slane %v6391_v23, %v10750_v46 }
 0x616   : > { %v6713_v38 = vrot.slane %v16028_v11, %v19990_v27  ;;  %vm16080_vm13 = vcmp.ne.s16.totalorder %v6219_v15, 0  ;;  %v16085_v1 = vsel %vm6882_vm5, 1, %v19798_v16  ;;  %vm7062_vm3 = vcmp.ne.f32.partialorder %v7060_v51, 0.0 }
 0x617   : > { %5938 = vrot.lane.b32.xlu1 %v15741_v57, %s10450_s23  ;;  %6114 = vrot.lane.b32.xlu0 %v15730_v48, %s10451_s24  ;;  %v6399_v25 = vrot.slane %v6391_v23, %v10696_v30  ;;  %vm16106_vm2 = vcmp.eq.s32.totalorder %v6709_v37, 1  ;;  %vm6437_vm14 = vcmp.ne.s16.totalorder %v6403_v52, 0  ;;  %v6889_v52 = vrot.slane %v16085_v1, %v10696_v30 }
 0x618   : > { %vm16111_vm8 = vcmp.eq.s32.totalorder %v6713_v38, 1  ;;  %v6893_v38 = vrot.slane %v16085_v1, %v19990_v27  ;;  %v6535_v35 = vrot.slane %v15978_v32, %v10750_v46 }
 0x619   : > { %vm16131_vm4 = vcmp.ne.s16.totalorder %v6399_v25, 0  ;;  %vm16157_vm5 = vcmp.eq.s32.totalorder %v6889_v52, 1 }
 0x61b   : > { %6116 = vrot.lane.b32.xlu1 %v15723_v22, %s10451_s24  ;;  %6118 = vrot.lane.b32.xlu0 %v15741_v57, %s10451_s24 }
 0x61f   : > { %6294 = vrot.lane.b32.xlu1 %v15730_v48, %s10452_s25  ;;  %6296 = vrot.lane.b32.xlu0 %v15723_v22, %s10452_s25 }
 0x623   : > { %6298 = vrot.lane.b32.xlu1 %v15741_v57, %s10452_s25  ;;  %6474 = vrot.lane.b32.xlu0 %v15730_v48, %s10453_s26 }
 0x627   : > { %6476 = vrot.lane.b32.xlu1 %v15723_v22, %s10453_s26  ;;  %6478 = vrot.lane.b32.xlu0 %v15741_v57, %s10453_s26 }
 0x62b   : > { %6664 = vrot.lane.b32.xlu1 %v15723_v22, %s10454_s27  ;;  %6666 = vrot.lane.b32.xlu0 %v15741_v57, %s10454_s27 }
 0x62f   : > { %6668 = vrot.lane.b32.xlu1 %v15792_v40, %s10454_s27  ;;  %6844 = vrot.lane.b32.xlu0 %v15723_v22, %s10455_s10 }
 0x633   : > { %6846 = vrot.lane.b32.xlu1 %v15741_v57, %s10455_s10  ;;  %6848 = vrot.lane.b32.xlu0 %v15792_v40, %s10455_s10 }
 0x637   : > { %7024 = vrot.lane.b32.xlu1 %v15723_v22, %s10456_s11  ;;  %7026 = vrot.lane.b32.xlu0 %v15741_v57, %s10456_s11 }
 0x63b   : > { %7028 = vrot.lane.b32.xlu1 %v15792_v40, %s10456_s11  ;;  %7204 = vrot.lane.b32.xlu0 %v15723_v22, %s10457_s15 }
 0x63f   : > { %7206 = vrot.lane.b32.xlu1 %v15741_v57, %s10457_s15  ;;  %7208 = vrot.lane.b32.xlu0 %v15792_v40, %s10457_s15 }
 0x643   : > { %5942 = vrot.lane.b32.xlu1 %v15851_v31, %s10450_s23  ;;  %5944 = vrot.lane.b32.xlu0 %v15845_v21, %s10450_s23 }
 0x647   : > { %6122 = vrot.lane.b32.xlu1 %v15851_v31, %s10451_s24  ;;  %6124 = vrot.lane.b32.xlu0 %v15845_v21, %s10451_s24 }
 0x64b   : > { %6302 = vrot.lane.b32.xlu1 %v15851_v31, %s10452_s25  ;;  %6304 = vrot.lane.b32.xlu0 %v15845_v21, %s10452_s25 }
 0x64f   : > { %6482 = vrot.lane.b32.xlu1 %v15851_v31, %s10453_s26  ;;  %6484 = vrot.lane.b32.xlu0 %v15845_v21, %s10453_s26 }
 0x653   : > { %6672 = vrot.lane.b32.xlu1 %v15845_v21, %s10454_s27  ;;  %6852 = vrot.lane.b32.xlu0 %v15845_v21, %s10455_s10 }
 0x655   : > { %v15886_v49 = vpop.permute.xlu0 %6840  ;;  %v15888_v19 = vpop.permute.xlu1 %6660 }
 0x656   : > { %20727 = vst [vmem:[#allocation12_spill] sm:$0xff] %v15886_v49 }
 0x657   : > { %5932 = vrot.lane.b32.xlu1 %v15587_v10, %s10450_s23  ;;  %6674 = vrot.lane.b32.xlu0 %v15658_v4, %s10454_s27 }
 0x659   : > { %v15906_v24 = vpop.permute.xlu1 %6108  ;;  %v15908_v63 = vpop.permute.xlu0 %5928 }
 0x65b   : > { %7032 = vrot.lane.b32.xlu1 %v15845_v21, %s10456_s11  ;;  %6112 = vrot.lane.b32.xlu0 %v15587_v10, %s10451_s24 }
 0x65d   : > { %v15914_v6 = vpop.permute.xlu1 %6468  ;;  %v15916_v58 = vpop.permute.xlu0 %6288 }
 0x65f   : > { %6854 = vrot.lane.b32.xlu1 %v15658_v4, %s10455_s10  ;;  %7034 = vrot.lane.b32.xlu0 %v15658_v4, %s10456_s11 }
 0x661   : > { %v15932_v42 = vpop.permute.xlu1 %6656  ;;  %v15934_v7 = vpop.permute.xlu0 %6836 }
 0x663   : > { %6292 = vrot.lane.b32.xlu1 %v15587_v10, %s10452_s25  ;;  %7212 = vrot.lane.b32.xlu0 %v15845_v21, %s10457_s15 }
 0x665   : > { %v15954_v18 = vpop.permute.xlu1 %5930  ;;  %v15956_v29 = vpop.permute.xlu0 %6110 }
 0x666   : > { %v5946_v56 = vsel %vm19690_vm11, %v15908_v63, %v15954_v18  ;;  %v6126_v61 = vsel %vm20747_vm0, %v15906_v24, %v15956_v29 }
 0x667   : > { %7214 = vrot.lane.b32.xlu1 %v15658_v4, %s10457_s15  ;;  %6472 = vrot.lane.b32.xlu0 %v15587_v10, %s10453_s26 }
 0x668   : > { %10216 = vmatprep.subr.msk.bf16.mxu1 %vm6077_vm7, %v5946_v56  ;;  %vm6566_vm7 = vmpackc.low %vm16040_vm6, %vm16036_vm12 }
 0x669   : > { %v15983_v34 = vpop.permute.xlu1 %6290  ;;  %v15985_v59 = vpop.permute.xlu0 %6470  ;;  %v6571_v51 = vsel %vm6566_vm7, 65537, %v19798_v16  ;;  %vm6756_vm6 = vmpackc.low %vm16111_vm8, %vm16106_vm2  ;;  %vm20758_vm7 = vcmask 7168  }
 0x66a   : > { %v6306_v56 = vsel %vm19689_vm9, %v15916_v58, %v15983_v34 }
 0x66b   : > { %6662 = vrot.lane.b32.xlu1 %v15730_v48, %s10454_s27  ;;  %6842 = vrot.lane.b32.xlu0 %v15730_v48, %s10455_s10 }
 0x66d   : > { %v16022_v2 = vpop.permute.xlu1 %6838  ;;  %v16024_v20 = vpop.permute.xlu0 %6658 }
 0x66f   : > { %7022 = vrot.lane.b32.xlu1 %v15730_v48, %s10456_s11  ;;  %7202 = vrot.lane.b32.xlu0 %v15730_v48, %s10457_s15 }
 0x671   : > { %v16048_v3 = vpop.permute.xlu1 %5917  ;;  %v16050_v62 = vpop.permute.xlu0 %6106 }
 0x672   : > { %v5966_v33 = vsel %vm19690_vm11, %v16048_v3, %v15908_v63  ;;  %v6146_v8 = vsel %vm20746_vm10, %v16050_v62, %v15906_v24  ;;  %v6583_v24 = vrot.slane %v6571_v51, %v10750_v46 }
 0x673   : > { %5940 = vrot.lane.b32.xlu1 %v15792_v40, %s10450_s23  ;;  %6120 = vrot.lane.b32.xlu0 %v15792_v40, %s10451_s24  ;;  %v6086_v36 = vsel %vm16044_vm1, %v5966_v33, 0  ;;  %v7240_v33 = vor.u32 %v10040_v26, %v10039_v17  ;;  %v6266_v43 = vsel %vm16080_vm13, %v6146_v8, 0  ;;  %v6579_v17 = vrot.slane %v6571_v51, %v10696_v30  ;;  %vm20759_vm13 = vmmov %vm20758_vm7  ;;  %v10045_v51 = vld [vmem:[%s19508_s3 + $0x38] sm:$0xff] }
 0x674   : > { %7495 = vmatpush1.bf16.msra.mxu1 %v6086_v36  ;;  %vm6617_vm1 = vcmp.ne.s16.totalorder %v6583_v24, 0  ;;  %v6486_v23 = vsel %vm20759_vm13, %v15914_v6, %v15985_v59 }
 0x675   : > { %v16094_v15 = vpop.permute.xlu1 %7016  ;;  %10217 = vmatprep.subr.msk.bf16.mxu1 %vm16063_vm15, %v6126_v61  ;;  %v16098_v14 = vpop.permute.xlu0 %7018  ;;  %v16116_v61 = vsel %vm7062_vm3, 1, %v19798_v16  ;;  %vm7242_vm12 = vcmp.ne.f32.partialorder %v7240_v33, 0.0  ;;  %vm16161_vm15 = vcmp.eq.s32.totalorder %v6893_v38, 1  ;;  %vm6616_vm3 = vcmp.ne.s16.totalorder %v6579_v17, 0 }
 0x676   : > { %v7069_v47 = vrot.slane %v16116_v61, %v10696_v30  ;;  %v7073_v25 = vrot.slane %v16116_v61, %v19990_v27  ;;  %vm6936_vm0 = vmpackc.low %vm16161_vm15, %vm16157_vm5 }
 0x677   : > { %6300 = vrot.lane.b32.xlu1 %v15792_v40, %s10452_s25  ;;  %6480 = vrot.lane.b32.xlu0 %v15792_v40, %s10453_s26  ;;  %v6941_v0 = vsel %vm6936_vm0, 65537, %v19798_v16 }
 0x678   : > { %7497 = vmatpush1.bf16.msra.mxu1 %v6266_v43  ;;  %v6761_v43 = vsel %vm6756_vm6, 65537, %v19798_v16  ;;  %vm16179_vm10 = vcmp.eq.s32.totalorder %v7069_v47, 1  ;;  %vm16188_vm2 = vcmp.eq.s32.totalorder %v7073_v25, 1  ;;  %v10044_v25 = vld [vmem:[%s19508_s3 + $0x30] sm:$0xff]  ;;  %v6953_v5 = vrot.slane %v6941_v0, %v10750_v46 }
 0x679   : > { %v16136_v26 = vpop.permute.xlu1 %6286  ;;  %10218 = vmatprep.subr.msk.bf16.mxu1 %vm6437_vm14, %v6306_v56  ;;  %v16138_v8 = vpop.permute.xlu0 %6466  ;;  %v6773_v37 = vrot.slane %v6761_v43, %v10750_v46  ;;  %vm7116_vm14 = vmpackc.low %vm16188_vm2, %vm16179_vm10  ;;  %vm20779_vm10 = vcmask 924672  }
 0x67a   : > { %v6326_v63 = vsel %vm19689_vm9, %v16136_v26, %v15916_v58  ;;  %v16166_v58 = vsel %vm7242_vm12, 1, %v19798_v16  ;;  %v6506_v24 = vsel %vm20758_vm7, %v16138_v8, %v15914_v6  ;;  %vm20780_vm0 = vmmov %vm20779_vm10 }
 0x67b   : > { %6670 = vrot.lane.b32.xlu1 %v15851_v31, %s10454_s27  ;;  %6850 = vrot.lane.b32.xlu0 %v15851_v31, %s10455_s10  ;;  %v6446_v33 = vsel %vm16131_vm4, %v6326_v63, 0  ;;  %v7249_v17 = vrot.slane %v16166_v58, %v10696_v30  ;;  %v7253_v47 = vrot.slane %v16166_v58, %v19990_v27  ;;  %v6626_v63 = vsel %vm6616_vm3, %v6506_v24, 0 }
 0x67c   : > { %7499 = vmatpush1.bf16.msra.mxu1 %v6446_v33  ;;  %v6769_v33 = vrot.slane %v6761_v43, %v10696_v30  ;;  %v5995_v24 = vrot.slane %v15876_v44, %v10750_v46  ;;  %v20766_v43 = vld [vmem:[#allocation5_spill] sm:$0xff]  ;;  %vm6807_vm8 = vcmp.ne.s16.totalorder %v6773_v37, 0  ;;  %vm6987_vm3 = vcmp.ne.s16.totalorder %v6953_v5, 0 }
 0x67d   : > { %v16175_v52 = vpop.permute.xlu1 %7020  ;;  %10219 = vmatprep.subr.msk.bf16.mxu1 %vm6617_vm1, %v6486_v23  ;;  %v16177_v38 = vpop.permute.xlu0 %7196  ;;  %vm16222_vm4 = vcmp.eq.s32.totalorder %v7249_v17, 1  ;;  %vm16226_vm12 = vcmp.eq.s32.totalorder %v7253_v47, 1  ;;  %vm20773_vm1 = vcmask 1039360   ;;  %v6949_v17 = vrot.slane %v6941_v0, %v10696_v30 }
 0x67e   : > { %20760 = vst [vmem:[#allocation11_spill] sm:$0xff] %v16175_v52  ;;  %vm16230_vm6 = vcmp.ne.s16.totalorder %v6769_v33, 0  ;;  %v6676_v37 = vsel %vm20773_vm1, %v15932_v42, %v16024_v20  ;;  %vm20774_vm5 = vmmov %vm20773_vm1  ;;  %v7121_v47 = vsel %vm7116_vm14, 65537, %v19798_v16  ;;  %vm16251_vm7 = vcmp.eq.s32.totalorder %v5995_v24, 1 }
 0x67f   : > { %7030 = vrot.lane.b32.xlu1 %v15851_v31, %s10456_s11  ;;  %7210 = vrot.lane.b32.xlu0 %v15851_v31, %s10457_s15  ;;  %v6677_v6 = vsel %vm20774_vm5, %v16024_v20, %v15888_v19  ;;  %vm7296_vm15 = vmpackc.low %vm16226_vm12, %vm16222_vm4  ;;  %v6175_v0 = vrot.slane %v15930_v41, %v10750_v46  ;;  %v6816_v50 = vsel %vm16230_vm6, %v6676_v37, 0  ;;  %v7129_v24 = vrot.slane %v7121_v47, %v10696_v30  ;;  %v10020_v31 = vld [vmem:[%s19506_s1 + $0x40] ss:$8 sm:$0x3] }
 0x680   : > { %7501 = vmatpush1.bf16.msra.mxu1 %v6626_v63  ;;  %v5999_v63 = vrot.slane %v15876_v44, %v20766_v43  ;;  %vm16273_vm2 = vcmp.ne.s16.totalorder %v6949_v17, 0  ;;  %v7301_v5 = vsel %vm7296_vm15, 65537, %v19798_v16  ;;  %v6359_v20 = vrot.slane %v15942_v12, %v20766_v43 }
 0x681   : > { %v16207_v36 = vpop.permute.xlu1 %7198  ;;  %7502 = vmatprep.subr.bf16.mxu1 %v15628_v39  ;;  %v16210_v23 = vpop.permute.xlu0 %7200  ;;  %v7133_v39 = vrot.slane %v7121_v47, %v10750_v46  ;;  %v7313_v17 = vrot.slane %v7301_v5, %v10750_v46  ;;  %vm16301_vm6 = vcmp.ne.s16.totalorder %v7129_v24, 0  ;;  %vm20790_vm1 = vcmask 916480  }
 0x682   : > { %20765 = vst [vmem:[#allocation16_spill] sm:$0xff] %v16210_v23  ;;  %vm16255_vm13 = vcmp.eq.s32.totalorder %v5999_v63, 1  ;;  %v6856_v63 = vsel %vm20779_vm10, %v15934_v7, %v16022_v2  ;;  %vm20791_vm5 = vmmov %vm20790_vm1  ;;  %v6539_v24 = vrot.slane %v15978_v32, %v20766_v43 }
 0x683   : > { %7474 = vperm.xlu1 %10367, %v10044_v25   ;;  %7479 = vperm.xlu0 %10366, %v10045_v51   ;;  %v6179_v51 = vrot.slane %v15930_v41, %v20766_v43  ;;  %vm6028_vm14 = vmpackc.low %vm16255_vm13, %vm16251_vm7  ;;  %vm7167_vm12 = vcmp.ne.s16.totalorder %v7133_v39, 0  ;;  %v7036_v39 = vsel %vm20790_vm1, %v16094_v15, %v16098_v14  ;;  %v7037_v55 = vsel %vm20791_vm5, %v16098_v14, %v16175_v52 }
 0x684   : > { %7503 = vmatpush1.bf16.msra.mxu1 %v15598_v45  ;;  %v6355_v45 = vrot.slane %v15942_v12, %v10750_v46  ;;  %vm7347_vm7 = vcmp.ne.s16.totalorder %v7313_v17, 0 }
 0x685   : > { %v16243_v25 = vpop.permute.xlu1 %5934  ;;  %10220 = vmatprep.subr.msk.bf16.mxu1 %vm6807_vm8, %v6677_v6  ;;  %v16245_v33 = vpop.permute.xlu0 %5936  ;;  %v6857_v6 = vsel %vm20780_vm0, %v16022_v2, %v15886_v49  ;;  %vm16286_vm8 = vcmp.eq.s32.totalorder %v6175_v0, 1  ;;  %vm16290_vm4 = vcmp.eq.s32.totalorder %v6179_v51, 1  ;;  %v7309_v51 = vrot.slane %v7301_v5, %v10696_v30 }
 0x686   : > { %vm6208_vm15 = vmpackc.low %vm16290_vm4, %vm16286_vm8  ;;  %vm16324_vm13 = vcmp.eq.s32.totalorder %v6355_v45, 1  ;;  %v7176_v2 = vsel %vm16301_vm6, %v7036_v39, 0  ;;  %vm20799_vm0 = vcmask 908288   ;;  %vm16350_vm8 = vcmp.eq.s32.totalorder %v6539_v24, 1 }
 0x687   : > { %vm16334_vm10 = vcmp.ne.s16.totalorder %v7309_v51, 0  ;;  %v6213_v17 = vsel %vm6208_vm15, 65537, %v19798_v16  ;;  %v7216_v45 = vsel %vm20799_vm0, %v16177_v38, %v16207_v36  ;;  %v5949_v28 = vsel %vm19690_vm11, %v16243_v25, %v16245_v33 }
 0x688   : > { %7505 = vmatpush1.bf16.msra.mxu1 %v6816_v50  ;;  %v6996_v50 = vsel %vm16273_vm2, %v6856_v63, 0  ;;  %vm20800_vm2 = vmmov %vm20799_vm0  ;;  %v7356_v24 = vsel %vm16334_vm10, %v7216_v45, 0  ;;  %v7089_v0 = vrot.slane %v16116_v61, %v20766_v43 }
 0x689   : > { %v16282_v56 = vpop.permute.xlu1 %5938  ;;  %10221 = vmatprep.subr.msk.bf16.mxu1 %vm6987_vm3, %v6857_v6  ;;  %v16284_v37 = vpop.permute.xlu0 %6114  ;;  %v6033_v6 = vsel %vm6028_vm14, 65537, %v19798_v16  ;;  %vm16328_vm3 = vcmp.eq.s32.totalorder %v6359_v20, 1  ;;  %v7217_v20 = vsel %vm20800_vm2, %v16207_v36, %v16210_v23  ;;  %vm16346_vm14 = vcmp.eq.s32.totalorder %v6535_v35, 1 }
 0x68a   : > { %20783 = vst [vmem:[#allocation17_spill] sm:$0xff] %v16282_v56  ;;  %vm6388_vm4 = vmpackc.low %vm16328_vm3, %vm16324_vm13  ;;  %v6239_v36 = vrot.slane %v6213_v17, %v10750_v46  ;;  %v6235_v35 = vrot.slane %v6213_v17, %v10696_v30  ;;  %v5950_v14 = vsel %vm19690_vm11, %v16245_v33, %v16282_v56  ;;  %vm20814_vm13 = vcmask 130048  }
 0x68b   : > { %vm6568_vm1 = vmpackc.low %vm16350_vm8, %vm16346_vm14  ;;  %v6393_v47 = vsel %vm6388_vm4, 65537, %v19798_v16  ;;  %vm5973_vm14 = vcmp.ne.f32.partialorder %v10020_v31, 0.0 }
 0x68c   : > { %7507 = vmatpush1.bf16.msra.mxu1 %v6996_v50  ;;  %v6059_v50 = vrot.slane %v6033_v6, %v10750_v46  ;;  %vm16392_vm5 = vcmp.ne.s16.totalorder %v6239_v36, 0  ;;  %vm16396_vm15 = vcmp.ne.s16.totalorder %v6235_v35, 0  ;;  %v6419_v33 = vrot.slane %v6393_v47, %v10750_v46  ;;  %vm20815_vm3 = vmmov %vm20814_vm13 }
 0x68d   : > { %v6117_v63 = vpop.permute.xlu1 %6116  ;;  %10222 = vmatprep.subr.msk.bf16.mxu1 %vm7167_vm12, %v7037_v55  ;;  %v16321_v5 = vpop.permute.xlu0 %6118  ;;  %v6055_v55 = vrot.slane %v6033_v6, %v10696_v30  ;;  %v6905_v35 = vrot.slane %v16085_v1, %v10750_v46  ;;  %vm20818_vm0 = vmmov %vm20815_vm3 }
 0x68e   : > { %20792 = vst [vmem:[#allocation15_spill] sm:$0xff] %v16321_v5  ;;  %vm6081_vm12 = vcmp.ne.s16.totalorder %v6059_v50, 0  ;;  %v6725_v50 = vrot.slane %v16028_v11, %v10750_v46  ;;  %v6129_v56 = vsel %vm20814_vm13, %v16284_v37, %v6117_v63  ;;  %vm6441_vm2 = vcmp.ne.s16.totalorder %v6419_v33, 0 }
 0x68f   : > { %vm16369_vm6 = vcmp.ne.s16.totalorder %v6055_v55, 0  ;;  %v6729_v55 = vrot.slane %v16028_v11, %v20766_v43  ;;  %vm16480_vm13 = vcmp.eq.s32.totalorder %v7089_v0, 1 }
 0x690   : > { %7509 = vmatpush1.bf16.msra.mxu1 %v7176_v2  ;;  %v16367_v2 = vld [vmem:[%s19507_s2 + $0x30] ss:$8 sps:$4 sm:$0xff]   ;;  %v6090_v40 = vsel %vm16369_vm6, %v5949_v28, 0 }
 0x691   : > { %v16354_v6 = vpop.permute.xlu1 %6294  ;;  %10223 = vmatprep.subr.msk.bf16.mxu1 %vm7347_vm7, %v7217_v20  ;;  %v6297_v39 = vpop.permute.xlu0 %6296  ;;  %vm16406_vm7 = vcmp.eq.s32.totalorder %v6725_v50, 1  ;;  %v6130_v20 = vsel %vm20815_vm3, %v6117_v63, %v16321_v5  ;;  %vm16419_vm10 = vcmp.eq.s32.totalorder %v6729_v55, 1  ;;  %v6909_v50 = vrot.slane %v16085_v1, %v20766_v43 }
 0x692   : > { %v7085_v55 = vrot.slane %v16116_v61, %v10750_v46  ;;  %v6270_v5 = vsel %vm16396_vm15, %v6129_v56, 0  ;;  %vm6758_vm4 = vmpackc.low %vm16419_vm10, %vm16406_vm7  ;;  %v6309_v33 = vsel %vm19689_vm9, %v16354_v6, %v6297_v39  ;;  %vm20832_vm3 = vcmask 7168  }
 0x693   : > { %vm16455_vm6 = vcmp.eq.s32.totalorder %v6909_v50, 1  ;;  %vm20833_vm10 = vmmov %vm20832_vm3 }
 0x694   : > { %7511 = vmatpush1.bf16.msra.mxu1 %v7356_v24  ;;  %v6573_v24 = vsel %vm6568_vm1, 65537, %v19798_v16  ;;  %vm16467_vm15 = vcmp.eq.s32.totalorder %v7085_v55, 1 }
 0x695   : > { %v16388_v17 = vpop.permute.xlu1 %6298  ;;  %10232 = vmatprep.subr.msk.bf16.mxu1 %vm6081_vm12, %v5950_v14  ;;  %v16390_v45 = vpop.permute.xlu0 %6474  ;;  %v6415_v14 = vrot.slane %v6393_v47, %v10696_v30  ;;  %v6599_v63 = vrot.slane %v6573_v24, %v10750_v46  ;;  %vm16451_vm12 = vcmp.eq.s32.totalorder %v6905_v35, 1 }
 0x696   : > { %20807 = vst [vmem:[#allocation18_spill] sm:$0xff] %v16388_v17  ;;  %v6310_v31 = vsel %vm19689_vm9, %v6297_v39, %v16388_v17  ;;  %v6763_v39 = vsel %vm6758_vm4, 65537, %v19798_v16  ;;  %vm6938_vm7 = vmpackc.low %vm16455_vm6, %vm16451_vm12 }
 0x697   : > { %7527 = vmatmul.mubr.bf16.vlgmr.msra.gmra.mrb[28].mxu1 %v16367_v2  ;;  %vm16437_vm8 = vcmp.ne.s16.totalorder %v6415_v14, 0  ;;  %v6789_v51 = vrot.slane %v6763_v39, %v10750_v46 }
 0x698   : > { %7581 = vmatpush1.bf16.msra.mxu1 %v6090_v40  ;;  %10050 = vmatprep.mubr.msk.bf16.mxu1 %vm20818_vm0, %v15746_v54  ;;  %v6595_v40 = vrot.slane %v6573_v24, %v10696_v30  ;;  %v6450_v28 = vsel %vm16437_vm8, %v6309_v33, 0 }
 0x699   : > { %v6477_v47 = vpop.permute.xlu1 %6476  ;;  %10233 = vmatprep.subr.msk.bf16.mxu1 %vm16392_vm5, %v6130_v20  ;;  %v16429_v23 = vpop.permute.xlu0 %6478  ;;  %vm6621_vm5 = vcmp.ne.s16.totalorder %v6599_v63, 0  ;;  %v10023_v20 = vld [vmem:[%s19506_s1 + $0x41] ss:$8 sm:$0x3]  ;;  %v7269_v63 = vrot.slane %v16166_v58, %v20766_v43  ;;  %v6943_v43 = vsel %vm6938_vm7, 65537, %v19798_v16 }
 0x69a   : > { %20819 = vst [vmem:[#allocation20_spill] sm:$0xff] %v16429_v23  ;;  %vm16461_vm1 = vcmp.ne.s16.totalorder %v6595_v40, 0  ;;  %v7265_v40 = vrot.slane %v16166_v58, %v10750_v46  ;;  %v6489_v55 = vsel %vm20832_vm3, %v16390_v45, %v6477_v47  ;;  %v6490_v52 = vsel %vm20833_vm10, %v6477_v47, %v16429_v23 }
 0x69b   : > { %vm6153_vm0 = vcmp.ne.f32.partialorder %v10023_v20, 0.0  ;;  %v6630_v47 = vsel %vm16461_vm1, %v6489_v55, 0  ;;  %v6785_v23 = vrot.slane %v6763_v39, %v10696_v30  ;;  %vm16514_vm8 = vcmp.eq.s32.totalorder %v7269_v63, 1 }
 0x69c   : > { %7583 = vmatpush1.bf16.msra.mxu1 %v6270_v5  ;;  %v5975_v5 = vsel %vm5973_vm14, 1, %v19798_v16  ;;  %vm16510_vm14 = vcmp.eq.s32.totalorder %v7265_v40, 1  ;;  %v6155_v39 = vsel %vm6153_vm0, 1, %v19798_v16  ;;  %v6969_v40 = vrot.slane %v6943_v43, %v10750_v46 }
 0x69d   : > { %v16459_v24 = vpop.permute.xlu1 %6664  ;;  %10234 = vmatprep.subr.msk.bf16.mxu1 %vm6441_vm2, %v6310_v31  ;;  %v6667_v14 = vpop.permute.xlu0 %6666  ;;  %v6011_v33 = vrot.slane %v5975_v5, %v10696_v30  ;;  %v6015_v0 = vrot.slane %v5975_v5, %v19990_v27  ;;  %vm7118_vm2 = vmpackc.low %vm16480_vm13, %vm16467_vm15  ;;  %v6965_v63 = vrot.slane %v6943_v43, %v10696_v30  ;;  %vm6811_vm1 = vcmp.ne.s16.totalorder %v6789_v51, 0  ;;  %v10029_v43 = vld [vmem:[%s19506_s1 + $0x43] ss:$8 sm:$0x3] }
 0x69e   : > { %v7123_v55 = vsel %vm7118_vm2, 65537, %v19798_v16  ;;  %vm16537_vm15 = vcmp.ne.s16.totalorder %v6785_v23, 0  ;;  %vm20847_vm13 = vcmask 1039360   ;;  %v6195_v51 = vrot.slane %v6155_v39, %v19990_v27 }
 0x69f   : > { %vm16518_vm4 = vcmp.eq.s32.totalorder %v6011_v33, 1  ;;  %vm16522_vm12 = vcmp.eq.s32.totalorder %v6015_v0, 1  ;;  %v6680_v0 = vsel %vm20847_vm13, %v16459_v24, %v6667_v14  ;;  %vm20848_vm3 = vmmov %vm20847_vm13  ;;  %vm16558_vm10 = vcmp.ne.s16.totalorder %v6969_v40, 0 }
 0x6a0   : > { %7585 = vmatpush1.bf16.msra.mxu1 %v6450_v28  ;;  %v10026_v28 = vld [vmem:[%s19506_s1 + $0x42] ss:$8 sm:$0x3]  ;;  %vm6030_vm7 = vmpackc.low %vm16522_vm12, %vm16518_vm4  ;;  %vm16562_vm0 = vcmp.ne.s16.totalorder %v6965_v63, 0  ;;  %vm6513_vm2 = vcmp.ne.f32.partialorder %v10029_v43, 0.0  ;;  %vm16595_vm4 = vcmp.eq.s32.totalorder %v6195_v51, 1 }
 0x6a1   : > { %v16494_v31 = vpop.permute.xlu1 %6668  ;;  %10235 = vmatprep.subr.msk.bf16.mxu1 %vm6621_vm5, %v6490_v52  ;;  %v16496_v56 = vpop.permute.xlu0 %6844  ;;  %vm6333_vm6 = vcmp.ne.f32.partialorder %v10026_v28, 0.0  ;;  %vm7298_vm5 = vmpackc.low %vm16514_vm8, %vm16510_vm14  ;;  %v6035_v63 = vsel %vm6030_vm7, 65537, %v19798_v16  ;;  %vm20856_vm14 = vcmask 924672  }
 0x6a2   : > { %20834 = vst [vmem:[#allocation19_spill] sm:$0xff] %v16494_v31  ;;  %20835 = vst [vmem:[#allocation21_spill] sm:$0xff] %v16496_v56  ;;  %v6681_v23 = vsel %vm20848_vm3, %v6667_v14, %v16494_v31  ;;  %v6335_v28 = vsel %vm6333_vm6, 1, %v19798_v16  ;;  %v10032_v14 = vld [vmem:[%s19506_s1 + $0x45] ss:$8 sm:$0x3]  ;;  %v6071_v51 = vrot.slane %v6035_v63, %v10696_v30 }
 0x6a3   : > { %v7303_v40 = vsel %vm7298_vm5, 65537, %v19798_v16  ;;  %v6371_v20 = vrot.slane %v6335_v28, %v10696_v30  ;;  %v6375_v5 = vrot.slane %v6335_v28, %v19990_v27  ;;  %vm20857_vm8 = vmmov %vm20856_vm14  ;;  %vm6703_vm12 = vcmp.ne.f32.partialorder %v10032_v14, 0.0 }
 0x6a4   : > { %7587 = vmatpush1.bf16.msra.mxu1 %v6630_v47  ;;  %v7329_v43 = vrot.slane %v7303_v40, %v10750_v46  ;;  %vm20868_vm3 = vcmask 916480  }
 0x6a5   : > { %v6847_v35 = vpop.permute.xlu1 %6846  ;;  %7588 = vmatprep.subr.bf16.mxu1 %v15741_v57  ;;  %v16528_v50 = vpop.permute.xlu0 %6848  ;;  %v6191_v57 = vrot.slane %v6155_v39, %v10696_v30  ;;  %v7149_v39 = vrot.slane %v7123_v55, %v10750_v46  ;;  %vm16619_vm7 = vcmp.eq.s32.totalorder %v6371_v20, 1  ;;  %vm16623_vm13 = vcmp.eq.s32.totalorder %v6375_v5, 1 }
 0x6a6   : > { %20844 = vst [vmem:[#allocation22_spill] sm:$0xff] %v16528_v50  ;;  %v6860_v31 = vsel %vm20856_vm14, %v16496_v56, %v6847_v35  ;;  %v6861_v52 = vsel %vm20857_vm8, %v6847_v35, %v16528_v50  ;;  %v7325_v35 = vrot.slane %v7303_v40, %v10696_v30  ;;  %vm6390_vm14 = vmpackc.low %vm16623_vm13, %vm16619_vm7  ;;  %vm20877_vm8 = vcmask 908288  }
 0x6a7   : > { %vm16585_vm6 = vcmp.eq.s32.totalorder %v6191_v57, 1  ;;  %v7000_v14 = vsel %vm16562_vm0, %v6860_v31, 0  ;;  %vm16636_vm0 = vcmp.ne.s16.totalorder %v7329_v43, 0  ;;  %v6347_v5 = vrot.slane %v15942_v12, %v11382_v13 }
 0x6a8   : > { %7589 = vmatpush1.bf16.msra.mxu1 %v15723_v22  ;;  %v7145_v22 = vrot.slane %v7123_v55, %v10696_v30 }
 0x6a9   : > { %v16556_v47 = vpop.permute.xlu1 %7024  ;;  %10236 = vmatprep.subr.msk.bf16.mxu1 %vm6811_vm1, %v6681_v23  ;;  %v7027_v17 = vpop.permute.xlu0 %7026  ;;  %v6820_v23 = vsel %vm16537_vm15, %v6680_v0, 0  ;;  %v6515_v0 = vsel %vm6513_vm2, 1, %v19798_v16  ;;  %vm7171_vm1 = vcmp.ne.s16.totalorder %v7149_v39, 0  ;;  %vm6210_vm15 = vmpackc.low %vm16595_vm4, %vm16585_vm6  ;;  %v6705_v39 = vsel %vm6703_vm12, 1, %v19798_v16 }
 0x6aa   : > { %20849 = vst [vmem:[#allocation25_spill] sm:$0xff] %v16556_v47  ;;  %vm16607_vm5 = vcmp.ne.s16.totalorder %v7145_v22, 0  ;;  %v7040_v40 = vsel %vm20868_vm3, %v16556_v47, %v7027_v17  ;;  %v6551_v31 = vrot.slane %v6515_v0, %v10696_v30  ;;  %v6215_v36 = vsel %vm6210_vm15, 65537, %v19798_v16  ;;  %vm20878_vm4 = vmmov %vm20877_vm8 }
 0x6ab   : > { %v7180_v43 = vsel %vm16607_vm5, %v7040_v40, 0  ;;  %vm16652_vm2 = vcmp.ne.s16.totalorder %v7325_v35, 0  ;;  %vm16656_vm6 = vcmp.ne.s16.totalorder %v6071_v51, 0  ;;  %v6745_v50 = vrot.slane %v6705_v39, %v19990_v27 }
 0x6ac   : > { %7591 = vmatpush1.bf16.msra.mxu1 %v6820_v23  ;;  %v6555_v23 = vrot.slane %v6515_v0, %v19990_v27  ;;  %v6741_v0 = vrot.slane %v6705_v39, %v10696_v30  ;;  %vm16669_vm12 = vcmp.eq.s32.totalorder %v6551_v31, 1  ;;  %v6255_v40 = vrot.slane %v6215_v36, %v10750_v46 }
 0x6ad   : > { %v16599_v33 = vpop.permute.xlu1 %7028  ;;  %10237 = vmatprep.subr.msk.bf16.mxu1 %vm16558_vm10, %v6861_v52  ;;  %v16603_v57 = vpop.permute.xlu0 %7204  ;;  %vm20869_vm10 = vmmov %vm20868_vm3  ;;  %v6075_v52 = vrot.slane %v6035_v63, %v10750_v46  ;;  %v6251_v31 = vrot.slane %v6215_v36, %v10696_v30 }
 0x6ae   : > { %20860 = vst [vmem:[#allocation26_spill] sm:$0xff] %v16599_v33  ;;  %20861 = vst [vmem:[#allocation24_spill] sm:$0xff] %v16603_v57  ;;  %v7041_v10 = vsel %vm20869_vm10, %v7027_v17, %v16599_v33  ;;  %v5991_v17 = vrot.slane %v15876_v44, %v11391_v53  ;;  %vm16699_vm3 = vcmp.eq.s32.totalorder %v6741_v0, 1  ;;  %v6171_v0 = vrot.slane %v15930_v41, %v11391_v53 }
 0x6af   : > { %vm16681_vm5 = vcmp.ne.s16.totalorder %v6075_v52, 0  ;;  %v6351_v52 = vrot.slane %v15942_v12, %v11391_v53 }
 0x6b0   : > { %7593 = vmatpush1.bf16.msra.mxu1 %v7000_v14  ;;  %v5987_v14 = vrot.slane %v15876_v44, %v11382_v13  ;;  %vm16695_vm13 = vcmp.eq.s32.totalorder %v5991_v17, 1  ;;  %v6167_v17 = vrot.slane %v15930_v41, %v11382_v13 }
 0x6b1   : > { %v7207_v55 = vpop.permute.xlu1 %7206  ;;  %10238 = vmatprep.subr.msk.bf16.mxu1 %vm7171_vm1, %v7041_v10  ;;  %v16634_v20 = vpop.permute.xlu0 %7208  ;;  %v10035_v10 = vld [vmem:[%s19506_s1 + $0x46] ss:$8 sm:$0x3]  ;;  %vm16673_vm1 = vcmp.eq.s32.totalorder %v6555_v23, 1 }
 0x6b2   : > { %20870 = vst [vmem:[#allocation27_spill] sm:$0xff] %v16634_v20  ;;  %v7220_v47 = vsel %vm20877_vm8, %v16603_v57, %v7207_v55  ;;  %v7221_v28 = vsel %vm20878_vm4, %v7207_v55, %v16634_v20  ;;  %vm6883_vm15 = vcmp.ne.f32.partialorder %v10035_v10, 0.0  ;;  %v10038_v23 = vld [vmem:[%s19506_s1 + $0x47] ss:$8 sm:$0x3]  ;;  %v6395_v55 = vsel %vm6390_vm14, 65537, %v19798_v16  ;;  %vm6570_vm10 = vmpackc.low %vm16673_vm1, %vm16669_vm12 }
 0x6b3   : > { %vm16691_vm7 = vcmp.eq.s32.totalorder %v5987_v14, 1  ;;  %v7360_v36 = vsel %vm16652_vm2, %v7220_v47, 0  ;;  %v6885_v33 = vsel %vm6883_vm15, 1, %v19798_v16  ;;  %vm7063_vm2 = vcmp.ne.f32.partialorder %v10038_v23, 0.0 }
 0x6b4   : > { %7595 = vmatpush1.bf16.msra.mxu1 %v7180_v43  ;;  %v6435_v20 = vrot.slane %v6395_v55, %v10750_v46  ;;  %v6431_v57 = vrot.slane %v6395_v55, %v10696_v30  ;;  %vm16728_vm14 = vcmp.ne.s16.totalorder %v6255_v40, 0  ;;  %vm16732_vm8 = vcmp.ne.s16.totalorder %v6251_v31, 0  ;;  %vm6027_vm4 = vmpackc.low %vm16695_vm13, %vm16691_vm7 }
 0x6b5   : > { %v16677_v49 = vpop.permute.xlu1 %5942  ;;  %10239 = vmatprep.subr.msk.bf16.mxu1 %vm16636_vm0, %v7221_v28  ;;  %v5945_v22 = vpop.permute.xlu0 %5944  ;;  %vm16709_vm0 = vcmp.eq.s32.totalorder %v6745_v50, 1  ;;  %vm16753_vm15 = vcmp.eq.s32.totalorder %v6167_v17, 1  ;;  %v6921_v35 = vrot.slane %v6885_v33, %v10696_v30  ;;  %v7065_v39 = vsel %vm7063_vm2, 1, %v19798_v16 }
 0x6b6   : > { %v5953_v10 = vsel %vm19690_vm11, %v16677_v49, %v5945_v22  ;;  %v5954_v47 = vsel %vm19690_vm11, %v5945_v22, %v16048_v3  ;;  %v6575_v3 = vsel %vm6570_vm10, 65537, %v19798_v16  ;;  %vm20899_vm12 = vcmask 130048  }
 0x6b7   : > { %v6094_v22 = vsel %vm16656_vm6, %v5953_v10, 0  ;;  %vm20900_vm1 = vmmov %vm20899_vm12  ;;  %vm16763_vm6 = vcmp.eq.s32.totalorder %v6171_v0, 1  ;;  %v6925_v23 = vrot.slane %v6885_v33, %v19990_v27  ;;  %vm16774_vm2 = vcmp.ne.s16.totalorder %v6435_v20, 0 }
 0x6b8   : > { %7597 = vmatpush1.bf16.msra.mxu1 %v7360_v36  ;;  %vm20903_vm10 = vmmov %vm20900_vm1  ;;  %v6615_v0 = vrot.slane %v6575_v3, %v10750_v46  ;;  %v6032_v56 = vsel %vm6027_vm4, 65537, %v19798_v16  ;;  %v7101_v20 = vrot.slane %v7065_v39, %v10696_v30  ;;  %v7105_v33 = vrot.slane %v7065_v39, %v19990_v27 }
 0x6b9   : > { %v16722_v50 = vpop.permute.xlu1 %6122  ;;  %10248 = vmatprep.subr.msk.bf16.mxu1 %vm16681_vm5, %v5954_v47  ;;  %v6125_v28 = vpop.permute.xlu0 %6124  ;;  %vm6760_vm5 = vmpackc.low %vm16709_vm0, %vm16699_vm3  ;;  %v6611_v47 = vrot.slane %v6575_v3, %v10696_v30  ;;  %vm16807_vm13 = vcmp.eq.s32.totalorder %v6921_v35, 1  ;;  %vm16819_vm3 = vcmp.eq.s32.totalorder %v6925_v23, 1 }
 0x6ba   : > { %v6133_v40 = vsel %vm20899_vm12, %v16722_v50, %v6125_v28  ;;  %v6134_v63 = vsel %vm20900_vm1, %v6125_v28, %v16050_v62  ;;  %vm16778_vm12 = vcmp.ne.s16.totalorder %v6431_v57, 0  ;;  %v6765_v57 = vsel %vm6760_vm5, 65537, %v19798_v16  ;;  %vm6207_vm7 = vmpackc.low %vm16763_vm6, %vm16753_vm15 }
 0x6bb   : > { %7613 = vmatmul.mubr.bf16.vlgmr.msra.gmra.mrb[32].mxu1 %v16367_v2  ;;  %v6274_v28 = vsel %vm16732_vm8, %v6133_v40, 0  ;;  %vm16831_vm8 = vcmp.ne.s16.totalorder %v6611_v47, 0  ;;  %v6212_v23 = vsel %vm6207_vm7, 65537, %v19798_v16  ;;  %vm16844_vm4 = vcmp.eq.s32.totalorder %v7101_v20, 1  ;;  %vm6940_vm1 = vmpackc.low %vm16819_vm3, %vm16807_vm13 }
 0x6bc   : > { %7667 = vmatpush1.bf16.msra.mxu1 %v6094_v22  ;;  %10052 = vmatprep.mubr.msk.bf16.mxu1 %vm20903_vm10, %v15746_v54  ;;  %v10041_v54 = vld [vmem:[%s19506_s1 + $0x90] ss:$8 sm:$0x3]  ;;  %vm16848_vm5 = vcmp.eq.s32.totalorder %v7105_v33, 1  ;;  %vm16858_vm15 = vcmp.eq.s32.totalorder %v6347_v5, 1  ;;  %vm16862_vm6 = vcmp.eq.s32.totalorder %v6351_v52, 1  ;;  %v6527_v33 = vrot.slane %v15978_v32, %v11382_v13 }
 0x6bd   : > { %v16770_v55 = vpop.permute.xlu1 %6302  ;;  %10249 = vmatprep.subr.msk.bf16.mxu1 %vm16728_vm14, %v6134_v63  ;;  %v6305_v17 = vpop.permute.xlu0 %6304  ;;  %vm7243_vm0 = vcmp.ne.f32.partialorder %v10041_v54, 0.0  ;;  %vm16827_vm14 = vcmp.ne.s16.totalorder %v6615_v0, 0  ;;  %v6047_v63 = vrot.slane %v6032_v56, %v10696_v30  ;;  %vm20924_vm10 = vcmask 7168   ;;  %vm7120_vm7 = vmpackc.low %vm16848_vm5, %vm16844_vm4 }
 0x6be   : > { %v6313_v14 = vsel %vm19689_vm9, %v16770_v55, %v6305_v17  ;;  %v6314_v36 = vsel %vm19689_vm9, %v6305_v17, %v16136_v26  ;;  %v6051_v26 = vrot.slane %v6032_v56, %v10750_v46  ;;  %v6801_v17 = vrot.slane %v6765_v57, %v10696_v30  ;;  %vm6387_vm3 = vmpackc.low %vm16862_vm6, %vm16858_vm15 }
 0x6bf   : > { %v6454_v47 = vsel %vm16778_vm12, %v6313_v14, 0  ;;  %v7245_v56 = vsel %vm7243_vm0, 1, %v19798_v16  ;;  %v6805_v5 = vrot.slane %v6765_v57, %v10750_v46  ;;  %v6231_v52 = vrot.slane %v6212_v23, %v10750_v46 }
 0x6c0   : > { %7669 = vmatpush1.bf16.msra.mxu1 %v6274_v28  ;;  %v6531_v28 = vrot.slane %v15978_v32, %v11391_v53  ;;  %vm16884_vm12 = vcmp.ne.s16.totalorder %v6051_v26, 0  ;;  %vm16895_vm13 = vcmp.ne.s16.totalorder %v6047_v63, 0  ;;  %v7281_v57 = vrot.slane %v7245_v56, %v10696_v30 }
 0x6c1   : > { %v16823_v22 = vpop.permute.xlu1 %6482  ;;  %10250 = vmatprep.subr.msk.bf16.mxu1 %vm16774_vm2, %v6314_v36  ;;  %v6485_v35 = vpop.permute.xlu0 %6484  ;;  %vm20925_vm2 = vmmov %vm20924_vm10  ;;  %v6227_v39 = vrot.slane %v6212_v23, %v10696_v30  ;;  %vm16906_vm0 = vcmp.ne.s16.totalorder %v6801_v17, 0  ;;  %vm20944_vm15 = vcmask 1039360   ;;  %v7257_v23 = vrot.slane %v16166_v58, %v11382_v13 }
 0x6c2   : > { %v6493_v62 = vsel %vm20924_vm10, %v16823_v22, %v6485_v35  ;;  %v6494_v20 = vsel %vm20925_vm2, %v6485_v35, %v16138_v8  ;;  %v6945_v8 = vsel %vm6940_vm1, 65537, %v19798_v16  ;;  %v7285_v35 = vrot.slane %v7245_v56, %v19990_v27  ;;  %vm20945_vm6 = vmmov %vm20944_vm15 }
 0x6c3   : > { %v6634_v36 = vsel %vm16831_vm8, %v6493_v62, 0  ;;  %vm16914_vm8 = vcmp.eq.s32.totalorder %v6531_v28, 1  ;;  %vm16919_vm1 = vcmp.ne.s16.totalorder %v6805_v5, 0  ;;  %vm16923_vm10 = vcmp.ne.s16.totalorder %v6231_v52, 0 }
 0x6c4   : > { %7671 = vmatpush1.bf16.msra.mxu1 %v6454_v47  ;;  %v6985_v17 = vrot.slane %v6945_v8, %v10750_v46  ;;  %v6981_v28 = vrot.slane %v6945_v8, %v10696_v30  ;;  %v6392_v5 = vsel %vm6387_vm3, 65537, %v19798_v16  ;;  %vm16954_vm5 = vcmp.eq.s32.totalorder %v7281_v57, 1 }
 0x6c5   : > { %v16876_v43 = vpop.permute.xlu1 %6672  ;;  %10251 = vmatprep.subr.msk.bf16.mxu1 %vm16827_vm14, %v6494_v20  ;;  %v16880_v54 = vpop.permute.xlu0 %6852  ;;  %vm16910_vm14 = vcmp.eq.s32.totalorder %v6527_v33, 1  ;;  %v7125_v20 = vsel %vm7120_vm7, 65537, %v19798_v16  ;;  %vm16958_vm2 = vcmp.eq.s32.totalorder %v7285_v35, 1  ;;  %v6411_v3 = vrot.slane %v6392_v5, %v10750_v46 }
 0x6c6   : > { %vm6567_vm4 = vmpackc.low %vm16914_vm8, %vm16910_vm14  ;;  %v7161_v14 = vrot.slane %v7125_v20, %v10696_v30  ;;  %vm20948_vm7 = vcmask 130048   ;;  %v6407_v40 = vrot.slane %v6392_v5, %v10696_v30  ;;  %vm6995_vm14 = vcmp.ne.s16.totalorder %v6985_v17, 0 }
 0x6c7   : > { %v6572_v35 = vsel %vm6567_vm4, 65537, %v19798_v16  ;;  %vm7300_vm3 = vmpackc.low %vm16958_vm2, %vm16954_vm5  ;;  %vm17002_vm8 = vcmp.ne.s16.totalorder %v6981_v28, 0  ;;  %vm20958_vm4 = vcmask 924672   ;;  %vm20966_vm2 = vcmask 916480  }
 0x6c8   : > { %7673 = vmatpush1.bf16.msra.mxu1 %v6634_v36  ;;  %v6591_v17 = vrot.slane %v6572_v35, %v10750_v46  ;;  %vm17041_vm5 = vcmp.ne.s16.totalorder %v6407_v40, 0  ;;  %v6587_v0 = vrot.slane %v6572_v35, %v10696_v30  ;;  %v6187_v35 = vrot.slane %v15930_v41, %v11863_v60 }
 0x6c9   : > { %v5933_v47 = vpop.permute.xlu1 %5932  ;;  %7674 = vmatprep.subr.bf16.mxu1 %v15658_v4  ;;  %v6675_v62 = vpop.permute.xlu0 %6674 }
 0x6ca   : > { %v5947_v4 = vsel %vm19690_vm11, %v15954_v18, %v5933_v47  ;;  %v5948_v33 = vsel %vm19690_vm11, %v5933_v47, %v16243_v25  ;;  %v7165_v18 = vrot.slane %v7125_v20, %v10750_v46  ;;  %v6684_v51 = vsel %vm20944_vm15, %v16876_v43, %v6675_v62  ;;  %vm20959_vm15 = vmmov %vm20958_vm4 }
 0x6cb   : > { %10224 = vmatprep.subr.msk.bf16.mxu0 %vm16884_vm12, %v5948_v33  ;;  %v6088_v10 = vsel %vm16895_vm13, %v5947_v4, 0  ;;  %v6696_v31 = vsel %vm20945_vm6, %v6675_v62, %v15932_v42  ;;  %vm16967_vm12 = vcmp.ne.s16.totalorder %v6227_v39, 0  ;;  %vm20949_vm13 = vmmov %vm20948_vm7  ;;  %v6721_v39 = vrot.slane %v16028_v11, %v11391_v53 }
 0x6cc   : > { %7538 = vmatpush1.bf16.msra.mxu0 %v6088_v10  ;;  %7675 = vmatpush1.bf16.msra.mxu1 %v15845_v21  ;;  %v6717_v21 = vrot.slane %v16028_v11, %v11382_v13  ;;  %v7305_v20 = vsel %vm7300_vm3, 65537, %v19798_v16  ;;  %v6897_v4 = vrot.slane %v16085_v1, %v11382_v13  ;;  %vm17068_vm3 = vcmp.ne.s16.totalorder %v6591_v17, 0 }
 0x6cd   : > { %v16972_v8 = vpop.permute.xlu1 %7032  ;;  %10252 = vmatprep.subr.msk.bf16.mxu1 %vm16919_vm1, %v6696_v31  ;;  %v6113_v36 = vpop.permute.xlu0 %6112  ;;  %vm17006_vm1 = vcmp.ne.s16.totalorder %v7165_v18, 0  ;;  %v7345_v52 = vrot.slane %v7305_v20, %v10750_v46 }
 0x6ce   : > { %v6127_v42 = vsel %vm20948_vm7, %v15956_v29, %v6113_v36  ;;  %v6128_v57 = vsel %vm20949_vm13, %v6113_v36, %v16284_v37  ;;  %v6824_v37 = vsel %vm16906_vm0, %v6684_v51, 0  ;;  %vm17014_vm0 = vcmp.ne.s16.totalorder %v6411_v3, 0  ;;  %vm20967_vm7 = vmmov %vm20966_vm2 }
 0x6cf   : > { %10225 = vmatprep.subr.msk.bf16.mxu0 %vm16923_vm10, %v6128_v57  ;;  %v6268_v29 = vsel %vm16967_vm12, %v6127_v42, 0  ;;  %vm17010_vm10 = vcmp.ne.s16.totalorder %v7161_v14, 0  ;;  %vm17031_vm6 = vcmp.eq.s32.totalorder %v6717_v21, 1  ;;  %vm17035_vm12 = vcmp.eq.s32.totalorder %v6721_v39, 1 }
 0x6d0   : > { %7540 = vmatpush1.bf16.msra.mxu0 %v6268_v29  ;;  %7677 = vmatpush1.bf16.msra.mxu1 %v6824_v37  ;;  %v7341_v14 = vrot.slane %v7305_v20, %v10696_v30  ;;  %vm6757_vm13 = vmpackc.low %vm17035_vm12, %vm17031_vm6  ;;  %v7077_v21 = vrot.slane %v16116_v61, %v11382_v13  ;;  %v6183_v57 = vrot.slane %v15930_v41, %v11860_v9  ;;  %v20999_v29 = vld [vmem:[#allocation21_spill] sm:$0xff] }
 0x6d1   : > { %v6855_v56 = vpop.permute.xlu1 %6854  ;;  %v7035_v26 = vpop.permute.xlu0 %7034  ;;  %v6762_v63 = vsel %vm6757_vm13, 65537, %v19798_v16  ;;  %v6363_v41 = vrot.slane %v15942_v12, %v11860_v9 }
 0x6d2   : > { %v6864_v33 = vsel %vm20958_vm4, %v16880_v54, %v6855_v56  ;;  %v6876_v28 = vsel %vm20959_vm15, %v6855_v56, %v15934_v7  ;;  %v6901_v7 = vrot.slane %v16085_v1, %v11391_v53  ;;  %v7044_v51 = vsel %vm20966_vm2, %v16972_v8, %v7035_v26 }
 0x6d3   : > { %10253 = vmatprep.subr.msk.bf16.mxu1 %vm6995_vm14, %v6876_v28  ;;  %v7004_v18 = vsel %vm17002_vm8, %v6864_v33, 0  ;;  %v7056_v31 = vsel %vm20967_vm7, %v7035_v26, %v16094_v15  ;;  %vm17072_vm14 = vcmp.eq.s32.totalorder %v6897_v4, 1  ;;  %vm17088_vm4 = vcmp.ne.s16.totalorder %v6587_v0, 0 }
 0x6d4   : > { %7679 = vmatpush1.bf16.msra.mxu1 %v7004_v18  ;;  %vm17082_vm8 = vcmp.eq.s32.totalorder %v6901_v7, 1  ;;  %v6781_v56 = vrot.slane %v6762_v63, %v10750_v46  ;;  %vm20980_vm15 = vcmask 908288   ;;  %v6777_v5 = vrot.slane %v6762_v63, %v10696_v30 }
 0x6d5   : > { %v6293_v36 = vpop.permute.xlu1 %6292  ;;  %10254 = vmatprep.subr.msk.bf16.mxu1 %vm17006_vm1, %v7056_v31  ;;  %v17056_v3 = vpop.permute.xlu0 %7212  ;;  %vm7355_vm1 = vcmp.ne.s16.totalorder %v7345_v52, 0  ;;  %vm20983_vm12 = vmmov %vm20980_vm15  ;;  %v6003_v0 = vrot.slane %v15876_v44, %v11860_v9  ;;  %v20991_v52 = vld [vmem:[#allocation23_spill] sm:$0xff] }
 0x6d6   : > { %v6307_v15 = vsel %vm19689_vm9, %v15983_v34, %v6293_v36  ;;  %v6308_v42 = vsel %vm19689_vm9, %v6293_v36, %v16354_v6  ;;  %v7184_v34 = vsel %vm17010_vm10, %v7044_v51, 0  ;;  %v7081_v6 = vrot.slane %v16116_v61, %v11391_v53  ;;  %vm6937_vm2 = vmpackc.low %vm17082_vm8, %vm17072_vm14 }
 0x6d7   : > { %10226 = vmatprep.subr.msk.bf16.mxu0 %vm17014_vm0, %v6308_v42  ;;  %v6448_v39 = vsel %vm17041_vm5, %v6307_v15, 0  ;;  %vm17092_vm0 = vcmp.ne.s16.totalorder %v7341_v14, 0  ;;  %vm17103_vm10 = vcmp.eq.s32.totalorder %v7077_v21, 1  ;;  %vm20981_vm5 = vcmask 7168  }
 0x6d8   : > { %7542 = vmatpush1.bf16.msra.mxu0 %v6448_v39  ;;  %7681 = vmatpush1.bf16.msra.mxu1 %v7184_v34  ;;  %vm20982_vm6 = vmmov %vm20981_vm5  ;;  %vm17127_vm7 = vcmp.eq.s32.totalorder %v7081_v6, 1  ;;  %v6942_v18 = vsel %vm6937_vm2, 65537, %v19798_v16  ;;  %vm6809_vm13 = vcmp.ne.s16.totalorder %v6781_v56, 0  ;;  %vm17144_vm14 = vcmp.eq.s32.totalorder %v7257_v23, 1  ;;  %v20997_v39 = vld [vmem:[#allocation12_spill] sm:$0xff] }
 0x6d9   : > { %v7215_v47 = vpop.permute.xlu1 %7214  ;;  %v6473_v62 = vpop.permute.xlu0 %6472  ;;  %v6961_v25 = vrot.slane %v6942_v18, %v10750_v46  ;;  %v6007_v51 = vrot.slane %v15876_v44, %v11863_v60  ;;  %v6957_v36 = vrot.slane %v6942_v18, %v10696_v30  ;;  %v6367_v23 = vrot.slane %v15942_v12, %v11863_v60  ;;  %v21035_v12 = vld [vmem:[#allocation20_spill] sm:$0xff] }
 0x6da   : > { %v7224_v17 = vsel %vm20980_vm15, %v17056_v3, %v7215_v47  ;;  %v6487_v20 = vsel %vm20981_vm5, %v15985_v59, %v6473_v62  ;;  %v6488_v4 = vsel %vm20982_vm6, %v6473_v62, %v16390_v45  ;;  %v7236_v33 = vsel %vm20983_vm12, %v7215_v47, %v16177_v38 }
 0x6db   : > { %10227 = vmatprep.subr.msk.bf16.mxu0 %vm17068_vm3, %v6488_v4  ;;  %10255 = vmatprep.subr.msk.bf16.mxu1 %vm7355_vm1, %v7236_v33  ;;  %v6628_v28 = vsel %vm17088_vm4, %v6487_v20, 0  ;;  %v7364_v59 = vsel %vm17092_vm0, %v7224_v17, 0  ;;  %v7261_v38 = vrot.slane %v16166_v58, %v11391_v53  ;;  %vm7117_vm3 = vmpackc.low %vm17127_vm7, %vm17103_vm10  ;;  %vm20990_vm1 = vcmask 1039360   ;;  %v21005_v17 = vld [vmem:[#allocation11_spill] sm:$0xff]  ;;  %v21007_v4 = vld [vmem:[#allocation25_spill] sm:$0xff] }
 0x6dc   : > { %7544 = vmatpush1.bf16.msra.mxu0 %v6628_v28  ;;  %7683 = vmatpush1.bf16.msra.mxu1 %v7364_v59  ;;  %vm20992_vm4 = vmmov %vm20990_vm1  ;;  %vm6808_vm0 = vcmp.ne.s16.totalorder %v6777_v5, 0  ;;  %v7122_v15 = vsel %vm7117_vm3, 65537, %v19798_v16  ;;  %vm6989_vm10 = vcmp.ne.s16.totalorder %v6961_v25, 0  ;;  %vm17166_vm5 = vcmp.eq.s32.totalorder %v6003_v0, 1  ;;  %v21013_v0 = vld [vmem:[#allocation16_spill] sm:$0xff] }
 0x6dd   : > { %v6663_v10 = vpop.permute.xlu1 %6662  ;;  %7545 = vmatprep.subr.bf16.mxu0 %v15730_v48  ;;  %vm17148_vm8 = vcmp.eq.s32.totalorder %v7261_v38, 1  ;;  %v6843_v21 = vpop.permute.xlu0 %6842  ;;  %v7141_v42 = vrot.slane %v7122_v15, %v10750_v46  ;;  %vm17170_vm6 = vcmp.eq.s32.totalorder %v6007_v51, 1  ;;  %vm20998_vm12 = vcmask 924672   ;;  %v21015_v48 = vld [vmem:[#allocation24_spill] sm:$0xff] }
 0x6de   : > { %v6678_v31 = vsel %vm20990_vm1, %v15888_v19, %v6663_v10  ;;  %v6679_v14 = vsel %vm20992_vm4, %v6663_v10, %v16459_v24  ;;  %vm7297_vm15 = vmpackc.low %vm17148_vm8, %vm17144_vm14  ;;  %v6858_v34 = vsel %vm20998_vm12, %v20997_v39, %v6843_v21  ;;  %vm6988_vm7 = vcmp.ne.s16.totalorder %v6957_v36, 0 }
 0x6df   : > { %7699 = vmatmul.mubr.bf16.vlgmr.msra.gmra.mrb[36].mxu1 %v16367_v2  ;;  %v6818_v19 = vsel %vm6808_vm0, %v6678_v31, 0  ;;  %vm21000_vm2 = vmmov %vm20998_vm12  ;;  %v7137_v37 = vrot.slane %v7122_v15, %v10696_v30  ;;  %v7302_v63 = vsel %vm7297_vm15, 65537, %v19798_v16  ;;  %v6998_v62 = vsel %vm6988_vm7, %v6858_v34, 0 }
 0x6e0   : > { %7546 = vmatpush1.bf16.msra.mxu0 %v20991_v52  ;;  %v6859_v6 = vsel %vm21000_vm2, %v6843_v21, %v20999_v29  ;;  %v7321_v47 = vrot.slane %v7302_v63, %v10750_v46  ;;  %vm6029_vm3 = vmpackc.low %vm17170_vm6, %vm17166_vm5  ;;  %vm17191_vm14 = vcmp.eq.s32.totalorder %v6183_v57, 1  ;;  %vm17195_vm8 = vcmp.eq.s32.totalorder %v6187_v35, 1  ;;  %v21047_v21 = vld [vmem:[#allocation19_spill] sm:$0xff] }
 0x6e1   : > { %10228 = vmatprep.subr.msk.bf16.mxu0 %vm6809_vm13, %v6679_v14  ;;  %v7023_v40 = vpop.permute.xlu1 %7022  ;;  %vm7169_vm13 = vcmp.ne.s16.totalorder %v7141_v42, 0  ;;  %vm21006_vm1 = vcmask 916480   ;;  %vm7168_vm0 = vcmp.ne.s16.totalorder %v7137_v37, 0  ;;  %v7317_v28 = vrot.slane %v7302_v63, %v10696_v30  ;;  %v7203_v59 = vpop.permute.xlu0 %7202  ;;  %vm6209_vm15 = vmpackc.low %vm17195_vm8, %vm17191_vm14  ;;  %v21021_v42 = vld [vmem:[#allocation17_spill] sm:$0xff] }
 0x6e2   : > { %v7038_v20 = vsel %vm21006_vm1, %v21005_v17, %v7023_v40  ;;  %vm21008_vm4 = vmmov %vm21006_vm1  ;;  %v6034_v45 = vsel %vm6029_vm3, 65537, %v19798_v16  ;;  %vm17212_vm5 = vcmp.eq.s32.totalorder %v6363_v41, 1  ;;  %vm17216_vm6 = vcmp.eq.s32.totalorder %v6367_v23, 1  ;;  %v21030_v17 = vld [vmem:[#allocation18_spill] sm:$0xff] }
 0x6e3   : > { %v7039_v33 = vsel %vm21008_vm4, %v7023_v40, %v21007_v4  ;;  %v6067_v38 = vrot.slane %v6034_v45, %v10750_v46  ;;  %v7178_v5 = vsel %vm7168_vm0, %v7038_v20, 0  ;;  %v6543_v18 = vrot.slane %v15978_v32, %v11860_v9  ;;  %vm6389_vm3 = vmpackc.low %vm17216_vm6, %vm17212_vm5 }
 0x6e4   : > { %7548 = vmatpush1.bf16.msra.mxu0 %v6818_v19  ;;  %v6547_v25 = vrot.slane %v15978_v32, %v11863_v60  ;;  %vm21014_vm12 = vcmask 908288   ;;  %vm7348_vm7 = vcmp.ne.s16.totalorder %v7317_v28, 0  ;;  %v6063_v31 = vrot.slane %v6034_v45, %v10696_v30 }
 0x6e5   : > { %10229 = vmatprep.subr.msk.bf16.mxu0 %vm6989_vm10, %v6859_v6  ;;  %vm7349_vm10 = vcmp.ne.s16.totalorder %v7321_v47, 0  ;;  %v7218_v7 = vsel %vm21014_vm12, %v21013_v0, %v7203_v59  ;;  %vm21016_vm2 = vmmov %vm21014_vm12  ;;  %v5941_v52 = vpop.permute.xlu1 %5940  ;;  %v6214_v14 = vsel %vm6209_vm15, 65537, %v19798_v16  ;;  %vm17235_vm14 = vcmp.eq.s32.totalorder %v6543_v18, 1  ;;  %v6121_v57 = vpop.permute.xlu0 %6120  ;;  %v21022_v6 = vld [vmem:[#allocation15_spill] sm:$0xff] }
 0x6e6   : > { %v7219_v51 = vsel %vm21016_vm2, %v7203_v59, %v21015_v48  ;;  %v6247_v36 = vrot.slane %v6214_v14, %v10750_v46  ;;  %v7358_v32 = vsel %vm7348_vm7, %v7218_v7, 0  ;;  %vm17239_vm8 = vcmp.eq.s32.totalorder %v6547_v25, 1 }
 0x6e7   : > { %v5951_v44 = vsel %vm19690_vm11, %v21021_v42, %v5941_v52  ;;  %v5952_v19 = vsel %vm19690_vm11, %v5941_v52, %v16677_v49  ;;  %vm6082_vm1 = vcmp.ne.s16.totalorder %v6063_v31, 0  ;;  %v6243_v24 = vrot.slane %v6214_v14, %v10696_v30  ;;  %vm6569_vm0 = vmpackc.low %vm17239_vm8, %vm17235_vm14  ;;  %v21042_v52 = vld [vmem:[#allocation8_spill] sm:$0xff]  ;;  %v21049_v42 = vld [vmem:[#allocation7_spill] sm:$0xff] }
 0x6e8   : > { %7550 = vmatpush1.bf16.msra.mxu0 %v6998_v62  ;;  %v6394_v35 = vsel %vm6389_vm3, 65537, %v19798_v16  ;;  %vm6263_vm4 = vcmp.ne.s16.totalorder %v6247_v36, 0  ;;  %v6092_v34 = vsel %vm6082_vm1, %v5951_v44, 0  ;;  %v6733_v49 = vrot.slane %v16028_v11, %v11860_v9 }
 0x6e9   : > { %10230 = vmatprep.subr.msk.bf16.mxu0 %vm7169_vm13, %v7039_v33  ;;  %vm6083_vm13 = vcmp.ne.s16.totalorder %v6067_v38, 0  ;;  %v6427_v39 = vrot.slane %v6394_v35, %v10750_v46  ;;  %v6737_v29 = vrot.slane %v16028_v11, %v11863_v60  ;;  %vm6262_vm5 = vcmp.ne.s16.totalorder %v6243_v24, 0  ;;  %v6301_v47 = vpop.permute.xlu1 %6300  ;;  %v6481_v28 = vpop.permute.xlu0 %6480 }
 0x6ea   : > { %v6423_v63 = vrot.slane %v6394_v35, %v10696_v30  ;;  %v6574_v11 = vsel %vm6569_vm0, 65537, %v19798_v16  ;;  %v6913_v62 = vrot.slane %v16085_v1, %v11860_v9  ;;  %vm17272_vm2 = vcmp.eq.s32.totalorder %v6733_v49, 1 }
 0x6eb   : > { %vm6443_vm12 = vcmp.ne.s16.totalorder %v6427_v39, 0  ;;  %v6607_v41 = vrot.slane %v6574_v11, %v10750_v46  ;;  %vm17276_vm7 = vcmp.eq.s32.totalorder %v6737_v29, 1  ;;  %v6917_v23 = vrot.slane %v16085_v1, %v11863_v60 }
 0x6ec   : > { %7552 = vmatpush1.bf16.msra.mxu0 %v7178_v5  ;;  %v6311_v20 = vsel %vm19689_vm9, %v21030_v17, %v6301_v47  ;;  %v6312_v4 = vsel %vm19689_vm9, %v6301_v47, %v16770_v55  ;;  %v6603_v33 = vrot.slane %v6574_v11, %v10696_v30  ;;  %vm6759_vm14 = vmpackc.low %vm17276_vm7, %vm17272_vm2  ;;  %v7093_v1 = vrot.slane %v16116_v61, %v11860_v9 }
 0x6ed   : > { %10231 = vmatprep.subr.msk.bf16.mxu0 %vm7349_vm10, %v7219_v51  ;;  %vm21023_vm10 = vcmask 130048   ;;  %vm6623_vm3 = vcmp.ne.s16.totalorder %v6607_v41, 0  ;;  %vm17293_vm8 = vcmp.eq.s32.totalorder %v6913_v62, 1  ;;  %vm17297_vm1 = vcmp.eq.s32.totalorder %v6917_v23, 1  ;;  %v6671_v31 = vpop.permute.xlu1 %6670  ;;  %v6851_v24 = vpop.permute.xlu0 %6850 }
 0x6ee   : > { %v6131_v37 = vsel %vm21023_vm10, %v21022_v6, %v6121_v57  ;;  %vm21024_vm15 = vmmov %vm21023_vm10  ;;  %v7097_v38 = vrot.slane %v16116_v61, %v11863_v60  ;;  %v6764_v18 = vsel %vm6759_vm14, 65537, %v19798_v16  ;;  %v7277_v48 = vrot.slane %v16166_v58, %v11863_v60 }
 0x6ef   : > { %v6132_v40 = vsel %vm21024_vm15, %v6121_v57, %v16722_v50  ;;  %vm21025_vm6 = vmmov %vm21023_vm10  ;;  %v6272_v50 = vsel %vm6262_vm5, %v6131_v37, 0  ;;  %vm6622_vm10 = vcmp.ne.s16.totalorder %v6603_v33, 0  ;;  %v6797_v25 = vrot.slane %v6764_v18, %v10750_v46 }
 0x6f0   : > { %7554 = vmatpush1.bf16.msra.mxu0 %v7358_v32  ;;  %vm6939_vm15 = vmpackc.low %vm17297_vm1, %vm17293_vm8  ;;  %vm17313_vm5 = vcmp.eq.s32.totalorder %v7093_v1, 1  ;;  %v6793_v51 = vrot.slane %v6764_v18, %v10696_v30 }
 0x6f1   : > { %10240 = vmatprep.subr.msk.bf16.mxu0 %vm6083_vm13, %v5952_v19  ;;  %vm6442_vm13 = vcmp.ne.s16.totalorder %v6423_v63, 0  ;;  %v6944_v14 = vsel %vm6939_vm15, 65537, %v19798_v16  ;;  %v7031_v6 = vpop.permute.xlu1 %7030  ;;  %v7211_v41 = vpop.permute.xlu0 %7210 }
 0x6f2   : > { %v6452_v59 = vsel %vm6442_vm13, %v6311_v20, 0  ;;  %v6977_v36 = vrot.slane %v6944_v14, %v10750_v46  ;;  %vm17337_vm13 = vcmp.eq.s32.totalorder %v7277_v48, 1  ;;  %vm6812_vm8 = vcmp.ne.s16.totalorder %v6793_v51, 0 }
 0x6f3   : > { %7570 = vmatmul.mubr.bf16.vlgmr.msra.gmra.mrb[32].mxu0 %v16367_v2  ;;  %v10422_v2 = vld [vmem:[%s19507_s2 + $0x34] ss:$8 sps:$4 sm:$0xff]   ;;  %v6973_v19 = vrot.slane %v6944_v14, %v10696_v30 }
 0x6f4   : > { %7624 = vmatpush1.bf16.msra.mxu0 %v6092_v34  ;;  %10051 = vmatprep.mubr.msk.bf16.mxu0 %vm21025_vm6, %v10422_v2  ;;  %vm17317_vm6 = vcmp.eq.s32.totalorder %v7097_v38, 1  ;;  %vm6993_vm1 = vcmp.ne.s16.totalorder %v6977_v36, 0  ;;  %v21051_v34 = vld [vmem:[#allocation22_spill] sm:$0xff] }
 0x6f5   : > { %10241 = vmatprep.subr.msk.bf16.mxu0 %vm6263_vm4, %v6132_v40  ;;  %vm21036_vm4 = vcmask 7168   ;;  %vm7119_vm2 = vmpackc.low %vm17317_vm6, %vm17313_vm5  ;;  %vm6992_vm15 = vcmp.ne.s16.totalorder %v6973_v19, 0  ;;  %v21054_v2 = vld [vmem:[#allocation26_spill] sm:$0xff]  ;;  %vm21055_vm6 = vcmask 916480  }
 0x6f6   : > { %v6491_v5 = vsel %vm21036_vm4, %v21035_v12, %v6481_v28  ;;  %vm21037_vm0 = vmmov %vm21036_vm4  ;;  %v7124_v57 = vsel %vm7119_vm2, 65537, %v19798_v16  ;;  %v7042_v47 = vsel %vm21055_vm6, %v21054_v2, %v7031_v6 }
 0x6f7   : > { %v6492_v10 = vsel %vm21037_vm0, %v6481_v28, %v16823_v22  ;;  %v6632_v0 = vsel %vm6622_vm10, %v6491_v5, 0  ;;  %v7273_v22 = vrot.slane %v16166_v58, %v11860_v9  ;;  %v7157_v35 = vrot.slane %v7124_v57, %v10750_v46 }
 0x6f8   : > { %7626 = vmatpush1.bf16.msra.mxu0 %v6272_v50  ;;  %vm21052_vm0 = vcmask 924672   ;;  %v7153_v29 = vrot.slane %v7124_v57, %v10696_v30  ;;  %v21057_v50 = vld [vmem:[#allocation27_spill] sm:$0xff] }
 0x6f9   : > { %10242 = vmatprep.subr.msk.bf16.mxu0 %vm6443_vm12, %v6312_v4  ;;  %vm6813_vm12 = vcmp.ne.s16.totalorder %v6797_v25, 0  ;;  %vm17333_vm7 = vcmp.eq.s32.totalorder %v7273_v22, 1  ;;  %v6862_v49 = vsel %vm21052_vm0, %v21051_v34, %v6851_v24  ;;  %vm21053_vm10 = vmmov %vm21052_vm0  ;;  %vm7173_vm5 = vcmp.ne.s16.totalorder %v7157_v35, 0 }
 0x6fa   : > { %vm7299_vm4 = vmpackc.low %vm17337_vm13, %vm17333_vm7  ;;  %v7002_v63 = vsel %vm6992_vm15, %v6862_v49, 0  ;;  %vm7172_vm2 = vcmp.ne.s16.totalorder %v7153_v29, 0  ;;  %vm21058_vm13 = vcmask 908288  }
 0x6fb   : > { %v7304_v37 = vsel %vm7299_vm4, 65537, %v19798_v16  ;;  %v7182_v62 = vsel %vm7172_vm2, %v7042_v47, 0  ;;  %v7222_v56 = vsel %vm21058_vm13, %v21057_v50, %v7211_v41 }
 0x6fc   : > { %7628 = vmatpush1.bf16.msra.mxu0 %v6452_v59  ;;  %v7337_v40 = vrot.slane %v7304_v37, %v10750_v46 }
 0x6fd   : > { %10243 = vmatprep.subr.msk.bf16.mxu0 %vm6623_vm3, %v6492_v10  ;;  %vm21048_vm3 = vcmask 1039360  }
 0x6fe   : > { %v6682_v15 = vsel %vm21048_vm3, %v21047_v21, %v6671_v31  ;;  %vm21050_vm14 = vmmov %vm21048_vm3  ;;  %vm7353_vm7 = vcmp.ne.s16.totalorder %v7337_v40, 0 }
 0x6ff   : > { %v6683_v44 = vsel %vm21050_vm14, %v6671_v31, %v16876_v43  ;;  %v6822_v39 = vsel %vm6812_vm8, %v6682_v15, 0  ;;  %v6863_v43 = vsel %vm21053_vm10, %v6851_v24, %v16880_v54  ;;  %v7333_v54 = vrot.slane %v7304_v37, %v10696_v30  ;;  %vm21059_vm3 = vmmov %vm21058_vm13 }
 0x700   : > { %7630 = vmatpush1.bf16.msra.mxu0 %v6632_v0  ;;  %v7223_v26 = vsel %vm21059_vm3, %v7211_v41, %v17056_v3  ;;  %vm21067_vm8 = vcmask 130048  }
 0x701   : > { %7631 = vmatprep.subr.bf16.mxu0 %v21042_v52  ;;  %vm7352_vm14 = vcmp.ne.s16.totalorder %v7333_v54, 0 }
 0x702   : > { %v7362_v23 = vsel %vm7352_vm14, %v7222_v56, 0  ;;  %v17372_v17 = vpop.permute.xlu1 %7474  ;;  %v17375_v28 = vpop.permute.xlu0 %7479 }
 0x704   : > { %7632 = vmatpush1.bf16.msra.mxu0 %v21049_v42 }
 0x705   : > { %10244 = vmatprep.subr.msk.bf16.mxu0 %vm6813_vm12, %v6683_v44  ;;  %vm21056_vm12 = vmmov %vm21055_vm6 }
 0x706   : > { %v7043_v11 = vsel %vm21056_vm12, %v7031_v6, %v16972_v8  ;;  %v10423_v8 = vld [vmem:[%s19507_s2 + $0x30] ss:$8 sps:$4 sm:$0xff]  }
 0x708   : > { %7634 = vmatpush1.bf16.msra.mxu0 %v6822_v39 }
 0x709   : > { %10245 = vmatprep.subr.msk.bf16.mxu0 %vm6993_vm1, %v6863_v43  ;;  %vm21068_vm1 = vmmov %vm21067_vm8 }
 0x70c   : > { %7636 = vmatpush1.bf16.msra.mxu0 %v7002_v63 }
 0x70d   : > { %10246 = vmatprep.subr.msk.bf16.mxu0 %vm7173_vm5, %v7043_v11 }
 0x710   : > { %7638 = vmatpush1.bf16.msra.mxu0 %v7182_v62 }
 0x711   : > { %10247 = vmatprep.subr.msk.bf16.mxu0 %vm7353_vm7, %v7223_v26 }
 0x714   : > { %7640 = vmatpush1.bf16.msra.mxu0 %v7362_v23 }
 0x717   : > { %7656 = vmatmul.mubr.bf16.vlgmr.msra.gmra.mrb[36].mxu0 %v10423_v8 }
 0x76a   : > { %v7528_v20 = vpop.f32.mrb[28].mxu1 }
 0x76b   : > { %v7529_v4 = vadd.f32 %v7528_v20, %v17372_v17  ;;  %v7530_v33 = vpop.f32.mrb[29].mxu1 }
 0x76c   : > { %v7531_v1 = vadd.f32 %v7530_v33, %v17372_v17  ;;  %v7532_v3 = vpop.f32.mrb[30].mxu1 }
 0x76d   : > { %v7533_v59 = vadd.f32 %v7532_v3, %v17375_v28  ;;  %v7534_v45 = vpop.f32.mrb[31].mxu1  ;;  %v7709_v38 = vmax.f32 %v7529_v4, 0.0 }
 0x76e   : > { %v7535_v55 = vadd.f32 %v7534_v45, %v17375_v28  ;;  %v7710_v5 = vmax.f32 %v7531_v1, 0.0 }
 0x76f   : > { %v7719_v12 = vmax.f32 %v7533_v59, 0.0 }
 0x770   : > { %v7720_v10 = vmax.f32 %v7535_v55, 0.0 }
 0x771   : > { %v17380_v18 = vpack.c.bf16 %v7719_v12, %v7709_v38 }
 0x772   : > { %v17382_v25 = vpack.c.bf16 %v7720_v10, %v7710_v5 }
 0x78e   : > { %v7614_v61 = vpop.f32.mrb[32].mxu1 }
 0x78f   : > { %v7615_v0 = vadd.f32 %v7614_v61, %v17372_v17  ;;  %v7616_v7 = vpop.f32.mrb[33].mxu1 }
 0x790   : > { %v7617_v22 = vadd.f32 %v7616_v7, %v17372_v17  ;;  %v7618_v48 = vpop.f32.mrb[34].mxu1 }
 0x791   : > { %v7619_v51 = vadd.f32 %v7618_v48, %v17375_v28  ;;  %v7620_v31 = vpop.f32.mrb[35].mxu1  ;;  %v7713_v14 = vmax.f32 %v7615_v0, 0.0  ;;  %v7792_v48 = vld [vmem:[%s19506_s1] ss:$8 sm:$0xf0] }
 0x792   : > { %v7621_v52 = vadd.f32 %v7620_v31, %v17375_v28  ;;  %v7714_v32 = vmax.f32 %v7617_v22, 0.0 }
 0x793   : > { %v7723_v36 = vmax.f32 %v7619_v51, 0.0 }
 0x794   : > { %v7724_v58 = vmax.f32 %v7621_v52, 0.0 }
 0x795   : > { %v17388_v21 = vpack.c.bf16 %v7723_v36, %v7713_v14  ;;  %v10054_v36 = vld [vmem:[%s19506_s1 + $0x1] ss:$8 sm:$0xf] }
 0x796   : > { %v17390_v15 = vpack.c.bf16 %v7724_v58, %v7714_v32  ;;  %v10055_v32 = vld [vmem:[%s19506_s1 + $0x1] ss:$8 sm:$0xf0] }
 0x797   : > { %21060 = vst [vmem:[#allocation23_spill] sm:$0xff] %v17388_v21 }
 0x798   : > { %21061 = vst [vmem:[#allocation12_spill] sm:$0xff] %v17390_v15 }
 0x7b2   : > { %v7700_v42 = vpop.f32.mrb[36].mxu1 }
 0x7b3   : > { %v7701_v44 = vadd.f32 %v7700_v42, %v17372_v17  ;;  %v7702_v19 = vpop.f32.mrb[37].mxu1 }
 0x7b4   : > { %v7703_v24 = vadd.f32 %v7702_v19, %v17372_v17  ;;  %v7704_v57 = vpop.f32.mrb[38].mxu1  ;;  %v7973_v19 = vor.u32 %v10055_v32, %v10054_v36 }
 0x7b5   : > { %v7705_v35 = vadd.f32 %v7704_v57, %v17375_v28  ;;  %v7706_v39 = vpop.f32.mrb[39].mxu1  ;;  %v7717_v49 = vmax.f32 %v7701_v44, 0.0 }
 0x7b6   : > { %v7707_v34 = vadd.f32 %v7706_v39, %v17375_v28  ;;  %v7718_v29 = vmax.f32 %v7703_v24, 0.0  ;;  %vm7975_vm5 = vcmp.ne.f32.partialorder %v7973_v19, 0.0 }
 0x7b7   : > { %v7727_v43 = vmax.f32 %v7705_v35, 0.0 }
 0x7b8   : > { %v7728_v6 = vmax.f32 %v7707_v34, 0.0 }
 0x7b9   : > { %v17396_v37 = vpack.c.bf16 %v7727_v43, %v7717_v49  ;;  %v17586_v43 = vsel %vm7975_vm5, 1, %v19798_v16 }
 0x7ba   : > { %v17398_v40 = vpack.c.bf16 %v7728_v6, %v7718_v29  ;;  %21069 = vst [vmem:[#allocation17_spill] sm:$0xff] %v17586_v43 }
 0x7bb   : > { %21062 = vst [vmem:[#allocation21_spill] sm:$0xff] %v17396_v37 }
 0x7bc   : > { %21063 = vst [vmem:[#allocation11_spill] sm:$0xff] %v17398_v40 }
 0x7c6   : > { %v7571_v63 = vpop.f32.mrb[32].mxu0 }
 0x7c7   : > { %v7572_v2 = vadd.f32 %v7571_v63, %v17372_v17  ;;  %v7573_v47 = vpop.f32.mrb[33].mxu0  ;;  %v7990_v63 = vrot.slane %v17586_v43, %v11382_v13 }
 0x7c8   : > { %v7574_v11 = vadd.f32 %v7573_v47, %v17372_v17  ;;  %v7575_v54 = vpop.f32.mrb[34].mxu0 }
 0x7c9   : > { %v7576_v41 = vadd.f32 %v7575_v54, %v17375_v28  ;;  %v7577_v62 = vpop.f32.mrb[35].mxu0  ;;  %v7711_v56 = vmax.f32 %v7572_v2, 0.0  ;;  %v7994_v2 = vrot.slane %v17586_v43, %v11391_v53  ;;  %vm17612_vm12 = vcmp.eq.s32.totalorder %v7990_v63, 1 }
 0x7ca   : > { %v7578_v50 = vadd.f32 %v7577_v62, %v17375_v28  ;;  %v7712_v23 = vmax.f32 %v7574_v11, 0.0 }
 0x7cb   : > { %v7721_v26 = vmax.f32 %v7576_v41, 0.0  ;;  %vm8022_vm2 = vcmp.eq.s32.totalorder %v7994_v2, 1  ;;  %v10060_v2 = vld [vmem:[%s19506_s1 + $0x3] ss:$8 sm:$0xf] }
 0x7cc   : > { %v7722_v8 = vmax.f32 %v7578_v50, 0.0  ;;  %vm8030_vm3 = vmpackc.low %vm8022_vm2, %vm17612_vm12 }
 0x7cd   : > { %v17404_v20 = vpack.c.bf16 %v7721_v26, %v7711_v56  ;;  %v10066_v26 = vld [vmem:[%s19506_s1 + $0x6] ss:$8 sm:$0xf] }
 0x7ce   : > { %v17406_v4 = vpack.c.bf16 %v7722_v8, %v7712_v23  ;;  %v10067_v23 = vld [vmem:[%s19506_s1 + $0x6] ss:$8 sm:$0xf0]  ;;  %v10063_v8 = vld [vmem:[%s19506_s1 + $0x5] ss:$8 sm:$0xf] }
 0x7cf   : > { %8663 = vrot.lane.b32.xlu0 %v17404_v20, %s10455_s10  ;;  %8483 = vrot.lane.b32.xlu1 %v17404_v20, %s10454_s27 }
 0x7d3   : > { %9023 = vrot.lane.b32.xlu0 %v17404_v20, %s10457_s15  ;;  %8843 = vrot.lane.b32.xlu1 %v17404_v20, %s10456_s11 }
 0x7d7   : > { %7757 = vrot.lane.b32.xlu0 %v17406_v4, %s10450_s23  ;;  %7755 = vrot.lane.b32.xlu1 %v17404_v20, %s10450_s23 }
 0x7db   : > { %7937 = vrot.lane.b32.xlu0 %v17406_v4, %s10451_s24  ;;  %7935 = vrot.lane.b32.xlu1 %v17404_v20, %s10451_s24 }
 0x7df   : > { %7931 = vrot.lane.b32.xlu1 %v17380_v18, %s10451_s24  ;;  %7751 = vrot.lane.b32.xlu0 %v17380_v18, %s10450_s23 }
 0x7e3   : > { %8291 = vrot.lane.b32.xlu1 %v17380_v18, %s10453_s26  ;;  %8111 = vrot.lane.b32.xlu0 %v17380_v18, %s10452_s25 }
 0x7e7   : > { %8479 = vrot.lane.b32.xlu1 %v17380_v18, %s10454_s27  ;;  %8659 = vrot.lane.b32.xlu0 %v17380_v18, %s10455_s10 }
 0x7ea   : > { %v7657_v33 = vpop.f32.mrb[36].mxu0 }
 0x7eb   : > { %v7658_v1 = vadd.f32 %v7657_v33, %v17372_v17  ;;  %v7659_v3 = vpop.f32.mrb[37].mxu0  ;;  %8839 = vrot.lane.b32.xlu1 %v17380_v18, %s10456_s11  ;;  %9019 = vrot.lane.b32.xlu0 %v17380_v18, %s10457_s15  ;;  %v8035_v33 = vsel %vm8030_vm3, 65537, %v19798_v16 }
 0x7ec   : > { %v7660_v59 = vadd.f32 %v7659_v3, %v17372_v17  ;;  %v7661_v45 = vpop.f32.mrb[38].mxu0  ;;  %v17495_v17 = vld [vmem:[%s19507_s2 + $0x44] ss:$8 sps:$4 sm:$0xff]   ;;  %v8054_v36 = vrot.slane %v8035_v33, %v10750_v46 }
 0x7ed   : > { %v7662_v55 = vadd.f32 %v7661_v45, %v17375_v28  ;;  %v7663_v38 = vpop.f32.mrb[39].mxu0  ;;  %v7715_v5 = vmax.f32 %v7658_v1, 0.0  ;;  %21066 = vst [vmem:[#allocation24_spill] sm:$0xff] %v17495_v17  ;;  %10081 = vmatprep.mubr.msk.bf16.mxu0 %vm21067_vm8, %v17495_v17  ;;  %10082 = vmatprep.mubr.msk.bf16.mxu1 %vm21068_vm1, %v17495_v17  ;;  %v10064_v3 = vld [vmem:[%s19506_s1 + $0x5] ss:$8 sm:$0xf0] }
 0x7ee   : > { %v7664_v12 = vadd.f32 %v7663_v38, %v17375_v28  ;;  %v7716_v61 = vmax.f32 %v7660_v59, 0.0  ;;  %v7791_v28 = vld [vmem:[%s19506_s1] ss:$8 sm:$0xf]  ;;  %v8050_v38 = vrot.slane %v8035_v33, %v10696_v30 }
 0x7ef   : > { %v7725_v10 = vmax.f32 %v7662_v55, 0.0  ;;  %7753 = vrot.lane.b32.xlu1 %v17382_v25, %s10450_s23  ;;  %7933 = vrot.lane.b32.xlu0 %v17382_v25, %s10451_s24  ;;  %v7793_v51 = vor.u32 %v7792_v48, %v7791_v28 }
 0x7f0   : > { %v7726_v0 = vmax.f32 %v7664_v12, 0.0  ;;  %vm17681_vm1 = vcmp.ne.s16.totalorder %v8050_v38, 0 }
 0x7f1   : > { %v17448_v7 = vpack.c.bf16 %v7725_v10, %v7715_v5  ;;  %vm7795_vm4 = vcmp.ne.f32.partialorder %v7793_v51, 0.0  ;;  %v8703_v5 = vor.u32 %v10067_v23, %v10066_v26  ;;  %v8523_v10 = vor.u32 %v10064_v3, %v10063_v8  ;;  %v10072_v51 = vld [vmem:[%s19506_s1 + $0x50] ss:$8 sm:$0xf] }
 0x7f2   : > { %v17450_v22 = vpack.c.bf16 %v7726_v0, %v7716_v61  ;;  %v17536_v31 = vsel %vm7795_vm4, 1, %v19798_v16  ;;  %v10057_v61 = vld [vmem:[%s19506_s1 + $0x2] ss:$8 sm:$0xf] }
 0x7f3   : > { %21064 = vst [vmem:[#allocation25_spill] sm:$0xff] %v17448_v7  ;;  %8113 = vrot.lane.b32.xlu1 %v17382_v25, %s10452_s25  ;;  %8293 = vrot.lane.b32.xlu0 %v17382_v25, %s10453_s26  ;;  %v7810_v52 = vrot.slane %v17536_v31, %v11382_v13  ;;  %v7814_v14 = vrot.slane %v17536_v31, %v11391_v53  ;;  %v10058_v0 = vld [vmem:[%s19506_s1 + $0x2] ss:$8 sm:$0xf0] }
 0x7f4   : > { %21065 = vst [vmem:[#allocation16_spill] sm:$0xff] %v17450_v22  ;;  %v7802_v47 = vrot.slane %v17536_v31, %v10696_v30  ;;  %v7806_v11 = vrot.slane %v17536_v31, %v19990_v27  ;;  %v8153_v32 = vor.u32 %v10058_v0, %v10057_v61  ;;  %v10069_v26 = vld [vmem:[%s19506_s1 + $0x7] ss:$8 sm:$0xf] }
 0x7f5   : > { %vm7841_vm0 = vcmp.eq.s32.totalorder %v7810_v52, 1  ;;  %vm7842_vm10 = vcmp.eq.s32.totalorder %v7814_v14, 1  ;;  %v10073_v52 = vld [vmem:[%s19506_s1 + $0x50] ss:$8 sm:$0xf0]  ;;  %v7986_v14 = vrot.slane %v17586_v43, %v19990_v27 }
 0x7f6   : > { %vm7850_vm15 = vmpackc.low %vm7842_vm10, %vm7841_vm0  ;;  %vm7839_vm7 = vcmp.eq.s32.totalorder %v7802_v47, 1  ;;  %vm7840_vm13 = vcmp.eq.s32.totalorder %v7806_v11, 1  ;;  %vm17689_vm0 = vcmp.ne.f32.partialorder %v8703_v5, 0.0  ;;  %vm17693_vm10 = vcmp.ne.f32.partialorder %v8523_v10, 0.0 }
 0x7f7   : > { %8661 = vrot.lane.b32.xlu1 %v17382_v25, %s10455_s10  ;;  %8481 = vrot.lane.b32.xlu0 %v17382_v25, %s10454_s27  ;;  %v7855_v44 = vsel %vm7850_vm15, 65537, %v19798_v16  ;;  %vm7849_vm14 = vmpackc.low %vm7840_vm13, %vm7839_vm7  ;;  %v9063_v63 = vor.u32 %v10073_v52, %v10072_v51  ;;  %v10061_v47 = vld [vmem:[%s19506_s1 + $0x3] ss:$8 sm:$0xf0]  ;;  %vm8082_vm15 = vcmp.ne.s16.totalorder %v8054_v36, 0  ;;  %vm17717_vm5 = vcmp.ne.f32.partialorder %v8153_v32, 0.0 }
 0x7f8   : > { %v7874_v24 = vrot.slane %v7855_v44, %v10750_v46  ;;  %v17641_v1 = vsel %vm7849_vm14, 65537, %v19798_v16  ;;  %v7870_v55 = vrot.slane %v7855_v44, %v10696_v30  ;;  %v10070_v23 = vld [vmem:[%s19506_s1 + $0x7] ss:$8 sm:$0xf0]  ;;  %v17730_v38 = vsel %vm17689_vm0, 1, %v19798_v16 }
 0x7f9   : > { %v7866_v12 = vrot.slane %v17641_v1, %v10750_v46  ;;  %vm9065_vm2 = vcmp.ne.f32.partialorder %v9063_v63, 0.0  ;;  %v8883_v61 = vor.u32 %v10070_v23, %v10069_v26  ;;  %v7982_v52 = vrot.slane %v17586_v43, %v10696_v30 }
 0x7fa   : > { %vm7902_vm6 = vcmp.ne.s16.totalorder %v7874_v24, 0  ;;  %vm17674_vm8 = vcmp.ne.s16.totalorder %v7870_v55, 0  ;;  %v8712_v36 = vrot.slane %v17730_v38, %v10696_v30  ;;  %v8716_v32 = vrot.slane %v17730_v38, %v19990_v27 }
 0x7fb   : > { %9021 = vrot.lane.b32.xlu1 %v17382_v25, %s10457_s15  ;;  %8841 = vrot.lane.b32.xlu0 %v17382_v25, %s10456_s11  ;;  %vm17685_vm4 = vcmp.ne.s16.totalorder %v7866_v12, 0  ;;  %v8333_v12 = vor.u32 %v10061_v47, %v10060_v2  ;;  %v17771_v63 = vsel %vm9065_vm2, 1, %v19798_v16  ;;  %vm8885_vm13 = vcmp.ne.f32.partialorder %v8883_v61, 0.0 }
 0x7fc   : > { %vm17783_vm3 = vcmp.eq.s32.totalorder %v7982_v52, 1  ;;  %vm17787_vm14 = vcmp.eq.s32.totalorder %v7986_v14, 1  ;;  %v9072_v3 = vrot.slane %v17771_v63, %v10696_v30  ;;  %v17817_v61 = vsel %vm8885_vm13, 1, %v19798_v16  ;;  %v10077_v52 = vld [vmem:[%s19508_s3 + $0x40] sm:$0xff] }
 0x7fd   : > { %vm8335_vm7 = vcmp.ne.f32.partialorder %v8333_v12, 0.0  ;;  %v7818_v12 = vrot.slane %v17536_v31, %v10750_v46 }
 0x7fe   : > { %vm17859_vm2 = vcmp.eq.s32.totalorder %v9072_v3, 1 }
 0x7ff   : > { %7759 = vrot.lane.b32.xlu1 %v17388_v21, %s10450_s23  ;;  %7761 = vrot.lane.b32.xlu0 %v17390_v15, %s10450_s23 }
 0x803   : > { %7740 = vrot.lane.b32.xlu1 %v17398_v40, %s10450_s23  ;;  %7941 = vrot.lane.b32.xlu0 %v17390_v15, %s10451_s24 }
 0x807   : > { %7939 = vrot.lane.b32.xlu1 %v17388_v21, %s10451_s24  ;;  %7929 = vrot.lane.b32.xlu0 %v17398_v40, %s10451_s24 }
 0x80b   : > { %8109 = vrot.lane.b32.xlu1 %v17398_v40, %s10452_s25  ;;  %8117 = vrot.lane.b32.xlu0 %v17406_v4, %s10452_s25 }
 0x80f   : > { %8115 = vrot.lane.b32.xlu1 %v17404_v20, %s10452_s25  ;;  %8289 = vrot.lane.b32.xlu0 %v17398_v40, %s10453_s26 }
 0x813   : > { %8119 = vrot.lane.b32.xlu1 %v17388_v21, %s10452_s25  ;;  %8121 = vrot.lane.b32.xlu0 %v17390_v15, %s10452_s25 }
 0x817   : > { %8295 = vrot.lane.b32.xlu1 %v17404_v20, %s10453_s26  ;;  %8297 = vrot.lane.b32.xlu0 %v17406_v4, %s10453_s26 }
 0x81b   : > { %8299 = vrot.lane.b32.xlu1 %v17388_v21, %s10453_s26  ;;  %8301 = vrot.lane.b32.xlu0 %v17390_v15, %s10453_s26 }
 0x81f   : > { %8485 = vrot.lane.b32.xlu1 %v17406_v4, %s10454_s27  ;;  %8487 = vrot.lane.b32.xlu0 %v17388_v21, %s10454_s27 }
 0x823   : > { %8489 = vrot.lane.b32.xlu1 %v17390_v15, %s10454_s27  ;;  %8491 = vrot.lane.b32.xlu0 %v17448_v7, %s10454_s27 }
 0x827   : > { %8665 = vrot.lane.b32.xlu1 %v17406_v4, %s10455_s10  ;;  %8667 = vrot.lane.b32.xlu0 %v17388_v21, %s10455_s10 }
 0x82b   : > { %8669 = vrot.lane.b32.xlu1 %v17390_v15, %s10455_s10  ;;  %8671 = vrot.lane.b32.xlu0 %v17448_v7, %s10455_s10 }
 0x82f   : > { %8845 = vrot.lane.b32.xlu1 %v17406_v4, %s10456_s11  ;;  %8847 = vrot.lane.b32.xlu0 %v17388_v21, %s10456_s11 }
 0x833   : > { %8849 = vrot.lane.b32.xlu1 %v17390_v15, %s10456_s11  ;;  %8851 = vrot.lane.b32.xlu0 %v17448_v7, %s10456_s11 }
 0x837   : > { %9025 = vrot.lane.b32.xlu1 %v17406_v4, %s10457_s15  ;;  %9027 = vrot.lane.b32.xlu0 %v17388_v21, %s10457_s15 }
 0x83b   : > { %9029 = vrot.lane.b32.xlu1 %v17390_v15, %s10457_s15  ;;  %9031 = vrot.lane.b32.xlu0 %v17448_v7, %s10457_s15 }
 0x83f   : > { %7763 = vrot.lane.b32.xlu1 %v17448_v7, %s10450_s23  ;;  %7765 = vrot.lane.b32.xlu0 %v17450_v22, %s10450_s23 }
 0x841   : > { %v17560_v58 = vpop.permute.xlu0 %8663  ;;  %v17562_v42 = vpop.permute.xlu1 %8483 }
 0x843   : > { %7767 = vrot.lane.b32.xlu1 %v17396_v37, %s10450_s23  ;;  %7943 = vrot.lane.b32.xlu0 %v17448_v7, %s10451_s24 }
 0x845   : > { %v17570_v57 = vpop.permute.xlu0 %9023  ;;  %v17572_v35 = vpop.permute.xlu1 %8843 }
 0x847   : > { %7945 = vrot.lane.b32.xlu1 %v17450_v22, %s10451_s24  ;;  %7947 = vrot.lane.b32.xlu0 %v17396_v37, %s10451_s24 }
 0x849   : > { %v17578_v39 = vpop.permute.xlu0 %7757  ;;  %v17580_v34 = vpop.permute.xlu1 %7755 }
 0x84a   : > { %v7771_v49 = vsel %vm19690_vm11, %v17580_v34, %v17578_v39 }
 0x84b   : > { %10264 = vmatprep.subr.msk.bf16.mxu1 %vm7902_vm6, %v7771_v49  ;;  %8123 = vrot.lane.b32.xlu1 %v17448_v7, %s10452_s25  ;;  %vm21085_vm6 = vcmask 130048  }
 0x84c   : > { %8125 = vrot.lane.b32.xlu0 %v17450_v22, %s10452_s25  ;;  %vm21086_vm12 = vmmov %vm21085_vm6 }
 0x84d   : > { %v17592_v29 = vpop.permute.xlu0 %7937  ;;  %v17594_v6 = vpop.permute.xlu1 %7935 }
 0x84e   : > { %21070 = vst [vmem:[#allocation15_spill] sm:$0xff] %v17592_v29  ;;  %v7951_v5 = vsel %vm21085_vm6, %v17594_v6, %v17592_v29 }
 0x84f   : > { %8127 = vrot.lane.b32.xlu1 %v17396_v37, %s10452_s25 }
 0x850   : > { %8303 = vrot.lane.b32.xlu0 %v17448_v7, %s10453_s26  ;;  %v8892_v7 = vrot.slane %v17817_v61, %v10696_v30 }
 0x851   : > { %v17608_v54 = vpop.permute.xlu1 %7931  ;;  %v17610_v41 = vpop.permute.xlu0 %7751 }
 0x853   : > { %8305 = vrot.lane.b32.xlu1 %v17450_v22, %s10453_s26 }
 0x854   : > { %8307 = vrot.lane.b32.xlu0 %v17396_v37, %s10453_s26 }
 0x855   : > { %v17622_v50 = vpop.permute.xlu1 %8291  ;;  %v17624_v56 = vpop.permute.xlu0 %8111 }
 0x857   : > { %8493 = vrot.lane.b32.xlu1 %v17450_v22, %s10454_s27 }
 0x858   : > { %8495 = vrot.lane.b32.xlu0 %v17396_v37, %s10454_s27 }
 0x859   : > { %v17646_v59 = vpop.permute.xlu1 %8479  ;;  %v17648_v45 = vpop.permute.xlu0 %8659 }
 0x85b   : > { %8675 = vrot.lane.b32.xlu1 %v17396_v37, %s10455_s10 }
 0x85c   : > { %8673 = vrot.lane.b32.xlu0 %v17450_v22, %s10455_s10 }
 0x85d   : > { %v17664_v28 = vpop.permute.xlu1 %8839  ;;  %v17666_v48 = vpop.permute.xlu0 %9019 }
 0x85f   : > { %8497 = vrot.lane.b32.xlu1 %v17398_v40, %s10454_s27 }
 0x860   : > { %8855 = vrot.lane.b32.xlu0 %v17396_v37, %s10456_s11 }
 0x861   : > { %v7754_v11 = vpop.permute.xlu1 %7753  ;;  %v17705_v62 = vpop.permute.xlu0 %7933 }
 0x862   : > { %v7769_v8 = vsel %vm19690_vm11, %v17610_v41, %v7754_v11  ;;  %v7770_v33 = vsel %vm19690_vm11, %v7754_v11, %v17580_v34  ;;  %v17735_v34 = vsel %vm17693_vm10, 1, %v19798_v16  ;;  %v7950_v10 = vsel %vm21086_vm12, %v17705_v62, %v17594_v6  ;;  %vm8029_vm10 = vmpackc.low %vm17787_vm14, %vm17783_vm3 }
 0x863   : > { %v7911_v55 = vsel %vm17674_vm8, %v7770_v33, 0  ;;  %8853 = vrot.lane.b32.xlu1 %v17450_v22, %s10456_s11  ;;  %10256 = vmatprep.subr.msk.bf16.mxu0 %vm17685_vm4, %v7769_v8  ;;  %v17756_v6 = vsel %vm17717_vm5, 1, %v19798_v16  ;;  %v8532_v19 = vrot.slane %v17735_v34, %v10696_v30  ;;  %v8091_v24 = vsel %vm17681_vm1, %v7950_v10, 0 }
 0x864   : > { %8677 = vrot.lane.b32.xlu0 %v17398_v40, %s10455_s10  ;;  %9361 = vmatpush1.bf16.msra.mxu1 %v7911_v55  ;;  %21087 = vst [vmem:[#allocation18_spill] sm:$0xff] %v17756_v6  ;;  %v8536_v49 = vrot.slane %v17735_v34, %v19990_v27  ;;  %v8162_v2 = vrot.slane %v17756_v6, %v10696_v30  ;;  %vm17791_vm8 = vcmp.eq.s32.totalorder %v8712_v36, 1  ;;  %vm17795_vm1 = vcmp.eq.s32.totalorder %v8716_v32, 1  ;;  %s344_s10 = scalar_lea.vmem %s19513_s8, %s10095_s21 }
 0x865   : > { %10265 = vmatprep.subr.msk.bf16.mxu1 %vm8082_vm15, %v7951_v5  ;;  %v17745_v0 = vpop.permute.xlu1 %8113  ;;  %v17747_v51 = vpop.permute.xlu0 %8293  ;;  %v8166_v44 = vrot.slane %v17756_v6, %v19990_v27  ;;  %v17802_v55 = vsel %vm8335_vm7, 1, %v19798_v16  ;;  %vm17804_vm4 = vcmp.eq.s32.totalorder %v8532_v19, 1  ;;  %v9076_v10 = vrot.slane %v17771_v63, %v19990_v27  ;;  %vm8759_vm6 = vmpackc.low %vm17795_vm1, %vm17791_vm8  ;;  %v21109_v5 = vld [vmem:[#allocation5_spill] sm:$0xff] }
 0x866   : > { %21096 = vst [vmem:[#allocation20_spill] sm:$0xff] %v17802_v55  ;;  %vm17808_vm0 = vcmp.eq.s32.totalorder %v8536_v49, 1  ;;  %vm17828_vm15 = vcmp.eq.s32.totalorder %v8162_v2, 1  ;;  %v8170_v32 = vrot.slane %v17756_v6, %v11382_v13  ;;  %v8174_v19 = vrot.slane %v17756_v6, %v11391_v53  ;;  %v10078_v2 = vld [vmem:[%s19508_s3 + $0x48] sm:$0xff] }
 0x867   : > { %8857 = vrot.lane.b32.xlu1 %v17398_v40, %s10456_s11  ;;  %vm17832_vm5 = vcmp.eq.s32.totalorder %v8166_v44, 1  ;;  %v8342_v44 = vrot.slane %v17802_v55, %v10696_v30  ;;  %vm8579_vm12 = vmpackc.low %vm17808_vm0, %vm17804_vm4  ;;  %vm17867_vm7 = vcmp.eq.s32.totalorder %v9076_v10, 1  ;;  %v7822_v3 = vrot.slane %v17536_v31, %v21109_v5 }
 0x868   : > { %9033 = vrot.lane.b32.xlu0 %v17450_v22, %s10457_s15  ;;  %9363 = vmatpush1.bf16.msra.mxu1 %v8091_v24  ;;  %v8896_v22 = vrot.slane %v17817_v61, %v19990_v27  ;;  %v8034_v15 = vsel %vm8029_vm10, 65537, %v19798_v16  ;;  %vm8209_vm13 = vmpackc.low %vm17832_vm5, %vm17828_vm15  ;;  %v7862_v10 = vrot.slane %v17641_v1, %v10696_v30  ;;  %vm17887_vm4 = vcmp.eq.s32.totalorder %v8170_v32, 1 }
 0x869   : > { %v17779_v47 = vpop.permute.xlu1 %8661  ;;  %v17781_v11 = vpop.permute.xlu0 %8481  ;;  %vm17891_vm0 = vcmp.eq.s32.totalorder %v8174_v19, 1  ;;  %v17901_v26 = vsel %vm8759_vm6, 65537, %v19798_v16  ;;  %v17904_v23 = vsel %vm8579_vm12, 65537, %v19798_v16  ;;  %vm17910_vm3 = vcmp.eq.s32.totalorder %v8342_v44, 1  ;;  %vm9119_vm8 = vmpackc.low %vm17867_vm7, %vm17859_vm2 }
 0x86a   : > { %vm17922_vm1 = vcmp.eq.s32.totalorder %v8892_v7, 1  ;;  %vm17926_vm10 = vcmp.eq.s32.totalorder %v8896_v22, 1  ;;  %v8046_v19 = vrot.slane %v8034_v15, %v10750_v46  ;;  %vm17932_vm15 = vcmp.eq.s32.totalorder %v7818_v12, 1  ;;  %vm8210_vm6 = vmpackc.low %vm17891_vm0, %vm17887_vm4 }
 0x86b   : > { %9035 = vrot.lane.b32.xlu1 %v17396_v37, %s10457_s15  ;;  %v8346_v37 = vrot.slane %v17802_v55, %v19990_v27  ;;  %vm17936_vm5 = vcmp.eq.s32.totalorder %v7822_v3, 1  ;;  %v8350_v21 = vrot.slane %v17802_v55, %v11382_v13  ;;  %v8354_v7 = vrot.slane %v17802_v55, %v11391_v53  ;;  %vm8939_vm7 = vmpackc.low %vm17926_vm10, %vm17922_vm1 }
 0x86c   : > { %9037 = vrot.lane.b32.xlu0 %v17398_v40, %s10457_s15  ;;  %vm17950_vm12 = vcmp.ne.s16.totalorder %v7862_v10, 0  ;;  %v8042_v12 = vrot.slane %v8034_v15, %v10696_v30  ;;  %v17962_v27 = vsel %vm9119_vm8, 65537, %v19798_v16  ;;  %v7998_v15 = vrot.slane %v17586_v43, %v10750_v46 }
 0x86d   : > { %v17844_v24 = vpop.permute.xlu1 %9021  ;;  %v17846_v49 = vpop.permute.xlu0 %8841  ;;  %vm17914_vm14 = vcmp.eq.s32.totalorder %v8346_v37, 1  ;;  %v8214_v37 = vsel %vm8209_vm13, 65537, %v19798_v16  ;;  %vm7851_vm13 = vmpackc.low %vm17936_vm5, %vm17932_vm15  ;;  %v8002_v8 = vrot.slane %v17586_v43, %v21109_v5  ;;  %v8215_v33 = vsel %vm8210_vm6, 65537, %v19798_v16 }
 0x86e   : > { %vm8389_vm2 = vmpackc.low %vm17914_vm14, %vm17910_vm3  ;;  %v8226_v36 = vrot.slane %v8214_v37, %v10750_v46  ;;  %vm8080_vm3 = vcmp.ne.s16.totalorder %v8046_v19, 0  ;;  %vm17993_vm14 = vcmp.eq.s32.totalorder %v8350_v21, 1  ;;  %vm17997_vm8 = vcmp.eq.s32.totalorder %v8354_v7, 1 }
 0x86f   : > { %9297 = vperm.xlu1 %10367, %v10077_v52   ;;  %v8394_v40 = vsel %vm8389_vm2, 65537, %v19798_v16  ;;  %vm21134_vm1 = vcmask 130048   ;;  %v18005_v52 = vsel %vm8939_vm7, 65537, %v19798_v16  ;;  %vm18007_vm4 = vcmp.ne.s16.totalorder %v8042_v12, 0  ;;  %vm8390_vm5 = vmpackc.low %vm17997_vm8, %vm17993_vm14 }
 0x870   : > { %9302 = vperm.xlu0 %10366, %v10078_v2   ;;  %v7949_v17 = vsel %vm21134_vm1, %v17608_v54, %v17705_v62  ;;  %v8222_v21 = vrot.slane %v8214_v37, %v10696_v30  ;;  %v18013_v44 = vsel %vm7851_vm13, 65537, %v19798_v16  ;;  %vm18015_vm0 = vcmp.eq.s32.totalorder %v7998_v15, 1  ;;  %vm21143_vm15 = vmmov %vm21134_vm1 }
 0x871   : > { %v17906_v1 = vpop.permute.xlu1 %7759  ;;  %v17908_v14 = vpop.permute.xlu0 %7761  ;;  %vm18023_vm10 = vcmp.ne.s16.totalorder %v8226_v36, 0  ;;  %v8178_v12 = vrot.slane %v17756_v6, %v10750_v46  ;;  %v8230_v15 = vrot.slane %v8215_v33, %v10696_v30  ;;  %v8234_v43 = vrot.slane %v8215_v33, %v10750_v46 }
 0x872   : > { %vm18039_vm6 = vcmp.eq.s32.totalorder %v8002_v8, 1  ;;  %v8129_v33 = vsel %vm19689_vm9, %v17624_v56, %v17745_v0  ;;  %v8540_v8 = vrot.slane %v17735_v34, %v11382_v13  ;;  %vm21159_vm1 = vcmask 7168  }
 0x873   : > { %vm18065_vm2 = vcmp.eq.s32.totalorder %v8178_v12, 1  ;;  %vm18077_vm7 = vcmp.ne.s16.totalorder %v8230_v15, 0  ;;  %v21172_v12 = vrot.slane %v17904_v23, %v10696_v30 }
 0x875   : > { %v17968_v10 = vpop.permute.xlu1 %7740  ;;  %v17970_v22 = vpop.permute.xlu0 %7941 }
 0x876   : > { %21128 = vst [vmem:[#allocation8_spill] sm:$0xff] %v17968_v10  ;;  %21129 = vst [vmem:[#allocation19_spill] sm:$0xff] %v17970_v22  ;;  %v7789_v32 = vsel %vm19690_vm11, %v17968_v10, %v17610_v41  ;;  %v8406_v10 = vrot.slane %v8394_v40, %v10750_v46  ;;  %v8544_v41 = vrot.slane %v17735_v34, %v11391_v53 }
 0x877   : > { %v7909_v2 = vsel %vm17950_vm12, %v7789_v32, 0  ;;  %vm18051_vm12 = vcmp.ne.s16.totalorder %v8222_v21, 0  ;;  %v8395_v21 = vsel %vm8390_vm5, 65537, %v19798_v16 }
 0x878   : > { %9318 = vmatpush1.bf16.msra.mxu0 %v7909_v2  ;;  %vm8440_vm13 = vcmp.ne.s16.totalorder %v8406_v10, 0  ;;  %v8410_v10 = vrot.slane %v8395_v21, %v10696_v30  ;;  %v8414_v3 = vrot.slane %v8395_v21, %v10750_v46  ;;  %v21169_v2 = vrot.slane %v17901_v26, %v10696_v30 }
 0x879   : > { %v18019_v32 = vpop.permute.xlu1 %7939  ;;  %10257 = vmatprep.subr.msk.bf16.mxu0 %vm8080_vm3, %v7949_v17  ;;  %v18021_v62 = vpop.permute.xlu0 %7929  ;;  %vm18081_vm3 = vcmp.ne.s16.totalorder %v8234_v43, 0  ;;  %v8309_v43 = vsel %vm21159_vm1, %v17622_v50, %v17747_v51 }
 0x87a   : > { %21139 = vst [vmem:[#allocation7_spill] sm:$0xff] %v18019_v32  ;;  %21140 = vst [vmem:[#allocation22_spill] sm:$0xff] %v18021_v62  ;;  %v7969_v37 = vsel %vm21143_vm15, %v18021_v62, %v17608_v54  ;;  %v8402_v54 = vrot.slane %v8394_v40, %v10696_v30  ;;  %v8182_v62 = vrot.slane %v17756_v6, %v21109_v5 }
 0x87b   : > { %v8089_v17 = vsel %vm18007_vm4, %v7969_v37, 0  ;;  %v8362_v6 = vrot.slane %v17802_v55, %v21109_v5  ;;  %vm18101_vm4 = vcmp.eq.s32.totalorder %v8540_v8, 1  ;;  %v8548_v8 = vrot.slane %v17735_v34, %v10750_v46 }
 0x87c   : > { %9320 = vmatpush1.bf16.msra.mxu0 %v8089_v17  ;;  %v8358_v17 = vrot.slane %v17802_v55, %v10750_v46  ;;  %vm18087_vm14 = vcmp.ne.s16.totalorder %v8402_v54, 0  ;;  %vm18091_vm8 = vcmp.eq.s32.totalorder %v8182_v62, 1  ;;  %v8956_v37 = vrot.slane %v18005_v52, %v10750_v46 }
 0x87d   : > { %v18059_v19 = vpop.permute.xlu1 %8109  ;;  %10258 = vmatprep.subr.msk.bf16.mxu0 %vm18023_vm10, %v8129_v33  ;;  %v18063_v40 = vpop.permute.xlu0 %8117  ;;  %vm18105_vm10 = vcmp.eq.s32.totalorder %v8544_v41, 1  ;;  %vm18116_vm5 = vcmp.eq.s32.totalorder %v8362_v6, 1 }
 0x87e   : > { %21148 = vst [vmem:[#allocation26_spill] sm:$0xff] %v18059_v19  ;;  %v8149_v22 = vsel %vm19689_vm9, %v18059_v19, %v17624_v56  ;;  %v8596_v56 = vrot.slane %v17904_v23, %v10750_v46  ;;  %vm18112_vm15 = vcmp.eq.s32.totalorder %v8358_v17, 1  ;;  %v8552_v17 = vrot.slane %v17735_v34, %v21109_v5 }
 0x87f   : > { %v8269_v33 = vsel %vm18051_vm12, %v8149_v22, 0  ;;  %vm8031_vm12 = vmpackc.low %vm18039_vm6, %vm18015_vm0  ;;  %vm18196_vm6 = vcmp.ne.s16.totalorder %v8414_v3, 0  ;;  %v8900_v19 = vrot.slane %v17817_v61, %v11382_v13 }
 0x880   : > { %9322 = vmatpush1.bf16.msra.mxu0 %v8269_v33  ;;  %v18175_v23 = vsel %vm8031_vm12, 65537, %v19798_v16  ;;  %vm18192_vm0 = vcmp.ne.s16.totalorder %v8596_v56, 0  ;;  %vm18214_vm11 = vcmp.eq.s32.totalorder %v8552_v17, 1  ;;  %v8728_v17 = vrot.slane %v17730_v38, %v10750_v46 }
 0x881   : > { %v8116_v62 = vpop.permute.xlu1 %8115  ;;  %10259 = vmatprep.subr.msk.bf16.mxu0 %vm8440_vm13, %v8309_v43  ;;  %v18109_v54 = vpop.permute.xlu0 %8289  ;;  %vm21168_vm13 = vmmov %vm21159_vm1  ;;  %v8904_v33 = vrot.slane %v17817_v61, %v11391_v53 }
 0x882   : > { %v8130_v41 = vsel %vm19689_vm9, %v17745_v0, %v8116_v62  ;;  %v8131_v21 = vsel %vm19689_vm9, %v8116_v62, %v18063_v40  ;;  %v8329_v6 = vsel %vm21168_vm13, %v18109_v54, %v17622_v50  ;;  %vm8580_vm1 = vmpackc.low %vm18105_vm10, %vm18101_vm4  ;;  %v8720_v50 = vrot.slane %v17730_v38, %v11382_v13 }
 0x883   : > { %v8271_v43 = vsel %vm18077_vm7, %v8130_v41, 0  ;;  %v8449_v32 = vsel %vm18087_vm14, %v8329_v6, 0  ;;  %10266 = vmatprep.subr.msk.bf16.mxu1 %vm18081_vm3, %v8131_v21  ;;  %v8724_v0 = vrot.slane %v17730_v38, %v11391_v53  ;;  %vm18152_vm7 = vcmp.ne.s16.totalorder %v21169_v2, 0 }
 0x884   : > { %vm18159_vm3 = vcmp.ne.s16.totalorder %v21172_v12, 0  ;;  %v8952_v41 = vrot.slane %v18005_v52, %v10696_v30  ;;  %9324 = vmatpush1.bf16.msra.mxu0 %v8449_v32  ;;  %9365 = vmatpush1.bf16.msra.mxu1 %v8271_v43  ;;  %v9132_v21 = vrot.slane %v17962_v27, %v10696_v30  ;;  %v7878_v6 = vrot.slane %v18013_v44, %v10696_v30 }
 0x885   : > { %v18181_v32 = vpop.permute.xlu1 %8119  ;;  %9325 = vmatprep.subr.bf16.mxu0 %v17382_v25  ;;  %v18184_v43 = vpop.permute.xlu0 %8121  ;;  %v8776_v2 = vrot.slane %v17901_v26, %v10750_v46  ;;  %vm18188_vm13 = vcmp.ne.s16.totalorder %v8410_v10, 0  ;;  %v8585_v25 = vsel %vm8580_vm1, 65537, %v19798_v16  ;;  %vm18210_vm9 = vcmp.eq.s32.totalorder %v8548_v8, 1 }
 0x886   : > { %vm18218_vm14 = vcmp.eq.s32.totalorder %v8720_v50, 1  ;;  %vm18222_vm12 = vcmp.eq.s32.totalorder %v8724_v0, 1  ;;  %vm21189_vm4 = vcmask 1039360   ;;  %vm18232_vm1 = vcmp.ne.s16.totalorder %v8952_v41, 0 }
 0x887   : > { %v8499_v22 = vsel %vm21189_vm4, %v17646_v59, %v17781_v11  ;;  %vm21190_vm10 = vmmov %vm21189_vm4  ;;  %v21191_v8 = vmov 0  ;;  %v8732_v50 = vrot.slane %v17730_v38, %v21109_v5 }
 0x888   : > { %v8500_v15 = vsel %vm21190_vm10, %v17781_v11, %v17562_v42  ;;  %v21192_v8 = vsel %vm18232_vm1, 4294967295, %v21191_v8  ;;  %9326 = vmatpush1.bf16.msra.mxu0 %v17380_v18  ;;  %vm21193_vm4 = vmpackc.low %vm18091_vm8, %vm18065_vm2  ;;  %vm18261_vm1 = vcmp.ne.s16.totalorder %v8776_v2, 0  ;;  %vm21197_vm2 = vcmask 7168  }
 0x889   : > { %v18247_v0 = vsel %vm21193_vm4, 65537, %v19798_v16  ;;  %v8296_v11 = vpop.permute.xlu1 %8295  ;;  %10260 = vmatprep.subr.msk.bf16.mxu0 %vm18192_vm0, %v8500_v15  ;;  %v18251_v41 = vpop.permute.xlu0 %8297  ;;  %vm21194_vm10 = vmpackc.low %vm18116_vm5, %vm18112_vm15  ;;  %v8639_v52 = vsel %vm18159_vm3, %v8499_v22, 0  ;;  %v8600_v2 = vrot.slane %v8585_v25, %v10696_v30  ;;  %vm21199_vm0 = vcmask 924672  }
 0x88a   : > { %v18259_v18 = vsel %vm21194_vm10, 65537, %v19798_v16  ;;  %v8310_v7 = vsel %vm21197_vm2, %v17747_v51, %v8296_v11  ;;  %vm21198_vm8 = vmmov %vm21197_vm2  ;;  %v8679_v62 = vsel %vm21199_vm0, %v17648_v45, %v17779_v47  ;;  %vm18305_vm4 = vcmp.eq.s32.totalorder %v8732_v50, 1 }
 0x88b   : > { %v8311_v15 = vsel %vm21198_vm8, %v8296_v11, %v18251_v41  ;;  %vm8581_vm15 = vmpackc.low %vm18214_vm11, %vm18210_vm9  ;;  %v8451_v51 = vsel %vm18188_vm13, %v8310_v7, 0  ;;  %v8604_v11 = vrot.slane %v8585_v25, %v10750_v46  ;;  %vm18297_vm13 = vcmp.ne.s16.totalorder %v9132_v21, 0 }
 0x88c   : > { %10267 = vmatprep.subr.msk.bf16.mxu1 %vm18196_vm6, %v8311_v15  ;;  %vm8760_vm5 = vmpackc.low %vm18222_vm12, %vm18218_vm14  ;;  %9328 = vmatpush1.bf16.msra.mxu0 %v8639_v52  ;;  %vm18301_vm6 = vcmp.eq.s32.totalorder %v8728_v17, 1  ;;  %v8058_v7 = vrot.slane %v18175_v23, %v10696_v30  ;;  %v18324_v21 = vsel %vm8581_vm15, 65537, %v19798_v16  ;;  %v9136_v17 = vrot.slane %v17962_v27, %v10750_v46 }
 0x88d   : > { %vm21200_vm3 = vmmov %vm21199_vm0  ;;  %9367 = vmatpush1.bf16.msra.mxu1 %v8451_v51  ;;  %v18311_v15 = vpop.permute.xlu1 %8299  ;;  %v7882_v50 = vrot.slane %v18013_v44, %v10750_v46  ;;  %vm18330_vm10 = vcmp.ne.s16.totalorder %v8956_v37, 0  ;;  %vm18340_vm11 = vcmp.eq.s32.totalorder %v8900_v19, 1  ;;  %vm18344_vm9 = vcmp.eq.s32.totalorder %v8904_v33, 1  ;;  %v18476_v44 = vld [vmem:[%s19507_s2 + $0x40] ss:$8 sps:$4 sm:$0xff]  }
 0x88e   : > { %v8680_v36 = vsel %vm21200_vm3, %v17779_v47, %v17560_v58  ;;  %9368 = vmatprep.subr.bf16.mxu1 %v17406_v4  ;;  %v18316_v47 = vpop.permute.xlu0 %8301  ;;  %v8765_v4 = vsel %vm8760_vm5, 65537, %v19798_v16  ;;  %v8819_v56 = vsel %vm18152_vm7, %v8679_v62, 0  ;;  %v8238_v37 = vrot.slane %v18247_v0, %v10696_v30  ;;  %vm8761_vm14 = vmpackc.low %vm18305_vm4, %vm18301_vm6 }
 0x88f   : > { %10261 = vmatprep.subr.msk.bf16.mxu0 %vm18261_vm1, %v8680_v36  ;;  %v8418_v3 = vrot.slane %v18259_v18, %v10696_v30  ;;  %vm18354_vm1 = vcmp.ne.s16.totalorder %v8600_v2, 0  ;;  %vm21215_vm12 = vcmask 916480   ;;  %vm18371_vm2 = vcmp.ne.s16.totalorder %v7878_v6, 0  ;;  %vm8940_vm0 = vmpackc.low %vm18344_vm9, %vm18340_vm11 }
 0x890   : > { %v8859_v29 = vsel %vm21215_vm12, %v17664_v28, %v17846_v49  ;;  %vm21216_vm7 = vmmov %vm21215_vm12  ;;  %9330 = vmatpush1.bf16.msra.mxu0 %v8819_v56  ;;  %vm18376_vm8 = vcmp.ne.s16.totalorder %v8604_v11, 0  ;;  %v8608_v51 = vrot.slane %v18324_v21, %v10696_v30  ;;  %vm18386_vm15 = vcmp.ne.s16.totalorder %v9136_v17, 0 }
 0x891   : > { %v8860_v19 = vsel %vm21216_vm7, %v17846_v49, %v17572_v35  ;;  %9369 = vmatpush1.bf16.msra.mxu1 %v17404_v20  ;;  %v8486_v2 = vpop.permute.xlu1 %8485  ;;  %v8780_v6 = vrot.slane %v8765_v4, %v10696_v30  ;;  %vm18391_vm5 = vcmp.ne.s16.totalorder %v7882_v50, 0  ;;  %v8784_v11 = vrot.slane %v8765_v4, %v10750_v46  ;;  %v10053_v4 = vld [vmem:[%s19506_s1 + $0x40] ss:$8 sm:$0x3] }
 0x892   : > { %10262 = vmatprep.subr.msk.bf16.mxu0 %vm18330_vm10, %v8860_v19  ;;  %v18384_v49 = vpop.permute.xlu0 %8487  ;;  %vm21225_vm3 = vcmask 1039360   ;;  %v18410_v17 = vsel %vm8761_vm14, 65537, %v19798_v16  ;;  %v8062_v50 = vrot.slane %v18175_v23, %v10750_v46  ;;  %vm21227_vm12 = vnez %v21192_v8 }
 0x893   : > { %v8501_v62 = vsel %vm21225_vm3, %v17562_v42, %v8486_v2  ;;  %vm21226_vm10 = vmmov %vm21225_vm3  ;;  %v8999_v55 = vsel %vm21227_vm12, %v8859_v29, 0  ;;  %v8242_v22 = vrot.slane %v18247_v0, %v10750_v46  ;;  %v9080_v25 = vrot.slane %v17771_v63, %v11382_v13 }
 0x894   : > { %v8502_v36 = vsel %vm21226_vm10, %v8486_v2, %v18384_v49  ;;  %v8641_v42 = vsel %vm18354_vm1, %v8501_v62, 0  ;;  %vm21228_vm6 = vcmask 908288   ;;  %vm18433_vm1 = vcmp.ne.s16.totalorder %v8058_v7, 0  ;;  %9332 = vmatpush1.bf16.msra.mxu0 %v8999_v55 }
 0x895   : > { %10268 = vmatprep.subr.msk.bf16.mxu1 %vm18376_vm8, %v8502_v36  ;;  %v9039_v23 = vsel %vm21228_vm6, %v17666_v48, %v17844_v24  ;;  %vm21229_vm4 = vmmov %vm21228_vm6  ;;  %v8945_v13 = vsel %vm8940_vm0, 65537, %v19798_v16  ;;  %v9084_v0 = vrot.slane %v17771_v63, %v11391_v53  ;;  %v18445_v10 = vpop.permute.xlu1 %8489  ;;  %vm18451_vm14 = vcmp.ne.s16.totalorder %v8780_v6, 0 }
 0x896   : > { %v9040_v8 = vsel %vm21229_vm4, %v17844_v24, %v17570_v57  ;;  %9371 = vmatpush1.bf16.msra.mxu1 %v8641_v42  ;;  %v18449_v24 = vpop.permute.xlu0 %8491  ;;  %vm18455_vm7 = vcmp.ne.s16.totalorder %v8784_v11, 0  ;;  %v8788_v26 = vrot.slane %v18410_v17, %v10696_v30  ;;  %v8908_v53 = vrot.slane %v17817_v61, %v10750_v46 }
 0x897   : > { %10263 = vmatprep.subr.msk.bf16.mxu0 %vm18386_vm15, %v9040_v8  ;;  %vm18463_vm11 = vcmp.ne.s16.totalorder %v8062_v50, 0  ;;  %v7826_v19 = vrot.slane %v17536_v31, %v11860_v9  ;;  %v7830_v52 = vrot.slane %v17536_v31, %v11863_v60  ;;  %vm7796_vm9 = vcmp.ne.f32.partialorder %v10053_v4, 0.0 }
 0x898   : > { %v9179_v2 = vsel %vm18297_vm13, %v9039_v23, 0  ;;  %v8960_v6 = vrot.slane %v8945_v13, %v10696_v30  ;;  %vm18479_vm8 = vcmp.ne.s16.totalorder %v8242_v22, 0  ;;  %v8912_v62 = vrot.slane %v17817_v61, %v21109_v5  ;;  %v10056_v23 = vld [vmem:[%s19506_s1 + $0x41] ss:$8 sm:$0x3] }
 0x899   : > { %vm21240_vm15 = vcmask 138240   ;;  %vm18491_vm0 = vcmp.ne.s16.totalorder %v8238_v37, 0  ;;  %9334 = vmatpush1.bf16.msra.mxu0 %v9179_v2  ;;  %vm18495_vm3 = vcmp.eq.s32.totalorder %v9080_v25, 1  ;;  %vm18499_vm10 = vcmp.eq.s32.totalorder %v9084_v0, 1  ;;  %v8666_v42 = vpop.permute.xlu1 %8665  ;;  %v21259_v2 = vld [vmem:[#allocation19_spill] sm:$0xff] }
 0x89a   : > { %v7772_v31 = vsel %vm21240_vm15, %v17578_v39, %v17906_v1  ;;  %vm21241_vm13 = vmmov %vm21240_vm15  ;;  %v18505_v39 = vpop.permute.xlu0 %8667  ;;  %vm18508_vm12 = vcmp.eq.s32.totalorder %v8908_v53, 1  ;;  %v8422_v22 = vrot.slane %v18259_v18, %v10750_v46  ;;  %v7798_v25 = vsel %vm7796_vm9, 1, %v19798_v16  ;;  %v21265_v18 = vld [vmem:[#allocation4_spill] sm:$0xff] }
 0x89b   : > { %v7773_v12 = vsel %vm21241_vm13, %v17906_v1, %v17908_v14  ;;  %v8964_v1 = vrot.slane %v8945_v13, %v10750_v46  ;;  %vm18523_vm4 = vcmp.eq.s32.totalorder %v7826_v19, 1  ;;  %vm18527_vm15 = vcmp.eq.s32.totalorder %v7830_v52, 1  ;;  %vm9120_vm9 = vmpackc.low %vm18499_vm10, %vm18495_vm3  ;;  %v21256_v19 = vld [vmem:[#allocation7_spill] sm:$0xff] }
 0x89c   : > { %10272 = vmatprep.subr.msk.bf16.mxu0 %vm18391_vm5, %v7773_v12  ;;  %vm21250_vm5 = vcmask 924672   ;;  %v7913_v4 = vsel %vm18371_vm2, %v7772_v31, 0  ;;  %9350 = vmatmul.mubr.bf16.vlgmr.msra.gmra.mrb[40].mxu0 %v18476_v44  ;;  %v9092_v33 = vrot.slane %v17771_v63, %v21109_v5  ;;  %v21257_v52 = vld [vmem:[#allocation15_spill] sm:$0xff]  ;;  %vm21258_vm2 = vcmask 130048  }
 0x89d   : > { %v8681_v20 = vsel %vm21250_vm5, %v17560_v58, %v8666_v42  ;;  %vm21251_vm6 = vmmov %vm21250_vm5  ;;  %v9088_v58 = vrot.slane %v17771_v63, %v10750_v46  ;;  %v7952_v7 = vsel %vm21258_vm2, %v21257_v52, %v21256_v19  ;;  %v21261_v31 = vmov 0  ;;  %9404 = vmatpush1.bf16.msra.mxu0 %v7913_v4  ;;  %v18560_v5 = vpop.permute.xlu1 %8669 }
 0x89e   : > { %v8682_v8 = vsel %vm21251_vm6, %v8666_v42, %v18505_v39  ;;  %v8821_v53 = vsel %vm18451_vm14, %v8681_v20, 0  ;;  %vm21260_vm14 = vmmov %vm21258_vm2  ;;  %v7834_v12 = vrot.slane %v7798_v25, %v10696_v30  ;;  %v18564_v42 = vpop.permute.xlu0 %8671  ;;  %vm18566_vm5 = vcmp.eq.s32.totalorder %v8912_v62, 1 }
 0x89f   : > { %10269 = vmatprep.subr.msk.bf16.mxu1 %vm18455_vm7, %v8682_v8  ;;  %v7953_v27 = vsel %vm21260_vm14, %v21256_v19, %v21259_v2  ;;  %vm18555_vm7 = vcmp.ne.s16.totalorder %v8418_v3, 0  ;;  %v7838_v3 = vrot.slane %v7798_v25, %v21265_v18  ;;  %v21266_v8 = vld [vmem:[#allocation17_spill] sm:$0xff]  ;;  %vm18585_vm14 = vcmp.ne.s16.totalorder %v8964_v1, 0 }
 0x8a0   : > { %v21262_v31 = vsel %vm18555_vm7, 4294967295, %v21261_v31  ;;  %9373 = vmatpush1.bf16.msra.mxu1 %v8821_v53  ;;  %10273 = vmatprep.subr.msk.bf16.mxu0 %vm18463_vm11, %v7953_v27  ;;  %v8006_v4 = vrot.slane %v21266_v8, %v11860_v9  ;;  %v8010_v29 = vrot.slane %v21266_v8, %v11863_v60  ;;  %v21267_v53 = vld [vmem:[#allocation24_spill] sm:$0xff]  ;;  %vm21268_vm11 = vmmov %vm21258_vm2  ;;  %vm18581_vm2 = vcmp.ne.s16.totalorder %v8960_v6, 0 }
 0x8a1   : > { %10083 = vmatprep.mubr.msk.bf16.mxu0 %vm21268_vm11, %v21267_v53  ;;  %vm18589_vm6 = vcmp.ne.s16.totalorder %v8422_v22, 0  ;;  %v21273_v52 = vmov 0  ;;  %v9125_v25 = vsel %vm9120_vm9, 65537, %v19798_v16  ;;  %v8093_v6 = vsel %vm18433_vm1, %v7952_v7, 0  ;;  %vm21282_vm1 = vmpackc.low %vm18527_vm15, %vm18523_vm4 }
 0x8a2   : > { %v21274_v52 = vsel %vm18589_vm6, 4294967295, %v21273_v52  ;;  %vm18601_vm11 = vcmp.eq.s32.totalorder %v9088_v58, 1  ;;  %vm18605_vm13 = vcmp.eq.s32.totalorder %v9092_v33, 1  ;;  %vm21279_vm7 = vcmp.ne.f32.partialorder %v10056_v23, 0.0  ;;  %9406 = vmatpush1.bf16.msra.mxu0 %v8093_v6  ;;  %v8846_v58 = vpop.permute.xlu1 %8845  ;;  %vm8941_vm9 = vmpackc.low %vm18566_vm5, %vm18508_vm12 }
 0x8a3   : > { %v7978_v22 = vsel %vm21279_vm7, 1, %v19798_v16  ;;  %vm21280_vm6 = vcmask 121856   ;;  %v18623_v55 = vsel %vm21282_vm1, 65537, %v19798_v16  ;;  %vm18625_vm10 = vcmp.eq.s32.totalorder %v7834_v12, 1 }
 0x8a4   : > { %v8132_v50 = vsel %vm21280_vm6, %v18063_v40, %v18181_v32  ;;  %vm21281_vm3 = vmmov %vm21280_vm6  ;;  %v18631_v40 = vpop.permute.xlu0 %8847  ;;  %vm18638_vm4 = vcmp.eq.s32.totalorder %v7838_v3, 1  ;;  %vm18642_vm15 = vcmp.eq.s32.totalorder %v8006_v4, 1  ;;  %vm18646_vm7 = vcmp.eq.s32.totalorder %v8010_v29, 1  ;;  %v10059_v33 = vld [vmem:[%s19506_s1 + $0x42] ss:$8 sm:$0x3] }
 0x8a5   : > { %v8133_v56 = vsel %vm21281_vm3, %v18181_v32, %v18184_v43  ;;  %v9140_v32 = vrot.slane %v9125_v25, %v10696_v30  ;;  %vm9121_vm3 = vmpackc.low %vm18605_vm13, %vm18601_vm11  ;;  %v8014_v3 = vrot.slane %v7978_v22, %v10696_v30  ;;  %v8018_v8 = vrot.slane %v7978_v22, %v21265_v18  ;;  %v10062_v22 = vld [vmem:[%s19506_s1 + $0x43] ss:$8 sm:$0x3] }
 0x8a6   : > { %10274 = vmatprep.subr.msk.bf16.mxu0 %vm18479_vm8, %v8133_v56  ;;  %vm21291_vm8 = vcmask 916480   ;;  %v8273_v4 = vsel %vm18491_vm0, %v8132_v50, 0  ;;  %vm21294_vm1 = vcmask 7168   ;;  %vm18682_vm0 = vcmp.ne.s16.totalorder %v8608_v51, 0  ;;  %vm7853_vm12 = vmpackc.low %vm18638_vm4, %vm18625_vm10 }
 0x8a7   : > { %v8861_v7 = vsel %vm21291_vm8, %v17572_v35, %v8846_v58  ;;  %vm21292_vm6 = vmmov %vm21291_vm8  ;;  %v21293_v35 = vld [vmem:[#allocation18_spill] sm:$0xff]  ;;  %v8312_v56 = vsel %vm21294_vm1, %v18251_v41, %v18311_v15  ;;  %v21296_v62 = vmov 0  ;;  %9408 = vmatpush1.bf16.msra.mxu0 %v8273_v4  ;;  %v9144_v19 = vrot.slane %v9125_v25, %v10750_v46 }
 0x8a8   : > { %v8862_v12 = vsel %vm21292_vm6, %v8846_v58, %v18631_v40  ;;  %v9001_v29 = vsel %vm18581_vm2, %v8861_v7, 0  ;;  %v8186_v53 = vrot.slane %v21293_v35, %v11860_v9  ;;  %v8190_v6 = vrot.slane %v21293_v35, %v11863_v60  ;;  %vm21295_vm8 = vmmov %vm21294_vm1  ;;  %v18699_v51 = vpop.permute.xlu0 %8851 }
 0x8a9   : > { %10270 = vmatprep.subr.msk.bf16.mxu1 %vm18585_vm14, %v8862_v12  ;;  %v8313_v36 = vsel %vm21295_vm8, %v18311_v15, %v18316_v47  ;;  %v21297_v62 = vsel %vm18682_vm0, 4294967295, %v21296_v62  ;;  %vm8156_vm2 = vcmp.ne.f32.partialorder %v10059_v33, 0.0  ;;  %v18693_v41 = vsel %vm8941_vm9, 65537, %v19798_v16  ;;  %v18695_v15 = vpop.permute.xlu1 %8849  ;;  %vm8032_vm13 = vmpackc.low %vm18646_vm7, %vm18642_vm15 }
 0x8aa   : > { %9375 = vmatpush1.bf16.msra.mxu1 %v9001_v29  ;;  %vm21298_vm14 = vnez %v21274_v52  ;;  %v18707_v25 = vsel %vm9121_vm3, 65537, %v19798_v16  ;;  %v8612_v37 = vrot.slane %v18324_v21, %v10750_v46  ;;  %v8792_v20 = vrot.slane %v18410_v17, %v10750_v46  ;;  %v21334_v21 = vld [vmem:[#allocation20_spill] sm:$0xff] }
 0x8ab   : > { %10275 = vmatprep.subr.msk.bf16.mxu0 %vm21298_vm14, %v8313_v36  ;;  %v7886_v52 = vrot.slane %v18623_v55, %v10696_v30  ;;  %v7890_v27 = vrot.slane %v18623_v55, %v10750_v46  ;;  %vm18725_vm5 = vcmp.eq.s32.totalorder %v8014_v3, 1  ;;  %vm18729_vm11 = vcmp.eq.s32.totalorder %v8018_v8, 1 }
 0x8ac   : > { %vm21303_vm9 = vnez %v21262_v31  ;;  %vm18738_vm6 = vcmp.eq.s32.totalorder %v8186_v53, 1  ;;  %vm18742_vm3 = vcmp.eq.s32.totalorder %v8190_v6, 1  ;;  %v8158_v7 = vsel %vm8156_vm2, 1, %v19798_v16  ;;  %v18768_v4 = vpop.permute.xlu0 %9027  ;;  %v10065_v6 = vld [vmem:[%s19506_s1 + $0x45] ss:$8 sm:$0x3] }
 0x8ad   : > { %v8453_v50 = vsel %vm21303_vm9, %v8312_v56, 0  ;;  %vm18751_vm1 = vcmp.ne.s16.totalorder %v8788_v26, 0  ;;  %v21308_v12 = vmov 0  ;;  %v8968_v31 = vrot.slane %v18693_v41, %v10696_v30  ;;  %v9026_v17 = vpop.permute.xlu1 %9025  ;;  %v21314_v26 = vld [vmem:[#allocation12_spill] sm:$0xff]  ;;  %vm8033_vm9 = vmpackc.low %vm18729_vm11, %vm18725_vm5 }
 0x8ae   : > { %v21309_v12 = vsel %vm18751_vm1, 4294967295, %v21308_v12  ;;  %9410 = vmatpush1.bf16.msra.mxu0 %v8453_v50  ;;  %vm18757_vm8 = vcmp.ne.s16.totalorder %v9140_v32, 0  ;;  %vm18761_vm14 = vcmp.ne.s16.totalorder %v9144_v19, 0  ;;  %v9148_v33 = vrot.slane %v18707_v25, %v10696_v30  ;;  %vm8212_vm4 = vmpackc.low %vm18742_vm3, %vm18738_vm6 }
 0x8af   : > { %9411 = vmatprep.subr.bf16.mxu0 %v21314_v26  ;;  %vm18770_vm2 = vcmp.ne.s16.totalorder %v8612_v37, 0  ;;  %v18780_v32 = vsel %vm7853_vm12, 65537, %v19798_v16  ;;  %v18788_v35 = vsel %vm8032_vm13, 65537, %v19798_v16  ;;  %vm8336_vm1 = vcmp.ne.f32.partialorder %v10062_v22, 0.0 }
 0x8b0   : > { %vm21317_vm0 = vcmask 908288   ;;  %v8194_v0 = vrot.slane %v8158_v7, %v10696_v30  ;;  %v8198_v11 = vrot.slane %v8158_v7, %v21265_v18  ;;  %vm18808_vm15 = vcmp.ne.s16.totalorder %v7886_v52, 0 }
 0x8b1   : > { %v9041_v23 = vsel %vm21317_vm0, %v17570_v57, %v9026_v17  ;;  %vm21318_vm10 = vmmov %vm21317_vm0  ;;  %vm18812_vm7 = vcmp.ne.s16.totalorder %v8792_v20, 0  ;;  %vm18816_vm0 = vcmp.ne.s16.totalorder %v7890_v27, 0  ;;  %vm21325_vm12 = vcmask 1039360   ;;  %v21329_v20 = vld [vmem:[#allocation23_spill] sm:$0xff]  ;;  %v18835_v50 = vpop.permute.xlu1 %9029 }
 0x8b2   : > { %v9042_v13 = vsel %vm21318_vm10, %v9026_v17, %v18768_v4  ;;  %v9181_v53 = vsel %vm18757_vm8, %v9041_v23, 0  ;;  %v8503_v36 = vsel %vm21325_vm12, %v18384_v49, %v18445_v10  ;;  %vm21326_vm13 = vmmov %vm21325_vm12  ;;  %vm18826_vm8 = vcmp.ne.s16.totalorder %v8968_v31, 0  ;;  %9412 = vmatpush1.bf16.msra.mxu0 %v21329_v20  ;;  %v18839_v49 = vpop.permute.xlu0 %9031 }
 0x8b3   : > { %10271 = vmatprep.subr.msk.bf16.mxu1 %vm18761_vm14, %v9042_v13  ;;  %v8504_v19 = vsel %vm21326_vm13, %v18445_v10, %v18449_v24  ;;  %v8972_v52 = vrot.slane %v18693_v41, %v10750_v46  ;;  %v8338_v27 = vsel %vm8336_vm1, 1, %v19798_v16  ;;  %v7894_v10 = vrot.slane %v18780_v32, %v10696_v30 }
 0x8b4   : > { %9377 = vmatpush1.bf16.msra.mxu1 %v9181_v53  ;;  %10276 = vmatprep.subr.msk.bf16.mxu0 %vm18770_vm2, %v8504_v19  ;;  %v8066_v7 = vrot.slane %v18788_v35, %v10696_v30  ;;  %v18851_v41 = vsel %vm8033_vm9, 65537, %v19798_v16  ;;  %v8217_v22 = vsel %vm8212_vm4, 65537, %v19798_v16  ;;  %vm18859_vm1 = vcmp.eq.s32.totalorder %v8194_v0, 1 }
 0x8b5   : > { %vm18863_vm14 = vcmp.eq.s32.totalorder %v8198_v11, 1  ;;  %v8366_v1 = vrot.slane %v21334_v21, %v11860_v9  ;;  %v8370_v8 = vrot.slane %v21334_v21, %v11863_v60  ;;  %vm21335_vm5 = vnez %v21297_v62 }
 0x8b6   : > { %v8643_v58 = vsel %vm21335_vm5, %v8503_v36, 0  ;;  %v9152_v55 = vrot.slane %v18707_v25, %v10750_v46  ;;  %v8374_v17 = vrot.slane %v8338_v27, %v10696_v30  ;;  %v8378_v26 = vrot.slane %v8338_v27, %v21265_v18  ;;  %vm8213_vm10 = vmpackc.low %vm18863_vm14, %vm18859_vm1 }
 0x8b7   : > { %9393 = vmatmul.mubr.bf16.vlgmr.msra.gmra.mrb[40].mxu1 %v18476_v44  ;;  %vm21336_vm11 = vcmask 924672   ;;  %vm18884_vm3 = vcmp.ne.s16.totalorder %v9148_v33, 0  ;;  %9414 = vmatpush1.bf16.msra.mxu0 %v8643_v58  ;;  %vm18888_vm2 = vcmp.ne.s16.totalorder %v8972_v52, 0  ;;  %v8070_v25 = vrot.slane %v18788_v35, %v10750_v46  ;;  %v18903_v33 = vpop.permute.xlu0 %7765 }
 0x8b8   : > { %v8683_v29 = vsel %vm21336_vm11, %v18505_v39, %v18560_v5  ;;  %vm21337_vm6 = vmmov %vm21336_vm11  ;;  %v18897_v39 = vld [vmem:[%s19507_s2 + $0x44] ss:$8 sps:$4 sm:$0xff]   ;;  %vm21342_vm9 = vcmask 130048   ;;  %v8074_v0 = vrot.slane %v18851_v41, %v10696_v30  ;;  %v8246_v11 = vrot.slane %v8217_v22, %v10696_v30 }
 0x8b9   : > { %v8684_v23 = vsel %vm21337_vm6, %v18560_v5, %v18564_v42  ;;  %10084 = vmatprep.mubr.msk.bf16.mxu1 %vm21342_vm9, %v18897_v39  ;;  %v7764_v5 = vpop.permute.xlu1 %7763  ;;  %v7898_v35 = vrot.slane %v18780_v32, %v10750_v46  ;;  %v8250_v53 = vrot.slane %v8217_v22, %v10750_v46  ;;  %vm21343_vm4 = vcmask 138240  }
 0x8ba   : > { %10277 = vmatprep.subr.msk.bf16.mxu0 %vm18812_vm7, %v8684_v23  ;;  %v7774_v36 = vsel %vm21343_vm4, %v17908_v14, %v7764_v5  ;;  %vm21344_vm7 = vmmov %vm21343_vm4  ;;  %vm18922_vm12 = vcmp.eq.s32.totalorder %v8366_v1, 1  ;;  %vm18926_vm13 = vcmp.eq.s32.totalorder %v8370_v8, 1  ;;  %vm21349_vm5 = vnez %v21309_v12  ;;  %v21384_v14 = vld [vmem:[#allocation8_spill] sm:$0xff] }
 0x8bb   : > { %v7775_v19 = vsel %vm21344_vm7, %v7764_v5, %v18903_v33  ;;  %v8823_v52 = vsel %vm21349_vm5, %v8683_v29, 0  ;;  %v7915_v27 = vsel %vm18808_vm15, %v7774_v36, 0  ;;  %vm18936_vm11 = vcmp.eq.s32.totalorder %v8374_v17, 1 }
 0x8bc   : > { %10280 = vmatprep.subr.msk.bf16.mxu1 %vm18816_vm0, %v7775_v19  ;;  %vm18940_vm6 = vcmp.eq.s32.totalorder %v8378_v26, 1  ;;  %vm21354_vm9 = vcmask 916480   ;;  %9416 = vmatpush1.bf16.msra.mxu0 %v8823_v52  ;;  %vm18950_vm15 = vcmp.ne.s16.totalorder %v7894_v10, 0  ;;  %v18960_v56 = vsel %vm8213_vm10, 65537, %v19798_v16  ;;  %v7944_v10 = vpop.permute.xlu0 %7943 }
 0x8bd   : > { %v8863_v21 = vsel %vm21354_vm9, %v18631_v40, %v18695_v15  ;;  %vm21355_vm4 = vmmov %vm21354_vm9  ;;  %9447 = vmatpush1.bf16.msra.mxu1 %v7915_v27  ;;  %vm8526_vm0 = vcmp.ne.f32.partialorder %v10065_v6, 0.0  ;;  %v7768_v40 = vpop.permute.xlu1 %7767  ;;  %vm18964_vm7 = vcmp.ne.s16.totalorder %v8066_v7, 0  ;;  %vm18968_vm5 = vcmp.ne.s16.totalorder %v9152_v55, 0  ;;  %v10071_v7 = vld [vmem:[%s19506_s1 + $0x47] ss:$8 sm:$0x3] }
 0x8be   : > { %v8864_v12 = vsel %vm21355_vm4, %v18695_v15, %v18699_v51  ;;  %v8556_v31 = vrot.slane %v17735_v34, %v11860_v9  ;;  %v8560_v3 = vrot.slane %v17735_v34, %v11863_v60  ;;  %vm18980_vm14 = vcmp.ne.s16.totalorder %v8070_v25, 0  ;;  %vm8393_vm4 = vmpackc.low %vm18940_vm6, %vm18936_vm11 }
 0x8bf   : > { %10278 = vmatprep.subr.msk.bf16.mxu0 %vm18888_vm2, %v8864_v12  ;;  %vm18984_vm2 = vcmp.ne.s16.totalorder %v8246_v11, 0  ;;  %vm18988_vm10 = vcmp.ne.s16.totalorder %v7898_v35, 0  ;;  %vm18992_vm9 = vcmp.ne.s16.totalorder %v8250_v53, 0  ;;  %v21368_v55 = vmov 0  ;;  %vm21375_vm6 = vmpackc.low %vm18926_vm13, %vm18922_vm12 }
 0x8c0   : > { %v21369_v55 = vsel %vm18992_vm9, 4294967295, %v21368_v55  ;;  %v9003_v34 = vsel %vm18826_vm8, %v8863_v21, 0  ;;  %v8254_v17 = vrot.slane %v18960_v56, %v10696_v30  ;;  %v8078_v26 = vrot.slane %v18851_v41, %v10750_v46  ;;  %v10068_v35 = vld [vmem:[%s19506_s1 + $0x46] ss:$8 sm:$0x3] }
 0x8c1   : > { %v8528_v29 = vsel %vm8526_vm0, 1, %v19798_v16  ;;  %vm21370_vm1 = vcmask 908288   ;;  %vm21372_vm11 = vcmask 130048   ;;  %9418 = vmatpush1.bf16.msra.mxu0 %v9003_v34  ;;  %vm19016_vm8 = vcmp.ne.s16.totalorder %v8074_v0, 0 }
 0x8c2   : > { %v9043_v23 = vsel %vm21370_vm1, %v18768_v4, %v18835_v50  ;;  %vm21371_vm9 = vmmov %vm21370_vm1  ;;  %v7954_v37 = vsel %vm21372_vm11, %v21259_v2, %v7944_v10  ;;  %v8397_v41 = vsel %vm21375_vm6, 65537, %v19798_v16  ;;  %v7946_v4 = vpop.permute.xlu1 %7945  ;;  %v8398_v5 = vsel %vm8393_vm4, 65537, %v19798_v16 }
 0x8c3   : > { %v9044_v13 = vsel %vm21371_vm9, %v18835_v50, %v18839_v49  ;;  %v7948_v50 = vpop.permute.xlu0 %7947  ;;  %vm19029_vm0 = vcmp.eq.s32.totalorder %v8556_v31, 1  ;;  %vm19033_vm1 = vcmp.eq.s32.totalorder %v8560_v3, 1  ;;  %v8736_v11 = vrot.slane %v17730_v38, %v11860_v9  ;;  %vm21380_vm12 = vmmov %vm21372_vm11 }
 0x8c4   : > { %10279 = vmatprep.subr.msk.bf16.mxu0 %vm18968_vm5, %v9044_v13  ;;  %v7955_v53 = vsel %vm21380_vm12, %v7944_v10, %v7946_v4  ;;  %v8740_v6 = vrot.slane %v17730_v38, %v11863_v60  ;;  %v8564_v36 = vrot.slane %v8528_v29, %v10696_v30  ;;  %v8568_v19 = vrot.slane %v8528_v29, %v21265_v18 }
 0x8c5   : > { %v9183_v20 = vsel %vm18884_vm3, %v9043_v23, 0  ;;  %v8095_v32 = vsel %vm18964_vm7, %v7954_v37, 0  ;;  %10281 = vmatprep.subr.msk.bf16.mxu1 %vm18980_vm14, %v7955_v53  ;;  %vm19053_vm13 = vcmp.ne.s16.totalorder %v8078_v26, 0  ;;  %v8426_v27 = vrot.slane %v8397_v41, %v10696_v30  ;;  %vm8582_vm7 = vmpackc.low %vm19033_vm1, %vm19029_vm0  ;;  %v21397_v23 = vld [vmem:[#allocation22_spill] sm:$0xff] }
 0x8c6   : > { %vm21383_vm5 = vcmask 138240   ;;  %9420 = vmatpush1.bf16.msra.mxu0 %v9183_v20  ;;  %9449 = vmatpush1.bf16.msra.mxu1 %v8095_v32  ;;  %v8258_v62 = vrot.slane %v18960_v56, %v10750_v46  ;;  %vm8706_vm3 = vcmp.ne.f32.partialorder %v10068_v35, 0.0  ;;  %v8124_v21 = vpop.permute.xlu1 %8123  ;;  %v8434_v12 = vrot.slane %v8398_v5, %v10696_v30 }
 0x8c7   : > { %v7776_v38 = vsel %vm21383_vm5, %v18903_v33, %v7768_v40  ;;  %vm21385_vm9 = vmmov %vm21383_vm5  ;;  %v8430_v15 = vrot.slane %v8397_v41, %v10750_v46  ;;  %v8438_v33 = vrot.slane %v8398_v5, %v10750_v46  ;;  %vm19073_vm14 = vcmp.eq.s32.totalorder %v8736_v11, 1  ;;  %v8126_v10 = vpop.permute.xlu0 %8125  ;;  %v10074_v11 = vld [vmem:[%s19506_s1 + $0x90] ss:$8 sm:$0x3] }
 0x8c8   : > { %v7777_v22 = vsel %vm21385_vm9, %v7768_v40, %v21384_v14  ;;  %vm21388_vm4 = vcmask 121856   ;;  %vm19083_vm11 = vcmp.eq.s32.totalorder %v8564_v36, 1  ;;  %vm19087_vm6 = vcmp.eq.s32.totalorder %v8568_v19, 1  ;;  %v21413_v19 = vld [vmem:[#allocation26_spill] sm:$0xff] }
 0x8c9   : > { %10288 = vmatprep.subr.msk.bf16.mxu0 %vm18988_vm10, %v7777_v22  ;;  %v8134_v56 = vsel %vm21388_vm4, %v18184_v43, %v8124_v21  ;;  %vm19079_vm10 = vcmp.eq.s32.totalorder %v8740_v6, 1  ;;  %v7917_v43 = vsel %vm18950_vm15, %v7776_v38, 0  ;;  %vm21395_vm12 = vmmov %vm21388_vm4  ;;  %9436 = vmatmul.mubr.bf16.vlgmr.msra.gmra.mrb[44].mxu0 %v18476_v44  ;;  %v8708_v26 = vsel %vm8706_vm3, 1, %v19798_v16 }
 0x8ca   : > { %v8275_v58 = vsel %vm18984_vm2, %v8134_v56, 0  ;;  %v8135_v34 = vsel %vm21395_vm12, %v8124_v21, %v8126_v10  ;;  %vm21396_vm5 = vcmask 130048   ;;  %vm21399_vm4 = vnez %v21369_v55  ;;  %9490 = vmatpush1.bf16.msra.mxu0 %v7917_v43  ;;  %v8128_v37 = vpop.permute.xlu1 %8127  ;;  %v21431_v43 = vld [vmem:[#allocation16_spill] sm:$0xff] }
 0x8cb   : > { %v7956_v29 = vsel %vm21396_vm5, %v7946_v4, %v7948_v50  ;;  %vm21398_vm9 = vmmov %vm21396_vm5  ;;  %10282 = vmatprep.subr.msk.bf16.mxu1 %vm21399_vm4, %v8135_v34  ;;  %vm19107_vm15 = vcmp.ne.s16.totalorder %v8254_v17, 0  ;;  %v8587_v8 = vsel %vm8582_vm7, 65537, %v19798_v16  ;;  %vm19119_vm2 = vcmp.ne.s16.totalorder %v8426_v27, 0  ;;  %v8304_v4 = vpop.permute.xlu0 %8303  ;;  %10085 = vmatprep.mubr.msk.bf16.mxu0 %vm21396_vm5, %v18897_v39  ;;  %v21440_v17 = vld [vmem:[#allocation25_spill] sm:$0xff] }
 0x8cc   : > { %v7957_v13 = vsel %vm21398_vm9, %v7948_v50, %v21397_v23  ;;  %9451 = vmatpush1.bf16.msra.mxu1 %v8275_v58  ;;  %vm19123_vm3 = vcmp.ne.s16.totalorder %v8258_v62, 0  ;;  %vm19127_vm12 = vcmp.ne.s16.totalorder %v8430_v15, 0  ;;  %vm8886_vm1 = vcmp.ne.f32.partialorder %v10071_v7, 0.0 }
 0x8cd   : > { %10289 = vmatprep.subr.msk.bf16.mxu0 %vm19053_vm13, %v7957_v13  ;;  %vm19135_vm13 = vcmp.ne.s16.totalorder %v8434_v12, 0  ;;  %v8916_v5 = vrot.slane %v17817_v61, %v11860_v9  ;;  %v8920_v2 = vrot.slane %v17817_v61, %v11863_v60  ;;  %v8744_v0 = vrot.slane %v8708_v26, %v10696_v30 }
 0x8ce   : > { %v8097_v35 = vsel %vm19016_vm8, %v7956_v29, 0  ;;  %v8616_v53 = vrot.slane %v8587_v8, %v10696_v30  ;;  %vm19156_vm9 = vcmp.ne.s16.totalorder %v8438_v33, 0  ;;  %v8748_v61 = vrot.slane %v8708_v26, %v21265_v18  ;;  %v8306_v25 = vpop.permute.xlu1 %8305  ;;  %vm21416_vm8 = vmpackc.low %vm19079_vm10, %vm19073_vm14 }
 0x8cf   : > { %vm21412_vm4 = vcmask 121856   ;;  %vm21415_vm0 = vcmask 7168   ;;  %9492 = vmatpush1.bf16.msra.mxu0 %v8097_v35  ;;  %v8888_v39 = vsel %vm8886_vm1, 1, %v19798_v16  ;;  %v8620_v52 = vrot.slane %v8587_v8, %v10750_v46  ;;  %v8308_v14 = vpop.permute.xlu0 %8307  ;;  %v21478_v35 = vld [vmem:[#allocation40_spill] sm:$0xff] }
 0x8d0   : > { %v8136_v36 = vsel %vm21412_vm4, %v8126_v10, %v8128_v37  ;;  %vm21414_vm7 = vmmov %vm21412_vm4  ;;  %v8314_v32 = vsel %vm21415_vm0, %v18316_v47, %v8304_v4  ;;  %v8767_v27 = vsel %vm21416_vm8, 65537, %v19798_v16  ;;  %vm9066_vm1 = vcmp.ne.f32.partialorder %v10074_v11, 0.0 }
 0x8d1   : > { %v8137_v20 = vsel %vm21414_vm7, %v8128_v37, %v21413_v19  ;;  %vm21417_vm0 = vmpackc.low %vm19087_vm6, %vm19083_vm11  ;;  %vm21418_vm7 = vcmask 7168   ;;  %vm19188_vm5 = vcmp.eq.s32.totalorder %v8920_v2, 1  ;;  %vm19192_vm14 = vcmp.eq.s32.totalorder %v8744_v0, 1  ;;  %v21476_v2 = vld [vmem:[#allocation39_spill] sm:$0xff] }
 0x8d2   : > { %10290 = vmatprep.subr.msk.bf16.mxu0 %vm19123_vm3, %v8137_v20  ;;  %v8588_v47 = vsel %vm21417_vm0, 65537, %v19798_v16  ;;  %v8315_v38 = vsel %vm21418_vm7, %v8304_v4, %v8306_v25  ;;  %vm19184_vm3 = vcmp.eq.s32.totalorder %v8916_v5, 1  ;;  %v8277_v12 = vsel %vm19107_vm15, %v8136_v36, 0  ;;  %vm21425_vm10 = vmmov %vm21418_vm7  ;;  %v8494_v7 = vpop.permute.xlu1 %8493  ;;  %v21441_v5 = vld [vmem:[#allocation11_spill] sm:$0xff] }
 0x8d3   : > { %v8455_v15 = vsel %vm19119_vm2, %v8314_v32, 0  ;;  %10283 = vmatprep.subr.msk.bf16.mxu1 %vm19127_vm12, %v8315_v38  ;;  %v8924_v33 = vrot.slane %v8888_v39, %v10696_v30  ;;  %v8928_v40 = vrot.slane %v8888_v39, %v21265_v18  ;;  %v8316_v56 = vsel %vm21425_vm10, %v8306_v25, %v8308_v14  ;;  %vm21426_vm11 = vmmov %vm21418_vm7  ;;  %9494 = vmatpush1.bf16.msra.mxu0 %v8277_v12  ;;  %v8496_v26 = vpop.permute.xlu0 %8495  ;;  %v21456_v39 = vld [vmem:[#allocation21_spill] sm:$0xff] }
 0x8d4   : > { %v8317_v10 = vsel %vm21426_vm11, %v8308_v14, %v18109_v54  ;;  %9453 = vmatpush1.bf16.msra.mxu1 %v8455_v15  ;;  %vm19207_vm6 = vcmp.eq.s32.totalorder %v8748_v61, 1  ;;  %v9068_v31 = vsel %vm9066_vm1, 1, %v19798_v16  ;;  %vm19213_vm15 = vcmp.ne.s16.totalorder %v8616_v53, 0  ;;  %vm8942_vm12 = vmpackc.low %vm19188_vm5, %vm19184_vm3  ;;  %v21484_v15 = vld [vmem:[#allocation10_spill] sm:$0xff] }
 0x8d5   : > { %9454 = vmatprep.subr.bf16.mxu1 %v21431_v43  ;;  %10291 = vmatprep.subr.msk.bf16.mxu0 %vm19156_vm9, %v8317_v10  ;;  %vm19220_vm2 = vcmp.ne.s16.totalorder %v8620_v52, 0  ;;  %v8796_v58 = vrot.slane %v8767_v27, %v10696_v30  ;;  %v8800_v34 = vrot.slane %v8767_v27, %v10750_v46  ;;  %v8624_v29 = vrot.slane %v8588_v47, %v10696_v30  ;;  %vm8763_vm9 = vmpackc.low %vm19207_vm6, %vm19192_vm14  ;;  %v21486_v10 = vld [vmem:[#allocation35_spill] sm:$0xff] }
 0x8d6   : > { %v8628_v23 = vrot.slane %v8588_v47, %v10750_v46  ;;  %v9096_v13 = vrot.slane %v17771_v63, %v11860_v9  ;;  %v9100_v57 = vrot.slane %v17771_v63, %v11863_v60  ;;  %v8457_v8 = vsel %vm19135_vm13, %v8316_v56, 0  ;;  %v8676_v50 = vpop.permute.xlu1 %8675 }
 0x8d7   : > { %vm19242_vm4 = vcmp.eq.s32.totalorder %v8924_v33, 1  ;;  %vm19246_vm8 = vcmp.eq.s32.totalorder %v8928_v40, 1  ;;  %v9104_v9 = vrot.slane %v9068_v31, %v10696_v30  ;;  %vm21438_vm0 = vcmask 1039360   ;;  %9496 = vmatpush1.bf16.msra.mxu0 %v8457_v8  ;;  %v8674_v0 = vpop.permute.xlu0 %8673 }
 0x8d8   : > { %v8505_v60 = vsel %vm21438_vm0, %v18449_v24, %v8494_v7  ;;  %vm21439_vm1 = vmmov %vm21438_vm0  ;;  %9455 = vmatpush1.bf16.msra.mxu1 %v21440_v17  ;;  %v8947_v41 = vsel %vm8942_vm12, 65537, %v19798_v16  ;;  %v9108_v4 = vrot.slane %v9068_v31, %v21265_v18  ;;  %9497 = vmatprep.subr.bf16.mxu0 %v21441_v5  ;;  %vm19260_vm13 = vcmp.ne.s16.totalorder %v8796_v58, 0 }
 0x8d9   : > { %v8506_v63 = vsel %vm21439_vm1, %v8494_v7, %v8496_v26  ;;  %vm19264_vm7 = vcmp.ne.s16.totalorder %v8800_v34, 0  ;;  %vm19268_vm3 = vcmp.ne.s16.totalorder %v8624_v29, 0  ;;  %v8768_v18 = vsel %vm8763_vm9, 65537, %v19798_v16  ;;  %vm8943_vm5 = vmpackc.low %vm19246_vm8, %vm19242_vm4 }
 0x8da   : > { %10284 = vmatprep.subr.msk.bf16.mxu1 %vm19220_vm2, %v8506_v63  ;;  %vm19282_vm10 = vcmp.eq.s32.totalorder %v9096_v13, 1  ;;  %vm19286_vm11 = vcmp.eq.s32.totalorder %v9100_v57, 1  ;;  %v8645_v6 = vsel %vm19213_vm15, %v8505_v60, 0  ;;  %vm19292_vm2 = vcmp.ne.s16.totalorder %v8628_v23, 0  ;;  %v8498_v27 = vpop.permute.xlu1 %8497  ;;  %vm21461_vm1 = vmmov %vm21438_vm0 }
 0x8db   : > { %v8976_v36 = vrot.slane %v8947_v41, %v10696_v30  ;;  %v8980_v19 = vrot.slane %v8947_v41, %v10750_v46  ;;  %vm21454_vm14 = vcmask 924672   ;;  %9498 = vmatpush1.bf16.msra.mxu0 %v21456_v39  ;;  %vm19302_vm12 = vcmp.eq.s32.totalorder %v9104_v9, 1  ;;  %vm9122_vm9 = vmpackc.low %vm19286_vm11, %vm19282_vm10  ;;  %v8856_v62 = vpop.permute.xlu0 %8855  ;;  %v21482_v39 = vld [vmem:[#allocation31_spill] sm:$0xff] }
 0x8dc   : > { %v8685_v20 = vsel %vm21454_vm14, %v18564_v42, %v8674_v0  ;;  %vm21455_vm6 = vmmov %vm21454_vm14  ;;  %9457 = vmatpush1.bf16.msra.mxu1 %v8645_v6  ;;  %vm19306_vm15 = vcmp.eq.s32.totalorder %v9108_v4, 1  ;;  %v8804_v47 = vrot.slane %v8768_v18, %v10696_v30  ;;  %v8808_v42 = vrot.slane %v8768_v18, %v10750_v46 }
 0x8dd   : > { %v8686_v32 = vsel %vm21455_vm6, %v8674_v0, %v8676_v50  ;;  %v8948_v38 = vsel %vm8943_vm5, 65537, %v19798_v16  ;;  %v8507_v14 = vsel %vm21438_vm0, %v8496_v26, %v8498_v27  ;;  %v8519_v22 = vsel %vm21461_vm1, %v8498_v27, %v17646_v59  ;;  %vm9123_vm8 = vmpackc.low %vm19306_vm15, %vm19302_vm12 }
 0x8de   : > { %10285 = vmatprep.subr.msk.bf16.mxu1 %vm19264_vm7, %v8686_v32  ;;  %v8825_v21 = vsel %vm19260_vm13, %v8685_v20, 0  ;;  %v8647_v12 = vsel %vm19268_vm3, %v8507_v14, 0  ;;  %10292 = vmatprep.subr.msk.bf16.mxu0 %vm19292_vm2, %v8519_v22  ;;  %vm19333_vm4 = vcmp.ne.s16.totalorder %v8976_v36, 0  ;;  %vm8996_vm7 = vcmp.ne.s16.totalorder %v8980_v19, 0  ;;  %v8854_v56 = vpop.permute.xlu1 %8853  ;;  %vm21468_vm11 = vmmov %vm21455_vm6  ;;  %v21480_v36 = vld [vmem:[#allocation30_spill] sm:$0xff] }
 0x8df   : > { %9500 = vmatpush1.bf16.msra.mxu0 %v8647_v12  ;;  %v8984_v59 = vrot.slane %v8948_v38, %v10696_v30  ;;  %v9127_v33 = vsel %vm9122_vm9, 65537, %v19798_v16  ;;  %v8988_v40 = vrot.slane %v8948_v38, %v10750_v46  ;;  %vm19344_vm13 = vcmp.ne.s16.totalorder %v8804_v47, 0  ;;  %v8678_v3 = vpop.permute.xlu0 %8677  ;;  %vm21469_vm2 = vmmov %vm21455_vm6 }
 0x8e0   : > { %9459 = vmatpush1.bf16.msra.mxu1 %v8825_v21  ;;  %vm8818_vm3 = vcmp.ne.s16.totalorder %v8808_v42, 0  ;;  %vm21466_vm5 = vcmask 916480   ;;  %v9128_v7 = vsel %vm9123_vm8, 65537, %v19798_v16  ;;  %v8687_v54 = vsel %vm21468_vm11, %v8676_v50, %v8678_v3 }
 0x8e1   : > { %v8865_v1 = vsel %vm21466_vm5, %v18699_v51, %v8854_v56  ;;  %vm21467_vm10 = vmmov %vm21466_vm5  ;;  %v8699_v58 = vsel %vm21469_vm2, %v8678_v3, %v17648_v45  ;;  %v9156_v34 = vrot.slane %v9127_v33, %v10696_v30  ;;  %v8827_v26 = vsel %vm19344_vm13, %v8687_v54, 0 }
 0x8e2   : > { %v8866_v31 = vsel %vm21467_vm10, %v8854_v56, %v8856_v62  ;;  %v9005_v43 = vsel %vm19333_vm4, %v8865_v1, 0  ;;  %10293 = vmatprep.subr.msk.bf16.mxu0 %vm8818_vm3, %v8699_v58  ;;  %vm8997_vm14 = vcmp.ne.s16.totalorder %v8984_v59, 0  ;;  %vm8998_vm6 = vcmp.ne.s16.totalorder %v8988_v40, 0  ;;  %v8858_v51 = vpop.permute.xlu1 %8857  ;;  %vm21470_vm12 = vmmov %vm21466_vm5 }
 0x8e3   : > { %10286 = vmatprep.subr.msk.bf16.mxu1 %vm8996_vm7, %v8866_v31  ;;  %v9160_v16 = vrot.slane %v9127_v33, %v10750_v46  ;;  %9502 = vmatpush1.bf16.msra.mxu0 %v8827_v26  ;;  %v9164_v29 = vrot.slane %v9128_v7, %v10696_v30  ;;  %v9168_v23 = vrot.slane %v9128_v7, %v10750_v46  ;;  %vm21471_vm15 = vmmov %vm21466_vm5  ;;  %v9034_v57 = vpop.permute.xlu0 %9033  ;;  %vm9175_vm9 = vcmp.ne.s16.totalorder %v9156_v34, 0  ;;  %v21490_v26 = vld [vmem:[#allocation34_spill] sm:$0xff] }
 0x8e4   : > { %9461 = vmatpush1.bf16.msra.mxu1 %v9005_v43  ;;  %v8867_v45 = vsel %vm21470_vm12, %v8856_v62, %v8858_v51  ;;  %v8879_v13 = vsel %vm21471_vm15, %v8858_v51, %v17664_v28  ;;  %vm21472_vm0 = vcmask 908288   ;;  %v21477_v24 = vmax.f32 %v21476_v2, 0.0  ;;  %v21488_v43 = vld [vmem:[#allocation28_spill] sm:$0xff]  ;;  %v21496_v2 = vld [vmem:[#allocation33_spill] sm:$0xff] }
 0x8e5   : > { %v9007_v8 = vsel %vm8997_vm14, %v8867_v45, 0  ;;  %10294 = vmatprep.subr.msk.bf16.mxu0 %vm8998_vm6, %v8879_v13  ;;  %v9045_v37 = vsel %vm21472_vm0, %v18839_v49, %v9034_v57  ;;  %vm9176_vm1 = vcmp.ne.s16.totalorder %v9160_v16, 0  ;;  %vm9177_vm4 = vcmp.ne.s16.totalorder %v9164_v29, 0  ;;  %vm21473_vm7 = vmmov %vm21472_vm0 }
 0x8e6   : > { %v9036_v55 = vpop.permute.xlu1 %9035  ;;  %vm9178_vm8 = vcmp.ne.s16.totalorder %v9168_v23, 0  ;;  %v9185_v9 = vsel %vm9175_vm9, %v9045_v37, 0  ;;  %vm21474_vm13 = vmmov %vm21472_vm0  ;;  %v21479_v53 = vmax.f32 %v21478_v35, 0.0  ;;  %v21481_v19 = vmax.f32 %v21480_v36, 0.0 }
 0x8e7   : > { %9504 = vmatpush1.bf16.msra.mxu0 %v9007_v8  ;;  %v9046_v30 = vsel %vm21473_vm7, %v9034_v57, %v9036_v55  ;;  %v9038_v46 = vpop.permute.xlu0 %9037  ;;  %vm21475_vm3 = vmmov %vm21472_vm0  ;;  %v21483_v25 = vmax.f32 %v21482_v39, 0.0  ;;  %v21485_v59 = vmax.f32 %v21484_v15, 0.0  ;;  %v21487_v1 = vmax.f32 %v21486_v10, 0.0  ;;  %v21504_v10 = vld [vmem:[#allocation9_spill] sm:$0xff] }
 0x8e8   : > { %v9047_v60 = vsel %vm21474_vm13, %v9036_v55, %v9038_v46  ;;  %v9059_v28 = vsel %vm21475_vm3, %v9038_v46, %v17666_v48  ;;  %10287 = vmatprep.subr.msk.bf16.mxu1 %vm9176_vm1, %v9046_v30  ;;  %v21489_v54 = vmax.f32 %v21488_v43, 0.0  ;;  %v21491_v16 = vmax.f32 %v21490_v26, 0.0  ;;  %v21492_v46 = vld [vmem:[#allocation37_spill] sm:$0xff] }
 0x8e9   : > { %v9187_v63 = vsel %vm9177_vm4, %v9047_v60, 0  ;;  %10295 = vmatprep.subr.msk.bf16.mxu0 %vm9178_vm8, %v9059_v28  ;;  %9463 = vmatpush1.bf16.msra.mxu1 %v9185_v9  ;;  %v21493_v9 = vmax.f32 %v21492_v46, 0.0  ;;  %vm21516_vm5 = vcmask 130048   ;;  %vm9604_vm10 = vcmask 15360  }
 0x8ea   : > { %vm21517_vm11 = vcmask 7168   ;;  %vm9607_vm2 = vcmask 23552   ;;  %vm9610_vm6 = vcmask 31744   ;;  %vm21519_vm12 = vmmov %vm21516_vm5  ;;  %vm9841_vm4 = vcmask 39936  }
 0x8eb   : > { %9506 = vmatpush1.bf16.msra.mxu0 %v9187_v63  ;;  %vm21518_vm14 = vmmov %vm21517_vm11 }
 0x8ec   : > { %9479 = vmatmul.mubr.bf16.vlgmr.msra.gmra.mrb[44].mxu1 %v18476_v44  ;;  %vm21520_vm15 = vmmov %vm21516_vm5 }
 0x8ed   : > { %vm21521_vm9 = vmmov %vm21516_vm5 }
 0x8ee   : > { %9522 = vmatmul.mubr.bf16.vlgmr.msra.gmra.mrb[48].mxu0 %v18476_v44  ;;  %v19374_v49 = vpop.permute.xlu1 %9297  ;;  %vm21522_vm0 = vmmov %vm21516_vm5 }
 0x8ef   : > { %v19377_v50 = vpop.permute.xlu0 %9302  ;;  %vm21523_vm1 = vmmov %vm21522_vm0 }
 0x96f   : > { %v9351_v17 = vpop.f32.mrb[40].mxu0 }
 0x970   : > { %v9352_v41 = vadd.f32 %v9351_v17, %v19374_v49  ;;  %v9353_v4 = vpop.f32.mrb[41].mxu0  ;;  %v21494_v17 = vld [vmem:[#allocation36_spill] sm:$0xff] }
 0x971   : > { %v9354_v5 = vadd.f32 %v9353_v4, %v19374_v49  ;;  %v9355_v48 = vpop.f32.mrb[42].mxu0 }
 0x972   : > { %v9532_v0 = vadd.f32 %v9352_v41, %v21477_v24  ;;  %v9356_v11 = vadd.f32 %v9355_v48, %v19377_v50  ;;  %v9357_v18 = vpop.f32.mrb[43].mxu0  ;;  %v21495_v41 = vmax.f32 %v21494_v17, 0.0  ;;  %v21497_v24 = vmax.f32 %v21496_v2, 0.0 }
 0x973   : > { %v9533_v44 = vadd.f32 %v9354_v5, %v21479_v53  ;;  %v9358_v6 = vadd.f32 %v9357_v18, %v19377_v50  ;;  %v21498_v18 = vld [vmem:[#allocation29_spill] sm:$0xff] }
 0x974   : > { %v9552_v61 = vmax.f32 %v9532_v0, 0.0  ;;  %v9542_v20 = vadd.f32 %v9356_v11, %v21481_v19  ;;  %v21499_v35 = vmax.f32 %v21498_v18, 0.0  ;;  %v9718_v18 = vld [vmem:[%s19512_s7 + $0x10] sm:$0xff] }
 0x975   : > { %v9553_v32 = vmax.f32 %v9533_v44, 0.0  ;;  %v9543_v52 = vadd.f32 %v9358_v6, %v21483_v25 }
 0x976   : > { %v9562_v27 = vmax.f32 %v9542_v20, 0.0 }
 0x977   : > { %v9563_v47 = vmax.f32 %v9543_v52, 0.0  ;;  %v19390_v42 = vadd.f32 %v9553_v32, %v9552_v61 }
 0x979   : > { %v19392_v38 = vadd.f32 %v9563_v47, %v9562_v27 }
 0x98a   : > { %v9394_v14 = vpop.f32.mrb[40].mxu1 }
 0x98b   : > { %v9395_v22 = vadd.f32 %v9394_v14, %v19374_v49  ;;  %v9396_v62 = vpop.f32.mrb[41].mxu1  ;;  %v21500_v14 = vld [vmem:[#allocation42_spill] sm:$0xff] }
 0x98c   : > { %v9397_v21 = vadd.f32 %v9396_v62, %v19374_v49  ;;  %v9398_v12 = vpop.f32.mrb[42].mxu1 }
 0x98d   : > { %v9534_v33 = vadd.f32 %v9395_v22, %v21485_v59  ;;  %v9399_v40 = vadd.f32 %v9398_v12, %v19377_v50  ;;  %v9400_v56 = vpop.f32.mrb[43].mxu1  ;;  %v21501_v22 = vmax.f32 %v21500_v14, 0.0 }
 0x98e   : > { %v9535_v31 = vadd.f32 %v9397_v21, %v21487_v1  ;;  %v9401_v3 = vadd.f32 %v9400_v56, %v19377_v50  ;;  %v21505_v1 = vmax.f32 %v21504_v10, 0.0 }
 0x98f   : > { %v9554_v7 = vmax.f32 %v9534_v33, 0.0  ;;  %v9544_v58 = vadd.f32 %v9399_v40, %v21489_v54  ;;  %v21502_v33 = vld [vmem:[#allocation13_spill] sm:$0xff] }
 0x990   : > { %v9555_v34 = vmax.f32 %v9535_v31, 0.0  ;;  %v9545_v51 = vadd.f32 %v9401_v3, %v21491_v16  ;;  %v21503_v40 = vmax.f32 %v21502_v33, 0.0 }
 0x991   : > { %v9564_v29 = vmax.f32 %v9544_v58, 0.0  ;;  %v21506_v58 = vld [vmem:[#allocation32_spill] sm:$0xff] }
 0x992   : > { %v9565_v23 = vmax.f32 %v9545_v51, 0.0  ;;  %v9578_v45 = vadd.f32 %v9555_v34, %v9554_v7  ;;  %v21507_v34 = vmax.f32 %v21506_v58, 0.0 }
 0x994   : > { %9579 = vadd.xlane.f32.xlu0 %v9578_v45  ;;  %v9581_v13 = vadd.f32 %v9565_v23, %v9564_v29 }
 0x996   : > { %9582 = vadd.xlane.f32.xlu1 %v9581_v13  ;;  %v21510_v13 = vld [vmem:[#allocation6_spill] sm:$0xff] }
 0x99c   : > { %v9437_v57 = vpop.f32.mrb[44].mxu0 }
 0x99d   : > { %v9438_v8 = vadd.f32 %v9437_v57, %v19374_v49  ;;  %v9439_v37 = vpop.f32.mrb[45].mxu0  ;;  %v21511_v57 = vmax.f32 %v21510_v13, 0.0 }
 0x99e   : > { %v9440_v55 = vadd.f32 %v9439_v37, %v19374_v49  ;;  %v9441_v30 = vpop.f32.mrb[46].mxu0  ;;  %v21512_v37 = vld [vmem:[#allocation14_spill] sm:$0xff] }
 0x99f   : > { %v9536_v60 = vadd.f32 %v9438_v8, %v21493_v9  ;;  %v9442_v28 = vadd.f32 %v9441_v30, %v19377_v50  ;;  %v9443_v63 = vpop.f32.mrb[47].mxu0 }
 0x9a0   : > { %v9537_v4 = vadd.f32 %v9440_v55, %v21495_v41  ;;  %v9444_v5 = vadd.f32 %v9443_v63, %v19377_v50  ;;  %v21513_v55 = vmax.f32 %v21512_v37, 0.0 }
 0x9a1   : > { %v9556_v48 = vmax.f32 %v9536_v60, 0.0  ;;  %v9546_v0 = vadd.f32 %v9442_v28, %v21497_v24  ;;  %v21514_v60 = vld [vmem:[#allocation41_spill] sm:$0xff] }
 0x9a2   : > { %v9557_v11 = vmax.f32 %v9537_v4, 0.0  ;;  %v9547_v53 = vadd.f32 %v9444_v5, %v21499_v35  ;;  %v21515_v28 = vmax.f32 %v21514_v60, 0.0  ;;  %v9618_v24 = vld [vmem:[%s19510_s5 + $0x8] sm:$0xff]  ;;  %v9719_v35 = vld [vmem:[%s19512_s7 + $0x18] sm:$0xff] }
 0x9a3   : > { %v9566_v44 = vmax.f32 %v9546_v0, 0.0  ;;  %v9617_v0 = vld [vmem:[%s19510_s5] sm:$0xff] }
 0x9a4   : > { %v9567_v6 = vmax.f32 %v9547_v53, 0.0  ;;  %v9584_v61 = vadd.f32 %v9557_v11, %v9556_v48  ;;  %v9716_v11 = vld [vmem:[%s19512_s7] sm:$0xff] }
 0x9a6   : > { %v9587_v36 = vadd.f32 %v9567_v6, %v9566_v44 }
 0x9bf   : > { %v9480_v19 = vpop.f32.mrb[44].mxu1 }
 0x9c0   : > { %v9481_v20 = vadd.f32 %v9480_v19, %v19374_v49  ;;  %v9482_v39 = vpop.f32.mrb[45].mxu1 }
 0x9c1   : > { %v9523_v32 = vpop.f32.mrb[48].mxu0  ;;  %v9483_v52 = vadd.f32 %v9482_v39, %v19374_v49  ;;  %v9484_v47 = vpop.f32.mrb[46].mxu1 }
 0x9c2   : > { %v9524_v25 = vadd.f32 %v9523_v32, %v19374_v49  ;;  %v9525_v27 = vpop.f32.mrb[49].mxu0  ;;  %v9538_v62 = vadd.f32 %v9481_v20, %v21501_v22  ;;  %v9485_v12 = vadd.f32 %v9484_v47, %v19377_v50  ;;  %v9486_v59 = vpop.f32.mrb[47].mxu1 }
 0x9c3   : > { %v9526_v21 = vadd.f32 %v9525_v27, %v19374_v49  ;;  %v9527_v15 = vpop.f32.mrb[50].mxu0  ;;  %v9539_v31 = vadd.f32 %v9483_v52, %v21505_v1  ;;  %v9487_v7 = vadd.f32 %v9486_v59, %v19377_v50  ;;  %v21508_v49 = vld [vmem:[#allocation38_spill] sm:$0xff] }
 0x9c4   : > { %v9540_v56 = vadd.f32 %v9524_v25, %v21503_v40  ;;  %v9528_v3 = vadd.f32 %v9527_v15, %v19377_v50  ;;  %v9529_v43 = vpop.f32.mrb[51].mxu0  ;;  %v9558_v54 = vmax.f32 %v9538_v62, 0.0  ;;  %v21509_v16 = vmax.f32 %v21508_v49, 0.0  ;;  %v9616_v40 = vld [vmem:[%s19509_s4 + $0x8] sm:$0xff]  ;;  %v9714_v49 = vld [vmem:[%s19511_s6 + $0x10] sm:$0xff] }
 0x9c5   : > { %v9541_v26 = vadd.f32 %v9526_v21, %v21507_v34  ;;  %v9530_v29 = vadd.f32 %v9529_v43, %v19377_v50  ;;  %v9559_v45 = vmax.f32 %v9539_v31, 0.0  ;;  %v9549_v30 = vadd.f32 %v9487_v7, %v21513_v55 }
 0x9c6   : > { %v9548_v51 = vadd.f32 %v9485_v12, %v21509_v16  ;;  %v9560_v23 = vmax.f32 %v9540_v56, 0.0  ;;  %v9550_v8 = vadd.f32 %v9528_v3, %v21511_v57  ;;  %v9712_v56 = vld [vmem:[%s19511_s6] sm:$0xff]  ;;  %v9715_v16 = vld [vmem:[%s19511_s6 + $0x18] sm:$0xff] }
 0x9c7   : > { %v9561_v46 = vmax.f32 %v9541_v26, 0.0  ;;  %v9551_v63 = vadd.f32 %v9530_v29, %v21515_v28  ;;  %v9569_v41 = vmax.f32 %v9549_v30, 0.0  ;;  %v9590_v4 = vadd.f32 %v9559_v45, %v9558_v54  ;;  %v9713_v26 = vld [vmem:[%s19511_s6 + $0x8] sm:$0xff] }
 0x9c8   : > { %v9568_v9 = vmax.f32 %v9548_v51, 0.0  ;;  %v9570_v17 = vmax.f32 %v9550_v8, 0.0 }
 0x9c9   : > { %v9571_v5 = vmax.f32 %v9551_v63, 0.0  ;;  %v9596_v48 = vadd.f32 %v9561_v46, %v9560_v23  ;;  %9591 = vadd.xlane.f32.xlu0 %v9590_v4 }
 0x9ca   : > { %v9593_v50 = vadd.f32 %v9569_v41, %v9568_v9 }
 0x9cb   : > { %v9599_v2 = vadd.f32 %v9571_v5, %v9570_v17 }
 0x9cc   : > { %9594 = vadd.xlane.f32.xlu1 %v9593_v50 }
 0x9cd   : > { %9576 = vadd.xlane.f32.xlu0 %v19392_v38  ;;  %v9615_v38 = vld [vmem:[%s19509_s4] sm:$0xff] }
 0x9ce   : > { %10310 = vmatprep.mubr.msk.f32.mxu1 %vm21516_vm5, %v9615_v38 }
 0x9d0   : > { %9573 = vadd.xlane.f32.xlu1 %v19390_v42  ;;  %v9717_v42 = vld [vmem:[%s19512_s7 + $0x8] sm:$0xff] }
 0x9d1   : > { %9585 = vadd.xlane.f32.xlu0 %v9584_v61 }
 0x9d4   : > { %9588 = vadd.xlane.f32.xlu1 %v9587_v36 }
 0x9d5   : > { %9597 = vadd.xlane.f32.xlu0 %v9596_v48 }
 0x9d8   : > { %9600 = vadd.xlane.f32.xlu1 %v9599_v2 }
 0x9e9   : > { %9626 = vperm.xlu1 %10367, %v9618_v24  }
 0x9eb   : > { %9621 = vperm.xlu0 %10366, %v9617_v0  }
 0x9ed   : > { %9722 = vperm.xlu1 %10367, %v9716_v11  }
 0x9ef   : > { %9727 = vperm.xlu0 %10366, %v9717_v42  }
 0x9f1   : > { %9732 = vperm.xlu1 %10367, %v9718_v18  }
 0x9f3   : > { %9737 = vperm.xlu0 %10366, %v9719_v35  }
 0xa21   : > { %v9580_v53 = vpop.xlane.xlu0 %9579 }
 0xa23   : > { %v9583_v44 = vpop.xlane.xlu1 %9582 }
 0xa56   : > { %v9592_v6 = vpop.xlane.xlu0 %9591 }
 0xa59   : > { %v9595_v61 = vpop.xlane.xlu1 %9594 }
 0xa5a   : > { %v9577_v36 = vpop.xlane.xlu0 %9576 }
 0xa5b   : > { %v9603_v25 = vsel %vm21518_vm14, %v9577_v36, %v9583_v44 }
 0xa5d   : > { %v9574_v19 = vpop.xlane.xlu1 %9573 }
 0xa5e   : > { %v9602_v20 = vsel %vm21517_vm11, %v9574_v19, %v9580_v53  ;;  %v9586_v32 = vpop.xlane.xlu0 %9585 }
 0xa5f   : > { %v9605_v39 = vsel %vm9604_vm10, %v9602_v20, %v9586_v32 }
 0xa60   : > { %v9608_v47 = vsel %vm9607_vm2, %v9605_v39, %v9592_v6 }
 0xa61   : > { %v9589_v52 = vpop.xlane.xlu1 %9588 }
 0xa62   : > { %v9606_v27 = vsel %vm9604_vm10, %v9603_v25, %v9589_v52  ;;  %v9598_v14 = vpop.xlane.xlu0 %9597 }
 0xa63   : > { %v9611_v22 = vsel %vm9610_vm6, %v9608_v47, %v9598_v14  ;;  %v9609_v21 = vsel %vm9607_vm2, %v9606_v27, %v9595_v61 }
 0xa64   : > { %v9613_v15 = vmul.f32 0.00390625, %v9611_v22 }
 0xa65   : > { %v9601_v62 = vpop.xlane.xlu1 %9600 }
 0xa66   : > { %v9612_v12 = vsel %vm9610_vm6, %v9609_v21, %v9601_v62 }
 0xa67   : > { %v9614_v59 = vmul.f32 0.00390625, %v9612_v12 }
 0xa69   : > { %v10323_v33 = vpack.c.bf16 %v9614_v59, %v9613_v15  ;;  %v9627_v10 = vpop.permute.xlu1 %9626 }
 0xa6a   : > { %v9622_v31 = vpop.permute.xlu0 %9621 }
 0xa6b   : > { %10324 = vmatprep.subr.bf16.mxu1 %v10323_v33 }
 0xa6c   : > { %10326 = vmatpush3.bf16.msra.mxu1 %v10323_v33 }
 0xa6d   : > { %v9723_v29 = vpop.permute.xlu1 %9722 }
 0xa6e   : > { %v9728_v51 = vpop.permute.xlu0 %9727 }
 0xa6f   : > { %10311 = vmatmul.mubr.msk.f32.vlgmr.msra.gmra.mrb[48].mxu1 %vm21519_vm12, %v9616_v40 }
 0xa70   : > { %10317 = vmatprep.mubr.msk.f32.mxu1 %vm21520_vm15, %v9712_v56 }
 0xa71   : > { %v9733_v55 = vpop.permute.xlu1 %9732 }
 0xa72   : > { %v9738_v8 = vpop.permute.xlu0 %9737 }
 0xb42   : > { %v10312_v1 = vpop.f32.mrb[48].mxu1 }
 0xb43   : > { %v9707_v3 = vadd.f32 %v10312_v1, %v9627_v10  ;;  %v9701_v7 = vpop.f32.mrb[49].mxu1 }
 0xb44   : > { %v9702_v43 = vadd.f32 %v9701_v7, %v9622_v31 }
 0xb45   : > { %10398 = vtanh.f32 %v9707_v3 }
 0xb46   : > { %10400 = vtanh.f32 %v9702_v43 }
 0xb4f   : > { %v10399_v54 = vpop.eup %10398 }
 0xb50   : > { %v10401_v58 = vpop.eup %10400 }
 0xb51   : > { %v10327_v34 = vpack.c.bf16 %v10399_v54, %v10401_v58 }
 0xb53   : > { %10328 = vmatprep.subr.bf16.mxu1 %v10327_v34 }
 0xb54   : > { %10330 = vmatpush3.bf16.msra.mxu1 %v10327_v34 }
 0xb57   : > { %10318 = vmatmul.mubr.msk.f32.vlgmr.msra.gmra.mrb[50].mxu1 %vm21521_vm9, %v9713_v26 }
 0xb58   : > { %10320 = vmatprep.mubr.msk.f32.mxu1 %vm21522_vm0, %v9714_v49 }
 0xb5b   : > { %10321 = vmatmul.mubr.msk.f32.gmra.mrb[52].mxu1 %vm21523_vm1, %v9715_v16 }
 0xc2a   : > { %v10319_v23 = vpop.f32.mrb[50].mxu1 }
 0xc2b   : > { %v9824_v45 = vadd.f32 %v10319_v23, %v9728_v51  ;;  %v9818_v13 = vpop.f32.mrb[51].mxu1 }
 0xc2c   : > { %v9819_v57 = vadd.f32 %v9818_v13, %v9723_v29 }
 0xc2d   : > { %10402 = vtanh.f32 %v9824_v45 }
 0xc2e   : > { %10404 = vtanh.f32 %v9819_v57  ;;  %v10322_v37 = vpop.f32.mrb[52].mxu1 }
 0xc2f   : > { %v9834_v30 = vadd.f32 %v10322_v37, %v9738_v8  ;;  %v9828_v46 = vpop.f32.mrb[53].mxu1 }
 0xc30   : > { %v9829_v9 = vadd.f32 %v9828_v46, %v9733_v55 }
 0xc31   : > { %10406 = vtanh.f32 %v9834_v30 }
 0xc32   : > { %10408 = vtanh.f32 %v9829_v9 }
 0xc37   : > { %v10403_v60 = vpop.eup %10402 }
 0xc38   : > { %v10405_v28 = vpop.eup %10404  ;;  %9843 = vst.msk [vmem:[%s344_s10 + $0x8] sm:$0xff] %vm9841_vm4, %v10403_v60 }
 0xc39   : > { %9842 = vst.msk [vmem:[%s344_s10] sm:$0xff] %vm9841_vm4, %v10405_v28 }
 0xc3b   : > { %v10407_v63 = vpop.eup %10406 }
 0xc3c   : > { %v10409_v17 = vpop.eup %10408  ;;  %9845 = vst.msk [vmem:[%s344_s10 + $0x18] sm:$0xff] %vm9841_vm4, %v10407_v63 }
 0xc3d   : > { %9844 = vst.msk [vmem:[%s344_s10 + $0x10] sm:$0xff] %vm9841_vm4, %v10409_v17 }
 0xc3e PF: > { %p15_p9 = scmp.ge.s32.totalorder %s10520_s9, 4   ;;  %s21524_s27 = smov %s10443_s28 }
 0xc3f   : > { %s21525_s28 = smov %s10529_s12  ;;  %s21526_s29 = smov %s10520_s9 }
 0xc40   :  { %17 = sbr.rel (!%p15_p9) target bundleno = 2 (0x2), region = 133 }

</bundles_post_ra>
